<compile_context>
chip_gen: v7x
topology: tpu7x:2x2x1
jax: 0.10.0
libtpu: 0.0.40
codegen_flags: <defaults>
</compile_context>

<pallas_src>
import functools

import jax
import jax.numpy as jnp
from jax.experimental import pallas as pl
from jax.experimental.pallas import tpu as pltpu

_EPS = 1e-5
_VMEM_LIMIT = 32 * 1024 * 1024  # <= half of v7x physical VMEM per TensorCore


# --------------------------------------------------------------------------
# Kernel 1: fused 3x3 conv (9 shifted matmuls) + BN partial statistics
# --------------------------------------------------------------------------
def _conv3x3_stats_kernel(xf_ref, w_ref, y_ref, ps_ref, pss_ref, *, H, W):
    # xf_ref : (1, (H+2)*W + 2, Cin)  flat H-padded (+1 guard elem each end)
    # w_ref  : (9, Cin, Cout)         weights, tap-major (kh*3 + kw)
    # y_ref  : (1, H*W, Cout)         conv output, flat rows m = h*W + w
    # ps_ref : (1, 1, Cout)           per-image channel sum
    # pss_ref: (1, 1, Cout)           per-image channel sum of squares
    M = H * W
    cout = y_ref.shape[-1]

    # Column index of each output row.  The flat-shift trick wraps around at
    # the left/right image borders; these masks zero the wrapped taps.
    col = jax.lax.broadcasted_iota(jnp.int32, (M, 1), 0) % W
    not_left = col > 0            # valid rows for kw == 0 taps
    not_right = col < (W - 1)     # valid rows for kw == 2 taps

    acc = jnp.zeros((M, cout), jnp.float32)
    for kh in range(3):
        for kw in range(3):
            # Output (h, w) needs padded-input flat element m + kh*W + kw.
            patch = xf_ref[0, pl.ds(kh * W + kw, M), :]      # (M, Cin), dense
            if kw == 0:
                patch = jnp.where(not_left, patch, 0.0)
            elif kw == 2:
                patch = jnp.where(not_right, patch, 0.0)
            acc += jnp.dot(patch, w_ref[kh * 3 + kw],
                           preferred_element_type=jnp.float32)

    y_ref[0] = acc
    ps_ref[0] = jnp.sum(acc, axis=0, keepdims=True)
    pss_ref[0] = jnp.sum(acc * acc, axis=0, keepdims=True)


def _conv3x3_stats(x_nhwc, w9):
    N, H, W, Cin = x_nhwc.shape
    Cout = w9.shape[-1]
    M = H * W
    R = (H + 2) * W + 2

    # Cheap XLA glue (~1x input bytes): pad H by 1 row each side, flatten the
    # spatial dims, add a 1-elem guard at both ends for the corner taps.
    xh = jnp.pad(x_nhwc, ((0, 0), (1, 1), (0, 0), (0, 0)))
    xf = jnp.pad(xh.reshape(N, (H + 2) * W, Cin), ((0, 0), (1, 1), (0, 0)))

    kernel = functools.partial(_conv3x3_stats_kernel, H=H, W=W)
    y, ps, pss = pl.pallas_call(
        kernel,
        out_shape=(
            jax.ShapeDtypeStruct((N, M, Cout), jnp.float32),
            jax.ShapeDtypeStruct((N, 1, Cout), jnp.float32),
            jax.ShapeDtypeStruct((N, 1, Cout), jnp.float32),
        ),
        grid=(N,),
        in_specs=[
            pl.BlockSpec((1, R, Cin), lambda n: (n, 0, 0)),
            pl.BlockSpec((9, Cin, Cout), lambda n: (0, 0, 0)),
        ],
        out_specs=(
            pl.BlockSpec((1, M, Cout), lambda n: (n, 0, 0)),
            pl.BlockSpec((1, 1, Cout), lambda n: (n, 0, 0)),
            pl.BlockSpec((1, 1, Cout), lambda n: (n, 0, 0)),
        ),
        compiler_params=pltpu.CompilerParams(
            dimension_semantics=("parallel",),
            vmem_limit_bytes=_VMEM_LIMIT,
        ),
    )(xf, w9)
    return y, ps, pss  # y is flat (N, H*W, Cout)


# --------------------------------------------------------------------------
# Kernel 2: BN apply (fused scale/shift) + ReLU + optional 2x2 max pool
# --------------------------------------------------------------------------
def _bn_relu_pool_kernel(y_ref, s_ref, b_ref, *out_refs, want_full, want_pool):
    # y_ref : (1, rb, 2, Wo, 2C)  rb row-pairs of one image; dim 2 is the row
    #         inside the 2x2 pool window; lanes hold [even col | odd col].
    # s_ref : (1, 2C) fused BN scale (per channel, duplicated for the pair)
    # b_ref : (1, 2C) fused BN shift
    # out_refs: [e_ref (1,rb,2,Wo,2C)] if want_full, then
    #           [p_ref (1,rb,Wo,C)]    if want_pool
    e = jnp.maximum(y_ref[...] * s_ref[...] + b_ref[...], 0.0)
    i = 0
    if want_full:
        out_refs[i][...] = e
        i += 1
    if want_pool:
        c = e.shape[-1] // 2
        # ReLU is monotone so it commutes with max; affine BN does not, so BN
        # was applied first.  All ops below are dense (no strided slices).
        rmax = jnp.maximum(e[:, :, 0], e[:, :, 1])                # (1,rb,Wo,2C)
        out_refs[i][...] = jnp.maximum(rmax[..., :c], rmax[..., c:])


def _bn_relu_pool(y_flat, ps, pss, gamma, beta, *, H, W, want_full, want_pool):
    N, M, C = y_flat.shape
    Ho, Wo = H // 2, W // 2
    count = float(N * H * W)

    # Tiny per-channel XLA glue: batch stats -> fused BN scale / shift.
    mean = jnp.sum(ps, axis=0) / count                 # (1, C)
    var = jnp.sum(pss, axis=0) / count - mean * mean   # biased (train-mode) var
    scale = gamma * jax.lax.rsqrt(var + _EPS)          # (1, C)
    shift = beta - mean * scale                        # (1, C)
    scale2 = jnp.concatenate([scale, scale], axis=-1)  # (1, 2C)
    shift2 = jnp.concatenate([shift, shift], axis=-1)  # (1, 2C)

    # Metadata-only HBM reshape: with h = 2*h2 + r and w = 2*w2 + j,
    # (N, H*W, C) -> (N, Ho, 2, Wo, 2C) where lane index = j*C + c.
    y5 = y_flat.reshape(N, Ho, 2, Wo, 2 * C)

    # Row-pairs per grid step (bigger lane-dense tiles, fewer grid steps).
    rb = 4 if Ho % 4 == 0 else (2 if Ho % 2 == 0 else 1)

    out_shape, out_specs = [], []
    if want_full:
        out_shape.append(jax.ShapeDtypeStruct((N, Ho, 2, Wo, 2 * C), jnp.float32))
        out_specs.append(
            pl.BlockSpec((1, rb, 2, Wo, 2 * C), lambda n, h: (n, h, 0, 0, 0)))
    if want_pool:
        out_shape.append(jax.ShapeDtypeStruct((N, Ho, Wo, C), jnp.float32))
        out_specs.append(
            pl.BlockSpec((1, rb, Wo, C), lambda n, h: (n, h, 0, 0)))

    kernel = functools.partial(_bn_relu_pool_kernel,
                               want_full=want_full, want_pool=want_pool)
    outs = pl.pallas_call(
        kernel,
        out_shape=tuple(out_shape),
        grid=(N, Ho // rb),
        in_specs=[
            pl.BlockSpec((1, rb, 2, Wo, 2 * C), lambda n, h: (n, h, 0, 0, 0)),
            pl.BlockSpec((1, 2 * C), lambda n, h: (0, 0)),
            pl.BlockSpec((1, 2 * C), lambda n, h: (0, 0)),
        ],
        out_specs=tuple(out_specs),
        compiler_params=pltpu.CompilerParams(
            dimension_semantics=("parallel", "parallel"),
            vmem_limit_bytes=_VMEM_LIMIT,
        ),
    )(y5, scale2, shift2)
    if not isinstance(outs, (tuple, list)):
        outs = (outs,)
    outs = list(outs)

    full = outs.pop(0).reshape(N, H, W, C) if want_full else None
    pooled = outs.pop(0) if want_pool else None
    return full, pooled


# --------------------------------------------------------------------------
# Parameter init (mirrors PyTorch defaults; weights pre-transposed once)
# --------------------------------------------------------------------------
def _init_block(key, cin, cout):
    k1, k2 = jax.random.split(key)
    bound = 1.0 / (cin * 9) ** 0.5
    w_oihw = jax.random.uniform(k1, (cout, cin, 3, 3), jnp.float32, -bound, bound)
    # Pre-transpose once at init: (Cout, Cin, kh, kw) -> (kh*3+kw, Cin, Cout).
    w9 = jnp.transpose(w_oihw, (2, 3, 1, 0)).reshape(9, cin, cout)
    # Conv bias is mathematically cancelled by train-mode BN mean subtraction;
    # kept only for parameter-structure parity with the PyTorch module.
    bias = jax.random.uniform(k2, (cout,), jnp.float32, -bound, bound)
    gamma = jnp.ones((1, cout), jnp.float32)   # BatchNorm2d default weight
    beta = jnp.zeros((1, cout), jnp.float32)   # BatchNorm2d default bias
    return (w9, bias, gamma, beta)


def init_encoder_params(key, in_ch=48):
    keys = jax.random.split(key, 4)
    chans = [(in_ch, 64), (64, 128), (128, 256), (256, 512)]
    return [_init_block(k, ci, co) for k, (ci, co) in zip(keys, chans)]


# --------------------------------------------------------------------------
# Encoder forward (matches utils/unet.py::Encoder.forward, train-mode BN)
# --------------------------------------------------------------------------
@jax.jit
def encoder_forward(x_nchw, params):
    x = jnp.transpose(x_nchw, (0, 2, 3, 1))          # NCHW -> NHWC
    _, H, W, _ = x.shape

    # block 0: e0 is only ever pooled -> never materialize e0, emit p0 only.
    w9, _, g, b = params[0]
    y, ps, pss = _conv3x3_stats(x, w9)
    _, p0 = _bn_relu_pool(y, ps, pss, g, b, H=H, W=W,
                          want_full=False, want_pool=True)

    # block 1: e1 is returned AND pooled -> one fused kernel writes both.
    w9, _, g, b = params[1]
    y, ps, pss = _conv3x3_stats(p0, w9)
    e1, p1 = _bn_relu_pool(y, ps, pss, g, b, H=H // 2, W=W // 2,
                           want_full=True, want_pool=True)

    # block 2: e2 is returned AND pooled.
    w9, _, g, b = params[2]
    y, ps, pss = _conv3x3_stats(p1, w9)
    e2, p2 = _bn_relu_pool(y, ps, pss, g, b, H=H // 4, W=W // 4,
                           want_full=True, want_pool=True)

    # block 3: e3 is returned; p3 = pool(e3) is never used by the PyTorch
    # module, so it is skipped (output-identical).
    w9, _, g, b = params[3]
    y, ps, pss = _conv3x3_stats(p2, w9)
    e3, _ = _bn_relu_pool(y, ps, pss, g, b, H=H // 8, W=W // 8,
                          want_full=True, want_pool=False)

    to_nchw = lambda t: jnp.transpose(t, (0, 3, 1, 2))
    feats = [to_nchw(p0), to_nchw(e1), to_nchw(e2), to_nchw(e3)]
    return feats, to_nchw(e3)


# --------------------------------------------------------------------------
# Pure-JAX reference of the PyTorch forward (train-mode BatchNorm)
# --------------------------------------------------------------------------
def _reference_forward(x_nchw, params):
    def block(x, p):
        w9, bias, gamma, beta = p
        cin, cout = w9.shape[1], w9.shape[2]
        w_oihw = jnp.transpose(w9.reshape(3, 3, cin, cout), (3, 2, 0, 1))
        y = jax.lax.conv_general_dilated(
            x, w_oihw, window_strides=(1, 1), padding=((1, 1), (1, 1)),
            dimension_numbers=("NCHW", "OIHW", "NCHW"))
        y = y + bias[None, :, None, None]
        mean = jnp.mean(y, axis=(0, 2, 3), keepdims=True)
        var = jnp.mean(jnp.square(y - mean), axis=(0, 2, 3), keepdims=True)
        g = gamma.reshape(1, -1, 1, 1)
        b = beta.reshape(1, -1, 1, 1)
        e = jnp.maximum(g * (y - mean) * jax.lax.rsqrt(var + _EPS) + b, 0.0)
        pooled = jax.lax.reduce_window(e, -jnp.inf, jax.lax.max,
                                       (1, 1, 2, 2), (1, 1, 2, 2), "VALID")
        return e, pooled

    e0, p0 = block(x_nchw, params[0])
    e1, p1 = block(p0, params[1])
    e2, p2 = block(p1, params[2])
    e3, _ = block(p2, params[3])
    return [p0, e1, e2, e3], e3


# --------------------------------------------------------------------------
if __name__ == "__main__":
    key = jax.random.PRNGKey(0)
    kx, kp = jax.random.split(key)

    N, Cin, H, W = 2, 48, 16, 16
    x = jax.random.normal(kx, (N, Cin, H, W), dtype=jnp.float32)
    params = init_encoder_params(kp, in_ch=Cin)

    feats, last = encoder_forward(x, params)
    jax.block_until_ready(last)
    for f in feats:
        jax.block_until_ready(f)

    # Shape sanity checks (mirror the PyTorch module):
    assert feats[0].shape == (N, 64, H // 2, W // 2)     # p0
    assert feats[1].shape == (N, 128, H // 2, W // 2)    # e1
    assert feats[2].shape == (N, 256, H // 4, W // 4)    # e2
    assert feats[3].shape == (N, 512, H // 8, W // 8)    # e3
    assert last.shape == (N, 512, H // 8, W // 8)
    assert bool(jnp.all(jnp.isfinite(last)))

    # Numerical check against the pure-JAX reference of the PyTorch forward.
    ref_feats, ref_last = _reference_forward(x, params)
    for got, ref in zip(feats + [last], ref_feats + [ref_last]):
        assert got.shape == ref.shape
        err = float(jnp.max(jnp.abs(got - ref)))
        assert bool(jnp.allclose(got, ref, rtol=3e-2, atol=3e-2)), err

    print("KERNEL_OK")
</pallas_src>

<mosaic_0001>
module attributes {stable_mosaic.version = 11 : i64} {
  func.func @_conv3x3_stats_kernel(%arg0: i32, %arg1: memref<1x290x48xf32, #tpu.memory_space<vmem>>, %arg2: memref<9x48x64xf32, #tpu.memory_space<vmem>>, %arg3: memref<1x256x64xf32, #tpu.memory_space<vmem>>, %arg4: memref<1x1x64xf32, #tpu.memory_space<vmem>>, %arg5: memref<1x1x64xf32, #tpu.memory_space<vmem>>) attributes {dimension_semantics = [#tpu.dimension_semantics<parallel>], iteration_bounds = array<i64: 2>, scalar_prefetch = 0 : i64, scratch_operands = 0 : i64, tpu.core_type = #tpu.core_type<tc>, window_params = [{transform_indices = @transform_0, window_bounds = array<i64: 1, 290, 48>}, {pipeline_mode = #tpu.pipeline_mode<synchronous>, transform_indices = @transform_1, window_bounds = array<i64: 9, 48, 64>}, {transform_indices = @transform_2, window_bounds = array<i64: 1, 256, 64>}, {transform_indices = @transform_3, window_bounds = array<i64: 1, 1, 64>}, {transform_indices = @transform_4, window_bounds = array<i64: 1, 1, 64>}]} {
    %0 = tpu.iota {dimensions = array<i32: 0>} : vector<256x1xi32>
    %c16_i32 = arith.constant 16 : i32
    %c0_i32 = arith.constant 0 : i32
    %1 = arith.cmpi eq, %c16_i32, %c0_i32 : i32
    %c1_i32 = arith.constant 1 : i32
    %2 = arith.select %1, %c1_i32, %c16_i32 : i32
    %3 = vector.broadcast %2 : i32 to vector<256x1xi32>
    %4 = arith.remsi %0, %3 : vector<256x1xi32>
    %c0_i32_0 = arith.constant 0 : i32
    %5 = vector.broadcast %c0_i32_0 : i32 to vector<256x1xi32>
    %6 = arith.cmpi ne, %4, %5 : vector<256x1xi32>
    %c0_i32_1 = arith.constant 0 : i32
    %7 = vector.broadcast %c0_i32_1 : i32 to vector<256x1xi32>
    %8 = arith.cmpi slt, %4, %7 : vector<256x1xi32>
    %c0_i32_2 = arith.constant 0 : i32
    %9 = arith.cmpi slt, %2, %c0_i32_2 : i32
    %10 = vector.broadcast %9 : i1 to vector<256x1xi1>
    %11 = vector.broadcast %10 : vector<256x1xi1> to vector<256x1xi1>
    %12 = arith.xori %8, %11 : vector<256x1xi1>
    %13 = arith.andi %12, %6 : vector<256x1xi1>
    %14 = vector.broadcast %2 : i32 to vector<256x1xi32>
    %15 = arith.addi %4, %14 : vector<256x1xi32>
    %16 = arith.select %13, %15, %4 : vector<256x1xi1>, vector<256x1xi32>
    %c0_i32_3 = arith.constant 0 : i32
    %17 = vector.broadcast %c0_i32_3 : i32 to vector<256x1xi32>
    %18 = arith.cmpi sgt, %16, %17 : vector<256x1xi32>
    %c15_i32 = arith.constant 15 : i32
    %19 = vector.broadcast %c15_i32 : i32 to vector<256x1xi32>
    %20 = arith.cmpi slt, %16, %19 : vector<256x1xi32>
    %cst = arith.constant 0.000000e+00 : f32
    %21 = vector.broadcast %cst : f32 to vector<256x64xf32>
    %c0 = arith.constant 0 : index
    %c0_4 = arith.constant 0 : index
    %c0_5 = arith.constant 0 : index
    %22 = vector.load %arg1[%c0, %c0_4, %c0_5] : memref<1x290x48xf32, #tpu.memory_space<vmem>>, vector<1x256x48xf32>
    %23 = vector.shape_cast %22 : vector<1x256x48xf32> to vector<256x48xf32>
    %cst_6 = arith.constant 0.000000e+00 : f32
    %24 = vector.shape_cast %18 : vector<256x1xi1> to vector<256x1xi1>
    %25 = vector.broadcast %24 : vector<256x1xi1> to vector<256x48xi1>
    %26 = vector.broadcast %cst_6 : f32 to vector<256x48xf32>
    %27 = arith.select %25, %23, %26 : vector<256x48xi1>, vector<256x48xf32>
    %c0_7 = arith.constant 0 : index
    %c0_8 = arith.constant 0 : index
    %c0_9 = arith.constant 0 : index
    %28 = vector.load %arg2[%c0_7, %c0_8, %c0_9] : memref<9x48x64xf32, #tpu.memory_space<vmem>>, vector<1x48x64xf32>
    %29 = vector.shape_cast %28 : vector<1x48x64xf32> to vector<48x64xf32>
    %cst_10 = arith.constant dense<0.000000e+00> : vector<256x64xf32>
    %30 = tpu.matmul %27, %29, %cst_10 {dimension_numbers = #tpu.dot_dimension_numbers<[1], [0], [0], [1], [0, 0, 1, 1], [], []>} : vector<256x48xf32>, vector<48x64xf32>, vector<256x64xf32> -> vector<256x64xf32>
    %31 = arith.addf %21, %30 : vector<256x64xf32>
    %c0_11 = arith.constant 0 : index
    %c1 = arith.constant 1 : index
    %c0_12 = arith.constant 0 : index
    %32 = vector.load %arg1[%c0_11, %c1, %c0_12] : memref<1x290x48xf32, #tpu.memory_space<vmem>>, vector<1x256x48xf32>
    %33 = vector.shape_cast %32 : vector<1x256x48xf32> to vector<256x48xf32>
    %c1_13 = arith.constant 1 : index
    %c0_14 = arith.constant 0 : index
    %c0_15 = arith.constant 0 : index
    %34 = vector.load %arg2[%c1_13, %c0_14, %c0_15] : memref<9x48x64xf32, #tpu.memory_space<vmem>>, vector<1x48x64xf32>
    %35 = vector.shape_cast %34 : vector<1x48x64xf32> to vector<48x64xf32>
    %cst_16 = arith.constant dense<0.000000e+00> : vector<256x64xf32>
    %36 = tpu.matmul %33, %35, %cst_16 {dimension_numbers = #tpu.dot_dimension_numbers<[1], [0], [0], [1], [0, 0, 1, 1], [], []>} : vector<256x48xf32>, vector<48x64xf32>, vector<256x64xf32> -> vector<256x64xf32>
    %37 = arith.addf %31, %36 : vector<256x64xf32>
    %c0_17 = arith.constant 0 : index
    %c2 = arith.constant 2 : index
    %c0_18 = arith.constant 0 : index
    %38 = vector.load %arg1[%c0_17, %c2, %c0_18] : memref<1x290x48xf32, #tpu.memory_space<vmem>>, vector<1x256x48xf32>
    %39 = vector.shape_cast %38 : vector<1x256x48xf32> to vector<256x48xf32>
    %cst_19 = arith.constant 0.000000e+00 : f32
    %40 = vector.shape_cast %20 : vector<256x1xi1> to vector<256x1xi1>
    %41 = vector.broadcast %40 : vector<256x1xi1> to vector<256x48xi1>
    %42 = vector.broadcast %cst_19 : f32 to vector<256x48xf32>
    %43 = arith.select %41, %39, %42 : vector<256x48xi1>, vector<256x48xf32>
    %c2_20 = arith.constant 2 : index
    %c0_21 = arith.constant 0 : index
    %c0_22 = arith.constant 0 : index
    %44 = vector.load %arg2[%c2_20, %c0_21, %c0_22] : memref<9x48x64xf32, #tpu.memory_space<vmem>>, vector<1x48x64xf32>
    %45 = vector.shape_cast %44 : vector<1x48x64xf32> to vector<48x64xf32>
    %cst_23 = arith.constant dense<0.000000e+00> : vector<256x64xf32>
    %46 = tpu.matmul %43, %45, %cst_23 {dimension_numbers = #tpu.dot_dimension_numbers<[1], [0], [0], [1], [0, 0, 1, 1], [], []>} : vector<256x48xf32>, vector<48x64xf32>, vector<256x64xf32> -> vector<256x64xf32>
    %47 = arith.addf %37, %46 : vector<256x64xf32>
    %c0_24 = arith.constant 0 : index
    %c16 = arith.constant 16 : index
    %c0_25 = arith.constant 0 : index
    %48 = vector.load %arg1[%c0_24, %c16, %c0_25] : memref<1x290x48xf32, #tpu.memory_space<vmem>>, vector<1x256x48xf32>
    %49 = vector.shape_cast %48 : vector<1x256x48xf32> to vector<256x48xf32>
    %cst_26 = arith.constant 0.000000e+00 : f32
    %50 = vector.shape_cast %18 : vector<256x1xi1> to vector<256x1xi1>
    %51 = vector.broadcast %50 : vector<256x1xi1> to vector<256x48xi1>
    %52 = vector.broadcast %cst_26 : f32 to vector<256x48xf32>
    %53 = arith.select %51, %49, %52 : vector<256x48xi1>, vector<256x48xf32>
    %c3 = arith.constant 3 : index
    %c0_27 = arith.constant 0 : index
    %c0_28 = arith.constant 0 : index
    %54 = vector.load %arg2[%c3, %c0_27, %c0_28] : memref<9x48x64xf32, #tpu.memory_space<vmem>>, vector<1x48x64xf32>
    %55 = vector.shape_cast %54 : vector<1x48x64xf32> to vector<48x64xf32>
    %cst_29 = arith.constant dense<0.000000e+00> : vector<256x64xf32>
    %56 = tpu.matmul %53, %55, %cst_29 {dimension_numbers = #tpu.dot_dimension_numbers<[1], [0], [0], [1], [0, 0, 1, 1], [], []>} : vector<256x48xf32>, vector<48x64xf32>, vector<256x64xf32> -> vector<256x64xf32>
    %57 = arith.addf %47, %56 : vector<256x64xf32>
    %c0_30 = arith.constant 0 : index
    %c17 = arith.constant 17 : index
    %c0_31 = arith.constant 0 : index
    %58 = vector.load %arg1[%c0_30, %c17, %c0_31] : memref<1x290x48xf32, #tpu.memory_space<vmem>>, vector<1x256x48xf32>
    %59 = vector.shape_cast %58 : vector<1x256x48xf32> to vector<256x48xf32>
    %c4 = arith.constant 4 : index
    %c0_32 = arith.constant 0 : index
    %c0_33 = arith.constant 0 : index
    %60 = vector.load %arg2[%c4, %c0_32, %c0_33] : memref<9x48x64xf32, #tpu.memory_space<vmem>>, vector<1x48x64xf32>
    %61 = vector.shape_cast %60 : vector<1x48x64xf32> to vector<48x64xf32>
    %cst_34 = arith.constant dense<0.000000e+00> : vector<256x64xf32>
    %62 = tpu.matmul %59, %61, %cst_34 {dimension_numbers = #tpu.dot_dimension_numbers<[1], [0], [0], [1], [0, 0, 1, 1], [], []>} : vector<256x48xf32>, vector<48x64xf32>, vector<256x64xf32> -> vector<256x64xf32>
    %63 = arith.addf %57, %62 : vector<256x64xf32>
    %c0_35 = arith.constant 0 : index
    %c18 = arith.constant 18 : index
    %c0_36 = arith.constant 0 : index
    %64 = vector.load %arg1[%c0_35, %c18, %c0_36] : memref<1x290x48xf32, #tpu.memory_space<vmem>>, vector<1x256x48xf32>
    %65 = vector.shape_cast %64 : vector<1x256x48xf32> to vector<256x48xf32>
    %cst_37 = arith.constant 0.000000e+00 : f32
    %66 = vector.shape_cast %20 : vector<256x1xi1> to vector<256x1xi1>
    %67 = vector.broadcast %66 : vector<256x1xi1> to vector<256x48xi1>
    %68 = vector.broadcast %cst_37 : f32 to vector<256x48xf32>
    %69 = arith.select %67, %65, %68 : vector<256x48xi1>, vector<256x48xf32>
    %c5 = arith.constant 5 : index
    %c0_38 = arith.constant 0 : index
    %c0_39 = arith.constant 0 : index
    %70 = vector.load %arg2[%c5, %c0_38, %c0_39] : memref<9x48x64xf32, #tpu.memory_space<vmem>>, vector<1x48x64xf32>
    %71 = vector.shape_cast %70 : vector<1x48x64xf32> to vector<48x64xf32>
    %cst_40 = arith.constant dense<0.000000e+00> : vector<256x64xf32>
    %72 = tpu.matmul %69, %71, %cst_40 {dimension_numbers = #tpu.dot_dimension_numbers<[1], [0], [0], [1], [0, 0, 1, 1], [], []>} : vector<256x48xf32>, vector<48x64xf32>, vector<256x64xf32> -> vector<256x64xf32>
    %73 = arith.addf %63, %72 : vector<256x64xf32>
    %c0_41 = arith.constant 0 : index
    %c32 = arith.constant 32 : index
    %c0_42 = arith.constant 0 : index
    %74 = vector.load %arg1[%c0_41, %c32, %c0_42] : memref<1x290x48xf32, #tpu.memory_space<vmem>>, vector<1x256x48xf32>
    %75 = vector.shape_cast %74 : vector<1x256x48xf32> to vector<256x48xf32>
    %cst_43 = arith.constant 0.000000e+00 : f32
    %76 = vector.shape_cast %18 : vector<256x1xi1> to vector<256x1xi1>
    %77 = vector.broadcast %76 : vector<256x1xi1> to vector<256x48xi1>
    %78 = vector.broadcast %cst_43 : f32 to vector<256x48xf32>
    %79 = arith.select %77, %75, %78 : vector<256x48xi1>, vector<256x48xf32>
    %c6 = arith.constant 6 : index
    %c0_44 = arith.constant 0 : index
    %c0_45 = arith.constant 0 : index
    %80 = vector.load %arg2[%c6, %c0_44, %c0_45] : memref<9x48x64xf32, #tpu.memory_space<vmem>>, vector<1x48x64xf32>
    %81 = vector.shape_cast %80 : vector<1x48x64xf32> to vector<48x64xf32>
    %cst_46 = arith.constant dense<0.000000e+00> : vector<256x64xf32>
    %82 = tpu.matmul %79, %81, %cst_46 {dimension_numbers = #tpu.dot_dimension_numbers<[1], [0], [0], [1], [0, 0, 1, 1], [], []>} : vector<256x48xf32>, vector<48x64xf32>, vector<256x64xf32> -> vector<256x64xf32>
    %83 = arith.addf %73, %82 : vector<256x64xf32>
    %c0_47 = arith.constant 0 : index
    %c33 = arith.constant 33 : index
    %c0_48 = arith.constant 0 : index
    %84 = vector.load %arg1[%c0_47, %c33, %c0_48] : memref<1x290x48xf32, #tpu.memory_space<vmem>>, vector<1x256x48xf32>
    %85 = vector.shape_cast %84 : vector<1x256x48xf32> to vector<256x48xf32>
    %c7 = arith.constant 7 : index
    %c0_49 = arith.constant 0 : index
    %c0_50 = arith.constant 0 : index
    %86 = vector.load %arg2[%c7, %c0_49, %c0_50] : memref<9x48x64xf32, #tpu.memory_space<vmem>>, vector<1x48x64xf32>
    %87 = vector.shape_cast %86 : vector<1x48x64xf32> to vector<48x64xf32>
    %cst_51 = arith.constant dense<0.000000e+00> : vector<256x64xf32>
    %88 = tpu.matmul %85, %87, %cst_51 {dimension_numbers = #tpu.dot_dimension_numbers<[1], [0], [0], [1], [0, 0, 1, 1], [], []>} : vector<256x48xf32>, vector<48x64xf32>, vector<256x64xf32> -> vector<256x64xf32>
    %89 = arith.addf %83, %88 : vector<256x64xf32>
    %c0_52 = arith.constant 0 : index
    %c34 = arith.constant 34 : index
    %c0_53 = arith.constant 0 : index
    %90 = vector.load %arg1[%c0_52, %c34, %c0_53] : memref<1x290x48xf32, #tpu.memory_space<vmem>>, vector<1x256x48xf32>
    %91 = vector.shape_cast %90 : vector<1x256x48xf32> to vector<256x48xf32>
    %cst_54 = arith.constant 0.000000e+00 : f32
    %92 = vector.shape_cast %20 : vector<256x1xi1> to vector<256x1xi1>
    %93 = vector.broadcast %92 : vector<256x1xi1> to vector<256x48xi1>
    %94 = vector.broadcast %cst_54 : f32 to vector<256x48xf32>
    %95 = arith.select %93, %91, %94 : vector<256x48xi1>, vector<256x48xf32>
    %c8 = arith.constant 8 : index
    %c0_55 = arith.constant 0 : index
    %c0_56 = arith.constant 0 : index
    %96 = vector.load %arg2[%c8, %c0_55, %c0_56] : memref<9x48x64xf32, #tpu.memory_space<vmem>>, vector<1x48x64xf32>
    %97 = vector.shape_cast %96 : vector<1x48x64xf32> to vector<48x64xf32>
    %cst_57 = arith.constant dense<0.000000e+00> : vector<256x64xf32>
    %98 = tpu.matmul %95, %97, %cst_57 {dimension_numbers = #tpu.dot_dimension_numbers<[1], [0], [0], [1], [0, 0, 1, 1], [], []>} : vector<256x48xf32>, vector<48x64xf32>, vector<256x64xf32> -> vector<256x64xf32>
    %99 = arith.addf %89, %98 : vector<256x64xf32>
    %c0_58 = arith.constant 0 : index
    %c0_59 = arith.constant 0 : index
    %c0_60 = arith.constant 0 : index
    %100 = vector.load %arg3[%c0_58, %c0_59, %c0_60] : memref<1x256x64xf32, #tpu.memory_space<vmem>>, vector<1x256x64xf32>
    %101 = vector.shape_cast %100 : vector<1x256x64xf32> to vector<256x64xf32>
    %102 = vector.shape_cast %99 : vector<256x64xf32> to vector<1x256x64xf32>
    tpu.vector_store %arg3[%c0_58, %c0_59, %c0_60], %102 {strides = array<i32>} : memref<1x256x64xf32, #tpu.memory_space<vmem>>, vector<1x256x64xf32>,
    %cst_61 = arith.constant dense<0.000000e+00> : vector<64xf32>
    %103 = vector.multi_reduction <add>, %99, %cst_61 [0] : vector<256x64xf32> to vector<64xf32>
    %104 = vector.shape_cast %103 : vector<64xf32> to vector<1x64xf32>
    %c0_62 = arith.constant 0 : index
    %c0_63 = arith.constant 0 : index
    %c0_64 = arith.constant 0 : index
    %105 = vector.load %arg4[%c0_62, %c0_63, %c0_64] : memref<1x1x64xf32, #tpu.memory_space<vmem>>, vector<1x1x64xf32>
    %106 = vector.shape_cast %105 : vector<1x1x64xf32> to vector<1x64xf32>
    %107 = vector.shape_cast %104 : vector<1x64xf32> to vector<1x1x64xf32>
    tpu.vector_store %arg4[%c0_62, %c0_63, %c0_64], %107 {strides = array<i32>} : memref<1x1x64xf32, #tpu.memory_space<vmem>>, vector<1x1x64xf32>,
    %108 = arith.mulf %99, %99 : vector<256x64xf32>
    %cst_65 = arith.constant dense<0.000000e+00> : vector<64xf32>
    %109 = vector.multi_reduction <add>, %108, %cst_65 [0] : vector<256x64xf32> to vector<64xf32>
    %110 = vector.shape_cast %109 : vector<64xf32> to vector<1x64xf32>
    %c0_66 = arith.constant 0 : index
    %c0_67 = arith.constant 0 : index
    %c0_68 = arith.constant 0 : index
    %111 = vector.load %arg5[%c0_66, %c0_67, %c0_68] : memref<1x1x64xf32, #tpu.memory_space<vmem>>, vector<1x1x64xf32>
    %112 = vector.shape_cast %111 : vector<1x1x64xf32> to vector<1x64xf32>
    %113 = vector.shape_cast %110 : vector<1x64xf32> to vector<1x1x64xf32>
    tpu.vector_store %arg5[%c0_66, %c0_67, %c0_68], %113 {strides = array<i32>} : memref<1x1x64xf32, #tpu.memory_space<vmem>>, vector<1x1x64xf32>,
    return
  }
  func.func @transform_0(%arg0: i32) -> (i32, i32, i32) {
    %c0_i32 = arith.constant 0 : i32
    %c0_i32_0 = arith.constant 0 : i32
    %c0_i32_1 = arith.constant 0 : i32
    return %arg0, %c0_i32, %c0_i32_0 : i32, i32, i32
  }
  func.func @transform_1(%arg0: i32) -> (i32, i32, i32) {
    %c0_i32 = arith.constant 0 : i32
    %c0_i32_0 = arith.constant 0 : i32
    %c0_i32_1 = arith.constant 0 : i32
    %c0_i32_2 = arith.constant 0 : i32
    return %c0_i32, %c0_i32_0, %c0_i32_1 : i32, i32, i32
  }
  func.func @transform_2(%arg0: i32) -> (i32, i32, i32) {
    %c0_i32 = arith.constant 0 : i32
    %c0_i32_0 = arith.constant 0 : i32
    %c0_i32_1 = arith.constant 0 : i32
    return %arg0, %c0_i32, %c0_i32_0 : i32, i32, i32
  }
  func.func @transform_3(%arg0: i32) -> (i32, i32, i32) {
    %c0_i32 = arith.constant 0 : i32
    %c0_i32_0 = arith.constant 0 : i32
    %c0_i32_1 = arith.constant 0 : i32
    return %arg0, %c0_i32, %c0_i32_0 : i32, i32, i32
  }
  func.func @transform_4(%arg0: i32) -> (i32, i32, i32) {
    %c0_i32 = arith.constant 0 : i32
    %c0_i32_0 = arith.constant 0 : i32
    %c0_i32_1 = arith.constant 0 : i32
    return %arg0, %c0_i32, %c0_i32_0 : i32, i32, i32
  }
}

module attributes {stable_mosaic.version = 11 : i64} {
  func.func @_bn_relu_pool_kernel(%arg0: i32, %arg1: i32, %arg2: memref<1x4x2x8x128xf32, #tpu.memory_space<vmem>>, %arg3: memref<1x128xf32, #tpu.memory_space<vmem>>, %arg4: memref<1x128xf32, #tpu.memory_space<vmem>>, %arg5: memref<1x4x8x64xf32, #tpu.memory_space<vmem>>) attributes {dimension_semantics = [#tpu.dimension_semantics<parallel>, #tpu.dimension_semantics<parallel>], iteration_bounds = array<i64: 2, 2>, scalar_prefetch = 0 : i64, scratch_operands = 0 : i64, tpu.core_type = #tpu.core_type<tc>, window_params = [{transform_indices = @transform_0, window_bounds = array<i64: 1, 4, 2, 8, 128>}, {pipeline_mode = #tpu.pipeline_mode<synchronous>, transform_indices = @transform_1, window_bounds = array<i64: 1, 128>}, {pipeline_mode = #tpu.pipeline_mode<synchronous>, transform_indices = @transform_2, window_bounds = array<i64: 1, 128>}, {transform_indices = @transform_3, window_bounds = array<i64: 1, 4, 8, 64>}]} {
    %c0 = arith.constant 0 : index
    %c0_0 = arith.constant 0 : index
    %c0_1 = arith.constant 0 : index
    %c0_2 = arith.constant 0 : index
    %c0_3 = arith.constant 0 : index
    %0 = vector.load %arg2[%c0, %c0_0, %c0_1, %c0_2, %c0_3] : memref<1x4x2x8x128xf32, #tpu.memory_space<vmem>>, vector<1x4x2x8x128xf32>
    %c0_4 = arith.constant 0 : index
    %c0_5 = arith.constant 0 : index
    %1 = vector.load %arg3[%c0_4, %c0_5] : memref<1x128xf32, #tpu.memory_space<vmem>>, vector<1x128xf32>
    %2 = vector.shape_cast %1 : vector<1x128xf32> to vector<1x1x1x1x128xf32>
    %3 = vector.broadcast %2 : vector<1x1x1x1x128xf32> to vector<1x4x2x8x128xf32>
    %4 = arith.mulf %0, %3 : vector<1x4x2x8x128xf32>
    %c0_6 = arith.constant 0 : index
    %c0_7 = arith.constant 0 : index
    %5 = vector.load %arg4[%c0_6, %c0_7] : memref<1x128xf32, #tpu.memory_space<vmem>>, vector<1x128xf32>
    %6 = vector.shape_cast %5 : vector<1x128xf32> to vector<1x1x1x1x128xf32>
    %7 = vector.broadcast %6 : vector<1x1x1x1x128xf32> to vector<1x4x2x8x128xf32>
    %8 = arith.addf %4, %7 : vector<1x4x2x8x128xf32>
    %cst = arith.constant 0.000000e+00 : f32
    %9 = vector.broadcast %cst : f32 to vector<1x4x2x8x128xf32>
    %10 = arith.maximumf %8, %9 : vector<1x4x2x8x128xf32>
    %11 = vector.extract_strided_slice %10 {offsets = [0, 0, 0, 0, 0], sizes = [1, 4, 1, 8, 128], strides = [1, 1, 1, 1, 1]} : vector<1x4x2x8x128xf32> to vector<1x4x1x8x128xf32>
    %12 = vector.shape_cast %11 : vector<1x4x1x8x128xf32> to vector<1x4x8x128xf32>
    %13 = vector.extract_strided_slice %10 {offsets = [0, 0, 1, 0, 0], sizes = [1, 4, 1, 8, 128], strides = [1, 1, 1, 1, 1]} : vector<1x4x2x8x128xf32> to vector<1x4x1x8x128xf32>
    %14 = vector.shape_cast %13 : vector<1x4x1x8x128xf32> to vector<1x4x8x128xf32>
    %15 = arith.maximumf %12, %14 : vector<1x4x8x128xf32>
    %16 = vector.extract_strided_slice %15 {offsets = [0, 0, 0, 0], sizes = [1, 4, 8, 64], strides = [1, 1, 1, 1]} : vector<1x4x8x128xf32> to vector<1x4x8x64xf32>
    %17 = vector.extract_strided_slice %15 {offsets = [0, 0, 0, 64], sizes = [1, 4, 8, 64], strides = [1, 1, 1, 1]} : vector<1x4x8x128xf32> to vector<1x4x8x64xf32>
    %18 = arith.maximumf %16, %17 : vector<1x4x8x64xf32>
    %c0_8 = arith.constant 0 : index
    %c0_9 = arith.constant 0 : index
    %c0_10 = arith.constant 0 : index
    %c0_11 = arith.constant 0 : index
    %19 = vector.load %arg5[%c0_8, %c0_9, %c0_10, %c0_11] : memref<1x4x8x64xf32, #tpu.memory_space<vmem>>, vector<1x4x8x64xf32>
    tpu.vector_store %arg5[%c0_8, %c0_9, %c0_10, %c0_11], %18 {strides = array<i32>} : memref<1x4x8x64xf32, #tpu.memory_space<vmem>>, vector<1x4x8x64xf32>,
    return
  }
  func.func @transform_0(%arg0: i32, %arg1: i32) -> (i32, i32, i32, i32, i32) {
    %c0_i32 = arith.constant 0 : i32
    %c0_i32_0 = arith.constant 0 : i32
    %c0_i32_1 = arith.constant 0 : i32
    %c0_i32_2 = arith.constant 0 : i32
    return %arg0, %arg1, %c0_i32, %c0_i32_0, %c0_i32_1 : i32, i32, i32, i32, i32
  }
  func.func @transform_1(%arg0: i32, %arg1: i32) -> (i32, i32) {
    %c0_i32 = arith.constant 0 : i32
    %c0_i32_0 = arith.constant 0 : i32
    %c0_i32_1 = arith.constant 0 : i32
    return %c0_i32, %c0_i32_0 : i32, i32
  }
  func.func @transform_2(%arg0: i32, %arg1: i32) -> (i32, i32) {
    %c0_i32 = arith.constant 0 : i32
    %c0_i32_0 = arith.constant 0 : i32
    %c0_i32_1 = arith.constant 0 : i32
    return %c0_i32, %c0_i32_0 : i32, i32
  }
  func.func @transform_3(%arg0: i32, %arg1: i32) -> (i32, i32, i32, i32) {
    %c0_i32 = arith.constant 0 : i32
    %c0_i32_0 = arith.constant 0 : i32
    %c0_i32_1 = arith.constant 0 : i32
    return %arg0, %arg1, %c0_i32, %c0_i32_0 : i32, i32, i32, i32
  }
}

module attributes {stable_mosaic.version = 11 : i64} {
  func.func @_conv3x3_stats_kernel(%arg0: i32, %arg1: memref<1x82x64xf32, #tpu.memory_space<vmem>>, %arg2: memref<9x64x128xf32, #tpu.memory_space<vmem>>, %arg3: memref<1x64x128xf32, #tpu.memory_space<vmem>>, %arg4: memref<1x1x128xf32, #tpu.memory_space<vmem>>, %arg5: memref<1x1x128xf32, #tpu.memory_space<vmem>>) attributes {dimension_semantics = [#tpu.dimension_semantics<parallel>], iteration_bounds = array<i64: 2>, scalar_prefetch = 0 : i64, scratch_operands = 0 : i64, tpu.core_type = #tpu.core_type<tc>, window_params = [{transform_indices = @transform_0, window_bounds = array<i64: 1, 82, 64>}, {pipeline_mode = #tpu.pipeline_mode<synchronous>, transform_indices = @transform_1, window_bounds = array<i64: 9, 64, 128>}, {transform_indices = @transform_2, window_bounds = array<i64: 1, 64, 128>}, {transform_indices = @transform_3, window_bounds = array<i64: 1, 1, 128>}, {transform_indices = @transform_4, window_bounds = array<i64: 1, 1, 128>}]} {
    %0 = tpu.iota {dimensions = array<i32: 0>} : vector<64x1xi32>
    %c8_i32 = arith.constant 8 : i32
    %c0_i32 = arith.constant 0 : i32
    %1 = arith.cmpi eq, %c8_i32, %c0_i32 : i32
    %c1_i32 = arith.constant 1 : i32
    %2 = arith.select %1, %c1_i32, %c8_i32 : i32
    %3 = vector.broadcast %2 : i32 to vector<64x1xi32>
    %4 = arith.remsi %0, %3 : vector<64x1xi32>
    %c0_i32_0 = arith.constant 0 : i32
    %5 = vector.broadcast %c0_i32_0 : i32 to vector<64x1xi32>
    %6 = arith.cmpi ne, %4, %5 : vector<64x1xi32>
    %c0_i32_1 = arith.constant 0 : i32
    %7 = vector.broadcast %c0_i32_1 : i32 to vector<64x1xi32>
    %8 = arith.cmpi slt, %4, %7 : vector<64x1xi32>
    %c0_i32_2 = arith.constant 0 : i32
    %9 = arith.cmpi slt, %2, %c0_i32_2 : i32
    %10 = vector.broadcast %9 : i1 to vector<64x1xi1>
    %11 = vector.broadcast %10 : vector<64x1xi1> to vector<64x1xi1>
    %12 = arith.xori %8, %11 : vector<64x1xi1>
    %13 = arith.andi %12, %6 : vector<64x1xi1>
    %14 = vector.broadcast %2 : i32 to vector<64x1xi32>
    %15 = arith.addi %4, %14 : vector<64x1xi32>
    %16 = arith.select %13, %15, %4 : vector<64x1xi1>, vector<64x1xi32>
    %c0_i32_3 = arith.constant 0 : i32
    %17 = vector.broadcast %c0_i32_3 : i32 to vector<64x1xi32>
    %18 = arith.cmpi sgt, %16, %17 : vector<64x1xi32>
    %c7_i32 = arith.constant 7 : i32
    %19 = vector.broadcast %c7_i32 : i32 to vector<64x1xi32>
    %20 = arith.cmpi slt, %16, %19 : vector<64x1xi32>
    %cst = arith.constant 0.000000e+00 : f32
    %21 = vector.broadcast %cst : f32 to vector<64x128xf32>
    %c0 = arith.constant 0 : index
    %c0_4 = arith.constant 0 : index
    %c0_5 = arith.constant 0 : index
    %22 = vector.load %arg1[%c0, %c0_4, %c0_5] : memref<1x82x64xf32, #tpu.memory_space<vmem>>, vector<1x64x64xf32>
    %23 = vector.shape_cast %22 : vector<1x64x64xf32> to vector<64x64xf32>
    %cst_6 = arith.constant 0.000000e+00 : f32
    %24 = vector.shape_cast %18 : vector<64x1xi1> to vector<64x1xi1>
    %25 = vector.broadcast %24 : vector<64x1xi1> to vector<64x64xi1>
    %26 = vector.broadcast %cst_6 : f32 to vector<64x64xf32>
    %27 = arith.select %25, %23, %26 : vector<64x64xi1>, vector<64x64xf32>
    %c0_7 = arith.constant 0 : index
    %c0_8 = arith.constant 0 : index
    %c0_9 = arith.constant 0 : index
    %28 = vector.load %arg2[%c0_7, %c0_8, %c0_9] : memref<9x64x128xf32, #tpu.memory_space<vmem>>, vector<1x64x128xf32>
    %29 = vector.shape_cast %28 : vector<1x64x128xf32> to vector<64x128xf32>
    %cst_10 = arith.constant dense<0.000000e+00> : vector<64x128xf32>
    %30 = tpu.matmul %27, %29, %cst_10 {dimension_numbers = #tpu.dot_dimension_numbers<[1], [0], [0], [1], [0, 0, 1, 1], [], []>} : vector<64x64xf32>, vector<64x128xf32>, vector<64x128xf32> -> vector<64x128xf32>
    %31 = arith.addf %21, %30 : vector<64x128xf32>
    %c0_11 = arith.constant 0 : index
    %c1 = arith.constant 1 : index
    %c0_12 = arith.constant 0 : index
    %32 = vector.load %arg1[%c0_11, %c1, %c0_12] : memref<1x82x64xf32, #tpu.memory_space<vmem>>, vector<1x64x64xf32>
    %33 = vector.shape_cast %32 : vector<1x64x64xf32> to vector<64x64xf32>
    %c1_13 = arith.constant 1 : index
    %c0_14 = arith.constant 0 : index
    %c0_15 = arith.constant 0 : index
    %34 = vector.load %arg2[%c1_13, %c0_14, %c0_15] : memref<9x64x128xf32, #tpu.memory_space<vmem>>, vector<1x64x128xf32>
    %35 = vector.shape_cast %34 : vector<1x64x128xf32> to vector<64x128xf32>
    %cst_16 = arith.constant dense<0.000000e+00> : vector<64x128xf32>
    %36 = tpu.matmul %33, %35, %cst_16 {dimension_numbers = #tpu.dot_dimension_numbers<[1], [0], [0], [1], [0, 0, 1, 1], [], []>} : vector<64x64xf32>, vector<64x128xf32>, vector<64x128xf32> -> vector<64x128xf32>
    %37 = arith.addf %31, %36 : vector<64x128xf32>
    %c0_17 = arith.constant 0 : index
    %c2 = arith.constant 2 : index
    %c0_18 = arith.constant 0 : index
    %38 = vector.load %arg1[%c0_17, %c2, %c0_18] : memref<1x82x64xf32, #tpu.memory_space<vmem>>, vector<1x64x64xf32>
    %39 = vector.shape_cast %38 : vector<1x64x64xf32> to vector<64x64xf32>
    %cst_19 = arith.constant 0.000000e+00 : f32
    %40 = vector.shape_cast %20 : vector<64x1xi1> to vector<64x1xi1>
    %41 = vector.broadcast %40 : vector<64x1xi1> to vector<64x64xi1>
    %42 = vector.broadcast %cst_19 : f32 to vector<64x64xf32>
    %43 = arith.select %41, %39, %42 : vector<64x64xi1>, vector<64x64xf32>
    %c2_20 = arith.constant 2 : index
    %c0_21 = arith.constant 0 : index
    %c0_22 = arith.constant 0 : index
    %44 = vector.load %arg2[%c2_20, %c0_21, %c0_22] : memref<9x64x128xf32, #tpu.memory_space<vmem>>, vector<1x64x128xf32>
    %45 = vector.shape_cast %44 : vector<1x64x128xf32> to vector<64x128xf32>
    %cst_23 = arith.constant dense<0.000000e+00> : vector<64x128xf32>
    %46 = tpu.matmul %43, %45, %cst_23 {dimension_numbers = #tpu.dot_dimension_numbers<[1], [0], [0], [1], [0, 0, 1, 1], [], []>} : vector<64x64xf32>, vector<64x128xf32>, vector<64x128xf32> -> vector<64x128xf32>
    %47 = arith.addf %37, %46 : vector<64x128xf32>
    %c0_24 = arith.constant 0 : index
    %c8 = arith.constant 8 : index
    %c0_25 = arith.constant 0 : index
    %48 = vector.load %arg1[%c0_24, %c8, %c0_25] : memref<1x82x64xf32, #tpu.memory_space<vmem>>, vector<1x64x64xf32>
    %49 = vector.shape_cast %48 : vector<1x64x64xf32> to vector<64x64xf32>
    %cst_26 = arith.constant 0.000000e+00 : f32
    %50 = vector.shape_cast %18 : vector<64x1xi1> to vector<64x1xi1>
    %51 = vector.broadcast %50 : vector<64x1xi1> to vector<64x64xi1>
    %52 = vector.broadcast %cst_26 : f32 to vector<64x64xf32>
    %53 = arith.select %51, %49, %52 : vector<64x64xi1>, vector<64x64xf32>
    %c3 = arith.constant 3 : index
    %c0_27 = arith.constant 0 : index
    %c0_28 = arith.constant 0 : index
    %54 = vector.load %arg2[%c3, %c0_27, %c0_28] : memref<9x64x128xf32, #tpu.memory_space<vmem>>, vector<1x64x128xf32>
    %55 = vector.shape_cast %54 : vector<1x64x128xf32> to vector<64x128xf32>
    %cst_29 = arith.constant dense<0.000000e+00> : vector<64x128xf32>
    %56 = tpu.matmul %53, %55, %cst_29 {dimension_numbers = #tpu.dot_dimension_numbers<[1], [0], [0], [1], [0, 0, 1, 1], [], []>} : vector<64x64xf32>, vector<64x128xf32>, vector<64x128xf32> -> vector<64x128xf32>
    %57 = arith.addf %47, %56 : vector<64x128xf32>
    %c0_30 = arith.constant 0 : index
    %c9 = arith.constant 9 : index
    %c0_31 = arith.constant 0 : index
    %58 = vector.load %arg1[%c0_30, %c9, %c0_31] : memref<1x82x64xf32, #tpu.memory_space<vmem>>, vector<1x64x64xf32>
    %59 = vector.shape_cast %58 : vector<1x64x64xf32> to vector<64x64xf32>
    %c4 = arith.constant 4 : index
    %c0_32 = arith.constant 0 : index
    %c0_33 = arith.constant 0 : index
    %60 = vector.load %arg2[%c4, %c0_32, %c0_33] : memref<9x64x128xf32, #tpu.memory_space<vmem>>, vector<1x64x128xf32>
    %61 = vector.shape_cast %60 : vector<1x64x128xf32> to vector<64x128xf32>
    %cst_34 = arith.constant dense<0.000000e+00> : vector<64x128xf32>
    %62 = tpu.matmul %59, %61, %cst_34 {dimension_numbers = #tpu.dot_dimension_numbers<[1], [0], [0], [1], [0, 0, 1, 1], [], []>} : vector<64x64xf32>, vector<64x128xf32>, vector<64x128xf32> -> vector<64x128xf32>
    %63 = arith.addf %57, %62 : vector<64x128xf32>
    %c0_35 = arith.constant 0 : index
    %c10 = arith.constant 10 : index
    %c0_36 = arith.constant 0 : index
    %64 = vector.load %arg1[%c0_35, %c10, %c0_36] : memref<1x82x64xf32, #tpu.memory_space<vmem>>, vector<1x64x64xf32>
    %65 = vector.shape_cast %64 : vector<1x64x64xf32> to vector<64x64xf32>
    %cst_37 = arith.constant 0.000000e+00 : f32
    %66 = vector.shape_cast %20 : vector<64x1xi1> to vector<64x1xi1>
    %67 = vector.broadcast %66 : vector<64x1xi1> to vector<64x64xi1>
    %68 = vector.broadcast %cst_37 : f32 to vector<64x64xf32>
    %69 = arith.select %67, %65, %68 : vector<64x64xi1>, vector<64x64xf32>
    %c5 = arith.constant 5 : index
    %c0_38 = arith.constant 0 : index
    %c0_39 = arith.constant 0 : index
    %70 = vector.load %arg2[%c5, %c0_38, %c0_39] : memref<9x64x128xf32, #tpu.memory_space<vmem>>, vector<1x64x128xf32>
    %71 = vector.shape_cast %70 : vector<1x64x128xf32> to vector<64x128xf32>
    %cst_40 = arith.constant dense<0.000000e+00> : vector<64x128xf32>
    %72 = tpu.matmul %69, %71, %cst_40 {dimension_numbers = #tpu.dot_dimension_numbers<[1], [0], [0], [1], [0, 0, 1, 1], [], []>} : vector<64x64xf32>, vector<64x128xf32>, vector<64x128xf32> -> vector<64x128xf32>
    %73 = arith.addf %63, %72 : vector<64x128xf32>
    %c0_41 = arith.constant 0 : index
    %c16 = arith.constant 16 : index
    %c0_42 = arith.constant 0 : index
    %74 = vector.load %arg1[%c0_41, %c16, %c0_42] : memref<1x82x64xf32, #tpu.memory_space<vmem>>, vector<1x64x64xf32>
    %75 = vector.shape_cast %74 : vector<1x64x64xf32> to vector<64x64xf32>
    %cst_43 = arith.constant 0.000000e+00 : f32
    %76 = vector.shape_cast %18 : vector<64x1xi1> to vector<64x1xi1>
    %77 = vector.broadcast %76 : vector<64x1xi1> to vector<64x64xi1>
    %78 = vector.broadcast %cst_43 : f32 to vector<64x64xf32>
    %79 = arith.select %77, %75, %78 : vector<64x64xi1>, vector<64x64xf32>
    %c6 = arith.constant 6 : index
    %c0_44 = arith.constant 0 : index
    %c0_45 = arith.constant 0 : index
    %80 = vector.load %arg2[%c6, %c0_44, %c0_45] : memref<9x64x128xf32, #tpu.memory_space<vmem>>, vector<1x64x128xf32>
    %81 = vector.shape_cast %80 : vector<1x64x128xf32> to vector<64x128xf32>
    %cst_46 = arith.constant dense<0.000000e+00> : vector<64x128xf32>
    %82 = tpu.matmul %79, %81, %cst_46 {dimension_numbers = #tpu.dot_dimension_numbers<[1], [0], [0], [1], [0, 0, 1, 1], [], []>} : vector<64x64xf32>, vector<64x128xf32>, vector<64x128xf32> -> vector<64x128xf32>
    %83 = arith.addf %73, %82 : vector<64x128xf32>
    %c0_47 = arith.constant 0 : index
    %c17 = arith.constant 17 : index
    %c0_48 = arith.constant 0 : index
    %84 = vector.load %arg1[%c0_47, %c17, %c0_48] : memref<1x82x64xf32, #tpu.memory_space<vmem>>, vector<1x64x64xf32>
    %85 = vector.shape_cast %84 : vector<1x64x64xf32> to vector<64x64xf32>
    %c7 = arith.constant 7 : index
    %c0_49 = arith.constant 0 : index
    %c0_50 = arith.constant 0 : index
    %86 = vector.load %arg2[%c7, %c0_49, %c0_50] : memref<9x64x128xf32, #tpu.memory_space<vmem>>, vector<1x64x128xf32>
    %87 = vector.shape_cast %86 : vector<1x64x128xf32> to vector<64x128xf32>
    %cst_51 = arith.constant dense<0.000000e+00> : vector<64x128xf32>
    %88 = tpu.matmul %85, %87, %cst_51 {dimension_numbers = #tpu.dot_dimension_numbers<[1], [0], [0], [1], [0, 0, 1, 1], [], []>} : vector<64x64xf32>, vector<64x128xf32>, vector<64x128xf32> -> vector<64x128xf32>
    %89 = arith.addf %83, %88 : vector<64x128xf32>
    %c0_52 = arith.constant 0 : index
    %c18 = arith.constant 18 : index
    %c0_53 = arith.constant 0 : index
    %90 = vector.load %arg1[%c0_52, %c18, %c0_53] : memref<1x82x64xf32, #tpu.memory_space<vmem>>, vector<1x64x64xf32>
    %91 = vector.shape_cast %90 : vector<1x64x64xf32> to vector<64x64xf32>
    %cst_54 = arith.constant 0.000000e+00 : f32
    %92 = vector.shape_cast %20 : vector<64x1xi1> to vector<64x1xi1>
    %93 = vector.broadcast %92 : vector<64x1xi1> to vector<64x64xi1>
    %94 = vector.broadcast %cst_54 : f32 to vector<64x64xf32>
    %95 = arith.select %93, %91, %94 : vector<64x64xi1>, vector<64x64xf32>
    %c8_55 = arith.constant 8 : index
    %c0_56 = arith.constant 0 : index
    %c0_57 = arith.constant 0 : index
    %96 = vector.load %arg2[%c8_55, %c0_56, %c0_57] : memref<9x64x128xf32, #tpu.memory_space<vmem>>, vector<1x64x128xf32>
    %97 = vector.shape_cast %96 : vector<1x64x128xf32> to vector<64x128xf32>
    %cst_58 = arith.constant dense<0.000000e+00> : vector<64x128xf32>
    %98 = tpu.matmul %95, %97, %cst_58 {dimension_numbers = #tpu.dot_dimension_numbers<[1], [0], [0], [1], [0, 0, 1, 1], [], []>} : vector<64x64xf32>, vector<64x128xf32>, vector<64x128xf32> -> vector<64x128xf32>
    %99 = arith.addf %89, %98 : vector<64x128xf32>
    %c0_59 = arith.constant 0 : index
    %c0_60 = arith.constant 0 : index
    %c0_61 = arith.constant 0 : index
    %100 = vector.load %arg3[%c0_59, %c0_60, %c0_61] : memref<1x64x128xf32, #tpu.memory_space<vmem>>, vector<1x64x128xf32>
    %101 = vector.shape_cast %100 : vector<1x64x128xf32> to vector<64x128xf32>
    %102 = vector.shape_cast %99 : vector<64x128xf32> to vector<1x64x128xf32>
    tpu.vector_store %arg3[%c0_59, %c0_60, %c0_61], %102 {strides = array<i32>} : memref<1x64x128xf32, #tpu.memory_space<vmem>>, vector<1x64x128xf32>,
    %cst_62 = arith.constant dense<0.000000e+00> : vector<128xf32>
    %103 = vector.multi_reduction <add>, %99, %cst_62 [0] : vector<64x128xf32> to vector<128xf32>
    %104 = vector.shape_cast %103 : vector<128xf32> to vector<1x128xf32>
    %c0_63 = arith.constant 0 : index
    %c0_64 = arith.constant 0 : index
    %c0_65 = arith.constant 0 : index
    %105 = vector.load %arg4[%c0_63, %c0_64, %c0_65] : memref<1x1x128xf32, #tpu.memory_space<vmem>>, vector<1x1x128xf32>
    %106 = vector.shape_cast %105 : vector<1x1x128xf32> to vector<1x128xf32>
    %107 = vector.shape_cast %104 : vector<1x128xf32> to vector<1x1x128xf32>
    tpu.vector_store %arg4[%c0_63, %c0_64, %c0_65], %107 {strides = array<i32>} : memref<1x1x128xf32, #tpu.memory_space<vmem>>, vector<1x1x128xf32>,
    %108 = arith.mulf %99, %99 : vector<64x128xf32>
    %cst_66 = arith.constant dense<0.000000e+00> : vector<128xf32>
    %109 = vector.multi_reduction <add>, %108, %cst_66 [0] : vector<64x128xf32> to vector<128xf32>
    %110 = vector.shape_cast %109 : vector<128xf32> to vector<1x128xf32>
    %c0_67 = arith.constant 0 : index
    %c0_68 = arith.constant 0 : index
    %c0_69 = arith.constant 0 : index
    %111 = vector.load %arg5[%c0_67, %c0_68, %c0_69] : memref<1x1x128xf32, #tpu.memory_space<vmem>>, vector<1x1x128xf32>
    %112 = vector.shape_cast %111 : vector<1x1x128xf32> to vector<1x128xf32>
    %113 = vector.shape_cast %110 : vector<1x128xf32> to vector<1x1x128xf32>
    tpu.vector_store %arg5[%c0_67, %c0_68, %c0_69], %113 {strides = array<i32>} : memref<1x1x128xf32, #tpu.memory_space<vmem>>, vector<1x1x128xf32>,
    return
  }
  func.func @transform_0(%arg0: i32) -> (i32, i32, i32) {
    %c0_i32 = arith.constant 0 : i32
    %c0_i32_0 = arith.constant 0 : i32
    %c0_i32_1 = arith.constant 0 : i32
    return %arg0, %c0_i32, %c0_i32_0 : i32, i32, i32
  }
  func.func @transform_1(%arg0: i32) -> (i32, i32, i32) {
    %c0_i32 = arith.constant 0 : i32
    %c0_i32_0 = arith.constant 0 : i32
    %c0_i32_1 = arith.constant 0 : i32
    %c0_i32_2 = arith.constant 0 : i32
    return %c0_i32, %c0_i32_0, %c0_i32_1 : i32, i32, i32
  }
  func.func @transform_2(%arg0: i32) -> (i32, i32, i32) {
    %c0_i32 = arith.constant 0 : i32
    %c0_i32_0 = arith.constant 0 : i32
    %c0_i32_1 = arith.constant 0 : i32
    return %arg0, %c0_i32, %c0_i32_0 : i32, i32, i32
  }
  func.func @transform_3(%arg0: i32) -> (i32, i32, i32) {
    %c0_i32 = arith.constant 0 : i32
    %c0_i32_0 = arith.constant 0 : i32
    %c0_i32_1 = arith.constant 0 : i32
    return %arg0, %c0_i32, %c0_i32_0 : i32, i32, i32
  }
  func.func @transform_4(%arg0: i32) -> (i32, i32, i32) {
    %c0_i32 = arith.constant 0 : i32
    %c0_i32_0 = arith.constant 0 : i32
    %c0_i32_1 = arith.constant 0 : i32
    return %arg0, %c0_i32, %c0_i32_0 : i32, i32, i32
  }
}

module attributes {stable_mosaic.version = 11 : i64} {
  func.func @_bn_relu_pool_kernel(%arg0: i32, %arg1: i32, %arg2: memref<1x4x2x4x256xf32, #tpu.memory_space<vmem>>, %arg3: memref<1x256xf32, #tpu.memory_space<vmem>>, %arg4: memref<1x256xf32, #tpu.memory_space<vmem>>, %arg5: memref<1x4x2x4x256xf32, #tpu.memory_space<vmem>>, %arg6: memref<1x4x4x128xf32, #tpu.memory_space<vmem>>) attributes {dimension_semantics = [#tpu.dimension_semantics<parallel>, #tpu.dimension_semantics<parallel>], iteration_bounds = array<i64: 2, 1>, scalar_prefetch = 0 : i64, scratch_operands = 0 : i64, tpu.core_type = #tpu.core_type<tc>, window_params = [{transform_indices = @transform_0, window_bounds = array<i64: 1, 4, 2, 4, 256>}, {pipeline_mode = #tpu.pipeline_mode<synchronous>, transform_indices = @transform_1, window_bounds = array<i64: 1, 256>}, {pipeline_mode = #tpu.pipeline_mode<synchronous>, transform_indices = @transform_2, window_bounds = array<i64: 1, 256>}, {transform_indices = @transform_3, window_bounds = array<i64: 1, 4, 2, 4, 256>}, {transform_indices = @transform_4, window_bounds = array<i64: 1, 4, 4, 128>}]} {
    %c0 = arith.constant 0 : index
    %c0_0 = arith.constant 0 : index
    %c0_1 = arith.constant 0 : index
    %c0_2 = arith.constant 0 : index
    %c0_3 = arith.constant 0 : index
    %0 = vector.load %arg2[%c0, %c0_0, %c0_1, %c0_2, %c0_3] : memref<1x4x2x4x256xf32, #tpu.memory_space<vmem>>, vector<1x4x2x4x256xf32>
    %c0_4 = arith.constant 0 : index
    %c0_5 = arith.constant 0 : index
    %1 = vector.load %arg3[%c0_4, %c0_5] : memref<1x256xf32, #tpu.memory_space<vmem>>, vector<1x256xf32>
    %2 = vector.shape_cast %1 : vector<1x256xf32> to vector<1x1x1x1x256xf32>
    %3 = vector.broadcast %2 : vector<1x1x1x1x256xf32> to vector<1x4x2x4x256xf32>
    %4 = arith.mulf %0, %3 : vector<1x4x2x4x256xf32>
    %c0_6 = arith.constant 0 : index
    %c0_7 = arith.constant 0 : index
    %5 = vector.load %arg4[%c0_6, %c0_7] : memref<1x256xf32, #tpu.memory_space<vmem>>, vector<1x256xf32>
    %6 = vector.shape_cast %5 : vector<1x256xf32> to vector<1x1x1x1x256xf32>
    %7 = vector.broadcast %6 : vector<1x1x1x1x256xf32> to vector<1x4x2x4x256xf32>
    %8 = arith.addf %4, %7 : vector<1x4x2x4x256xf32>
    %cst = arith.constant 0.000000e+00 : f32
    %9 = vector.broadcast %cst : f32 to vector<1x4x2x4x256xf32>
    %10 = arith.maximumf %8, %9 : vector<1x4x2x4x256xf32>
    %c0_8 = arith.constant 0 : index
    %c0_9 = arith.constant 0 : index
    %c0_10 = arith.constant 0 : index
    %c0_11 = arith.constant 0 : index
    %c0_12 = arith.constant 0 : index
    %11 = vector.load %arg5[%c0_8, %c0_9, %c0_10, %c0_11, %c0_12] : memref<1x4x2x4x256xf32, #tpu.memory_space<vmem>>, vector<1x4x2x4x256xf32>
    tpu.vector_store %arg5[%c0_8, %c0_9, %c0_10, %c0_11, %c0_12], %10 {strides = array<i32>} : memref<1x4x2x4x256xf32, #tpu.memory_space<vmem>>, vector<1x4x2x4x256xf32>,
    %12 = vector.extract_strided_slice %10 {offsets = [0, 0, 0, 0, 0], sizes = [1, 4, 1, 4, 256], strides = [1, 1, 1, 1, 1]} : vector<1x4x2x4x256xf32> to vector<1x4x1x4x256xf32>
    %13 = vector.shape_cast %12 : vector<1x4x1x4x256xf32> to vector<1x4x4x256xf32>
    %14 = vector.extract_strided_slice %10 {offsets = [0, 0, 1, 0, 0], sizes = [1, 4, 1, 4, 256], strides = [1, 1, 1, 1, 1]} : vector<1x4x2x4x256xf32> to vector<1x4x1x4x256xf32>
    %15 = vector.shape_cast %14 : vector<1x4x1x4x256xf32> to vector<1x4x4x256xf32>
    %16 = arith.maximumf %13, %15 : vector<1x4x4x256xf32>
    %17 = vector.extract_strided_slice %16 {offsets = [0, 0, 0, 0], sizes = [1, 4, 4, 128], strides = [1, 1, 1, 1]} : vector<1x4x4x256xf32> to vector<1x4x4x128xf32>
    %18 = vector.extract_strided_slice %16 {offsets = [0, 0, 0, 128], sizes = [1, 4, 4, 128], strides = [1, 1, 1, 1]} : vector<1x4x4x256xf32> to vector<1x4x4x128xf32>
    %19 = arith.maximumf %17, %18 : vector<1x4x4x128xf32>
    %c0_13 = arith.constant 0 : index
    %c0_14 = arith.constant 0 : index
    %c0_15 = arith.constant 0 : index
    %c0_16 = arith.constant 0 : index
    %20 = vector.load %arg6[%c0_13, %c0_14, %c0_15, %c0_16] : memref<1x4x4x128xf32, #tpu.memory_space<vmem>>, vector<1x4x4x128xf32>
    tpu.vector_store %arg6[%c0_13, %c0_14, %c0_15, %c0_16], %19 {strides = array<i32>} : memref<1x4x4x128xf32, #tpu.memory_space<vmem>>, vector<1x4x4x128xf32>,
    return
  }
  func.func @transform_0(%arg0: i32, %arg1: i32) -> (i32, i32, i32, i32, i32) {
    %c0_i32 = arith.constant 0 : i32
    %c0_i32_0 = arith.constant 0 : i32
    %c0_i32_1 = arith.constant 0 : i32
    %c0_i32_2 = arith.constant 0 : i32
    return %arg0, %arg1, %c0_i32, %c0_i32_0, %c0_i32_1 : i32, i32, i32, i32, i32
  }
  func.func @transform_1(%arg0: i32, %arg1: i32) -> (i32, i32) {
    %c0_i32 = arith.constant 0 : i32
    %c0_i32_0 = arith.constant 0 : i32
    %c0_i32_1 = arith.constant 0 : i32
    return %c0_i32, %c0_i32_0 : i32, i32
  }
  func.func @transform_2(%arg0: i32, %arg1: i32) -> (i32, i32) {
    %c0_i32 = arith.constant 0 : i32
    %c0_i32_0 = arith.constant 0 : i32
    %c0_i32_1 = arith.constant 0 : i32
    return %c0_i32, %c0_i32_0 : i32, i32
  }
  func.func @transform_3(%arg0: i32, %arg1: i32) -> (i32, i32, i32, i32, i32) {
    %c0_i32 = arith.constant 0 : i32
    %c0_i32_0 = arith.constant 0 : i32
    %c0_i32_1 = arith.constant 0 : i32
    %c0_i32_2 = arith.constant 0 : i32
    return %arg0, %arg1, %c0_i32, %c0_i32_0, %c0_i32_1 : i32, i32, i32, i32, i32
  }
  func.func @transform_4(%arg0: i32, %arg1: i32) -> (i32, i32, i32, i32) {
    %c0_i32 = arith.constant 0 : i32
    %c0_i32_0 = arith.constant 0 : i32
    %c0_i32_1 = arith.constant 0 : i32
    return %arg0, %arg1, %c0_i32, %c0_i32_0 : i32, i32, i32, i32
  }
}

module attributes {stable_mosaic.version = 11 : i64} {
  func.func @_conv3x3_stats_kernel(%arg0: i32, %arg1: memref<1x26x128xf32, #tpu.memory_space<vmem>>, %arg2: memref<9x128x256xf32, #tpu.memory_space<vmem>>, %arg3: memref<1x16x256xf32, #tpu.memory_space<vmem>>, %arg4: memref<1x1x256xf32, #tpu.memory_space<vmem>>, %arg5: memref<1x1x256xf32, #tpu.memory_space<vmem>>) attributes {dimension_semantics = [#tpu.dimension_semantics<parallel>], iteration_bounds = array<i64: 2>, scalar_prefetch = 0 : i64, scratch_operands = 0 : i64, tpu.core_type = #tpu.core_type<tc>, window_params = [{transform_indices = @transform_0, window_bounds = array<i64: 1, 26, 128>}, {pipeline_mode = #tpu.pipeline_mode<synchronous>, transform_indices = @transform_1, window_bounds = array<i64: 9, 128, 256>}, {transform_indices = @transform_2, window_bounds = array<i64: 1, 16, 256>}, {transform_indices = @transform_3, window_bounds = array<i64: 1, 1, 256>}, {transform_indices = @transform_4, window_bounds = array<i64: 1, 1, 256>}]} {
    %0 = tpu.iota {dimensions = array<i32: 0>} : vector<16x1xi32>
    %c4_i32 = arith.constant 4 : i32
    %c0_i32 = arith.constant 0 : i32
    %1 = arith.cmpi eq, %c4_i32, %c0_i32 : i32
    %c1_i32 = arith.constant 1 : i32
    %2 = arith.select %1, %c1_i32, %c4_i32 : i32
    %3 = vector.broadcast %2 : i32 to vector<16x1xi32>
    %4 = arith.remsi %0, %3 : vector<16x1xi32>
    %c0_i32_0 = arith.constant 0 : i32
    %5 = vector.broadcast %c0_i32_0 : i32 to vector<16x1xi32>
    %6 = arith.cmpi ne, %4, %5 : vector<16x1xi32>
    %c0_i32_1 = arith.constant 0 : i32
    %7 = vector.broadcast %c0_i32_1 : i32 to vector<16x1xi32>
    %8 = arith.cmpi slt, %4, %7 : vector<16x1xi32>
    %c0_i32_2 = arith.constant 0 : i32
    %9 = arith.cmpi slt, %2, %c0_i32_2 : i32
    %10 = vector.broadcast %9 : i1 to vector<16x1xi1>
    %11 = vector.broadcast %10 : vector<16x1xi1> to vector<16x1xi1>
    %12 = arith.xori %8, %11 : vector<16x1xi1>
    %13 = arith.andi %12, %6 : vector<16x1xi1>
    %14 = vector.broadcast %2 : i32 to vector<16x1xi32>
    %15 = arith.addi %4, %14 : vector<16x1xi32>
    %16 = arith.select %13, %15, %4 : vector<16x1xi1>, vector<16x1xi32>
    %c0_i32_3 = arith.constant 0 : i32
    %17 = vector.broadcast %c0_i32_3 : i32 to vector<16x1xi32>
    %18 = arith.cmpi sgt, %16, %17 : vector<16x1xi32>
    %c3_i32 = arith.constant 3 : i32
    %19 = vector.broadcast %c3_i32 : i32 to vector<16x1xi32>
    %20 = arith.cmpi slt, %16, %19 : vector<16x1xi32>
    %cst = arith.constant 0.000000e+00 : f32
    %21 = vector.broadcast %cst : f32 to vector<16x256xf32>
    %c0 = arith.constant 0 : index
    %c0_4 = arith.constant 0 : index
    %c0_5 = arith.constant 0 : index
    %22 = vector.load %arg1[%c0, %c0_4, %c0_5] : memref<1x26x128xf32, #tpu.memory_space<vmem>>, vector<1x16x128xf32>
    %23 = vector.shape_cast %22 : vector<1x16x128xf32> to vector<16x128xf32>
    %cst_6 = arith.constant 0.000000e+00 : f32
    %24 = vector.shape_cast %18 : vector<16x1xi1> to vector<16x1xi1>
    %25 = vector.broadcast %24 : vector<16x1xi1> to vector<16x128xi1>
    %26 = vector.broadcast %cst_6 : f32 to vector<16x128xf32>
    %27 = arith.select %25, %23, %26 : vector<16x128xi1>, vector<16x128xf32>
    %c0_7 = arith.constant 0 : index
    %c0_8 = arith.constant 0 : index
    %c0_9 = arith.constant 0 : index
    %28 = vector.load %arg2[%c0_7, %c0_8, %c0_9] : memref<9x128x256xf32, #tpu.memory_space<vmem>>, vector<1x128x256xf32>
    %29 = vector.shape_cast %28 : vector<1x128x256xf32> to vector<128x256xf32>
    %cst_10 = arith.constant dense<0.000000e+00> : vector<16x256xf32>
    %30 = tpu.matmul %27, %29, %cst_10 {dimension_numbers = #tpu.dot_dimension_numbers<[1], [0], [0], [1], [0, 0, 1, 1], [], []>} : vector<16x128xf32>, vector<128x256xf32>, vector<16x256xf32> -> vector<16x256xf32>
    %31 = arith.addf %21, %30 : vector<16x256xf32>
    %c0_11 = arith.constant 0 : index
    %c1 = arith.constant 1 : index
    %c0_12 = arith.constant 0 : index
    %32 = vector.load %arg1[%c0_11, %c1, %c0_12] : memref<1x26x128xf32, #tpu.memory_space<vmem>>, vector<1x16x128xf32>
    %33 = vector.shape_cast %32 : vector<1x16x128xf32> to vector<16x128xf32>
    %c1_13 = arith.constant 1 : index
    %c0_14 = arith.constant 0 : index
    %c0_15 = arith.constant 0 : index
    %34 = vector.load %arg2[%c1_13, %c0_14, %c0_15] : memref<9x128x256xf32, #tpu.memory_space<vmem>>, vector<1x128x256xf32>
    %35 = vector.shape_cast %34 : vector<1x128x256xf32> to vector<128x256xf32>
    %cst_16 = arith.constant dense<0.000000e+00> : vector<16x256xf32>
    %36 = tpu.matmul %33, %35, %cst_16 {dimension_numbers = #tpu.dot_dimension_numbers<[1], [0], [0], [1], [0, 0, 1, 1], [], []>} : vector<16x128xf32>, vector<128x256xf32>, vector<16x256xf32> -> vector<16x256xf32>
    %37 = arith.addf %31, %36 : vector<16x256xf32>
    %c0_17 = arith.constant 0 : index
    %c2 = arith.constant 2 : index
    %c0_18 = arith.constant 0 : index
    %38 = vector.load %arg1[%c0_17, %c2, %c0_18] : memref<1x26x128xf32, #tpu.memory_space<vmem>>, vector<1x16x128xf32>
    %39 = vector.shape_cast %38 : vector<1x16x128xf32> to vector<16x128xf32>
    %cst_19 = arith.constant 0.000000e+00 : f32
    %40 = vector.shape_cast %20 : vector<16x1xi1> to vector<16x1xi1>
    %41 = vector.broadcast %40 : vector<16x1xi1> to vector<16x128xi1>
    %42 = vector.broadcast %cst_19 : f32 to vector<16x128xf32>
    %43 = arith.select %41, %39, %42 : vector<16x128xi1>, vector<16x128xf32>
    %c2_20 = arith.constant 2 : index
    %c0_21 = arith.constant 0 : index
    %c0_22 = arith.constant 0 : index
    %44 = vector.load %arg2[%c2_20, %c0_21, %c0_22] : memref<9x128x256xf32, #tpu.memory_space<vmem>>, vector<1x128x256xf32>
    %45 = vector.shape_cast %44 : vector<1x128x256xf32> to vector<128x256xf32>
    %cst_23 = arith.constant dense<0.000000e+00> : vector<16x256xf32>
    %46 = tpu.matmul %43, %45, %cst_23 {dimension_numbers = #tpu.dot_dimension_numbers<[1], [0], [0], [1], [0, 0, 1, 1], [], []>} : vector<16x128xf32>, vector<128x256xf32>, vector<16x256xf32> -> vector<16x256xf32>
    %47 = arith.addf %37, %46 : vector<16x256xf32>
    %c0_24 = arith.constant 0 : index
    %c4 = arith.constant 4 : index
    %c0_25 = arith.constant 0 : index
    %48 = vector.load %arg1[%c0_24, %c4, %c0_25] : memref<1x26x128xf32, #tpu.memory_space<vmem>>, vector<1x16x128xf32>
    %49 = vector.shape_cast %48 : vector<1x16x128xf32> to vector<16x128xf32>
    %cst_26 = arith.constant 0.000000e+00 : f32
    %50 = vector.shape_cast %18 : vector<16x1xi1> to vector<16x1xi1>
    %51 = vector.broadcast %50 : vector<16x1xi1> to vector<16x128xi1>
    %52 = vector.broadcast %cst_26 : f32 to vector<16x128xf32>
    %53 = arith.select %51, %49, %52 : vector<16x128xi1>, vector<16x128xf32>
    %c3 = arith.constant 3 : index
    %c0_27 = arith.constant 0 : index
    %c0_28 = arith.constant 0 : index
    %54 = vector.load %arg2[%c3, %c0_27, %c0_28] : memref<9x128x256xf32, #tpu.memory_space<vmem>>, vector<1x128x256xf32>
    %55 = vector.shape_cast %54 : vector<1x128x256xf32> to vector<128x256xf32>
    %cst_29 = arith.constant dense<0.000000e+00> : vector<16x256xf32>
    %56 = tpu.matmul %53, %55, %cst_29 {dimension_numbers = #tpu.dot_dimension_numbers<[1], [0], [0], [1], [0, 0, 1, 1], [], []>} : vector<16x128xf32>, vector<128x256xf32>, vector<16x256xf32> -> vector<16x256xf32>
    %57 = arith.addf %47, %56 : vector<16x256xf32>
    %c0_30 = arith.constant 0 : index
    %c5 = arith.constant 5 : index
    %c0_31 = arith.constant 0 : index
    %58 = vector.load %arg1[%c0_30, %c5, %c0_31] : memref<1x26x128xf32, #tpu.memory_space<vmem>>, vector<1x16x128xf32>
    %59 = vector.shape_cast %58 : vector<1x16x128xf32> to vector<16x128xf32>
    %c4_32 = arith.constant 4 : index
    %c0_33 = arith.constant 0 : index
    %c0_34 = arith.constant 0 : index
    %60 = vector.load %arg2[%c4_32, %c0_33, %c0_34] : memref<9x128x256xf32, #tpu.memory_space<vmem>>, vector<1x128x256xf32>
    %61 = vector.shape_cast %60 : vector<1x128x256xf32> to vector<128x256xf32>
    %cst_35 = arith.constant dense<0.000000e+00> : vector<16x256xf32>
    %62 = tpu.matmul %59, %61, %cst_35 {dimension_numbers = #tpu.dot_dimension_numbers<[1], [0], [0], [1], [0, 0, 1, 1], [], []>} : vector<16x128xf32>, vector<128x256xf32>, vector<16x256xf32> -> vector<16x256xf32>
    %63 = arith.addf %57, %62 : vector<16x256xf32>
    %c0_36 = arith.constant 0 : index
    %c6 = arith.constant 6 : index
    %c0_37 = arith.constant 0 : index
    %64 = vector.load %arg1[%c0_36, %c6, %c0_37] : memref<1x26x128xf32, #tpu.memory_space<vmem>>, vector<1x16x128xf32>
    %65 = vector.shape_cast %64 : vector<1x16x128xf32> to vector<16x128xf32>
    %cst_38 = arith.constant 0.000000e+00 : f32
    %66 = vector.shape_cast %20 : vector<16x1xi1> to vector<16x1xi1>
    %67 = vector.broadcast %66 : vector<16x1xi1> to vector<16x128xi1>
    %68 = vector.broadcast %cst_38 : f32 to vector<16x128xf32>
    %69 = arith.select %67, %65, %68 : vector<16x128xi1>, vector<16x128xf32>
    %c5_39 = arith.constant 5 : index
    %c0_40 = arith.constant 0 : index
    %c0_41 = arith.constant 0 : index
    %70 = vector.load %arg2[%c5_39, %c0_40, %c0_41] : memref<9x128x256xf32, #tpu.memory_space<vmem>>, vector<1x128x256xf32>
    %71 = vector.shape_cast %70 : vector<1x128x256xf32> to vector<128x256xf32>
    %cst_42 = arith.constant dense<0.000000e+00> : vector<16x256xf32>
    %72 = tpu.matmul %69, %71, %cst_42 {dimension_numbers = #tpu.dot_dimension_numbers<[1], [0], [0], [1], [0, 0, 1, 1], [], []>} : vector<16x128xf32>, vector<128x256xf32>, vector<16x256xf32> -> vector<16x256xf32>
    %73 = arith.addf %63, %72 : vector<16x256xf32>
    %c0_43 = arith.constant 0 : index
    %c8 = arith.constant 8 : index
    %c0_44 = arith.constant 0 : index
    %74 = vector.load %arg1[%c0_43, %c8, %c0_44] : memref<1x26x128xf32, #tpu.memory_space<vmem>>, vector<1x16x128xf32>
    %75 = vector.shape_cast %74 : vector<1x16x128xf32> to vector<16x128xf32>
    %cst_45 = arith.constant 0.000000e+00 : f32
    %76 = vector.shape_cast %18 : vector<16x1xi1> to vector<16x1xi1>
    %77 = vector.broadcast %76 : vector<16x1xi1> to vector<16x128xi1>
    %78 = vector.broadcast %cst_45 : f32 to vector<16x128xf32>
    %79 = arith.select %77, %75, %78 : vector<16x128xi1>, vector<16x128xf32>
    %c6_46 = arith.constant 6 : index
    %c0_47 = arith.constant 0 : index
    %c0_48 = arith.constant 0 : index
    %80 = vector.load %arg2[%c6_46, %c0_47, %c0_48] : memref<9x128x256xf32, #tpu.memory_space<vmem>>, vector<1x128x256xf32>
    %81 = vector.shape_cast %80 : vector<1x128x256xf32> to vector<128x256xf32>
    %cst_49 = arith.constant dense<0.000000e+00> : vector<16x256xf32>
    %82 = tpu.matmul %79, %81, %cst_49 {dimension_numbers = #tpu.dot_dimension_numbers<[1], [0], [0], [1], [0, 0, 1, 1], [], []>} : vector<16x128xf32>, vector<128x256xf32>, vector<16x256xf32> -> vector<16x256xf32>
    %83 = arith.addf %73, %82 : vector<16x256xf32>
    %c0_50 = arith.constant 0 : index
    %c9 = arith.constant 9 : index
    %c0_51 = arith.constant 0 : index
    %84 = vector.load %arg1[%c0_50, %c9, %c0_51] : memref<1x26x128xf32, #tpu.memory_space<vmem>>, vector<1x16x128xf32>
    %85 = vector.shape_cast %84 : vector<1x16x128xf32> to vector<16x128xf32>
    %c7 = arith.constant 7 : index
    %c0_52 = arith.constant 0 : index
    %c0_53 = arith.constant 0 : index
    %86 = vector.load %arg2[%c7, %c0_52, %c0_53] : memref<9x128x256xf32, #tpu.memory_space<vmem>>, vector<1x128x256xf32>
    %87 = vector.shape_cast %86 : vector<1x128x256xf32> to vector<128x256xf32>
    %cst_54 = arith.constant dense<0.000000e+00> : vector<16x256xf32>
    %88 = tpu.matmul %85, %87, %cst_54 {dimension_numbers = #tpu.dot_dimension_numbers<[1], [0], [0], [1], [0, 0, 1, 1], [], []>} : vector<16x128xf32>, vector<128x256xf32>, vector<16x256xf32> -> vector<16x256xf32>
    %89 = arith.addf %83, %88 : vector<16x256xf32>
    %c0_55 = arith.constant 0 : index
    %c10 = arith.constant 10 : index
    %c0_56 = arith.constant 0 : index
    %90 = vector.load %arg1[%c0_55, %c10, %c0_56] : memref<1x26x128xf32, #tpu.memory_space<vmem>>, vector<1x16x128xf32>
    %91 = vector.shape_cast %90 : vector<1x16x128xf32> to vector<16x128xf32>
    %cst_57 = arith.constant 0.000000e+00 : f32
    %92 = vector.shape_cast %20 : vector<16x1xi1> to vector<16x1xi1>
    %93 = vector.broadcast %92 : vector<16x1xi1> to vector<16x128xi1>
    %94 = vector.broadcast %cst_57 : f32 to vector<16x128xf32>
    %95 = arith.select %93, %91, %94 : vector<16x128xi1>, vector<16x128xf32>
    %c8_58 = arith.constant 8 : index
    %c0_59 = arith.constant 0 : index
    %c0_60 = arith.constant 0 : index
    %96 = vector.load %arg2[%c8_58, %c0_59, %c0_60] : memref<9x128x256xf32, #tpu.memory_space<vmem>>, vector<1x128x256xf32>
    %97 = vector.shape_cast %96 : vector<1x128x256xf32> to vector<128x256xf32>
    %cst_61 = arith.constant dense<0.000000e+00> : vector<16x256xf32>
    %98 = tpu.matmul %95, %97, %cst_61 {dimension_numbers = #tpu.dot_dimension_numbers<[1], [0], [0], [1], [0, 0, 1, 1], [], []>} : vector<16x128xf32>, vector<128x256xf32>, vector<16x256xf32> -> vector<16x256xf32>
    %99 = arith.addf %89, %98 : vector<16x256xf32>
    %c0_62 = arith.constant 0 : index
    %c0_63 = arith.constant 0 : index
    %c0_64 = arith.constant 0 : index
    %100 = vector.load %arg3[%c0_62, %c0_63, %c0_64] : memref<1x16x256xf32, #tpu.memory_space<vmem>>, vector<1x16x256xf32>
    %101 = vector.shape_cast %100 : vector<1x16x256xf32> to vector<16x256xf32>
    %102 = vector.shape_cast %99 : vector<16x256xf32> to vector<1x16x256xf32>
    tpu.vector_store %arg3[%c0_62, %c0_63, %c0_64], %102 {strides = array<i32>} : memref<1x16x256xf32, #tpu.memory_space<vmem>>, vector<1x16x256xf32>,
    %cst_65 = arith.constant dense<0.000000e+00> : vector<256xf32>
    %103 = vector.multi_reduction <add>, %99, %cst_65 [0] : vector<16x256xf32> to vector<256xf32>
    %104 = vector.shape_cast %103 : vector<256xf32> to vector<1x256xf32>
    %c0_66 = arith.constant 0 : index
    %c0_67 = arith.constant 0 : index
    %c0_68 = arith.constant 0 : index
    %105 = vector.load %arg4[%c0_66, %c0_67, %c0_68] : memref<1x1x256xf32, #tpu.memory_space<vmem>>, vector<1x1x256xf32>
    %106 = vector.shape_cast %105 : vector<1x1x256xf32> to vector<1x256xf32>
    %107 = vector.shape_cast %104 : vector<1x256xf32> to vector<1x1x256xf32>
    tpu.vector_store %arg4[%c0_66, %c0_67, %c0_68], %107 {strides = array<i32>} : memref<1x1x256xf32, #tpu.memory_space<vmem>>, vector<1x1x256xf32>,
    %108 = arith.mulf %99, %99 : vector<16x256xf32>
    %cst_69 = arith.constant dense<0.000000e+00> : vector<256xf32>
    %109 = vector.multi_reduction <add>, %108, %cst_69 [0] : vector<16x256xf32> to vector<256xf32>
    %110 = vector.shape_cast %109 : vector<256xf32> to vector<1x256xf32>
    %c0_70 = arith.constant 0 : index
    %c0_71 = arith.constant 0 : index
    %c0_72 = arith.constant 0 : index
    %111 = vector.load %arg5[%c0_70, %c0_71, %c0_72] : memref<1x1x256xf32, #tpu.memory_space<vmem>>, vector<1x1x256xf32>
    %112 = vector.shape_cast %111 : vector<1x1x256xf32> to vector<1x256xf32>
    %113 = vector.shape_cast %110 : vector<1x256xf32> to vector<1x1x256xf32>
    tpu.vector_store %arg5[%c0_70, %c0_71, %c0_72], %113 {strides = array<i32>} : memref<1x1x256xf32, #tpu.memory_space<vmem>>, vector<1x1x256xf32>,
    return
  }
  func.func @transform_0(%arg0: i32) -> (i32, i32, i32) {
    %c0_i32 = arith.constant 0 : i32
    %c0_i32_0 = arith.constant 0 : i32
    %c0_i32_1 = arith.constant 0 : i32
    return %arg0, %c0_i32, %c0_i32_0 : i32, i32, i32
  }
  func.func @transform_1(%arg0: i32) -> (i32, i32, i32) {
    %c0_i32 = arith.constant 0 : i32
    %c0_i32_0 = arith.constant 0 : i32
    %c0_i32_1 = arith.constant 0 : i32
    %c0_i32_2 = arith.constant 0 : i32
    return %c0_i32, %c0_i32_0, %c0_i32_1 : i32, i32, i32
  }
  func.func @transform_2(%arg0: i32) -> (i32, i32, i32) {
    %c0_i32 = arith.constant 0 : i32
    %c0_i32_0 = arith.constant 0 : i32
    %c0_i32_1 = arith.constant 0 : i32
    return %arg0, %c0_i32, %c0_i32_0 : i32, i32, i32
  }
  func.func @transform_3(%arg0: i32) -> (i32, i32, i32) {
    %c0_i32 = arith.constant 0 : i32
    %c0_i32_0 = arith.constant 0 : i32
    %c0_i32_1 = arith.constant 0 : i32
    return %arg0, %c0_i32, %c0_i32_0 : i32, i32, i32
  }
  func.func @transform_4(%arg0: i32) -> (i32, i32, i32) {
    %c0_i32 = arith.constant 0 : i32
    %c0_i32_0 = arith.constant 0 : i32
    %c0_i32_1 = arith.constant 0 : i32
    return %arg0, %c0_i32, %c0_i32_0 : i32, i32, i32
  }
}

module attributes {stable_mosaic.version = 11 : i64} {
  func.func @_bn_relu_pool_kernel(%arg0: i32, %arg1: i32, %arg2: memref<1x2x2x2x512xf32, #tpu.memory_space<vmem>>, %arg3: memref<1x512xf32, #tpu.memory_space<vmem>>, %arg4: memref<1x512xf32, #tpu.memory_space<vmem>>, %arg5: memref<1x2x2x2x512xf32, #tpu.memory_space<vmem>>, %arg6: memref<1x2x2x256xf32, #tpu.memory_space<vmem>>) attributes {dimension_semantics = [#tpu.dimension_semantics<parallel>, #tpu.dimension_semantics<parallel>], iteration_bounds = array<i64: 2, 1>, scalar_prefetch = 0 : i64, scratch_operands = 0 : i64, tpu.core_type = #tpu.core_type<tc>, window_params = [{transform_indices = @transform_0, window_bounds = array<i64: 1, 2, 2, 2, 512>}, {pipeline_mode = #tpu.pipeline_mode<synchronous>, transform_indices = @transform_1, window_bounds = array<i64: 1, 512>}, {pipeline_mode = #tpu.pipeline_mode<synchronous>, transform_indices = @transform_2, window_bounds = array<i64: 1, 512>}, {transform_indices = @transform_3, window_bounds = array<i64: 1, 2, 2, 2, 512>}, {transform_indices = @transform_4, window_bounds = array<i64: 1, 2, 2, 256>}]} {
    %c0 = arith.constant 0 : index
    %c0_0 = arith.constant 0 : index
    %c0_1 = arith.constant 0 : index
    %c0_2 = arith.constant 0 : index
    %c0_3 = arith.constant 0 : index
    %0 = vector.load %arg2[%c0, %c0_0, %c0_1, %c0_2, %c0_3] : memref<1x2x2x2x512xf32, #tpu.memory_space<vmem>>, vector<1x2x2x2x512xf32>
    %c0_4 = arith.constant 0 : index
    %c0_5 = arith.constant 0 : index
    %1 = vector.load %arg3[%c0_4, %c0_5] : memref<1x512xf32, #tpu.memory_space<vmem>>, vector<1x512xf32>
    %2 = vector.shape_cast %1 : vector<1x512xf32> to vector<1x1x1x1x512xf32>
    %3 = vector.broadcast %2 : vector<1x1x1x1x512xf32> to vector<1x2x2x2x512xf32>
    %4 = arith.mulf %0, %3 : vector<1x2x2x2x512xf32>
    %c0_6 = arith.constant 0 : index
    %c0_7 = arith.constant 0 : index
    %5 = vector.load %arg4[%c0_6, %c0_7] : memref<1x512xf32, #tpu.memory_space<vmem>>, vector<1x512xf32>
    %6 = vector.shape_cast %5 : vector<1x512xf32> to vector<1x1x1x1x512xf32>
    %7 = vector.broadcast %6 : vector<1x1x1x1x512xf32> to vector<1x2x2x2x512xf32>
    %8 = arith.addf %4, %7 : vector<1x2x2x2x512xf32>
    %cst = arith.constant 0.000000e+00 : f32
    %9 = vector.broadcast %cst : f32 to vector<1x2x2x2x512xf32>
    %10 = arith.maximumf %8, %9 : vector<1x2x2x2x512xf32>
    %c0_8 = arith.constant 0 : index
    %c0_9 = arith.constant 0 : index
    %c0_10 = arith.constant 0 : index
    %c0_11 = arith.constant 0 : index
    %c0_12 = arith.constant 0 : index
    %11 = vector.load %arg5[%c0_8, %c0_9, %c0_10, %c0_11, %c0_12] : memref<1x2x2x2x512xf32, #tpu.memory_space<vmem>>, vector<1x2x2x2x512xf32>
    tpu.vector_store %arg5[%c0_8, %c0_9, %c0_10, %c0_11, %c0_12], %10 {strides = array<i32>} : memref<1x2x2x2x512xf32, #tpu.memory_space<vmem>>, vector<1x2x2x2x512xf32>,
    %12 = vector.extract_strided_slice %10 {offsets = [0, 0, 0, 0, 0], sizes = [1, 2, 1, 2, 512], strides = [1, 1, 1, 1, 1]} : vector<1x2x2x2x512xf32> to vector<1x2x1x2x512xf32>
    %13 = vector.shape_cast %12 : vector<1x2x1x2x512xf32> to vector<1x2x2x512xf32>
    %14 = vector.extract_strided_slice %10 {offsets = [0, 0, 1, 0, 0], sizes = [1, 2, 1, 2, 512], strides = [1, 1, 1, 1, 1]} : vector<1x2x2x2x512xf32> to vector<1x2x1x2x512xf32>
    %15 = vector.shape_cast %14 : vector<1x2x1x2x512xf32> to vector<1x2x2x512xf32>
    %16 = arith.maximumf %13, %15 : vector<1x2x2x512xf32>
    %17 = vector.extract_strided_slice %16 {offsets = [0, 0, 0, 0], sizes = [1, 2, 2, 256], strides = [1, 1, 1, 1]} : vector<1x2x2x512xf32> to vector<1x2x2x256xf32>
    %18 = vector.extract_strided_slice %16 {offsets = [0, 0, 0, 256], sizes = [1, 2, 2, 256], strides = [1, 1, 1, 1]} : vector<1x2x2x512xf32> to vector<1x2x2x256xf32>
    %19 = arith.maximumf %17, %18 : vector<1x2x2x256xf32>
    %c0_13 = arith.constant 0 : index
    %c0_14 = arith.constant 0 : index
    %c0_15 = arith.constant 0 : index
    %c0_16 = arith.constant 0 : index
    %20 = vector.load %arg6[%c0_13, %c0_14, %c0_15, %c0_16] : memref<1x2x2x256xf32, #tpu.memory_space<vmem>>, vector<1x2x2x256xf32>
    tpu.vector_store %arg6[%c0_13, %c0_14, %c0_15, %c0_16], %19 {strides = array<i32>} : memref<1x2x2x256xf32, #tpu.memory_space<vmem>>, vector<1x2x2x256xf32>,
    return
  }
  func.func @transform_0(%arg0: i32, %arg1: i32) -> (i32, i32, i32, i32, i32) {
    %c0_i32 = arith.constant 0 : i32
    %c0_i32_0 = arith.constant 0 : i32
    %c0_i32_1 = arith.constant 0 : i32
    %c0_i32_2 = arith.constant 0 : i32
    return %arg0, %arg1, %c0_i32, %c0_i32_0, %c0_i32_1 : i32, i32, i32, i32, i32
  }
  func.func @transform_1(%arg0: i32, %arg1: i32) -> (i32, i32) {
    %c0_i32 = arith.constant 0 : i32
    %c0_i32_0 = arith.constant 0 : i32
    %c0_i32_1 = arith.constant 0 : i32
    return %c0_i32, %c0_i32_0 : i32, i32
  }
  func.func @transform_2(%arg0: i32, %arg1: i32) -> (i32, i32) {
    %c0_i32 = arith.constant 0 : i32
    %c0_i32_0 = arith.constant 0 : i32
    %c0_i32_1 = arith.constant 0 : i32
    return %c0_i32, %c0_i32_0 : i32, i32
  }
  func.func @transform_3(%arg0: i32, %arg1: i32) -> (i32, i32, i32, i32, i32) {
    %c0_i32 = arith.constant 0 : i32
    %c0_i32_0 = arith.constant 0 : i32
    %c0_i32_1 = arith.constant 0 : i32
    %c0_i32_2 = arith.constant 0 : i32
    return %arg0, %arg1, %c0_i32, %c0_i32_0, %c0_i32_1 : i32, i32, i32, i32, i32
  }
  func.func @transform_4(%arg0: i32, %arg1: i32) -> (i32, i32, i32, i32) {
    %c0_i32 = arith.constant 0 : i32
    %c0_i32_0 = arith.constant 0 : i32
    %c0_i32_1 = arith.constant 0 : i32
    return %arg0, %arg1, %c0_i32, %c0_i32_0 : i32, i32, i32, i32
  }
}

module attributes {stable_mosaic.version = 11 : i64} {
  func.func @_conv3x3_stats_kernel(%arg0: i32, %arg1: memref<1x10x256xf32, #tpu.memory_space<vmem>>, %arg2: memref<9x256x512xf32, #tpu.memory_space<vmem>>, %arg3: memref<1x4x512xf32, #tpu.memory_space<vmem>>, %arg4: memref<1x1x512xf32, #tpu.memory_space<vmem>>, %arg5: memref<1x1x512xf32, #tpu.memory_space<vmem>>) attributes {dimension_semantics = [#tpu.dimension_semantics<parallel>], iteration_bounds = array<i64: 2>, scalar_prefetch = 0 : i64, scratch_operands = 0 : i64, tpu.core_type = #tpu.core_type<tc>, window_params = [{transform_indices = @transform_0, window_bounds = array<i64: 1, 10, 256>}, {pipeline_mode = #tpu.pipeline_mode<synchronous>, transform_indices = @transform_1, window_bounds = array<i64: 9, 256, 512>}, {transform_indices = @transform_2, window_bounds = array<i64: 1, 4, 512>}, {transform_indices = @transform_3, window_bounds = array<i64: 1, 1, 512>}, {transform_indices = @transform_4, window_bounds = array<i64: 1, 1, 512>}]} {
    %0 = tpu.iota {dimensions = array<i32: 0>} : vector<4x1xi32>
    %c2_i32 = arith.constant 2 : i32
    %c0_i32 = arith.constant 0 : i32
    %1 = arith.cmpi eq, %c2_i32, %c0_i32 : i32
    %c1_i32 = arith.constant 1 : i32
    %2 = arith.select %1, %c1_i32, %c2_i32 : i32
    %3 = vector.broadcast %2 : i32 to vector<4x1xi32>
    %4 = arith.remsi %0, %3 : vector<4x1xi32>
    %c0_i32_0 = arith.constant 0 : i32
    %5 = vector.broadcast %c0_i32_0 : i32 to vector<4x1xi32>
    %6 = arith.cmpi ne, %4, %5 : vector<4x1xi32>
    %c0_i32_1 = arith.constant 0 : i32
    %7 = vector.broadcast %c0_i32_1 : i32 to vector<4x1xi32>
    %8 = arith.cmpi slt, %4, %7 : vector<4x1xi32>
    %c0_i32_2 = arith.constant 0 : i32
    %9 = arith.cmpi slt, %2, %c0_i32_2 : i32
    %10 = vector.broadcast %9 : i1 to vector<4x1xi1>
    %11 = vector.broadcast %10 : vector<4x1xi1> to vector<4x1xi1>
    %12 = arith.xori %8, %11 : vector<4x1xi1>
    %13 = arith.andi %12, %6 : vector<4x1xi1>
    %14 = vector.broadcast %2 : i32 to vector<4x1xi32>
    %15 = arith.addi %4, %14 : vector<4x1xi32>
    %16 = arith.select %13, %15, %4 : vector<4x1xi1>, vector<4x1xi32>
    %c0_i32_3 = arith.constant 0 : i32
    %17 = vector.broadcast %c0_i32_3 : i32 to vector<4x1xi32>
    %18 = arith.cmpi sgt, %16, %17 : vector<4x1xi32>
    %c1_i32_4 = arith.constant 1 : i32
    %19 = vector.broadcast %c1_i32_4 : i32 to vector<4x1xi32>
    %20 = arith.cmpi slt, %16, %19 : vector<4x1xi32>
    %cst = arith.constant 0.000000e+00 : f32
    %21 = vector.broadcast %cst : f32 to vector<4x512xf32>
    %c0 = arith.constant 0 : index
    %c0_5 = arith.constant 0 : index
    %c0_6 = arith.constant 0 : index
    %22 = vector.load %arg1[%c0, %c0_5, %c0_6] : memref<1x10x256xf32, #tpu.memory_space<vmem>>, vector<1x4x256xf32>
    %23 = vector.shape_cast %22 : vector<1x4x256xf32> to vector<4x256xf32>
    %cst_7 = arith.constant 0.000000e+00 : f32
    %24 = vector.shape_cast %18 : vector<4x1xi1> to vector<4x1xi1>
    %25 = vector.broadcast %24 : vector<4x1xi1> to vector<4x256xi1>
    %26 = vector.broadcast %cst_7 : f32 to vector<4x256xf32>
    %27 = arith.select %25, %23, %26 : vector<4x256xi1>, vector<4x256xf32>
    %c0_8 = arith.constant 0 : index
    %c0_9 = arith.constant 0 : index
    %c0_10 = arith.constant 0 : index
    %28 = vector.load %arg2[%c0_8, %c0_9, %c0_10] : memref<9x256x512xf32, #tpu.memory_space<vmem>>, vector<1x256x512xf32>
    %29 = vector.shape_cast %28 : vector<1x256x512xf32> to vector<256x512xf32>
    %cst_11 = arith.constant dense<0.000000e+00> : vector<4x512xf32>
    %30 = tpu.matmul %27, %29, %cst_11 {dimension_numbers = #tpu.dot_dimension_numbers<[1], [0], [0], [1], [0, 0, 1, 1], [], []>} : vector<4x256xf32>, vector<256x512xf32>, vector<4x512xf32> -> vector<4x512xf32>
    %31 = arith.addf %21, %30 : vector<4x512xf32>
    %c0_12 = arith.constant 0 : index
    %c1 = arith.constant 1 : index
    %c0_13 = arith.constant 0 : index
    %32 = vector.load %arg1[%c0_12, %c1, %c0_13] : memref<1x10x256xf32, #tpu.memory_space<vmem>>, vector<1x4x256xf32>
    %33 = vector.shape_cast %32 : vector<1x4x256xf32> to vector<4x256xf32>
    %c1_14 = arith.constant 1 : index
    %c0_15 = arith.constant 0 : index
    %c0_16 = arith.constant 0 : index
    %34 = vector.load %arg2[%c1_14, %c0_15, %c0_16] : memref<9x256x512xf32, #tpu.memory_space<vmem>>, vector<1x256x512xf32>
    %35 = vector.shape_cast %34 : vector<1x256x512xf32> to vector<256x512xf32>
    %cst_17 = arith.constant dense<0.000000e+00> : vector<4x512xf32>
    %36 = tpu.matmul %33, %35, %cst_17 {dimension_numbers = #tpu.dot_dimension_numbers<[1], [0], [0], [1], [0, 0, 1, 1], [], []>} : vector<4x256xf32>, vector<256x512xf32>, vector<4x512xf32> -> vector<4x512xf32>
    %37 = arith.addf %31, %36 : vector<4x512xf32>
    %c0_18 = arith.constant 0 : index
    %c2 = arith.constant 2 : index
    %c0_19 = arith.constant 0 : index
    %38 = vector.load %arg1[%c0_18, %c2, %c0_19] : memref<1x10x256xf32, #tpu.memory_space<vmem>>, vector<1x4x256xf32>
    %39 = vector.shape_cast %38 : vector<1x4x256xf32> to vector<4x256xf32>
    %cst_20 = arith.constant 0.000000e+00 : f32
    %40 = vector.shape_cast %20 : vector<4x1xi1> to vector<4x1xi1>
    %41 = vector.broadcast %40 : vector<4x1xi1> to vector<4x256xi1>
    %42 = vector.broadcast %cst_20 : f32 to vector<4x256xf32>
    %43 = arith.select %41, %39, %42 : vector<4x256xi1>, vector<4x256xf32>
    %c2_21 = arith.constant 2 : index
    %c0_22 = arith.constant 0 : index
    %c0_23 = arith.constant 0 : index
    %44 = vector.load %arg2[%c2_21, %c0_22, %c0_23] : memref<9x256x512xf32, #tpu.memory_space<vmem>>, vector<1x256x512xf32>
    %45 = vector.shape_cast %44 : vector<1x256x512xf32> to vector<256x512xf32>
    %cst_24 = arith.constant dense<0.000000e+00> : vector<4x512xf32>
    %46 = tpu.matmul %43, %45, %cst_24 {dimension_numbers = #tpu.dot_dimension_numbers<[1], [0], [0], [1], [0, 0, 1, 1], [], []>} : vector<4x256xf32>, vector<256x512xf32>, vector<4x512xf32> -> vector<4x512xf32>
    %47 = arith.addf %37, %46 : vector<4x512xf32>
    %c0_25 = arith.constant 0 : index
    %c2_26 = arith.constant 2 : index
    %c0_27 = arith.constant 0 : index
    %48 = vector.load %arg1[%c0_25, %c2_26, %c0_27] : memref<1x10x256xf32, #tpu.memory_space<vmem>>, vector<1x4x256xf32>
    %49 = vector.shape_cast %48 : vector<1x4x256xf32> to vector<4x256xf32>
    %cst_28 = arith.constant 0.000000e+00 : f32
    %50 = vector.shape_cast %18 : vector<4x1xi1> to vector<4x1xi1>
    %51 = vector.broadcast %50 : vector<4x1xi1> to vector<4x256xi1>
    %52 = vector.broadcast %cst_28 : f32 to vector<4x256xf32>
    %53 = arith.select %51, %49, %52 : vector<4x256xi1>, vector<4x256xf32>
    %c3 = arith.constant 3 : index
    %c0_29 = arith.constant 0 : index
    %c0_30 = arith.constant 0 : index
    %54 = vector.load %arg2[%c3, %c0_29, %c0_30] : memref<9x256x512xf32, #tpu.memory_space<vmem>>, vector<1x256x512xf32>
    %55 = vector.shape_cast %54 : vector<1x256x512xf32> to vector<256x512xf32>
    %cst_31 = arith.constant dense<0.000000e+00> : vector<4x512xf32>
    %56 = tpu.matmul %53, %55, %cst_31 {dimension_numbers = #tpu.dot_dimension_numbers<[1], [0], [0], [1], [0, 0, 1, 1], [], []>} : vector<4x256xf32>, vector<256x512xf32>, vector<4x512xf32> -> vector<4x512xf32>
    %57 = arith.addf %47, %56 : vector<4x512xf32>
    %c0_32 = arith.constant 0 : index
    %c3_33 = arith.constant 3 : index
    %c0_34 = arith.constant 0 : index
    %58 = vector.load %arg1[%c0_32, %c3_33, %c0_34] : memref<1x10x256xf32, #tpu.memory_space<vmem>>, vector<1x4x256xf32>
    %59 = vector.shape_cast %58 : vector<1x4x256xf32> to vector<4x256xf32>
    %c4 = arith.constant 4 : index
    %c0_35 = arith.constant 0 : index
    %c0_36 = arith.constant 0 : index
    %60 = vector.load %arg2[%c4, %c0_35, %c0_36] : memref<9x256x512xf32, #tpu.memory_space<vmem>>, vector<1x256x512xf32>
    %61 = vector.shape_cast %60 : vector<1x256x512xf32> to vector<256x512xf32>
    %cst_37 = arith.constant dense<0.000000e+00> : vector<4x512xf32>
    %62 = tpu.matmul %59, %61, %cst_37 {dimension_numbers = #tpu.dot_dimension_numbers<[1], [0], [0], [1], [0, 0, 1, 1], [], []>} : vector<4x256xf32>, vector<256x512xf32>, vector<4x512xf32> -> vector<4x512xf32>
    %63 = arith.addf %57, %62 : vector<4x512xf32>
    %c0_38 = arith.constant 0 : index
    %c4_39 = arith.constant 4 : index
    %c0_40 = arith.constant 0 : index
    %64 = vector.load %arg1[%c0_38, %c4_39, %c0_40] : memref<1x10x256xf32, #tpu.memory_space<vmem>>, vector<1x4x256xf32>
    %65 = vector.shape_cast %64 : vector<1x4x256xf32> to vector<4x256xf32>
    %cst_41 = arith.constant 0.000000e+00 : f32
    %66 = vector.shape_cast %20 : vector<4x1xi1> to vector<4x1xi1>
    %67 = vector.broadcast %66 : vector<4x1xi1> to vector<4x256xi1>
    %68 = vector.broadcast %cst_41 : f32 to vector<4x256xf32>
    %69 = arith.select %67, %65, %68 : vector<4x256xi1>, vector<4x256xf32>
    %c5 = arith.constant 5 : index
    %c0_42 = arith.constant 0 : index
    %c0_43 = arith.constant 0 : index
    %70 = vector.load %arg2[%c5, %c0_42, %c0_43] : memref<9x256x512xf32, #tpu.memory_space<vmem>>, vector<1x256x512xf32>
    %71 = vector.shape_cast %70 : vector<1x256x512xf32> to vector<256x512xf32>
    %cst_44 = arith.constant dense<0.000000e+00> : vector<4x512xf32>
    %72 = tpu.matmul %69, %71, %cst_44 {dimension_numbers = #tpu.dot_dimension_numbers<[1], [0], [0], [1], [0, 0, 1, 1], [], []>} : vector<4x256xf32>, vector<256x512xf32>, vector<4x512xf32> -> vector<4x512xf32>
    %73 = arith.addf %63, %72 : vector<4x512xf32>
    %c0_45 = arith.constant 0 : index
    %c4_46 = arith.constant 4 : index
    %c0_47 = arith.constant 0 : index
    %74 = vector.load %arg1[%c0_45, %c4_46, %c0_47] : memref<1x10x256xf32, #tpu.memory_space<vmem>>, vector<1x4x256xf32>
    %75 = vector.shape_cast %74 : vector<1x4x256xf32> to vector<4x256xf32>
    %cst_48 = arith.constant 0.000000e+00 : f32
    %76 = vector.shape_cast %18 : vector<4x1xi1> to vector<4x1xi1>
    %77 = vector.broadcast %76 : vector<4x1xi1> to vector<4x256xi1>
    %78 = vector.broadcast %cst_48 : f32 to vector<4x256xf32>
    %79 = arith.select %77, %75, %78 : vector<4x256xi1>, vector<4x256xf32>
    %c6 = arith.constant 6 : index
    %c0_49 = arith.constant 0 : index
    %c0_50 = arith.constant 0 : index
    %80 = vector.load %arg2[%c6, %c0_49, %c0_50] : memref<9x256x512xf32, #tpu.memory_space<vmem>>, vector<1x256x512xf32>
    %81 = vector.shape_cast %80 : vector<1x256x512xf32> to vector<256x512xf32>
    %cst_51 = arith.constant dense<0.000000e+00> : vector<4x512xf32>
    %82 = tpu.matmul %79, %81, %cst_51 {dimension_numbers = #tpu.dot_dimension_numbers<[1], [0], [0], [1], [0, 0, 1, 1], [], []>} : vector<4x256xf32>, vector<256x512xf32>, vector<4x512xf32> -> vector<4x512xf32>
    %83 = arith.addf %73, %82 : vector<4x512xf32>
    %c0_52 = arith.constant 0 : index
    %c5_53 = arith.constant 5 : index
    %c0_54 = arith.constant 0 : index
    %84 = vector.load %arg1[%c0_52, %c5_53, %c0_54] : memref<1x10x256xf32, #tpu.memory_space<vmem>>, vector<1x4x256xf32>
    %85 = vector.shape_cast %84 : vector<1x4x256xf32> to vector<4x256xf32>
    %c7 = arith.constant 7 : index
    %c0_55 = arith.constant 0 : index
    %c0_56 = arith.constant 0 : index
    %86 = vector.load %arg2[%c7, %c0_55, %c0_56] : memref<9x256x512xf32, #tpu.memory_space<vmem>>, vector<1x256x512xf32>
    %87 = vector.shape_cast %86 : vector<1x256x512xf32> to vector<256x512xf32>
    %cst_57 = arith.constant dense<0.000000e+00> : vector<4x512xf32>
    %88 = tpu.matmul %85, %87, %cst_57 {dimension_numbers = #tpu.dot_dimension_numbers<[1], [0], [0], [1], [0, 0, 1, 1], [], []>} : vector<4x256xf32>, vector<256x512xf32>, vector<4x512xf32> -> vector<4x512xf32>
    %89 = arith.addf %83, %88 : vector<4x512xf32>
    %c0_58 = arith.constant 0 : index
    %c6_59 = arith.constant 6 : index
    %c0_60 = arith.constant 0 : index
    %90 = vector.load %arg1[%c0_58, %c6_59, %c0_60] : memref<1x10x256xf32, #tpu.memory_space<vmem>>, vector<1x4x256xf32>
    %91 = vector.shape_cast %90 : vector<1x4x256xf32> to vector<4x256xf32>
    %cst_61 = arith.constant 0.000000e+00 : f32
    %92 = vector.shape_cast %20 : vector<4x1xi1> to vector<4x1xi1>
    %93 = vector.broadcast %92 : vector<4x1xi1> to vector<4x256xi1>
    %94 = vector.broadcast %cst_61 : f32 to vector<4x256xf32>
    %95 = arith.select %93, %91, %94 : vector<4x256xi1>, vector<4x256xf32>
    %c8 = arith.constant 8 : index
    %c0_62 = arith.constant 0 : index
    %c0_63 = arith.constant 0 : index
    %96 = vector.load %arg2[%c8, %c0_62, %c0_63] : memref<9x256x512xf32, #tpu.memory_space<vmem>>, vector<1x256x512xf32>
    %97 = vector.shape_cast %96 : vector<1x256x512xf32> to vector<256x512xf32>
    %cst_64 = arith.constant dense<0.000000e+00> : vector<4x512xf32>
    %98 = tpu.matmul %95, %97, %cst_64 {dimension_numbers = #tpu.dot_dimension_numbers<[1], [0], [0], [1], [0, 0, 1, 1], [], []>} : vector<4x256xf32>, vector<256x512xf32>, vector<4x512xf32> -> vector<4x512xf32>
    %99 = arith.addf %89, %98 : vector<4x512xf32>
    %c0_65 = arith.constant 0 : index
    %c0_66 = arith.constant 0 : index
    %c0_67 = arith.constant 0 : index
    %100 = vector.load %arg3[%c0_65, %c0_66, %c0_67] : memref<1x4x512xf32, #tpu.memory_space<vmem>>, vector<1x4x512xf32>
    %101 = vector.shape_cast %100 : vector<1x4x512xf32> to vector<4x512xf32>
    %102 = vector.shape_cast %99 : vector<4x512xf32> to vector<1x4x512xf32>
    tpu.vector_store %arg3[%c0_65, %c0_66, %c0_67], %102 {strides = array<i32>} : memref<1x4x512xf32, #tpu.memory_space<vmem>>, vector<1x4x512xf32>,
    %cst_68 = arith.constant dense<0.000000e+00> : vector<512xf32>
    %103 = vector.multi_reduction <add>, %99, %cst_68 [0] : vector<4x512xf32> to vector<512xf32>
    %104 = vector.shape_cast %103 : vector<512xf32> to vector<1x512xf32>
    %c0_69 = arith.constant 0 : index
    %c0_70 = arith.constant 0 : index
    %c0_71 = arith.constant 0 : index
    %105 = vector.load %arg4[%c0_69, %c0_70, %c0_71] : memref<1x1x512xf32, #tpu.memory_space<vmem>>, vector<1x1x512xf32>
    %106 = vector.shape_cast %105 : vector<1x1x512xf32> to vector<1x512xf32>
    %107 = vector.shape_cast %104 : vector<1x512xf32> to vector<1x1x512xf32>
    tpu.vector_store %arg4[%c0_69, %c0_70, %c0_71], %107 {strides = array<i32>} : memref<1x1x512xf32, #tpu.memory_space<vmem>>, vector<1x1x512xf32>,
    %108 = arith.mulf %99, %99 : vector<4x512xf32>
    %cst_72 = arith.constant dense<0.000000e+00> : vector<512xf32>
    %109 = vector.multi_reduction <add>, %108, %cst_72 [0] : vector<4x512xf32> to vector<512xf32>
    %110 = vector.shape_cast %109 : vector<512xf32> to vector<1x512xf32>
    %c0_73 = arith.constant 0 : index
    %c0_74 = arith.constant 0 : index
    %c0_75 = arith.constant 0 : index
    %111 = vector.load %arg5[%c0_73, %c0_74, %c0_75] : memref<1x1x512xf32, #tpu.memory_space<vmem>>, vector<1x1x512xf32>
    %112 = vector.shape_cast %111 : vector<1x1x512xf32> to vector<1x512xf32>
    %113 = vector.shape_cast %110 : vector<1x512xf32> to vector<1x1x512xf32>
    tpu.vector_store %arg5[%c0_73, %c0_74, %c0_75], %113 {strides = array<i32>} : memref<1x1x512xf32, #tpu.memory_space<vmem>>, vector<1x1x512xf32>,
    return
  }
  func.func @transform_0(%arg0: i32) -> (i32, i32, i32) {
    %c0_i32 = arith.constant 0 : i32
    %c0_i32_0 = arith.constant 0 : i32
    %c0_i32_1 = arith.constant 0 : i32
    return %arg0, %c0_i32, %c0_i32_0 : i32, i32, i32
  }
  func.func @transform_1(%arg0: i32) -> (i32, i32, i32) {
    %c0_i32 = arith.constant 0 : i32
    %c0_i32_0 = arith.constant 0 : i32
    %c0_i32_1 = arith.constant 0 : i32
    %c0_i32_2 = arith.constant 0 : i32
    return %c0_i32, %c0_i32_0, %c0_i32_1 : i32, i32, i32
  }
  func.func @transform_2(%arg0: i32) -> (i32, i32, i32) {
    %c0_i32 = arith.constant 0 : i32
    %c0_i32_0 = arith.constant 0 : i32
    %c0_i32_1 = arith.constant 0 : i32
    return %arg0, %c0_i32, %c0_i32_0 : i32, i32, i32
  }
  func.func @transform_3(%arg0: i32) -> (i32, i32, i32) {
    %c0_i32 = arith.constant 0 : i32
    %c0_i32_0 = arith.constant 0 : i32
    %c0_i32_1 = arith.constant 0 : i32
    return %arg0, %c0_i32, %c0_i32_0 : i32, i32, i32
  }
  func.func @transform_4(%arg0: i32) -> (i32, i32, i32) {
    %c0_i32 = arith.constant 0 : i32
    %c0_i32_0 = arith.constant 0 : i32
    %c0_i32_1 = arith.constant 0 : i32
    return %arg0, %c0_i32, %c0_i32_0 : i32, i32, i32
  }
}

module attributes {stable_mosaic.version = 11 : i64} {
  func.func @_bn_relu_pool_kernel(%arg0: i32, %arg1: i32, %arg2: memref<1x1x2x1x1024xf32, #tpu.memory_space<vmem>>, %arg3: memref<1x1024xf32, #tpu.memory_space<vmem>>, %arg4: memref<1x1024xf32, #tpu.memory_space<vmem>>, %arg5: memref<1x1x2x1x1024xf32, #tpu.memory_space<vmem>>) attributes {dimension_semantics = [#tpu.dimension_semantics<parallel>, #tpu.dimension_semantics<parallel>], iteration_bounds = array<i64: 2, 1>, scalar_prefetch = 0 : i64, scratch_operands = 0 : i64, tpu.core_type = #tpu.core_type<tc>, window_params = [{transform_indices = @transform_0, window_bounds = array<i64: 1, 1, 2, 1, 1024>}, {pipeline_mode = #tpu.pipeline_mode<synchronous>, transform_indices = @transform_1, window_bounds = array<i64: 1, 1024>}, {pipeline_mode = #tpu.pipeline_mode<synchronous>, transform_indices = @transform_2, window_bounds = array<i64: 1, 1024>}, {transform_indices = @transform_3, window_bounds = array<i64: 1, 1, 2, 1, 1024>}]} {
    %c0 = arith.constant 0 : index
    %c0_0 = arith.constant 0 : index
    %c0_1 = arith.constant 0 : index
    %c0_2 = arith.constant 0 : index
    %c0_3 = arith.constant 0 : index
    %0 = vector.load %arg2[%c0, %c0_0, %c0_1, %c0_2, %c0_3] : memref<1x1x2x1x1024xf32, #tpu.memory_space<vmem>>, vector<1x1x2x1x1024xf32>
    %c0_4 = arith.constant 0 : index
    %c0_5 = arith.constant 0 : index
    %1 = vector.load %arg3[%c0_4, %c0_5] : memref<1x1024xf32, #tpu.memory_space<vmem>>, vector<1x1024xf32>
    %2 = vector.shape_cast %1 : vector<1x1024xf32> to vector<1x1x1x1x1024xf32>
    %3 = vector.broadcast %2 : vector<1x1x1x1x1024xf32> to vector<1x1x2x1x1024xf32>
    %4 = arith.mulf %0, %3 : vector<1x1x2x1x1024xf32>
    %c0_6 = arith.constant 0 : index
    %c0_7 = arith.constant 0 : index
    %5 = vector.load %arg4[%c0_6, %c0_7] : memref<1x1024xf32, #tpu.memory_space<vmem>>, vector<1x1024xf32>
    %6 = vector.shape_cast %5 : vector<1x1024xf32> to vector<1x1x1x1x1024xf32>
    %7 = vector.broadcast %6 : vector<1x1x1x1x1024xf32> to vector<1x1x2x1x1024xf32>
    %8 = arith.addf %4, %7 : vector<1x1x2x1x1024xf32>
    %cst = arith.constant 0.000000e+00 : f32
    %9 = vector.broadcast %cst : f32 to vector<1x1x2x1x1024xf32>
    %10 = arith.maximumf %8, %9 : vector<1x1x2x1x1024xf32>
    %c0_8 = arith.constant 0 : index
    %c0_9 = arith.constant 0 : index
    %c0_10 = arith.constant 0 : index
    %c0_11 = arith.constant 0 : index
    %c0_12 = arith.constant 0 : index
    %11 = vector.load %arg5[%c0_8, %c0_9, %c0_10, %c0_11, %c0_12] : memref<1x1x2x1x1024xf32, #tpu.memory_space<vmem>>, vector<1x1x2x1x1024xf32>
    tpu.vector_store %arg5[%c0_8, %c0_9, %c0_10, %c0_11, %c0_12], %10 {strides = array<i32>} : memref<1x1x2x1x1024xf32, #tpu.memory_space<vmem>>, vector<1x1x2x1x1024xf32>,
    return
  }
  func.func @transform_0(%arg0: i32, %arg1: i32) -> (i32, i32, i32, i32, i32) {
    %c0_i32 = arith.constant 0 : i32
    %c0_i32_0 = arith.constant 0 : i32
    %c0_i32_1 = arith.constant 0 : i32
    %c0_i32_2 = arith.constant 0 : i32
    return %arg0, %arg1, %c0_i32, %c0_i32_0, %c0_i32_1 : i32, i32, i32, i32, i32
  }
  func.func @transform_1(%arg0: i32, %arg1: i32) -> (i32, i32) {
    %c0_i32 = arith.constant 0 : i32
    %c0_i32_0 = arith.constant 0 : i32
    %c0_i32_1 = arith.constant 0 : i32
    return %c0_i32, %c0_i32_0 : i32, i32
  }
  func.func @transform_2(%arg0: i32, %arg1: i32) -> (i32, i32) {
    %c0_i32 = arith.constant 0 : i32
    %c0_i32_0 = arith.constant 0 : i32
    %c0_i32_1 = arith.constant 0 : i32
    return %c0_i32, %c0_i32_0 : i32, i32
  }
  func.func @transform_3(%arg0: i32, %arg1: i32) -> (i32, i32, i32, i32, i32) {
    %c0_i32 = arith.constant 0 : i32
    %c0_i32_0 = arith.constant 0 : i32
    %c0_i32_1 = arith.constant 0 : i32
    %c0_i32_2 = arith.constant 0 : i32
    return %arg0, %arg1, %c0_i32, %c0_i32_0, %c0_i32_1 : i32, i32, i32, i32, i32
  }
}

</mosaic_0001>

<bundles_post_ra>
// kernel: encoder_forward.9
= control target key start
LH: loop header
LB: loop body
LE: loop exit
PB: predicated region body
PF: predicated region fallthrough
CT: control target
= control target key end

     0   :  { %s499_s12 = smov 0   ;;  %s501_s13 = smov 0   ;;  %s559_s0 = inlined_call_operand.vmem [shape: f32[2,8,2,8,128], index: 0, kind: input, shape index: {}]   ;;  %s560_s1 = inlined_call_operand.vmem [shape: f32[1,128], index: 1, kind: input, shape index: {}]   ;;  %s561_s2 = inlined_call_operand.vmem [shape: f32[1,128], index: 2, kind: input, shape index: {}]   ;;  %s562_s3 = inlined_call_operand.vmem [shape: f32[2,8,8,64], index: 3, kind: output, shape index: {}]  }
   0x1   :  { %s503_s14 = smov 0   ;;  %s505_s15 = smov 0  }
   0x2   :  { %s507_s16 = smov 0  }
   0x3 LB: > { %s22_s17 = sadd.s32 1, %s468_s14  ;;  %s25_s18 = sadd.s32 1, %s472_s15  ;;  %s476_s16 = sphi %s507_s16, %s13_s16   ;;  %s472_s15 = sphi %s505_s15, %s566_s15   ;;  %s468_s14 = sphi %s503_s14, %s565_s14   ;;  %s464_s13 = sphi %s501_s13, %s564_s13   ;;  %s460_s12 = sphi %s499_s12, %s563_s12  }
   0x4   : > { %p23_p0 = scmp.ge.s32.totalorder %s22_s17, 2  ;;  %p385_p1 = scmp.ge.s32.totalorder %s476_s16, 1 }
   0x5   : > { %p159_p2 = scmp.lt.s32.totalorder %s476_s16, 5 }
   0x6   : > { %s568_s17 = smov (%p23_p0, %s22_s17), 0  ;;  %s570_s18 = smov (!%p23_p0, %s25_s18), %s472_s15 }
   0x7   : > { %p160_p3 = pnand %p385_p1, %p159_p2  ;;  %p27_p4 = scmp.ge.s32.totalorder %s570_s18, 2 }
   0x8   : > { %s386_s19 = sshll.u32 (!%p160_p3), %s460_s12, 2  ;;  %p193_p5 = scmp.lt.s32.totalorder (!%p160_p3), %s464_s13, 1  ;;  %v393_v0 = vld [vmem:[%s560_s1] ss:$0 sm:$0xff] (!%p160_p3)  ;;  %vm283_vm0 = vcmask (!%p160_p3), 523264  }
   0x9   : > { %s572_s18 = smov (%p27_p4, %s570_s18), 0  ;;  %163 = sbr.rel (%p160_p3) target bundleno = 154 (0x9a), region = 32 }
   0xa   : > { %p195_p6 = scmp.lt.s32.totalorder (!%p160_p3), %s386_s19, 7  ;;  %v394_v1 = vld [vmem:[%s561_s2] ss:$0 sm:$0xff] (!%p160_p3)  ;;  %s478_s6 = smov (!%p160_p3), 64  }
  0x10   : > { %s574_s13 = smov (!%p193_p5, %s464_s13), 1  ;;  %s576_s19 = smov (!%p195_p6, %s386_s19), 7 }
  0x11   : > { %s388_s20 = sshll.u32 %s574_s13, 4  ;;  %s391_s21 = sshll.u32 %s574_s13, 3 }
  0x12   : > { %s387_s22 = sshll.u32 %s576_s19, 1  ;;  %s529_s23 = sadd.s32 %s391_s21, %s576_s19 }
  0x13   : > { %s199_s24 = sadd.s32 %s388_s20, %s387_s22  ;;  %s392_s7 = sshll.u32 %s529_s23, 3 }
  0x14   : > { %s389_s25 = sshll.u32 %s199_s24, 3  ;;  %s211_s10 = scalar_lea.vmem %s562_s3, %s392_s7 }
  0x15   : > { %s201_s30 = scalar_lea.vmem %s559_s0, %s389_s25 }
  0x16   : > { %v217_v2 = vld [vmem:[%s201_s30 + $0x20] sm:$0xff]  ;;  %v218_v3 = vld [vmem:[%s201_s30 + $0x28] sm:$0xff]  ;;  %v219_v9 = vld [vmem:[%s201_s30 + $0x30] sm:$0xff] }
  0x17   : > { %v213_v4 = vld [vmem:[%s201_s30] sm:$0xff]  ;;  %v232_v5 = vmul.f32 %v393_v0, %v217_v2  ;;  %v233_v6 = vmul.f32 %v393_v0, %v218_v3  ;;  %v214_v7 = vld [vmem:[%s201_s30 + $0x8] sm:$0xff]  ;;  %v220_v10 = vld [vmem:[%s201_s30 + $0x38] sm:$0xff]  ;;  %v234_v12 = vmul.f32 %v393_v0, %v219_v9 }
  0x18   : > { %v228_v8 = vmul.f32 %v393_v0, %v213_v4  ;;  %v229_v11 = vmul.f32 %v393_v0, %v214_v7  ;;  %v235_v13 = vmul.f32 %v393_v0, %v220_v10  ;;  %v215_v14 = vld [vmem:[%s201_s30 + $0x10] sm:$0xff]  ;;  %v216_v15 = vld [vmem:[%s201_s30 + $0x18] sm:$0xff] }
  0x19   : > { %v247_v16 = vadd.f32 %v394_v1, %v232_v5  ;;  %v248_v17 = vadd.f32 %v394_v1, %v233_v6  ;;  %v230_v19 = vmul.f32 %v393_v0, %v215_v14  ;;  %v249_v21 = vadd.f32 %v394_v1, %v234_v12 }
  0x1a   : > { %v243_v18 = vadd.f32 %v394_v1, %v228_v8  ;;  %v244_v20 = vadd.f32 %v394_v1, %v229_v11  ;;  %v250_v22 = vadd.f32 %v394_v1, %v235_v13  ;;  %v231_v23 = vmul.f32 %v393_v0, %v216_v15 }
  0x1b   : > { %v255_v24 = vmax.f32 %v247_v16, 0.0  ;;  %v256_v25 = vmax.f32 %v248_v17, 0.0  ;;  %v245_v27 = vadd.f32 %v394_v1, %v230_v19  ;;  %v257_v29 = vmax.f32 %v249_v21, 0.0 }
  0x1c   : > { %v251_v26 = vmax.f32 %v243_v18, 0.0  ;;  %v252_v28 = vmax.f32 %v244_v20, 0.0  ;;  %v258_v30 = vmax.f32 %v250_v22, 0.0  ;;  %v246_v31 = vadd.f32 %v394_v1, %v231_v23 }
  0x1d   : > { %v261_v32 = vmax.f32 %v255_v24, %v256_v25  ;;  %v253_v33 = vmax.f32 %v245_v27, 0.0 }
  0x1e   : > { %v259_v34 = vmax.f32 %v251_v26, %v252_v28  ;;  %v254_v35 = vmax.f32 %v246_v31, 0.0  ;;  %v262_v36 = vmax.f32 %v257_v29, %v258_v30 }
  0x1f   : > { %271 = vrot.lane.b32.xlu1 %v261_v32, %s478_s6 }
  0x20   : > { %267 = vrot.lane.b32.xlu0 %v259_v34, %s478_s6  ;;  %v260_v37 = vmax.f32 %v253_v33, %v254_v35 }
  0x23   : > { %273 = vrot.lane.b32.xlu1 %v262_v36, %s478_s6 }
  0x24   : > { %269 = vrot.lane.b32.xlu0 %v260_v37, %s478_s6 }
  0x91   : > { %v272_v38 = vpop.permute.xlu1 %271 }
  0x92   : > { %v281_v39 = vmax.f32 %v261_v32, %v272_v38  ;;  %v268_v40 = vpop.permute.xlu0 %267 }
  0x93   : > { %v279_v41 = vmax.f32 %v259_v34, %v268_v40 }
  0x94   : > { %286 = vst.msk [vmem:[%s211_s10 + $0x10] sm:$0xff] %vm283_vm0, %v281_v39 }
  0x95   : > { %284 = vst.msk [vmem:[%s211_s10] sm:$0xff] %vm283_vm0, %v279_v41  ;;  %v274_v42 = vpop.permute.xlu1 %273 }
  0x96   : > { %v282_v43 = vmax.f32 %v262_v36, %v274_v42  ;;  %v270_v44 = vpop.permute.xlu0 %269 }
  0x97   : > { %v280_v45 = vmax.f32 %v260_v37, %v270_v44 }
  0x98   : > { %287 = vst.msk [vmem:[%s211_s10 + $0x18] sm:$0xff] %vm283_vm0, %v282_v43 }
  0x99   : > { %285 = vst.msk [vmem:[%s211_s10 + $0x8] sm:$0xff] %vm283_vm0, %v280_v45 }
  0x9a PF: > { %s13_s16 = sadd.s32 1, %s476_s16   ;;  %s563_s12 = smov %s468_s14 }
  0x9b   : > { %p10_p7 = scmp.ge.s32.totalorder %s13_s16, 6   ;;  %s564_s13 = smov %s472_s15 }
  0x9c   : > { %s565_s14 = smov %s568_s17  ;;  %s566_s15 = smov %s572_s18 }
  0x9d   :  { %12 = sbr.rel (!%p10_p7) target bundleno = 3 (0x3), region = 62 }

// kernel: encoder_forward.11
= control target key start
LH: loop header
LB: loop body
LE: loop exit
PB: predicated region body
PF: predicated region fallthrough
CT: control target
= control target key end

     0   :  { %s589_s15 = smov 0   ;;  %s591_s16 = smov 0   ;;  %s639_s0 = inlined_call_operand.vmem [shape: f32[2,4,2,4,256], index: 0, kind: input, shape index: {}]   ;;  %s640_s1 = inlined_call_operand.vmem [shape: f32[1,256], index: 1, kind: input, shape index: {}]   ;;  %s641_s2 = inlined_call_operand.vmem [shape: f32[1,256], index: 2, kind: input, shape index: {}]   ;;  %s642_s3 = inlined_call_operand.vmem [shape: f32[2,4,2,4,256], index: 3, kind: output, shape index: {0}]   ;;  %s643_s4 = inlined_call_operand.vmem [shape: f32[2,4,4,128], index: 4, kind: output, shape index: {1}]  }
   0x1   :  { %s593_s17 = smov 0  }
   0x2 LB: > { %s27_s18 = sadd.s32 1, %s558_s16  ;;  %p504_p0 = scmp.ge.s32.totalorder %s562_s17, 1  ;;  %s562_s17 = sphi %s593_s17, %s15_s17   ;;  %s558_s16 = sphi %s591_s16, %s645_s16   ;;  %s554_s15 = sphi %s589_s15, %s644_s15  }
   0x3   : > { %p29_p1 = scmp.ge.s32.totalorder %s27_s18, 2  ;;  %p189_p2 = scmp.lt.s32.totalorder %s562_s17, 3 }
   0x5   : > { %s647_s18 = smov (%p29_p1, %s27_s18), 0  ;;  %p190_p3 = pnand %p504_p0, %p189_p2 }
   0x6   : > { %p235_p4 = scmp.lt.s32.totalorder (!%p190_p3), %s554_s15, 1  ;;  %v276_v0 = vlaneseq (!%p190_p3)  ;;  %v274_v2 = vld [vmem:[%s640_s1] sm:$0x3] (!%p190_p3) }
   0x7   : > { %193 = sbr.rel (%p190_p3) target bundleno = 33 (0x21), region = 32  ;;  %v294_v3 = vld [vmem:[%s641_s2] sm:$0x3] (!%p190_p3) }
   0x8   : > { %v277_v1 = vshrl.u32 (!%p190_p3), %v276_v0, 7 }
   0xa   : > { %v278_v4 = vsub.s32 (!%p190_p3), 0, %v277_v1  ;;  %v282_v5 = vsub.s32 (!%p190_p3), 1, %v277_v1 }
   0xc   : > { %v279_v7 = vrot.slane (!%p190_p3), %v274_v2, %v278_v4  ;;  %v283_v8 = vrot.slane (!%p190_p3), %v274_v2, %v282_v5  ;;  %v299_v9 = vrot.slane (!%p190_p3), %v294_v3, %v278_v4  ;;  %v303_v10 = vrot.slane (!%p190_p3), %v294_v3, %v282_v5 }
   0xe   : > { %s649_s15 = smov (!%p235_p4, %s554_s15), 1  ;;  %v284_v15 = vcombine.low %v279_v7, %v283_v8  ;;  %v304_v16 = vcombine.low %v299_v9, %v303_v10 }
   0xf   : > { %s513_s23 = sshll.u32 %s649_s15, 6  ;;  %s515_s30 = sshll.u32 %s649_s15, 4 }
  0x10   : > { %s243_s26 = scalar_lea.vmem %s639_s0, %s513_s23  ;;  %s254_s29 = scalar_lea.vmem %s642_s3, %s513_s23 }
  0x11   : > { %v266_v6 = vld [vmem:[%s243_s26] sm:$0xff]  ;;  %v267_v11 = vld [vmem:[%s243_s26 + $0x8] sm:$0xff]  ;;  %v268_v12 = vld [vmem:[%s243_s26 + $0x10] sm:$0xff]  ;;  %s264_s7 = scalar_lea.vmem %s643_s4, %s515_s30 }
  0x12   : > { %v269_v13 = vld [vmem:[%s243_s26 + $0x18] sm:$0xff]  ;;  %v270_v14 = vld [vmem:[%s243_s26 + $0x20] sm:$0xff]  ;;  %v271_v17 = vld [vmem:[%s243_s26 + $0x28] sm:$0xff]  ;;  %v286_v20 = vmul.f32 %v284_v15, %v266_v6  ;;  %v287_v21 = vmul.f32 %v284_v15, %v267_v11  ;;  %v288_v22 = vmul.f32 %v284_v15, %v268_v12 }
  0x13   : > { %v272_v18 = vld [vmem:[%s243_s26 + $0x30] sm:$0xff]  ;;  %v273_v19 = vld [vmem:[%s243_s26 + $0x38] sm:$0xff]  ;;  %v289_v23 = vmul.f32 %v284_v15, %v269_v13  ;;  %v290_v24 = vmul.f32 %v284_v15, %v270_v14  ;;  %v291_v25 = vmul.f32 %v284_v15, %v271_v17 }
  0x14   : > { %v292_v26 = vmul.f32 %v284_v15, %v272_v18  ;;  %v293_v27 = vmul.f32 %v284_v15, %v273_v19  ;;  %v306_v28 = vadd.f32 %v304_v16, %v286_v20  ;;  %v307_v29 = vadd.f32 %v304_v16, %v287_v21 }
  0x15   : > { %v308_v30 = vadd.f32 %v304_v16, %v288_v22  ;;  %v309_v31 = vadd.f32 %v304_v16, %v289_v23  ;;  %v310_v32 = vadd.f32 %v304_v16, %v290_v24  ;;  %v311_v33 = vadd.f32 %v304_v16, %v291_v25 }
  0x16   : > { %v312_v34 = vadd.f32 %v304_v16, %v292_v26  ;;  %v313_v35 = vadd.f32 %v304_v16, %v293_v27  ;;  %v314_v36 = vmax.f32 %v306_v28, 0.0  ;;  %v315_v37 = vmax.f32 %v307_v29, 0.0 }
  0x17   : > { %v316_v38 = vmax.f32 %v308_v30, 0.0  ;;  %v317_v39 = vmax.f32 %v309_v31, 0.0  ;;  %v318_v40 = vmax.f32 %v310_v32, 0.0  ;;  %v319_v41 = vmax.f32 %v311_v33, 0.0 }
  0x18   : > { %v320_v42 = vmax.f32 %v312_v34, 0.0  ;;  %v321_v43 = vmax.f32 %v313_v35, 0.0  ;;  %322 = vst [vmem:[%s254_s29] sm:$0xff] %v314_v36  ;;  %323 = vst [vmem:[%s254_s29 + $0x8] sm:$0xff] %v315_v37  ;;  %v330_v44 = vmax.f32 %v314_v36, %v315_v37 }
  0x19   : > { %324 = vst [vmem:[%s254_s29 + $0x10] sm:$0xff] %v316_v38  ;;  %325 = vst [vmem:[%s254_s29 + $0x18] sm:$0xff] %v317_v39  ;;  %v331_v45 = vmax.f32 %v316_v38, %v317_v39  ;;  %v332_v46 = vmax.f32 %v318_v40, %v319_v41 }
  0x1a   : > { %326 = vst [vmem:[%s254_s29 + $0x20] sm:$0xff] %v318_v40  ;;  %327 = vst [vmem:[%s254_s29 + $0x28] sm:$0xff] %v319_v41  ;;  %v333_v47 = vmax.f32 %v320_v42, %v321_v43  ;;  %v338_v48 = vrot.slane %v330_v44, 4 }
  0x1b   : > { %328 = vst [vmem:[%s254_s29 + $0x30] sm:$0xff] %v320_v42  ;;  %329 = vst [vmem:[%s254_s29 + $0x38] sm:$0xff] %v321_v43  ;;  %v339_v49 = vrot.slane %v331_v45, 4  ;;  %v340_v50 = vrot.slane %v332_v46, 4 }
  0x1c   : > { %v341_v51 = vrot.slane %v333_v47, 4  ;;  %v346_v52 = vmax.f32 %v330_v44, %v338_v48 }
  0x1d   : > { %v347_v53 = vmax.f32 %v331_v45, %v339_v49  ;;  %v348_v54 = vmax.f32 %v332_v46, %v340_v50 }
  0x1e   : > { %v349_v55 = vmax.f32 %v333_v47, %v341_v51  ;;  %350 = vst [vmem:[%s264_s7] sm:$0xf] %v346_v52 }
  0x1f   : > { %351 = vst [vmem:[%s264_s7 + $0x4] sm:$0xf] %v347_v53  ;;  %352 = vst [vmem:[%s264_s7 + $0x8] sm:$0xf] %v348_v54 }
  0x20   : > { %353 = vst [vmem:[%s264_s7 + $0xc] sm:$0xf] %v349_v55 }
  0x21 PF: > { %s15_s17 = sadd.s32 1, %s562_s17   ;;  %s644_s15 = smov %s558_s16 }
  0x22   : > { %p12_p5 = scmp.ge.s32.totalorder %s15_s17, 4   ;;  %s645_s16 = smov %s647_s18 }
  0x24   :  { %14 = sbr.rel (!%p12_p5) target bundleno = 2 (0x2), region = 74 }

// kernel: encoder_forward.10
= control target key start
LH: loop header
LB: loop body
LE: loop exit
PB: predicated region body
PF: predicated region fallthrough
CT: control target
= control target key end

     0   :  { %10 = vsyncpa [#allocation3], 0  ;;  %s2749_s15 = smov 0   ;;  %s3207_s0 = inlined_call_operand.vmem [shape: f32[2,82,64], index: 0, kind: input, shape index: {}]   ;;  %s3208_s1 = inlined_call_operand.hbm [shape: f32[9,64,128], index: 1, kind: input, shape index: {}]   ;;  %s3209_s2 = inlined_call_operand.vmem [shape: f32[2,64,128], index: 2, kind: output, shape index: {0}]   ;;  %s3210_s3 = inlined_call_operand.vmem [shape: f32[2,1,128], index: 3, kind: output, shape index: {1}]   ;;  %s3211_s4 = inlined_call_operand.vmem [shape: f32[2,1,128], index: 4, kind: output, shape index: {2}]  }
   0x1 LB: > { %s2755_s16 = sadd.s32 4294967295, %s2719_s15   ;;  %p1964_p0 = scmp.ge.s32.totalorder %s2719_s15, 1  ;;  %s2719_s15 = sphi %s2749_s15, %s16_s15  }
   0x2   : > { %p146_p1 = scmp.lt.s32.totalorder %s2719_s15, 3  ;;  %s2721_s17 = smov [#allocation2]  }
   0x3   : > { %s158_s18 = sshll.u32 %s2721_s17, 4  ;;  %p3212_p3 = scmp.eq.s32.totalorder %s2755_s16, 0  ;;  %s159_s18 = int_to_ptr.vmem [resolvable:$true] %s158_s18 }
   0x4   : > { %p2759_p2 = pnand %p1964_p0, %p146_p1  ;;  %s2681_s23 = scalar_lea.hbm %s3208_s1, 9216 }
   0x5   : > { %p2682_p6 = scmp.ne.s32.totalorder %s3208_s1, %s2681_s23  ;;  %p2688_p10 = scmp.lt.u32.totalorder %s2681_s23, %s3208_s1 }
   0x6   : > { %s3217_s19 = scalar_select %p2759_p2, 1, 0 }
   0x7   : > { %p2664_p4 = pneg %p2759_p2 }
   0x9   : > { %p2768_p5 = pnand %p3212_p3, %p2664_p4 }
   0xb   : > { %p2683_p7 = pneg %p2768_p5 }
   0xd   : > { %p2684_p8 = pnand %p2683_p7, %p2682_p6 }
   0xf   : > { %p2685_p9 = pneg %p2684_p8 }
  0x11   : > { %p2690_p11 = pnand %p2688_p10, %p2685_p9 }
  0x13   : > { %2693 = shalt.err (!%p2690_p11)
}
  0x14   : > { %s2694_s28 = scalar_lea.vmem %s159_s18, 9216  ;;  %p2702_p1 = scmp.lt.s32.totalorder %s159_s18, %s159_s18 }
  0x15   : > { %p2695_p12 = scmp.ne.s32.totalorder %s159_s18, %s2694_s28  ;;  %p2703_p4 = scmp.lt.s32.totalorder %s2694_s28, %s2694_s28 }
  0x17   : > { %p2697_p13 = pnand %p2695_p12, %p2683_p7  ;;  %p2704_p3 = por %p2703_p4, %p2702_p1 }
  0x19   : > { %p2698_p0 = pneg %p2697_p13 }
  0x1b   : > { %p2705_p2 = pnand %p2704_p3, %p2698_p0 }
  0x1d   : > { %2708 = shalt.err (!%p2705_p2)
}
  0x1e   : > { %s2722_s29 = smov 128   ;;  %s2723_s30 = smov 8  }
  0x1f   : > { %2667 = dma.hbm_to_vmem [thread:$0]  (!%p2768_p5), %s3208_s1, 9216, %s159_s18, [#allocation3], %s2722_s29, %s2722_s29, %s2723_s30  }
  0x20   : > { %p3219_p6 = scmp.ne.s32.totalorder %s3217_s19, 0 }
  0x21   : > { %p3220_p8 = scmp.eq.s32.totalorder (!%p3219_p6), %s2755_s16, 0 }
  0x22   : > { %182 = sbr.rel (%p3219_p6) target bundleno = 372 (0x174), region = 28 }
  0x29   : > { %2714 = dma.done.wait (%p3220_p8), [#allocation3], 9216   ;;  %p3221_p7 = pmov %p3220_p8 }
  0x2a   : > { %p214_p2 = scmp.lt.s32.totalorder %s2755_s16, 1  ;;  %v400_v0 = vld [vmem:[#allocation2 + $0x40] sm:$0xff]  ;;  %v401_v1 = vld [vmem:[#allocation2 + $0x48] sm:$0xff]  ;;  %v402_v5 = vld [vmem:[#allocation2 + $0x50] sm:$0xff]  ;;  %vm408_vm0 = vcmask 523264   ;;  %v230_v31 = vlaneseq }
  0x2b   : > { %2716 = vsyncadd (%p3221_p7), [#allocation3], 4294958080  ;;  %v1016_v2 = vld [vmem:[#allocation2 + $0x100] sm:$0xff]  ;;  %v2443_v3 = vpack.c.bf16 %v401_v1, %v400_v0  ;;  %v1017_v4 = vld [vmem:[#allocation2 + $0x108] sm:$0xff] }
  0x2c   : > { %s3257_s16 = smov (!%p214_p2, %s2755_s16), 1  ;;  %v403_v6 = vld [vmem:[#allocation2 + $0x58] sm:$0xff]  ;;  %v2507_v7 = vpack.c.bf16 %v1017_v4, %v1016_v2  ;;  %v1018_v9 = vld [vmem:[#allocation2 + $0x110] sm:$0xff]  ;;  %v404_v11 = vld [vmem:[#allocation2 + $0x60] sm:$0xff]  ;;  %v2811_v38 = vshrl.u32 %v230_v31, 7 }
  0x2d   : > { %s2659_s7 = smul.u32 88, %s3257_s16  ;;  %v2447_v8 = vpack.c.bf16 %v403_v6, %v402_v5  ;;  %v1019_v10 = vld [vmem:[#allocation2 + $0x118] sm:$0xff]  ;;  %2444 = vmatprep.subr.bf16.mxu1 %v2443_v3  ;;  %v405_v13 = vld [vmem:[#allocation2 + $0x68] sm:$0xff]  ;;  %v1020_v14 = vld [vmem:[#allocation2 + $0x120] sm:$0xff]  ;;  %s2046_s11 = sshll.u32 %s3257_s16, 6 }
  0x2e   : > { %v2511_v12 = vpack.c.bf16 %v1019_v10, %v1018_v9  ;;  %v1021_v15 = vld [vmem:[#allocation2 + $0x128] sm:$0xff]  ;;  %2508 = vmatprep.subr.bf16.mxu0 %v2507_v7  ;;  %2446 = vmatpush3.bf16.msra.mxu1 %v2443_v3  ;;  %v2451_v16 = vpack.c.bf16 %v405_v13, %v404_v11  ;;  %v406_v20 = vld [vmem:[#allocation2 + $0x70] sm:$0xff]  ;;  %v407_v21 = vld [vmem:[#allocation2 + $0x78] sm:$0xff]  ;;  %v232_v47 = vadd.s32 8, %v2811_v38  ;;  %v243_v53 = vand.u32 7, %v2811_v38  ;;  %s223_s14 = scalar_lea.vmem %s3209_s2, %s2046_s11  ;;  %s226_s19 = scalar_lea.vmem %s3210_s3, %s3257_s16 }
  0x2f   : > { %s2802_s10 = scalar_lea.vmem %s3207_s0, %s2659_s7  ;;  %2510 = vmatpush3.bf16.msra.mxu0 %v2507_v7  ;;  %2448 = vmatprep.subr.bf16.mxu1 %v2447_v8  ;;  %v2515_v19 = vpack.c.bf16 %v1021_v15, %v1020_v14  ;;  %v1022_v22 = vld [vmem:[#allocation2 + $0x130] sm:$0xff]  ;;  %v1023_v23 = vld [vmem:[#allocation2 + $0x138] sm:$0xff]  ;;  %v2455_v24 = vpack.c.bf16 %v407_v21, %v406_v20  ;;  %v383_v26 = vld [vmem:[#allocation2] sm:$0xff]  ;;  %v233_v54 = vadd.s32 16, %v2811_v38  ;;  %v234_v59 = vadd.s32 24, %v2811_v38  ;;  %s229_s22 = scalar_lea.vmem %s3211_s4, %s3257_s16 }
  0x30   : > { %v391_v17 = vld [vmem:[%s2802_s10 + $0x1] sm:$0xff]  ;;  %v1007_v18 = vld [vmem:[%s2802_s10 + $0x9] sm:$0xff]  ;;  %2512 = vmatprep.subr.bf16.mxu0 %v2511_v12  ;;  %v2519_v25 = vpack.c.bf16 %v1023_v23, %v1022_v22  ;;  %v386_v34 = vld [vmem:[#allocation2 + $0x18] sm:$0xff]  ;;  %v250_v58 = vand.u32 7, %v232_v47  ;;  %vm2849_vm1 = vcmp.gt.s32.totalorder %v243_v53, 0  ;;  %v235_v4 = vadd.s32 32, %v2811_v38 }
  0x31   : > { %2207 = vmatprep.mubr.msk.f32.mxu1 %vm408_vm0, %v391_v17  ;;  %2319 = vmatprep.mubr.msk.f32.mxu0 %vm408_vm0, %v1007_v18  ;;  %v384_v27 = vld [vmem:[#allocation2 + $0x8] sm:$0xff]  ;;  %v1178_v28 = vld [vmem:[#allocation2 + $0x140] sm:$0xff]  ;;  %v385_v33 = vld [vmem:[#allocation2 + $0x10] sm:$0xff]  ;;  %v257_v3 = vand.u32 7, %v233_v54  ;;  %vm2857_vm2 = vcmp.lt.s32.totalorder %v243_v53, 7  ;;  %v2877_v13 = vadd.s32 40, %v2811_v38 }
  0x32   : > { %2450 = vmatpush3.bf16.msra.mxu1 %v2447_v8  ;;  %v1179_v29 = vld [vmem:[#allocation2 + $0x148] sm:$0xff]  ;;  %v2459_v30 = vpack.c.bf16 %v384_v27, %v383_v26  ;;  %v1180_v35 = vld [vmem:[#allocation2 + $0x150] sm:$0xff]  ;;  %v1181_v36 = vld [vmem:[#allocation2 + $0x158] sm:$0xff]  ;;  %v2463_v39 = vpack.c.bf16 %v386_v34, %v385_v33  ;;  %vm2869_vm3 = vcmp.gt.s32.totalorder %v250_v58, 0  ;;  %vm2883_vm4 = vcmp.lt.s32.totalorder %v250_v58, 7 }
  0x33   : > { %2514 = vmatpush3.bf16.msra.mxu0 %v2511_v12  ;;  %2452 = vmatprep.subr.bf16.mxu1 %v2451_v16  ;;  %v2523_v32 = vpack.c.bf16 %v1179_v29, %v1178_v28  ;;  %v2809_v37 = vld [vmem:[%s2802_s10 + $0x11] sm:$0xff]  ;;  %v2815_v40 = vld [vmem:[%s2802_s10 + $0x19] sm:$0xff]  ;;  %v2527_v41 = vpack.c.bf16 %v1181_v36, %v1180_v35  ;;  %v388_v43 = vld [vmem:[#allocation2 + $0x28] sm:$0xff]  ;;  %v264_v12 = vand.u32 7, %v234_v59  ;;  %vm2898_vm5 = vcmp.gt.s32.totalorder %v257_v3, 0 }
  0x34   : > { %2516 = vmatprep.subr.bf16.mxu0 %v2515_v19  ;;  %v387_v42 = vld [vmem:[#allocation2 + $0x20] sm:$0xff]  ;;  %v1183_v45 = vld [vmem:[#allocation2 + $0x168] sm:$0xff]  ;;  %v389_v51 = vld [vmem:[#allocation2 + $0x30] sm:$0xff]  ;;  %vm2910_vm6 = vcmp.lt.s32.totalorder %v257_v3, 7  ;;  %v278_v34 = vand.u32 7, %v2877_v13  ;;  %v238_v35 = vadd.s32 56, %v2811_v38 }
  0x35   : > { %v1182_v44 = vld [vmem:[#allocation2 + $0x160] sm:$0xff]  ;;  %v2467_v48 = vpack.c.bf16 %v388_v43, %v387_v42  ;;  %v2830_v49 = vld [vmem:[%s2802_s10 + $0x29] sm:$0xff]  ;;  %v390_v52 = vld [vmem:[#allocation2 + $0x38] sm:$0xff]  ;;  %vm2921_vm7 = vcmp.gt.s32.totalorder %v264_v12, 0  ;;  %vm2934_vm8 = vcmp.lt.s32.totalorder %v264_v12, 7  ;;  %v3242_v58 = vmov 0 }
  0x36   : > { %2454 = vmatpush3.bf16.msra.mxu1 %v2451_v16  ;;  %v2822_v46 = vld [vmem:[%s2802_s10 + $0x21] sm:$0xff]  ;;  %v2531_v50 = vpack.c.bf16 %v1183_v45, %v1182_v44  ;;  %v1184_v55 = vld [vmem:[#allocation2 + $0x170] sm:$0xff]  ;;  %v1185_v56 = vld [vmem:[#allocation2 + $0x178] sm:$0xff]  ;;  %v2471_v61 = vpack.c.bf16 %v390_v52, %v389_v51  ;;  %vm2968_vm11 = vcmp.gt.s32.totalorder %v278_v34, 0  ;;  %vm2979_vm12 = vcmp.lt.s32.totalorder %v278_v34, 7 }
  0x37   : > { %2518 = vmatpush3.bf16.msra.mxu0 %v2515_v19  ;;  %2456 = vmatprep.subr.bf16.mxu1 %v2455_v24  ;;  %v2839_v57 = vld [vmem:[%s2802_s10 + $0x31] sm:$0xff]  ;;  %v2845_v60 = vld [vmem:[%s2802_s10 + $0x39] sm:$0xff]  ;;  %v2535_v62 = vpack.c.bf16 %v1185_v56, %v1184_v55  ;;  %v701_v2 = vld [vmem:[#allocation2 + $0x88] sm:$0xff]  ;;  %v3243_v58 = vsel %vm2968_vm11, 4294967295, %v3242_v58 }
  0x38   : > { %2520 = vmatprep.subr.bf16.mxu0 %v2519_v25  ;;  %v351_v0 = vld [vmem:[%s2802_s10] sm:$0xff]  ;;  %v2862_v6 = vld [vmem:[%s2802_s10 + $0xa] sm:$0xff]  ;;  %v2888_v17 = vld [vmem:[%s2802_s10 + $0x12] sm:$0xff] }
  0x39   : > { %v700_v1 = vld [vmem:[#allocation2 + $0x80] sm:$0xff]  ;;  %v1341_v8 = vld [vmem:[#allocation2 + $0x188] sm:$0xff]  ;;  %v375_v14 = vsel %vm2849_vm1, %v351_v0, 0.0  ;;  %v1169_v19 = vsel %vm2857_vm2, %v2862_v6, 0.0  ;;  %v2903_v22 = vld [vmem:[%s2802_s10 + $0x10] sm:$0xff]  ;;  %v1170_v31 = vsel %vm2883_vm4, %v2888_v17, 0.0 }
  0x3a   : > { %2458 = vmatpush3.bf16.msra.mxu1 %v2455_v24  ;;  %v1340_v7 = vld [vmem:[#allocation2 + $0x180] sm:$0xff]  ;;  %v2874_v11 = vld [vmem:[%s2802_s10 + $0x8] sm:$0xff]  ;;  %v2475_v15 = vpack.c.bf16 %v701_v2, %v700_v1  ;;  %v702_v23 = vld [vmem:[#allocation2 + $0x90] sm:$0xff]  ;;  %v377_v36 = vsel %vm2898_vm5, %v2903_v22, 0.0  ;;  %v1647_v44 = vsel %vm2857_vm2, %v2888_v17, 0.0 }
  0x3b   : > { %2522 = vmatpush3.bf16.msra.mxu0 %v2519_v25  ;;  %2460 = vmatprep.subr.bf16.mxu1 %v2459_v30  ;;  %v2867_v9 = vld [vmem:[%s2802_s10 + $0x41] sm:$0xff]  ;;  %v2539_v20 = vpack.c.bf16 %v1341_v8, %v1340_v7  ;;  %v703_v24 = vld [vmem:[#allocation2 + $0x98] sm:$0xff]  ;;  %v271_v25 = vand.u32 7, %v235_v4  ;;  %v376_v26 = vsel %vm2869_vm3, %v2874_v11, 0.0  ;;  %v1342_v29 = vld [vmem:[#allocation2 + $0x190] sm:$0xff] }
  0x3c   : > { %2524 = vmatprep.subr.bf16.mxu0 %v2523_v32  ;;  %v2915_v28 = vld [vmem:[%s2802_s10 + $0x1a] sm:$0xff]  ;;  %v2939_v42 = vld [vmem:[%s2802_s10 + $0x22] sm:$0xff]  ;;  %v2962_v53 = vld [vmem:[%s2802_s10 + $0x2a] sm:$0xff] }
  0x3d   : > { %2208 = vmatmul.mubr.msk.f32.vlgmr.msra.gmra.mrb[0].mxu1 %vm408_vm0, %v1007_v18  ;;  %v2891_v18 = vadd.s32 48, %v2811_v38  ;;  %v2926_v33 = vld [vmem:[%s2802_s10 + $0x18] sm:$0xff]  ;;  %v1171_v38 = vsel %vm2910_vm6, %v2915_v28, 0.0  ;;  %vm2945_vm9 = vcmp.gt.s32.totalorder %v271_v25, 0  ;;  %v2950_v45 = vld [vmem:[%s2802_s10 + $0x20] sm:$0xff]  ;;  %vm2957_vm10 = vcmp.lt.s32.totalorder %v271_v25, 7 }
  0x3e   : > { %2320 = vmatmul.mubr.msk.f32.vlgmr.msra.gmra.mrb[0].mxu0 %vm408_vm0, %v2809_v37  ;;  %2462 = vmatpush3.bf16.msra.mxu1 %v2459_v30  ;;  %v1343_v30 = vld [vmem:[#allocation2 + $0x198] sm:$0xff]  ;;  %v704_v47 = vld [vmem:[#allocation2 + $0xa0] sm:$0xff]  ;;  %v378_v51 = vsel %vm2921_vm7, %v2926_v33, 0.0  ;;  %v1345_v55 = vld [vmem:[#allocation2 + $0x1a8] sm:$0xff]  ;;  %v1172_v56 = vsel %vm2934_vm8, %v2939_v42, 0.0  ;;  %v1173_v3 = vsel %vm2957_vm10, %v2962_v53, 0.0 }
  0x3f   : > { %2526 = vmatpush3.bf16.msra.mxu0 %v2523_v32  ;;  %2210 = vmatprep.mubr.msk.f32.mxu1 %vm408_vm0, %v2809_v37  ;;  %v2543_v43 = vpack.c.bf16 %v1343_v30, %v1342_v29  ;;  %v1344_v54 = vld [vmem:[#allocation2 + $0x1a0] sm:$0xff]  ;;  %v2973_v59 = vld [vmem:[%s2802_s10 + $0x28] sm:$0xff]  ;;  %v2984_v2 = vld [vmem:[%s2802_s10 + $0x32] sm:$0xff]  ;;  %v855_v63 = vsel %vm2898_vm5, %v2926_v33, 0.0  ;;  %v856_v10 = vsel %vm2921_vm7, %v2950_v45, 0.0  ;;  %v1648_v5 = vsel %vm2883_vm4, %v2915_v28, 0.0 }
  0x40   : > { %2322 = vmatprep.mubr.msk.f32.mxu0 %vm408_vm0, %v2815_v40  ;;  %2464 = vmatprep.subr.bf16.mxu1 %v2463_v39  ;;  %v2547_v4 = vpack.c.bf16 %v1345_v55, %v1344_v54  ;;  %v2995_v8 = vld [vmem:[%s2802_s10 + $0x30] sm:$0xff]  ;;  %v707_v13 = vld [vmem:[#allocation2 + $0xb8] sm:$0xff]  ;;  %v1331_v55 = vsel %vm2849_vm1, %v2903_v22, 0.0  ;;  %v1649_v52 = vsel %vm2910_vm6, %v2939_v42, 0.0 }
  0x41   : > { %2211 = vmatmul.mubr.msk.f32.gmra.mrb[2].mxu1 %vm408_vm0, %v2815_v40  ;;  %2528 = vmatprep.subr.bf16.mxu0 %v2527_v41  ;;  %v706_v12 = vld [vmem:[#allocation2 + $0xb0] sm:$0xff]  ;;  %v3017_v25 = vld [vmem:[%s2802_s10 + $0x38] sm:$0xff] }
  0x42   : > { %2323 = vmatmul.mubr.msk.f32.gmra.mrb[2].mxu0 %vm408_vm0, %v2822_v46  ;;  %2466 = vmatpush3.bf16.msra.mxu1 %v2463_v39  ;;  %v2479_v39 = vpack.c.bf16 %v703_v24, %v702_v23  ;;  %v1174_v23 = vsel %vm2979_vm12, %v2984_v2, 0.0  ;;  %v2487_v29 = vpack.c.bf16 %v707_v13, %v706_v12  ;;  %v1332_v12 = vsel %vm2869_vm3, %v2926_v33, 0.0 }
  0x43   : > { %2530 = vmatpush3.bf16.msra.mxu0 %v2527_v41  ;;  %2213 = vmatprep.mubr.msk.f32.mxu1 %vm408_vm0, %v2822_v46  ;;  %v3236_v41 = vmov 0  ;;  %v693_v13 = vsel %vm2910_vm6, %v2888_v17, 0.0  ;;  %v1646_v17 = vld [vmem:[%s2802_s10 + $0x4a] sm:$0xff] }
  0x44   : > { %2325 = vmatprep.mubr.msk.f32.mxu0 %vm408_vm0, %v2830_v49  ;;  %2468 = vmatprep.subr.bf16.mxu1 %v2467_v48  ;;  %v3237_v41 = vsel %vm2934_vm8, 4294967295, %v3236_v41 }
  0x45   : > { %2214 = vmatmul.mubr.msk.f32.gmra.mrb[4].mxu1 %vm408_vm0, %v2830_v49  ;;  %2532 = vmatprep.subr.bf16.mxu0 %v2531_v50 }
  0x46   : > { %2326 = vmatmul.mubr.msk.f32.gmra.mrb[4].mxu0 %vm408_vm0, %v2839_v57  ;;  %2470 = vmatpush3.bf16.msra.mxu1 %v2467_v48  ;;  %v705_v48 = vld [vmem:[#allocation2 + $0xa8] sm:$0xff] }
  0x47   : > { %2534 = vmatpush3.bf16.msra.mxu0 %v2531_v50  ;;  %2216 = vmatprep.mubr.msk.f32.mxu1 %vm408_vm0, %v2839_v57  ;;  %v285_v50 = vand.u32 7, %v2891_v18  ;;  %v2483_v0 = vpack.c.bf16 %v705_v48, %v704_v47  ;;  %v1494_v47 = vld [vmem:[#allocation2 + $0x1c0] sm:$0xff]  ;;  %v1495_v48 = vld [vmem:[#allocation2 + $0x1c8] sm:$0xff] }
  0x48   : > { %2328 = vmatprep.mubr.msk.f32.mxu0 %vm408_vm0, %v2845_v60  ;;  %2472 = vmatprep.subr.bf16.mxu1 %v2471_v61 }
  0x49   : > { %2217 = vmatmul.mubr.msk.f32.gmra.mrb[6].mxu1 %vm408_vm0, %v2845_v60  ;;  %2536 = vmatprep.subr.bf16.mxu0 %v2535_v62  ;;  %vm2990_vm13 = vcmp.gt.s32.totalorder %v285_v50, 0  ;;  %vm3004_vm14 = vcmp.lt.s32.totalorder %v285_v50, 7 }
  0x4a   : > { %2329 = vmatmul.mubr.msk.f32.gmra.mrb[6].mxu0 %vm408_vm0, %v2867_v9  ;;  %2474 = vmatpush3.bf16.msra.mxu1 %v2471_v61  ;;  %v292_v61 = vand.u32 7, %v238_v35  ;;  %v859_v32 = vsel %vm2990_vm13, %v3017_v25, 0.0 }
  0x4b   : > { %2538 = vmatpush3.bf16.msra.mxu0 %v2535_v62  ;;  %2235 = vmatprep.mubr.msk.f32.mxu1 %vm408_vm0, %v375_v14  ;;  %v379_v62 = vsel %vm2945_vm9, %v2950_v45, 0.0  ;;  %v380_v14 = vsel %vm2968_vm11, %v2973_v59, 0.0 }
  0x4c   : > { %2347 = vmatprep.mubr.msk.f32.mxu0 %vm408_vm0, %v1169_v19  ;;  %2476 = vmatprep.subr.bf16.mxu1 %v2475_v15  ;;  %v1346_v19 = vld [vmem:[#allocation2 + $0x1b0] sm:$0xff]  ;;  %vm3012_vm15 = vcmp.gt.s32.totalorder %v292_v61, 0  ;;  %vm3023_vm11 = vcmp.lt.s32.totalorder %v292_v61, 7 }
  0x4d   : > { %2236 = vmatmul.mubr.msk.f32.vlgmr.msra.gmra.mrb[0].mxu1 %vm408_vm0, %v376_v26  ;;  %2540 = vmatprep.subr.bf16.mxu0 %v2539_v20  ;;  %v381_v26 = vsel %vm2990_vm13, %v2995_v8, 0.0  ;;  %v864_v61 = vld [vmem:[#allocation2 + $0xd0] sm:$0xff]  ;;  %v1654_v16 = vsel %vm3023_vm11, %v1646_v17, 0.0 }
  0x4e   : > { %2348 = vmatmul.mubr.msk.f32.vlgmr.msra.gmra.mrb[0].mxu0 %vm408_vm0, %v1170_v31  ;;  %2478 = vmatpush3.bf16.msra.mxu1 %v2475_v15  ;;  %v3002_v15 = vld [vmem:[%s2802_s10 + $0x3a] sm:$0xff]  ;;  %v3028_v31 = vld [vmem:[%s2802_s10 + $0x42] sm:$0xff] }
  0x4f   : > { %2542 = vmatpush3.bf16.msra.mxu0 %v2539_v20  ;;  %2238 = vmatprep.mubr.msk.f32.mxu1 %vm408_vm0, %v377_v36  ;;  %v1347_v20 = vld [vmem:[#allocation2 + $0x1b8] sm:$0xff]  ;;  %v1175_v34 = vsel %vm3004_vm14, %v3002_v15, 0.0  ;;  %v667_v36 = vld [vmem:[%s2802_s10 + $0x2] sm:$0xff]  ;;  %v1176_v50 = vsel %vm3023_vm11, %v3028_v31, 0.0 }
  0x50   : > { %2350 = vmatprep.mubr.msk.f32.mxu0 %vm408_vm0, %v1171_v38  ;;  %2480 = vmatprep.subr.bf16.mxu1 %v2479_v39  ;;  %v2551_v35 = vpack.c.bf16 %v1347_v20, %v1346_v19  ;;  %v863_v38 = vld [vmem:[#allocation2 + $0xc8] sm:$0xff]  ;;  %v866_v20 = vld [vmem:[#allocation2 + $0xe0] sm:$0xff] }
  0x51   : > { %2239 = vmatmul.mubr.msk.f32.gmra.mrb[2].mxu1 %vm408_vm0, %v378_v51  ;;  %2544 = vmatprep.subr.bf16.mxu0 %v2543_v43  ;;  %v691_v51 = vsel %vm2857_vm2, %v667_v36, 0.0  ;;  %v695_v36 = vsel %vm2957_vm10, %v2939_v42, 0.0 }
  0x52   : > { %2351 = vmatmul.mubr.msk.f32.gmra.mrb[2].mxu0 %vm408_vm0, %v1172_v56  ;;  %2482 = vmatpush3.bf16.msra.mxu1 %v2479_v39  ;;  %v862_v39 = vld [vmem:[#allocation2 + $0xc0] sm:$0xff]  ;;  %v2555_v56 = vpack.c.bf16 %v1495_v48, %v1494_v47  ;;  %v868_v47 = vld [vmem:[#allocation2 + $0xf0] sm:$0xff]  ;;  %v869_v48 = vld [vmem:[#allocation2 + $0xf8] sm:$0xff] }
  0x53   : > { %2546 = vmatpush3.bf16.msra.mxu0 %v2543_v43  ;;  %2241 = vmatprep.mubr.msk.f32.mxu1 %vm408_vm0, %v379_v62  ;;  %v382_v43 = vsel %vm3012_vm15, %v3017_v25, 0.0  ;;  %v2491_v54 = vpack.c.bf16 %v863_v38, %v862_v39  ;;  %v865_v62 = vld [vmem:[#allocation2 + $0xd8] sm:$0xff]  ;;  %v1335_v38 = vsel %vm2945_vm9, %v2995_v8, 0.0 }
  0x54   : > { %2353 = vmatprep.mubr.msk.f32.mxu0 %vm408_vm0, %v1173_v3  ;;  %2484 = vmatprep.subr.bf16.mxu1 %v2483_v0  ;;  %v1496_v3 = vld [vmem:[#allocation2 + $0x1d0] sm:$0xff] }
  0x55   : > { %2242 = vmatmul.mubr.msk.f32.gmra.mrb[4].mxu1 %vm408_vm0, %v380_v14  ;;  %2548 = vmatprep.subr.bf16.mxu0 %v2547_v4  ;;  %v2495_v14 = vpack.c.bf16 %v865_v62, %v864_v61  ;;  %v697_v61 = vsel %vm3004_vm14, %v2984_v2, 0.0  ;;  %v2503_v62 = vpack.c.bf16 %v869_v48, %v868_v47 }
  0x56   : > { %2354 = vmatmul.mubr.msk.f32.gmra.mrb[4].mxu0 %vm408_vm0, %v1174_v23  ;;  %2486 = vmatpush3.bf16.msra.mxu1 %v2483_v0  ;;  %v692_v0 = vsel %vm2883_vm4, %v2862_v6, 0.0  ;;  %v1333_v6 = vsel %vm2898_vm5, %v2950_v45, 0.0  ;;  %v867_v23 = vld [vmem:[#allocation2 + $0xe8] sm:$0xff]  ;;  %v1652_v45 = vsel %vm2979_vm12, %v3002_v15, 0.0 }
  0x57   : > { %2550 = vmatpush3.bf16.msra.mxu0 %v2547_v4  ;;  %2244 = vmatprep.mubr.msk.f32.mxu1 %vm408_vm0, %v381_v26  ;;  %v1497_v4 = vld [vmem:[#allocation2 + $0x1d8] sm:$0xff]  ;;  %v694_v26 = vsel %vm2934_vm8, %v2915_v28, 0.0  ;;  %v2499_v39 = vpack.c.bf16 %v867_v23, %v866_v20  ;;  %vm3254_vm8 = vnez %v3243_v58  ;;  %v1658_v23 = vld [vmem:[#allocation2 + $0x210] sm:$0xff] }
  0x58   : > { %2356 = vmatprep.mubr.msk.f32.mxu0 %vm408_vm0, %v1175_v34  ;;  %2488 = vmatprep.subr.bf16.mxu1 %v2487_v29  ;;  %v2559_v19 = vpack.c.bf16 %v1497_v4, %v1496_v3  ;;  %v1499_v34 = vld [vmem:[#allocation2 + $0x1e8] sm:$0xff] }
  0x59   : > { %2245 = vmatmul.mubr.msk.f32.gmra.mrb[6].mxu1 %vm408_vm0, %v382_v43  ;;  %2552 = vmatprep.subr.bf16.mxu0 %v2551_v35 }
  0x5a   : > { %2357 = vmatmul.mubr.msk.f32.gmra.mrb[6].mxu0 %vm408_vm0, %v1176_v50  ;;  %2490 = vmatpush3.bf16.msra.mxu1 %v2487_v29  ;;  %v1498_v29 = vld [vmem:[#allocation2 + $0x1e0] sm:$0xff]  ;;  %v696_v50 = vsel %vm2979_vm12, %v2962_v53, 0.0 }
  0x5b   : > { %2554 = vmatpush3.bf16.msra.mxu0 %v2551_v35  ;;  %2263 = vmatprep.mubr.msk.f32.mxu1 %vm408_vm0, %v691_v51  ;;  %v1334_v35 = vsel %vm2921_vm7, %v2973_v59, 0.0  ;;  %v2563_v43 = vpack.c.bf16 %v1499_v34, %v1498_v29  ;;  %v3087_v51 = vld [vmem:[%s2802_s10 + $0x40] sm:$0xff]  ;;  %v854_v29 = vsel %vm2869_vm3, %v2903_v22, 0.0  ;;  %v1663_v22 = vld [vmem:[#allocation2 + $0x238] sm:$0xff] }
  0x5c   : > { %2375 = vmatprep.mubr.msk.f32.mxu0 %vm408_vm0, %v1331_v55  ;;  %2492 = vmatprep.subr.bf16.mxu1 %v2491_v54  ;;  %v1501_v55 = vld [vmem:[#allocation2 + $0x1f8] sm:$0xff]  ;;  %v1337_v3 = vsel %vm2990_vm13, %v3087_v51, 0.0  ;;  %v1660_v34 = vld [vmem:[#allocation2 + $0x220] sm:$0xff] }
  0x5d   : > { %2264 = vmatmul.mubr.msk.f32.vlgmr.msra.gmra.mrb[0].mxu1 %vm408_vm0, %v692_v0  ;;  %2556 = vmatprep.subr.bf16.mxu0 %v2555_v56  ;;  %v1330_v0 = vld [vmem:[%s2802_s10 + $0x48] sm:$0xff] }
  0x5e   : > { %2376 = vmatmul.mubr.msk.f32.vlgmr.msra.gmra.mrb[0].mxu0 %vm408_vm0, %v1332_v12  ;;  %2494 = vmatpush3.bf16.msra.mxu1 %v2491_v54  ;;  %v1500_v54 = vld [vmem:[#allocation2 + $0x1f0] sm:$0xff]  ;;  %v1656_v12 = vld [vmem:[#allocation2 + $0x200] sm:$0xff] }
  0x5f   : > { %2558 = vmatpush3.bf16.msra.mxu0 %v2555_v56  ;;  %2266 = vmatprep.mubr.msk.f32.mxu1 %vm408_vm0, %v693_v13  ;;  %v1336_v56 = vsel %vm3254_vm8, %v3017_v25, 0.0  ;;  %v2567_v4 = vpack.c.bf16 %v1501_v55, %v1500_v54  ;;  %v1657_v13 = vld [vmem:[#allocation2 + $0x208] sm:$0xff] }
  0x60   : > { %2378 = vmatprep.mubr.msk.f32.mxu0 %vm408_vm0, %v1333_v6  ;;  %2496 = vmatprep.subr.bf16.mxu1 %v2495_v14  ;;  %v1338_v6 = vsel %vm3012_vm15, %v1330_v0, 0.0  ;;  %v2571_v20 = vpack.c.bf16 %v1657_v13, %v1656_v12 }
  0x61   : > { %2267 = vmatmul.mubr.msk.f32.gmra.mrb[2].mxu1 %vm408_vm0, %v694_v26  ;;  %2560 = vmatprep.subr.bf16.mxu0 %v2559_v19  ;;  %v1659_v26 = vld [vmem:[#allocation2 + $0x218] sm:$0xff] }
  0x62   : > { %2379 = vmatmul.mubr.msk.f32.gmra.mrb[2].mxu0 %vm408_vm0, %v1334_v35  ;;  %2498 = vmatpush3.bf16.msra.mxu1 %v2495_v14  ;;  %v698_v14 = vsel %vm3023_vm11, %v3002_v15, 0.0  ;;  %v1661_v35 = vld [vmem:[#allocation2 + $0x228] sm:$0xff] }
  0x63   : > { %2562 = vmatpush3.bf16.msra.mxu0 %v2559_v19  ;;  %2269 = vmatprep.mubr.msk.f32.mxu1 %vm408_vm0, %v695_v36  ;;  %v853_v19 = vsel %vm2849_vm1, %v2874_v11, 0.0  ;;  %v2575_v11 = vpack.c.bf16 %v1659_v26, %v1658_v23  ;;  %v2579_v21 = vpack.c.bf16 %v1661_v35, %v1660_v34  ;;  %vm3255_vm1 = vnez %v3237_v41 }
  0x64   : > { %2381 = vmatprep.mubr.msk.f32.mxu0 %vm408_vm0, %v1335_v38  ;;  %2500 = vmatprep.subr.bf16.mxu1 %v2499_v39  ;;  %v1650_v28 = vsel %vm3255_vm1, %v2962_v53, 0.0 }
  0x65   : > { %2270 = vmatmul.mubr.msk.f32.gmra.mrb[4].mxu1 %vm408_vm0, %v696_v50  ;;  %2564 = vmatprep.subr.bf16.mxu0 %v2563_v43 }
  0x66   : > { %2382 = vmatmul.mubr.msk.f32.gmra.mrb[4].mxu0 %vm408_vm0, %v1336_v56  ;;  %2502 = vmatpush3.bf16.msra.mxu1 %v2499_v39 }
  0x67   : > { %2566 = vmatpush3.bf16.msra.mxu0 %v2563_v43  ;;  %2272 = vmatprep.mubr.msk.f32.mxu1 %vm408_vm0, %v697_v61 }
  0x68   : > { %2384 = vmatprep.mubr.msk.f32.mxu0 %vm408_vm0, %v1337_v3  ;;  %2504 = vmatprep.subr.bf16.mxu1 %v2503_v62 }
  0x69   : > { %2273 = vmatmul.mubr.msk.f32.gmra.mrb[6].mxu1 %vm408_vm0, %v698_v14  ;;  %2568 = vmatprep.subr.bf16.mxu0 %v2567_v4 }
  0x6a   : > { %2385 = vmatmul.mubr.msk.f32.gmra.mrb[6].mxu0 %vm408_vm0, %v1338_v6  ;;  %2506 = vmatpush3.bf16.msra.mxu1 %v2503_v62 }
  0x6b   : > { %2570 = vmatpush3.bf16.msra.mxu0 %v2567_v4  ;;  %2291 = vmatprep.mubr.msk.f32.mxu1 %vm408_vm0, %v853_v19 }
  0x6c   : > { %2403 = vmatprep.mubr.msk.f32.mxu0 %vm408_vm0, %v2809_v37  ;;  %2572 = vmatprep.subr.bf16.mxu0 %v2571_v20  ;;  %v857_v37 = vsel %vm2945_vm9, %v2973_v59, 0.0 }
  0x6d   : > { %2292 = vmatmul.mubr.msk.f32.vlgmr.msra.gmra.mrb[0].mxu1 %vm408_vm0, %v854_v29  ;;  %2587 = vmatprep.subr.bf16.mxu1 %v2571_v20 }
  0x6e   : > { %2404 = vmatmul.mubr.msk.f32.vlgmr.msra.gmra.mrb[0].mxu0 %vm408_vm0, %v2815_v40  ;;  %2591 = vmatpush3.bf16.msra.mxu1 %v2571_v20  ;;  %v1662_v40 = vld [vmem:[#allocation2 + $0x230] sm:$0xff] }
  0x6f   : > { %2574 = vmatpush3.bf16.msra.mxu0 %v2571_v20  ;;  %2294 = vmatprep.mubr.msk.f32.mxu1 %vm408_vm0, %v855_v63  ;;  %v2583_v33 = vpack.c.bf16 %v1663_v22, %v1662_v40 }
  0x70   : > { %2406 = vmatprep.mubr.msk.f32.mxu0 %vm408_vm0, %v2822_v46  ;;  %2576 = vmatprep.subr.bf16.mxu0 %v2575_v11  ;;  %v858_v46 = vsel %vm3254_vm8, %v2995_v8, 0.0 }
  0x71   : > { %2295 = vmatmul.mubr.msk.f32.gmra.mrb[2].mxu1 %vm408_vm0, %v856_v10  ;;  %2588 = vmatprep.subr.bf16.mxu1 %v2575_v11 }
  0x72   : > { %2407 = vmatmul.mubr.msk.f32.gmra.mrb[2].mxu0 %vm408_vm0, %v2830_v49  ;;  %2592 = vmatpush3.bf16.msra.mxu1 %v2575_v11  ;;  %v860_v49 = vsel %vm3012_vm15, %v3087_v51, 0.0 }
  0x73   : > { %2578 = vmatpush3.bf16.msra.mxu0 %v2575_v11  ;;  %2297 = vmatprep.mubr.msk.f32.mxu1 %vm408_vm0, %v857_v37 }
  0x74   : > { %2409 = vmatprep.mubr.msk.f32.mxu0 %vm408_vm0, %v2839_v57  ;;  %2580 = vmatprep.subr.bf16.mxu0 %v2579_v21  ;;  %v1492_v57 = vld [vmem:[%s2802_s10 + $0x49] sm:$0xff] }
  0x75   : > { %2298 = vmatmul.mubr.msk.f32.gmra.mrb[4].mxu1 %vm408_vm0, %v858_v46  ;;  %2589 = vmatprep.subr.bf16.mxu1 %v2579_v21 }
  0x76   : > { %2410 = vmatmul.mubr.msk.f32.gmra.mrb[4].mxu0 %vm408_vm0, %v2845_v60  ;;  %2593 = vmatpush3.bf16.msra.mxu1 %v2579_v21  ;;  %v1651_v60 = vsel %vm2957_vm10, %v2984_v2, 0.0 }
  0x77   : > { %2582 = vmatpush3.bf16.msra.mxu0 %v2579_v21  ;;  %2300 = vmatprep.mubr.msk.f32.mxu1 %vm408_vm0, %v859_v32 }
  0x78   : > { %2412 = vmatprep.mubr.msk.f32.mxu0 %vm408_vm0, %v2867_v9  ;;  %2584 = vmatprep.subr.bf16.mxu0 %v2583_v33  ;;  %v1653_v9 = vsel %vm3004_vm14, %v3028_v31, 0.0 }
  0x79   : > { %2301 = vmatmul.mubr.msk.f32.gmra.mrb[6].mxu1 %vm408_vm0, %v860_v49  ;;  %2590 = vmatprep.subr.bf16.mxu1 %v2583_v33 }
  0x7a   : > { %2413 = vmatmul.mubr.msk.f32.gmra.mrb[6].mxu0 %vm408_vm0, %v1492_v57  ;;  %2594 = vmatpush3.bf16.msra.mxu1 %v2583_v33 }
  0x7b   : > { %2586 = vmatpush3.bf16.msra.mxu0 %v2583_v33  ;;  %2431 = vmatprep.mubr.msk.f32.mxu0 %vm408_vm0, %v1647_v44 }
  0x7c   : > { %2437 = vmatprep.mubr.msk.f32.mxu1 %vm408_vm0, %v1651_v60 }
  0x7d   : > { %2438 = vmatmul.mubr.msk.f32.vlgmr.msra.gmra.mrb[8].mxu1 %vm408_vm0, %v1652_v45 }
  0x7e   : > { %2432 = vmatmul.mubr.msk.f32.vlgmr.msra.gmra.mrb[0].mxu0 %vm408_vm0, %v1648_v5  ;;  %2440 = vmatprep.mubr.msk.f32.mxu1 %vm408_vm0, %v1653_v9 }
  0x7f   : > { %2434 = vmatprep.mubr.msk.f32.mxu0 %vm408_vm0, %v1649_v52 }
  0x81   : > { %2441 = vmatmul.mubr.msk.f32.gmra.mrb[10].mxu1 %vm408_vm0, %v1654_v16 }
  0x82   : > { %2435 = vmatmul.mubr.msk.f32.gmra.mrb[2].mxu0 %vm408_vm0, %v1650_v28 }
 0x140   : > { %v2293_v27 = vpop.f32.mrb[0].mxu1 }
 0x141   : > { %v960_v42 = vpop.f32.mrb[1].mxu1 }
 0x144   : > { %v2296_v58 = vpop.f32.mrb[2].mxu1 }
 0x145   : > { %v970_v59 = vpop.f32.mrb[3].mxu1 }
 0x148   : > { %v2299_v1 = vpop.f32.mrb[4].mxu1 }
 0x149   : > { %v2411_v2 = vpop.f32.mrb[4].mxu0  ;;  %v980_v7 = vpop.f32.mrb[5].mxu1 }
 0x14a   : > { %v2599_v8 = vadd.f32 %v2411_v2, %v2299_v1  ;;  %v1612_v15 = vpop.f32.mrb[5].mxu0 }
 0x14b   : > { %v2601_v18 = vadd.f32 %v1612_v15, %v980_v7 }
 0x14c   : > { %v2302_v24 = vpop.f32.mrb[6].mxu1 }
 0x14d   : > { %v2414_v25 = vpop.f32.mrb[6].mxu0  ;;  %v990_v30 = vpop.f32.mrb[7].mxu1 }
 0x14e   : > { %v2603_v41 = vadd.f32 %v2414_v25, %v2302_v24  ;;  %v1622_v53 = vpop.f32.mrb[7].mxu0 }
 0x14f   : > { %v2605_v31 = vadd.f32 %v1622_v53, %v990_v30 }
 0x150   : > { %v2439_v36 = vpop.f32.mrb[8].mxu1 }
 0x151   : > { %v2433_v39 = vpop.f32.mrb[0].mxu0  ;;  %v2600_v38 = vadd.f32 %v2599_v8, %v2439_v36  ;;  %v1774_v43 = vpop.f32.mrb[9].mxu1 }
 0x152   : > { %v2595_v47 = vadd.f32 %v2433_v39, %v2293_v27  ;;  %v1754_v48 = vpop.f32.mrb[1].mxu0  ;;  %v2602_v50 = vadd.f32 %v2601_v18, %v1774_v43 }
 0x153   : > { %1806 = vst [vmem:[%s223_s14 + $0x28] sm:$0xff] %v2600_v38  ;;  %v2596_v51 = vadd.f32 %v1754_v48, %v960_v42  ;;  %v1828_v35 = vmul.f32 %v2600_v38, %v2600_v38 }
 0x154   : > { %1802 = vst [vmem:[%s223_s14 + $0x8] sm:$0xff] %v2595_v47  ;;  %v1824_v54 = vmul.f32 %v2595_v47, %v2595_v47  ;;  %1805 = vst [vmem:[%s223_s14 + $0x20] sm:$0xff] %v2602_v50  ;;  %v2442_v55 = vpop.f32.mrb[10].mxu1  ;;  %v1827_v63 = vmul.f32 %v2602_v50, %v2602_v50 }
 0x155   : > { %1801 = vst [vmem:[%s223_s14] sm:$0xff] %v2596_v51  ;;  %v1809_v56 = vadd.f32 %v2596_v51, %v2595_v47  ;;  %v1823_v61 = vmul.f32 %v2596_v51, %v2596_v51  ;;  %v2436_v62 = vpop.f32.mrb[2].mxu0  ;;  %v2604_v0 = vadd.f32 %v2603_v41, %v2442_v55  ;;  %v1784_v3 = vpop.f32.mrb[11].mxu1 }
 0x156   : > { %v2597_v4 = vadd.f32 %v2436_v62, %v2296_v58  ;;  %v1764_v12 = vpop.f32.mrb[3].mxu0  ;;  %v2606_v13 = vadd.f32 %v2605_v31, %v1784_v3 }
 0x157   : > { %v1831_v14 = vadd.f32 %v1824_v54, %v1823_v61  ;;  %1808 = vst [vmem:[%s223_s14 + $0x38] sm:$0xff] %v2604_v0  ;;  %v2598_v6 = vadd.f32 %v1764_v12, %v970_v59  ;;  %v1830_v46 = vmul.f32 %v2604_v0, %v2604_v0 }
 0x158   : > { %1804 = vst [vmem:[%s223_s14 + $0x18] sm:$0xff] %v2597_v4  ;;  %1807 = vst [vmem:[%s223_s14 + $0x30] sm:$0xff] %v2606_v13  ;;  %v1826_v23 = vmul.f32 %v2597_v4, %v2597_v4  ;;  %v1829_v40 = vmul.f32 %v2606_v13, %v2606_v13 }
 0x159   : > { %1803 = vst [vmem:[%s223_s14 + $0x10] sm:$0xff] %v2598_v6  ;;  %v1810_v19 = vadd.f32 %v2598_v6, %v1809_v56  ;;  %v1825_v20 = vmul.f32 %v2598_v6, %v2598_v6 }
 0x15b   : > { %v1811_v26 = vadd.f32 %v2597_v4, %v1810_v19  ;;  %v1832_v29 = vadd.f32 %v1831_v14, %v1825_v20 }
 0x15d   : > { %v1833_v11 = vadd.f32 %v1832_v29, %v1826_v23  ;;  %v1812_v34 = vadd.f32 %v2602_v50, %v1811_v26 }
 0x15f   : > { %v1813_v10 = vadd.f32 %v2600_v38, %v1812_v34  ;;  %v1834_v37 = vadd.f32 %v1833_v11, %v1827_v63 }
 0x161   : > { %v1814_v21 = vadd.f32 %v2606_v13, %v1813_v10  ;;  %v1835_v22 = vadd.f32 %v1834_v37, %v1828_v35 }
 0x163   : > { %v1815_v32 = vadd.f32 %v2604_v0, %v1814_v21  ;;  %v1836_v33 = vadd.f32 %v1835_v22, %v1829_v40 }
 0x165   : > { %v1816_v49 = vrot.slane %v1815_v32, 4  ;;  %v1837_v57 = vadd.f32 %v1836_v33, %v1830_v46 }
 0x167   : > { %v1817_v44 = vadd.f32 %v1816_v49, %v1815_v32  ;;  %v1838_v60 = vrot.slane %v1837_v57, 4 }
 0x169   : > { %v1818_v45 = vrot.slane %v1817_v44, 2  ;;  %v1839_v5 = vadd.f32 %v1838_v60, %v1837_v57 }
 0x16b   : > { %v1819_v9 = vadd.f32 %v1818_v45, %v1817_v44  ;;  %v1840_v17 = vrot.slane %v1839_v5, 2 }
 0x16d   : > { %v1820_v52 = vrot.slane %v1819_v9, 1  ;;  %v1841_v16 = vadd.f32 %v1840_v17, %v1839_v5 }
 0x16f   : > { %v1821_v28 = vadd.f32 %v1820_v52, %v1819_v9  ;;  %v1842_v27 = vrot.slane %v1841_v16, 1 }
 0x171   : > { %1822 = vst [vmem:[%s226_s19] sm:$0x1] %v1821_v28  ;;  %v1843_v42 = vadd.f32 %v1842_v27, %v1841_v16 }
 0x173   : > { %1844 = vst [vmem:[%s229_s22] sm:$0x1] %v1843_v42 }
 0x174 PF: > { %s16_s15 = sadd.s32 1, %s2719_s15  }
 0x175   : > { %p13_p3 = scmp.ge.s32.totalorder %s16_s15, 4  }
 0x177   :  { %15 = sbr.rel (!%p13_p3) target bundleno = 1 (0x1), region = 95 }
 0x17e   :  { %1890 = vsyncpa [#allocation3], 1 }
 0x17f   :  { %1892 = vsyncpa [#allocation3 + $0x1], 1 }

// kernel: encoder_forward.8
= control target key start
LH: loop header
LB: loop body
LE: loop exit
PB: predicated region body
PF: predicated region fallthrough
CT: control target
= control target key end

     0   :  { %10 = vsyncpa [#allocation3], 0  ;;  %s6461_s15 = smov 0   ;;  %s7899_s0 = inlined_call_operand.vmem [shape: f32[2,290,48], index: 0, kind: input, shape index: {}]   ;;  %s7900_s1 = inlined_call_operand.hbm [shape: f32[9,48,64], index: 1, kind: input, shape index: {}]   ;;  %s7901_s2 = inlined_call_operand.vmem [shape: f32[2,256,64], index: 2, kind: output, shape index: {0}]   ;;  %s7902_s3 = inlined_call_operand.vmem [shape: f32[2,1,64], index: 3, kind: output, shape index: {1}]   ;;  %s7903_s4 = inlined_call_operand.vmem [shape: f32[2,1,64], index: 4, kind: output, shape index: {2}]  }
   0x1 LB: > { %s6467_s16 = sadd.s32 4294967295, %s6431_s15   ;;  %p4820_p0 = scmp.ge.s32.totalorder %s6431_s15, 1  ;;  %s6431_s15 = sphi %s6461_s15, %s16_s15  }
   0x2   : > { %p146_p1 = scmp.lt.s32.totalorder %s6431_s15, 3  ;;  %s6433_s17 = smov [#allocation2]  }
   0x3   : > { %s158_s18 = sshll.u32 %s6433_s17, 4  ;;  %p7904_p3 = scmp.eq.s32.totalorder %s6467_s16, 0  ;;  %s159_s18 = int_to_ptr.vmem [resolvable:$true] %s158_s18 }
   0x4   : > { %p6471_p2 = pnand %p4820_p0, %p146_p1  ;;  %s6393_s23 = scalar_lea.hbm %s7900_s1, 6912 }
   0x5   : > { %p6394_p6 = scmp.ne.s32.totalorder %s7900_s1, %s6393_s23  ;;  %p6400_p10 = scmp.lt.u32.totalorder %s6393_s23, %s7900_s1 }
   0x6   : > { %s8000_s19 = scalar_select %p6471_p2, 1, 0 }
   0x7   : > { %p6376_p4 = pneg %p6471_p2 }
   0x9   : > { %p6480_p5 = pnand %p7904_p3, %p6376_p4 }
   0xb   : > { %p6395_p7 = pneg %p6480_p5 }
   0xd   : > { %p6396_p8 = pnand %p6395_p7, %p6394_p6 }
   0xf   : > { %p6397_p9 = pneg %p6396_p8 }
  0x11   : > { %p6402_p11 = pnand %p6400_p10, %p6397_p9 }
  0x13   : > { %6405 = shalt.err (!%p6402_p11)
}
  0x14   : > { %s6406_s28 = scalar_lea.vmem %s159_s18, 6912  ;;  %p6414_p1 = scmp.lt.s32.totalorder %s159_s18, %s159_s18 }
  0x15   : > { %p6407_p12 = scmp.ne.s32.totalorder %s159_s18, %s6406_s28  ;;  %p6415_p4 = scmp.lt.s32.totalorder %s6406_s28, %s6406_s28 }
  0x17   : > { %p6409_p13 = pnand %p6407_p12, %p6395_p7  ;;  %p6416_p3 = por %p6415_p4, %p6414_p1 }
  0x19   : > { %p6410_p0 = pneg %p6409_p13 }
  0x1b   : > { %p6417_p2 = pnand %p6416_p3, %p6410_p0 }
  0x1d   : > { %6420 = shalt.err (!%p6417_p2)
}
  0x1e   : > { %s6434_s29 = smov 128   ;;  %s6435_s30 = smov 8  }
  0x1f   : > { %6379 = dma.hbm_to_vmem [thread:$0]  (!%p6480_p5), %s7900_s1, 6912, %s159_s18, [#allocation3], %s6434_s29, %s6434_s29, %s6435_s30  }
  0x20   : > { %p8002_p6 = scmp.ne.s32.totalorder %s8000_s19, 0 }
  0x22   : > { %182 = sbr.rel (%p8002_p6) target bundleno = 579 (0x243), region = 28 }
  0x29   : > { %p8003_p8 = scmp.eq.s32.totalorder %s6467_s16, 0 }
  0x2b   : > { %6426 = dma.done.wait (%p8003_p8), [#allocation3], 6912   ;;  %p8004_p7 = pmov %p8003_p8 }
  0x2c   : > { %p214_p2 = scmp.lt.s32.totalorder %s6467_s16, 1  ;;  %v878_v0 = vld [vmem:[#allocation2 + $0x30] sm:$0xff]  ;;  %v879_v1 = vld [vmem:[#allocation2 + $0x38] sm:$0xff]  ;;  %v2472_v2 = vld [vmem:[#allocation2 + $0xc0] sm:$0xff]  ;;  %vm7908_vm0 = vcmask 392192   ;;  %v230_v50 = vlaneseq }
  0x2d   : > { %6428 = vsyncadd (%p8004_p7), [#allocation3], 4294960384  ;;  %v6001_v3 = vpack.c.bf16 %v879_v1, %v878_v0  ;;  %v2473_v4 = vld [vmem:[#allocation2 + $0xc8] sm:$0xff]  ;;  %v880_v5 = vld [vmem:[#allocation2 + $0x40] sm:$0xff] }
  0x2e   : > { %s8388_s16 = smov (!%p214_p2, %s6467_s16), 1  ;;  %v881_v6 = vld [vmem:[#allocation2 + $0x48] sm:$0xff]  ;;  %v6516_v7 = vpack.c.bf16 %v2473_v4, %v2472_v2  ;;  %v2474_v9 = vld [vmem:[#allocation2 + $0xd0] sm:$0xff]  ;;  %v2475_v10 = vld [vmem:[#allocation2 + $0xd8] sm:$0xff]  ;;  %v6565_v56 = vshrl.u32 %v230_v50, 7 }
  0x2f   : > { %s6371_s7 = smul.u32 296, %s8388_s16  ;;  %v6005_v8 = vpack.c.bf16 %v881_v6, %v880_v5  ;;  %v882_v11 = vld [vmem:[#allocation2 + $0x50] sm:$0xff]  ;;  %6002 = vmatprep.subr.bf16.mxu1 %v6001_v3  ;;  %v6518_v12 = vpack.c.bf16 %v2475_v10, %v2474_v9  ;;  %v883_v13 = vld [vmem:[#allocation2 + $0x58] sm:$0xff]  ;;  %v2476_v14 = vld [vmem:[#allocation2 + $0xe0] sm:$0xff]  ;;  %s5118_s11 = sshll.u32 %s8388_s16, 8 }
  0x30   : > { %v2477_v15 = vld [vmem:[#allocation2 + $0xe8] sm:$0xff]  ;;  %6050 = vmatprep.subr.bf16.mxu0 %v6516_v7  ;;  %6004 = vmatpush3.bf16.msra.mxu1 %v6001_v3  ;;  %v6009_v18 = vpack.c.bf16 %v883_v13, %v882_v11  ;;  %v839_v20 = vld [vmem:[#allocation2] sm:$0xff]  ;;  %v2896_v22 = vld [vmem:[#allocation2 + $0xf0] sm:$0xff]  ;;  %v232_v59 = vadd.s32 8, %v6565_v56  ;;  %v234_v63 = vadd.s32 24, %v6565_v56  ;;  %v236_v5 = vadd.s32 40, %v6565_v56  ;;  %s7750_s14 = scalar_lea.vmem %s7901_s2, %s5118_s11  ;;  %s226_s19 = scalar_lea.vmem %s7902_s3, %s8388_s16 }
  0x31   : > { %s6514_s10 = scalar_lea.vmem %s7899_s0, %s6371_s7  ;;  %8005 = vst [vmem:[#allocation5_spill] sm:$0xff] %v6518_v12  ;;  %6052 = vmatpush3.bf16.msra.mxu0 %v6516_v7  ;;  %6006 = vmatprep.subr.bf16.mxu1 %v6005_v8  ;;  %v6525_v19 = vpack.c.bf16 %v2477_v15, %v2476_v14  ;;  %v840_v21 = vld [vmem:[#allocation2 + $0x8] sm:$0xff]  ;;  %v2897_v23 = vld [vmem:[#allocation2 + $0xf8] sm:$0xff]  ;;  %v2898_v26 = vld [vmem:[#allocation2 + $0x100] sm:$0xff]  ;;  %v8009_v13 = vmov 0  ;;  %s229_s22 = scalar_lea.vmem %s7903_s4, %s8388_s16 }
  0x32   : > { %v845_v16 = vld [vmem:[%s6514_s10 + $0x1] sm:$0xff]  ;;  %v2439_v17 = vld [vmem:[%s6514_s10 + $0x11] sm:$0xff]  ;;  %6054 = vmatprep.subr.bf16.mxu0 %v6518_v12  ;;  %v6013_v24 = vpack.c.bf16 %v840_v21, %v839_v20  ;;  %v6061_v25 = vpack.c.bf16 %v2897_v23, %v2896_v22  ;;  %v846_v28 = vld [vmem:[%s6514_s10 + $0x9] sm:$0xff]  ;;  %v274_v62 = vand.u32 15, %v232_v59  ;;  %v288_v4 = vand.u32 15, %v234_v63 }
  0x33   : > { %8006 = vst [vmem:[#allocation6_spill] sm:$0xff] %v6525_v19  ;;  %5473 = vmatprep.mubr.msk.f32.mxu1 %vm7908_vm0, %v845_v16  ;;  %5713 = vmatprep.mubr.msk.f32.mxu0 %vm7908_vm0, %v2439_v17  ;;  %v2899_v27 = vld [vmem:[#allocation2 + $0x108] sm:$0xff]  ;;  %v841_v29 = vld [vmem:[#allocation2 + $0x10] sm:$0xff]  ;;  %v842_v30 = vld [vmem:[#allocation2 + $0x18] sm:$0xff]  ;;  %v302_v15 = vand.u32 15, %v236_v5  ;;  %v238_v16 = vadd.s32 56, %v6565_v56 }
  0x34   : > { %6008 = vmatpush3.bf16.msra.mxu1 %v6005_v8  ;;  %v2440_v31 = vld [vmem:[%s6514_s10 + $0x19] sm:$0xff]  ;;  %v6065_v32 = vpack.c.bf16 %v2899_v27, %v2898_v26  ;;  %v2441_v33 = vld [vmem:[%s6514_s10 + $0x21] sm:$0xff]  ;;  %v6017_v34 = vpack.c.bf16 %v842_v30, %v841_v29  ;;  %v2900_v35 = vld [vmem:[#allocation2 + $0x110] sm:$0xff]  ;;  %vm6589_vm1 = vcmp.lt.s32.totalorder %v274_v62, 15  ;;  %vm6609_vm2 = vcmp.lt.s32.totalorder %v288_v4, 15 }
  0x35   : > { %6056 = vmatpush3.bf16.msra.mxu0 %v6518_v12  ;;  %6010 = vmatprep.subr.bf16.mxu1 %v6009_v18  ;;  %v2901_v36 = vld [vmem:[#allocation2 + $0x118] sm:$0xff]  ;;  %v2442_v37 = vld [vmem:[%s6514_s10 + $0x29] sm:$0xff]  ;;  %v843_v38 = vld [vmem:[#allocation2 + $0x20] sm:$0xff]  ;;  %v8010_v13 = vsel %vm6609_vm2, 4294967295, %v8009_v13  ;;  %vm6631_vm3 = vcmp.lt.s32.totalorder %v302_v15, 15  ;;  %v316_v27 = vand.u32 15, %v238_v16 }
  0x36   : > { %6058 = vmatprep.subr.bf16.mxu0 %v6525_v19  ;;  %v2443_v39 = vld [vmem:[%s6514_s10 + $0x31] sm:$0xff]  ;;  %v6069_v40 = vpack.c.bf16 %v2901_v36, %v2900_v35  ;;  %v844_v41 = vld [vmem:[#allocation2 + $0x28] sm:$0xff]  ;;  %v3320_v42 = vld [vmem:[#allocation2 + $0x120] sm:$0xff]  ;;  %v8013_v36 = vmov 0  ;;  %v8019_v63 = vmov 0  ;;  %v267_v5 = vand.u32 15, %v6565_v56 }
  0x37   : > { %v3321_v43 = vld [vmem:[#allocation2 + $0x128] sm:$0xff]  ;;  %v6021_v44 = vpack.c.bf16 %v844_v41, %v843_v38  ;;  %v2444_v45 = vld [vmem:[%s6514_s10 + $0x39] sm:$0xff]  ;;  %v2447_v49 = vld [vmem:[%s6514_s10 + $0x51] sm:$0xff]  ;;  %vm6652_vm4 = vcmp.lt.s32.totalorder %v316_v27, 15  ;;  %v250_v16 = vadd.s32 152, %v6565_v56  ;;  %v243_v12 = vadd.s32 96, %v6565_v56 }
  0x38   : > { %6012 = vmatpush3.bf16.msra.mxu1 %v6009_v18  ;;  %v2445_v46 = vld [vmem:[%s6514_s10 + $0x41] sm:$0xff]  ;;  %v6547_v47 = vpack.c.bf16 %v3321_v43, %v3320_v42  ;;  %v2446_v48 = vld [vmem:[%s6514_s10 + $0x49] sm:$0xff]  ;;  %v2448_v54 = vld [vmem:[%s6514_s10 + $0x59] sm:$0xff]  ;;  %v8014_v36 = vsel %vm6652_vm4, 4294967295, %v8013_v36  ;;  %vm6752_vm9 = vcmp.gt.s32.totalorder %v267_v5, 0 }
  0x39   : > { %6060 = vmatpush3.bf16.msra.mxu0 %v6525_v19  ;;  %6014 = vmatprep.subr.bf16.mxu1 %v6013_v24  ;;  %v1656_v51 = vld [vmem:[#allocation2 + $0x60] sm:$0xff]  ;;  %v1657_v52 = vld [vmem:[#allocation2 + $0x68] sm:$0xff]  ;;  %v2451_v58 = vld [vmem:[%s6514_s10 + $0x71] sm:$0xff] }
  0x3a   : > { %6062 = vmatprep.subr.bf16.mxu0 %v6061_v25  ;;  %v6557_v53 = vpack.c.bf16 %v1657_v52, %v1656_v51  ;;  %v2449_v55 = vld [vmem:[%s6514_s10 + $0x61] sm:$0xff]  ;;  %v2450_v57 = vld [vmem:[%s6514_s10 + $0x69] sm:$0xff]  ;;  %v2452_v60 = vld [vmem:[%s6514_s10 + $0x79] sm:$0xff] }
  0x3b   : > { %5474 = vmatmul.mubr.msk.f32.vlgmr.msra.gmra.mrb[0].mxu1 %vm7908_vm0, %v846_v28  ;;  %v2453_v61 = vld [vmem:[%s6514_s10 + $0x81] sm:$0xff]  ;;  %v2454_v0 = vld [vmem:[%s6514_s10 + $0x89] sm:$0xff]  ;;  %v6587_v1 = vld [vmem:[%s6514_s10 + $0x12] sm:$0xff]  ;;  %v240_v28 = vadd.s32 72, %v6565_v56 }
  0x3c   : > { %5714 = vmatmul.mubr.msk.f32.vlgmr.msra.gmra.mrb[0].mxu0 %vm7908_vm0, %v2440_v31  ;;  %6016 = vmatpush3.bf16.msra.mxu1 %v6013_v24  ;;  %v6594_v3 = vld [vmem:[%s6514_s10 + $0x1a] sm:$0xff]  ;;  %v3322_v6 = vld [vmem:[#allocation2 + $0x130] sm:$0xff]  ;;  %v6607_v11 = vld [vmem:[%s6514_s10 + $0x22] sm:$0xff] }
  0x3d   : > { %6064 = vmatpush3.bf16.msra.mxu0 %v6061_v25  ;;  %5476 = vmatprep.mubr.msk.f32.mxu1 %vm7908_vm0, %v2439_v17  ;;  %v3323_v8 = vld [vmem:[#allocation2 + $0x138] sm:$0xff]  ;;  %v2864_v9 = vsel %vm6589_vm1, %v6594_v3, 0.0  ;;  %v6614_v14 = vld [vmem:[%s6514_s10 + $0x2a] sm:$0xff]  ;;  %v3324_v18 = vld [vmem:[#allocation2 + $0x140] sm:$0xff]  ;;  %v8011_v25 = vmov 0  ;;  %v330_v38 = vand.u32 15, %v240_v28 }
  0x3e   : > { %5716 = vmatprep.mubr.msk.f32.mxu0 %vm7908_vm0, %v2441_v33  ;;  %6066 = vmatprep.subr.bf16.mxu0 %v6065_v32  ;;  %v863_v10 = vld [vmem:[%s6514_s10 + $0x91] sm:$0xff]  ;;  %v6077_v17 = vpack.c.bf16 %v3323_v8, %v3322_v6  ;;  %v3325_v20 = vld [vmem:[#allocation2 + $0x148] sm:$0xff]  ;;  %v864_v21 = vld [vmem:[%s6514_s10 + $0x99] sm:$0xff]  ;;  %v2866_v22 = vsel %vm6609_vm2, %v6614_v14, 0.0  ;;  %v8012_v25 = vsel %vm6631_vm3, 4294967295, %v8011_v25  ;;  %v248_v6 = vadd.s32 136, %v6565_v56 }
  0x3f   : > { %5477 = vmatmul.mubr.msk.f32.gmra.mrb[2].mxu1 %vm7908_vm0, %v2440_v31  ;;  %6018 = vmatprep.subr.bf16.mxu1 %v6017_v34  ;;  %v865_v23 = vld [vmem:[%s6514_s10 + $0xa1] sm:$0xff]  ;;  %v6629_v24 = vld [vmem:[%s6514_s10 + $0x32] sm:$0xff]  ;;  %v6081_v29 = vpack.c.bf16 %v3325_v20, %v3324_v18  ;;  %vm6675_vm5 = vcmp.lt.s32.totalorder %v330_v38, 15  ;;  %v233_v8 = vadd.s32 16, %v6565_v56  ;;  %v8022_v20 = vmov 0 }
  0x40   : > { %5717 = vmatmul.mubr.msk.f32.gmra.mrb[2].mxu0 %vm7908_vm0, %v2442_v37  ;;  %5479 = vmatprep.mubr.msk.f32.mxu1 %vm7908_vm0, %v2441_v33  ;;  %v6636_v26 = vld [vmem:[%s6514_s10 + $0x3a] sm:$0xff]  ;;  %v3712_v30 = vld [vmem:[#allocation2 + $0x150] sm:$0xff]  ;;  %v6650_v35 = vld [vmem:[%s6514_s10 + $0x42] sm:$0xff]  ;;  %v386_v27 = vand.u32 15, %v248_v6 }
  0x41   : > { %5719 = vmatprep.mubr.msk.f32.mxu0 %vm7908_vm0, %v2443_v39  ;;  %6068 = vmatpush3.bf16.msra.mxu0 %v6065_v32  ;;  %v3713_v31 = vld [vmem:[#allocation2 + $0x158] sm:$0xff]  ;;  %v866_v32 = vld [vmem:[%s6514_s10 + $0xa9] sm:$0xff]  ;;  %v2868_v33 = vsel %vm6631_vm3, %v6636_v26, 0.0  ;;  %v869_v43 = vld [vmem:[%s6514_s10 + $0xc1] sm:$0xff]  ;;  %v281_v28 = vand.u32 15, %v233_v8 }
  0x42   : > { %6070 = vmatprep.subr.bf16.mxu0 %v6069_v40  ;;  %6020 = vmatpush3.bf16.msra.mxu1 %v6017_v34  ;;  %v867_v34 = vld [vmem:[%s6514_s10 + $0xb1] sm:$0xff]  ;;  %v868_v41 = vld [vmem:[%s6514_s10 + $0xb9] sm:$0xff]  ;;  %v6695_v52 = vld [vmem:[%s6514_s10 + $0x62] sm:$0xff]  ;;  %vm6775_vm10 = vcmp.lt.s32.totalorder %v386_v27, 15 }
  0x43   : > { %5480 = vmatmul.mubr.msk.f32.gmra.mrb[4].mxu1 %vm7908_vm0, %v2442_v37  ;;  %6022 = vmatprep.subr.bf16.mxu1 %v6021_v44  ;;  %v6657_v37 = vld [vmem:[%s6514_s10 + $0x4a] sm:$0xff]  ;;  %v872_v59 = vld [vmem:[%s6514_s10 + $0xd9] sm:$0xff]  ;;  %v6743_v18 = vld [vmem:[%s6514_s10 + $0x82] sm:$0xff]  ;;  %vm6785_vm11 = vcmp.gt.s32.totalorder %v281_v28, 0  ;;  %v8046_v28 = vmov 0 }
  0x44   : > { %5720 = vmatmul.mubr.msk.f32.gmra.mrb[4].mxu0 %vm7908_vm0, %v2444_v45  ;;  %5482 = vmatprep.mubr.msk.f32.mxu1 %vm7908_vm0, %v2443_v39  ;;  %v242_v39 = vadd.s32 88, %v6565_v56  ;;  %v2870_v42 = vsel %vm6652_vm4, %v6657_v37, 0.0  ;;  %v871_v51 = vld [vmem:[%s6514_s10 + $0xd1] sm:$0xff]  ;;  %v6816_v5 = vld [vmem:[%s6514_s10 + $0xa2] sm:$0xff] }
  0x45   : > { %5722 = vmatprep.mubr.msk.f32.mxu0 %vm7908_vm0, %v2445_v46  ;;  %6072 = vmatpush3.bf16.msra.mxu0 %v6069_v40  ;;  %v6660_v40 = vpack.c.bf16 %v3713_v31, %v3712_v30  ;;  %v6716_v62 = vld [vmem:[%s6514_s10 + $0x72] sm:$0xff]  ;;  %v252_v30 = vadd.s32 168, %v6565_v56  ;;  %8042 = vst [vmem:[#allocation16_spill] sm:$0xff] %v6816_v5  ;;  %v6819_v6 = vld [vmem:[%s6514_s10 + $0xaa] sm:$0xff]  ;;  %v6822_v8 = vld [vmem:[%s6514_s10 + $0x20] sm:$0xff] }
  0x46   : > { %6074 = vmatprep.subr.bf16.mxu0 %v6547_v47  ;;  %6024 = vmatpush3.bf16.msra.mxu1 %v6021_v44  ;;  %v6673_v44 = vld [vmem:[%s6514_s10 + $0x52] sm:$0xff]  ;;  %8043 = vst [vmem:[#allocation17_spill] sm:$0xff] %v6819_v6  ;;  %8044 = vst [vmem:[#allocation18_spill] sm:$0xff] %v6822_v8 }
  0x47   : > { %5483 = vmatmul.mubr.msk.f32.gmra.mrb[6].mxu1 %vm7908_vm0, %v2444_v45  ;;  %6026 = vmatprep.subr.bf16.mxu1 %v6557_v53  ;;  %v8015_v45 = vmov 0  ;;  %v6738_v15 = vld [vmem:[%s6514_s10 + $0xf1] sm:$0xff] }
  0x48   : > { %5723 = vmatmul.mubr.msk.f32.gmra.mrb[6].mxu0 %vm7908_vm0, %v2446_v48  ;;  %5485 = vmatprep.mubr.msk.f32.mxu1 %vm7908_vm0, %v2445_v46  ;;  %v8016_v45 = vsel %vm6675_vm5, 4294967295, %v8015_v45  ;;  %v6680_v46 = vld [vmem:[%s6514_s10 + $0x5a] sm:$0xff]  ;;  %8021 = vst [vmem:[#allocation7_spill] sm:$0xff] %v6738_v15  ;;  %v6773_v38 = vld [vmem:[%s6514_s10 + $0x92] sm:$0xff] }
  0x49   : > { %5725 = vmatprep.mubr.msk.f32.mxu0 %vm7908_vm0, %v2447_v49  ;;  %v2872_v50 = vsel %vm6675_vm5, %v6680_v46, 0.0  ;;  %8028 = vst [vmem:[#allocation10_spill] sm:$0xff] %v6773_v38  ;;  %v6829_v27 = vld [vmem:[%s6514_s10 + $0x18] sm:$0xff] }
  0x4a   : > { %8045 = vst [vmem:[#allocation19_spill] sm:$0xff] %v6829_v27 }
  0x4b   : > { %5486 = vmatmul.mubr.msk.f32.gmra.mrb[8].mxu1 %vm7908_vm0, %v2446_v48  ;;  %v244_v48 = vadd.s32 104, %v6565_v56 }
  0x4c   : > { %5726 = vmatmul.mubr.msk.f32.gmra.mrb[8].mxu0 %vm7908_vm0, %v2448_v54  ;;  %5488 = vmatprep.mubr.msk.f32.mxu1 %vm7908_vm0, %v2447_v49  ;;  %v870_v49 = vld [vmem:[%s6514_s10 + $0xc9] sm:$0xff] }
  0x4d   : > { %5728 = vmatprep.mubr.msk.f32.mxu0 %vm7908_vm0, %v2449_v55 }
  0x4f   : > { %5489 = vmatmul.mubr.msk.f32.gmra.mrb[10].mxu1 %vm7908_vm0, %v2448_v54  ;;  %v8017_v54 = vmov 0 }
  0x50   : > { %5729 = vmatmul.mubr.msk.f32.gmra.mrb[10].mxu0 %vm7908_vm0, %v2450_v57  ;;  %5491 = vmatprep.mubr.msk.f32.mxu1 %vm7908_vm0, %v2449_v55  ;;  %v6702_v55 = vld [vmem:[%s6514_s10 + $0x6a] sm:$0xff] }
  0x51   : > { %5731 = vmatprep.mubr.msk.f32.mxu0 %vm7908_vm0, %v2451_v58 }
  0x53   : > { %5492 = vmatmul.mubr.msk.f32.gmra.mrb[12].mxu1 %vm7908_vm0, %v2450_v57  ;;  %v358_v57 = vand.u32 15, %v244_v48  ;;  %v1658_v48 = vld [vmem:[#allocation2 + $0x70] sm:$0xff] }
  0x54   : > { %5732 = vmatmul.mubr.msk.f32.gmra.mrb[12].mxu0 %vm7908_vm0, %v2452_v60  ;;  %5494 = vmatprep.mubr.msk.f32.mxu1 %vm7908_vm0, %v2451_v58  ;;  %v246_v58 = vadd.s32 120, %v6565_v56 }
  0x55   : > { %5734 = vmatprep.mubr.msk.f32.mxu0 %vm7908_vm0, %v2453_v61  ;;  %vm6718_vm7 = vcmp.lt.s32.totalorder %v358_v57, 15  ;;  %v6886_v57 = vld [vmem:[%s6514_s10 + $0xc2] sm:$0xff] }
  0x56   : > { %v8020_v63 = vsel %vm6718_vm7, 4294967295, %v8019_v63  ;;  %v372_v4 = vand.u32 15, %v246_v58  ;;  %8058 = vst [vmem:[#allocation26_spill] sm:$0xff] %v6886_v57 }
  0x57   : > { %5495 = vmatmul.mubr.msk.f32.gmra.mrb[14].mxu1 %vm7908_vm0, %v2452_v60 }
  0x58   : > { %5735 = vmatmul.mubr.msk.f32.gmra.mrb[14].mxu0 %vm7908_vm0, %v2454_v0  ;;  %5497 = vmatprep.mubr.msk.f32.mxu1 %vm7908_vm0, %v2453_v61  ;;  %v873_v61 = vld [vmem:[%s6514_s10 + $0xe1] sm:$0xff]  ;;  %vm6745_vm8 = vcmp.lt.s32.totalorder %v372_v4, 15 }
  0x59   : > { %5773 = vmatprep.mubr.msk.f32.mxu0 %vm7908_vm0, %v6587_v1  ;;  %v8023_v20 = vsel %vm6745_vm8, 4294967295, %v8022_v20 }
  0x5b   : > { %5498 = vmatmul.mubr.msk.f32.gmra.mrb[16].mxu1 %vm7908_vm0, %v2454_v0  ;;  %v6723_v0 = vld [vmem:[%s6514_s10 + $0x7a] sm:$0xff] }
  0x5c   : > { %5774 = vmatmul.mubr.msk.f32.vlgmr.msra.gmra.mrb[0].mxu0 %vm7908_vm0, %v2864_v9  ;;  %5500 = vmatprep.mubr.msk.f32.mxu1 %vm7908_vm0, %v863_v10  ;;  %v874_v9 = vld [vmem:[%s6514_s10 + $0xe9] sm:$0xff]  ;;  %v2876_v10 = vsel %vm6718_vm7, %v6723_v0, 0.0 }
  0x5d   : > { %6076 = vmatpush3.bf16.msra.mxu0 %v6547_v47  ;;  %5776 = vmatprep.mubr.msk.f32.mxu0 %vm7908_vm0, %v6607_v11  ;;  %v344_v47 = vand.u32 15, %v242_v39  ;;  %v8029_v39 = vmov 0 }
  0x5e   : > { %6078 = vmatprep.subr.bf16.mxu0 %v6077_v17  ;;  %v8030_v39 = vsel %vm6775_vm10, 4294967295, %v8029_v39 }
  0x5f   : > { %5501 = vmatmul.mubr.msk.f32.gmra.mrb[18].mxu1 %vm7908_vm0, %v864_v21  ;;  %vm6697_vm6 = vcmp.lt.s32.totalorder %v344_v47, 15  ;;  %v6750_v21 = vld [vmem:[%s6514_s10 + $0x8a] sm:$0xff]  ;;  %8031 = vst [vmem:[#allocation11_spill] sm:$0xff] %v8030_v39  ;;  %v3717_v39 = vld [vmem:[#allocation2 + $0x178] sm:$0xff] }
  0x60   : > { %5777 = vmatmul.mubr.msk.f32.gmra.mrb[2].mxu0 %vm7908_vm0, %v2866_v22  ;;  %5503 = vmatprep.mubr.msk.f32.mxu1 %vm7908_vm0, %v865_v23  ;;  %v8018_v54 = vsel %vm6697_vm6, 4294967295, %v8017_v54  ;;  %v2874_v60 = vsel %vm6697_vm6, %v6702_v55, 0.0  ;;  %v8024_v22 = vmov 0  ;;  %v711_v23 = vld [vmem:[%s6514_s10] sm:$0xff]  ;;  %v2878_v31 = vsel %vm6745_vm8, %v6750_v21, 0.0  ;;  %v6790_v47 = vld [vmem:[%s6514_s10 + $0x10] sm:$0xff] }
  0x61   : > { %5779 = vmatprep.mubr.msk.f32.mxu0 %vm7908_vm0, %v6629_v24  ;;  %6080 = vmatpush3.bf16.msra.mxu0 %v6077_v17  ;;  %v235_v17 = vadd.s32 32, %v6565_v56  ;;  %v8025_v22 = vsel %vm6752_vm9, 4294967295, %v8024_v22  ;;  %8035 = vst [vmem:[#allocation13_spill] sm:$0xff] %v6790_v47  ;;  %v809_v4 = vsel %vm6785_vm11, %v6790_v47, 0.0  ;;  %v6936_v47 = vld [vmem:[%s6514_s10 + $0x50] sm:$0xff] }
  0x62   : > { %6082 = vmatprep.subr.bf16.mxu0 %v6081_v29  ;;  %8026 = vst [vmem:[#allocation8_spill] sm:$0xff] %v8025_v22 }
  0x63   : > { %5504 = vmatmul.mubr.msk.f32.gmra.mrb[20].mxu1 %vm7908_vm0, %v866_v32  ;;  %v807_v32 = vsel %vm6752_vm9, %v711_v23, 0.0  ;;  %v1661_v23 = vld [vmem:[#allocation2 + $0x88] sm:$0xff] }
  0x64   : > { %5780 = vmatmul.mubr.msk.f32.gmra.mrb[4].mxu0 %vm7908_vm0, %v2868_v33  ;;  %5506 = vmatprep.mubr.msk.f32.mxu1 %vm7908_vm0, %v867_v34  ;;  %v400_v33 = vand.u32 15, %v250_v16  ;;  %v295_v34 = vand.u32 15, %v235_v17  ;;  %v1660_v17 = vld [vmem:[#allocation2 + $0x80] sm:$0xff] }
  0x65   : > { %5782 = vmatprep.mubr.msk.f32.mxu0 %vm7908_vm0, %v6650_v35  ;;  %6084 = vmatpush3.bf16.msra.mxu0 %v6081_v29  ;;  %v6762_v29 = vld [vmem:[%s6514_s10 + $0xf9] sm:$0xff] }
  0x66   : > { %6086 = vmatprep.subr.bf16.mxu0 %v6660_v40  ;;  %8027 = vst [vmem:[#allocation9_spill] sm:$0xff] %v6762_v29  ;;  %vm6803_vm12 = vcmp.lt.s32.totalorder %v400_v33, 15  ;;  %vm6807_vm13 = vcmp.gt.s32.totalorder %v295_v34, 0  ;;  %v256_v33 = vadd.s32 200, %v6565_v56  ;;  %v6849_v34 = vld [vmem:[%s6514_s10 + $0xb2] sm:$0xff] }
  0x67   : > { %5507 = vmatmul.mubr.msk.f32.gmra.mrb[22].mxu1 %vm7908_vm0, %v868_v41  ;;  %v6780_v41 = vld [vmem:[%s6514_s10 + $0x9a] sm:$0xff]  ;;  %8049 = vst [vmem:[#allocation21_spill] sm:$0xff] %v6849_v34 }
  0x68   : > { %5783 = vmatmul.mubr.msk.f32.gmra.mrb[6].mxu0 %vm7908_vm0, %v2870_v42  ;;  %5509 = vmatprep.mubr.msk.f32.mxu1 %vm7908_vm0, %v869_v43  ;;  %8032 = vst [vmem:[#allocation12_spill] sm:$0xff] %v6780_v41  ;;  %v237_v42 = vadd.s32 48, %v6565_v56  ;;  %v8033_v43 = vmov 0  ;;  %v2880_v58 = vsel %vm6775_vm10, %v6780_v41, 0.0 }
  0x69   : > { %5785 = vmatprep.mubr.msk.f32.mxu0 %vm7908_vm0, %v6673_v44  ;;  %v8034_v43 = vsel %vm6785_vm11, 4294967295, %v8033_v43 }
  0x6b   : > { %5510 = vmatmul.mubr.msk.f32.gmra.mrb[24].mxu1 %vm7908_vm0, %v870_v49  ;;  %v1659_v49 = vld [vmem:[#allocation2 + $0x78] sm:$0xff] }
  0x6c   : > { %5786 = vmatmul.mubr.msk.f32.gmra.mrb[8].mxu0 %vm7908_vm0, %v2872_v50  ;;  %5512 = vmatprep.mubr.msk.f32.mxu1 %vm7908_vm0, %v871_v51  ;;  %v712_v50 = vld [vmem:[%s6514_s10 + $0x8] sm:$0xff]  ;;  %v414_v51 = vand.u32 15, %v252_v30  ;;  %v6029_v16 = vpack.c.bf16 %v1659_v49, %v1658_v48  ;;  %v8051_v48 = vmov 0  ;;  %v6859_v49 = vld [vmem:[%s6514_s10 + $0x30] sm:$0xff] }
  0x6d   : > { %5788 = vmatprep.mubr.msk.f32.mxu0 %vm7908_vm0, %v6695_v52  ;;  %8053 = vst [vmem:[#allocation23_spill] sm:$0xff] %v6859_v49  ;;  %v6889_v30 = vld [vmem:[%s6514_s10 + $0xca] sm:$0xff]  ;;  %v3289_v22 = vsel %vm6785_vm11, %v6859_v49, 0.0 }
  0x6e   : > { %vm6831_vm14 = vcmp.lt.s32.totalorder %v414_v51, 15  ;;  %v241_v51 = vadd.s32 80, %v6565_v56  ;;  %8059 = vst [vmem:[#allocation27_spill] sm:$0xff] %v6889_v30 }
  0x6f   : > { %5513 = vmatmul.mubr.msk.f32.gmra.mrb[26].mxu1 %vm7908_vm0, %v872_v59  ;;  %v8036_v59 = vmov 0  ;;  %v8047_v28 = vsel %vm6831_vm14, 4294967295, %v8046_v28 }
  0x70   : > { %5789 = vmatmul.mubr.msk.f32.gmra.mrb[10].mxu0 %vm7908_vm0, %v2874_v60  ;;  %5515 = vmatprep.mubr.msk.f32.mxu1 %vm7908_vm0, %v873_v61  ;;  %v8037_v59 = vsel %vm6803_vm12, 4294967295, %v8036_v59  ;;  %v8039_v60 = vmov 0  ;;  %v254_v61 = vadd.s32 184, %v6565_v56  ;;  %8048 = vst [vmem:[#allocation20_spill] sm:$0xff] %v8047_v28  ;;  %v337_v19 = vand.u32 15, %v241_v51  ;;  %v2862_v28 = vld [vmem:[%s6514_s10 + $0x10a] sm:$0xff] }
  0x71   : > { %5791 = vmatprep.mubr.msk.f32.mxu0 %vm7908_vm0, %v6716_v62  ;;  %8038 = vst [vmem:[#allocation14_spill] sm:$0xff] %v8037_v59  ;;  %v8040_v60 = vsel %vm6807_vm13, 4294967295, %v8039_v60 }
  0x72   : > { %8041 = vst [vmem:[#allocation15_spill] sm:$0xff] %v8040_v60  ;;  %v259_v60 = vadd.s32 224, %v6565_v56 }
  0x73   : > { %5516 = vmatmul.mubr.msk.f32.gmra.mrb[28].mxu1 %vm7908_vm0, %v874_v9  ;;  %v309_v9 = vand.u32 15, %v237_v42  ;;  %v6852_v42 = vld [vmem:[%s6514_s10 + $0xba] sm:$0xff] }
  0x74   : > { %5792 = vmatmul.mubr.msk.f32.gmra.mrb[12].mxu0 %vm7908_vm0, %v2876_v10  ;;  %5518 = vmatprep.mubr.msk.f32.mxu1 %vm7908_vm0, %v6738_v15  ;;  %v239_v10 = vadd.s32 64, %v6565_v56  ;;  %8050 = vst [vmem:[#allocation22_spill] sm:$0xff] %v6852_v42  ;;  %v6896_v15 = vld [vmem:[%s6514_s10 + $0x40] sm:$0xff] }
  0x75   : > { %5794 = vmatprep.mubr.msk.f32.mxu0 %vm7908_vm0, %v6743_v18  ;;  %vm6854_vm15 = vcmp.gt.s32.totalorder %v309_v9, 0  ;;  %v6867_v9 = vld [vmem:[%s6514_s10 + $0x28] sm:$0xff]  ;;  %8062 = vst [vmem:[#allocation28_spill] sm:$0xff] %v6896_v15 }
  0x76   : > { %v8052_v48 = vsel %vm6854_vm15, 4294967295, %v8051_v48  ;;  %8054 = vst [vmem:[#allocation24_spill] sm:$0xff] %v6867_v9 }
  0x77   : > { %5519 = vmatmul.mubr.msk.f32.gmra.mrb[30].mxu1 %vm7908_vm0, %v6762_v29  ;;  %v8060_v29 = vmov 0 }
  0x78   : > { %5795 = vmatmul.mubr.msk.f32.gmra.mrb[14].mxu0 %vm7908_vm0, %v2878_v31  ;;  %5533 = vmatprep.mubr.msk.f32.mxu1 %vm7908_vm0, %v807_v32  ;;  %v2882_v31 = vsel %vm6803_vm12, %v6819_v6, 0.0  ;;  %v428_v32 = vand.u32 15, %v254_v61  ;;  %v2080_v61 = vld [vmem:[#allocation2 + $0x90] sm:$0xff]  ;;  %v8102_v6 = vmov 0 }
  0x79   : > { %5797 = vmatprep.mubr.msk.f32.mxu0 %vm7908_vm0, %v6773_v38 }
  0x7a   : > { %vm6881_vm12 = vcmp.lt.s32.totalorder %v428_v32, 15 }
  0x7b   : > { %5534 = vmatmul.mubr.msk.f32.vlgmr.msra.gmra.mrb[0].mxu1 %vm7908_vm0, %v712_v50  ;;  %v323_v50 = vand.u32 15, %v239_v10  ;;  %v258_v10 = vadd.s32 216, %v6565_v56  ;;  %v2886_v51 = vsel %vm6881_vm12, %v6889_v30, 0.0  ;;  %v351_v30 = vand.u32 15, %v243_v12 }
  0x7c   : > { %5798 = vmatmul.mubr.msk.f32.gmra.mrb[16].mxu0 %vm7908_vm0, %v2880_v58  ;;  %6028 = vmatpush3.bf16.msra.mxu1 %v6557_v53  ;;  %v811_v53 = vsel %vm6807_vm13, %v6822_v8, 0.0  ;;  %v6033_v58 = vpack.c.bf16 %v1661_v23, %v1660_v17  ;;  %v2884_v17 = vsel %vm6831_vm14, %v6852_v42, 0.0  ;;  %v813_v23 = vsel %vm6854_vm15, %v6859_v49, 0.0  ;;  %v7096_v49 = vld [vmem:[%s6514_s10 + $0x98] sm:$0xff] }
  0x7d   : > { %5536 = vmatprep.mubr.msk.f32.mxu1 %vm7908_vm0, %v809_v4  ;;  %5800 = vmatprep.mubr.msk.f32.mxu0 %vm7908_vm0, %v6816_v5  ;;  %v2081_v4 = vld [vmem:[#allocation2 + $0x98] sm:$0xff]  ;;  %vm8063_vm14 = vcmask 392192   ;;  %v8083_v12 = vmov 0  ;;  %v8093_v42 = vmov 0  ;;  %v8105_v5 = vmov 0 }
  0x7e   : > { %6030 = vmatprep.subr.bf16.mxu1 %v6029_v16  ;;  %v6899_v32 = vpack.c.bf16 %v2081_v4, %v2080_v61  ;;  %vm8064_vm10 = vmmov %vm8063_vm14  ;;  %v260_v4 = vadd.s32 232, %v6565_v56 }
  0x7f   : > { %5537 = vmatmul.mubr.msk.f32.gmra.mrb[2].mxu1 %vm7908_vm0, %v6829_v27  ;;  %vm8065_vm8 = vmmov %vm8064_vm10  ;;  %v8073_v27 = vmov 0 }
  0x80   : > { %5801 = vmatmul.mubr.msk.f32.gmra.mrb[18].mxu0 %vm7908_vm0, %v2882_v31  ;;  %5539 = vmatprep.mubr.msk.f32.mxu1 %vm7908_vm0, %v811_v53  ;;  %v8055_v31 = vmov 0  ;;  %v442_v53 = vand.u32 15, %v256_v33  ;;  %v456_v33 = vand.u32 15, %v258_v10  ;;  %vm8067_vm7 = vmmov %vm8065_vm8  ;;  %v245_v10 = vadd.s32 112, %v6565_v56 }
  0x81   : > { %5803 = vmatprep.mubr.msk.f32.mxu0 %vm7908_vm0, %v6849_v34  ;;  %v8056_v31 = vsel %vm6881_vm12, 4294967295, %v8055_v31  ;;  %6032 = vmatpush3.bf16.msra.mxu1 %v6029_v16  ;;  %vm6891_vm0 = vcmp.gt.s32.totalorder %v323_v50, 0  ;;  %v6906_v16 = vld [vmem:[%s6514_s10 + $0x38] sm:$0xff]  ;;  %vm8076_vm12 = vmmov %vm8064_vm10 }
  0x82   : > { %8057 = vst [vmem:[#allocation25_spill] sm:$0xff] %v8056_v31  ;;  %v8061_v29 = vsel %vm6891_vm0, 4294967295, %v8060_v29  ;;  %6034 = vmatprep.subr.bf16.mxu1 %v6033_v58  ;;  %8066 = vst [vmem:[#allocation29_spill] sm:$0xff] %v6906_v16  ;;  %v815_v61 = vsel %vm6891_vm0, %v6896_v15, 0.0  ;;  %v6929_v50 = vld [vmem:[%s6514_s10 + $0xda] sm:$0xff]  ;;  %vm6946_vm6 = vcmp.lt.s32.totalorder %v456_v33, 15 }
  0x83   : > { %5540 = vmatmul.mubr.msk.f32.gmra.mrb[4].mxu1 %vm8063_vm14, %v6867_v9  ;;  %8072 = vst [vmem:[#allocation32_spill] sm:$0xff] %v6929_v50  ;;  %vm8075_vm14 = vmmov %vm8064_vm10  ;;  %v470_v33 = vand.u32 15, %v260_v4  ;;  %v6965_v31 = vld [vmem:[%s6514_s10 + $0xea] sm:$0xff]  ;;  %v6981_v4 = vld [vmem:[%s6514_s10 + $0x58] sm:$0xff] }
  0x84   : > { %5804 = vmatmul.mubr.msk.f32.gmra.mrb[20].mxu0 %vm8064_vm10, %v2884_v17  ;;  %5542 = vmatprep.mubr.msk.f32.mxu1 %vm8065_vm8, %v813_v23  ;;  %v6922_v17 = vld [vmem:[%s6514_s10 + $0xd2] sm:$0xff]  ;;  %vm6924_vm8 = vcmp.lt.s32.totalorder %v442_v53, 15  ;;  %v8069_v23 = vmov 0  ;;  %vm8080_vm5 = vmmov %vm8064_vm10  ;;  %8082 = vst [vmem:[#allocation35_spill] sm:$0xff] %v6965_v31 }
  0x85   : > { %5806 = vmatprep.mubr.msk.f32.mxu0 %vm8067_vm7, %v6886_v57  ;;  %6036 = vmatpush3.bf16.msra.mxu1 %v6033_v58  ;;  %8068 = vst [vmem:[#allocation30_spill] sm:$0xff] %v6922_v17  ;;  %v8070_v23 = vsel %vm6924_vm8, 4294967295, %v8069_v23  ;;  %vm6931_vm7 = vcmp.gt.s32.totalorder %v337_v19, 0  ;;  %v6944_v58 = vld [vmem:[%s6514_s10 + $0x48] sm:$0xff]  ;;  %v8077_v19 = vmov 0  ;;  %v2888_v53 = vsel %vm6924_vm8, %v6929_v50, 0.0  ;;  %vm8089_vm8 = vmmov %vm8080_vm5 }
  0x86   : > { %8071 = vst [vmem:[#allocation31_spill] sm:$0xff] %v8070_v23  ;;  %v8074_v27 = vsel %vm6931_vm7, 4294967295, %v8073_v27  ;;  %6038 = vmatprep.subr.bf16.mxu1 %v6899_v32  ;;  %v8078_v19 = vsel %vm6946_vm6, 4294967295, %v8077_v19  ;;  %v6962_v57 = vld [vmem:[%s6514_s10 + $0xe2] sm:$0xff]  ;;  %v262_v50 = vadd.s32 248, %v6565_v56  ;;  %v247_v23 = vadd.s32 128, %v6565_v56 }
  0x87   : > { %5543 = vmatmul.mubr.msk.f32.gmra.mrb[6].mxu1 %vm8064_vm10, %v6906_v16  ;;  %8079 = vst [vmem:[#allocation33_spill] sm:$0xff] %v8078_v19  ;;  %8081 = vst [vmem:[#allocation34_spill] sm:$0xff] %v6962_v57  ;;  %v7009_v19 = vld [vmem:[%s6514_s10 + $0x70] sm:$0xff] }
  0x88   : > { %5807 = vmatmul.mubr.msk.f32.gmra.mrb[22].mxu0 %vm8075_vm14, %v2886_v51  ;;  %5545 = vmatprep.mubr.msk.f32.mxu1 %vm8076_vm12, %v815_v61  ;;  %v817_v51 = vsel %vm6931_vm7, %v6936_v47, 0.0  ;;  %v365_v61 = vand.u32 15, %v245_v10  ;;  %vm6967_vm12 = vcmp.gt.s32.totalorder %v351_v30, 0  ;;  %vm8087_vm10 = vmmov %vm8080_vm5  ;;  %v2890_v10 = vsel %vm6946_vm6, %v6965_v31, 0.0  ;;  %v7003_v30 = vld [vmem:[%s6514_s10 + $0xf2] sm:$0xff]  ;;  %8098 = vst [vmem:[#allocation42_spill] sm:$0xff] %v7009_v19 }
  0x89   : > { %5809 = vmatprep.mubr.msk.f32.mxu0 %vm8080_vm5, %v6922_v17  ;;  %v8084_v12 = vsel %vm6967_vm12, 4294967295, %v8083_v12  ;;  %v6972_v17 = vld [vmem:[%s6514_s10 + $0x60] sm:$0xff]  ;;  %vm8088_vm14 = vmmov %vm8080_vm5  ;;  %8096 = vst [vmem:[#allocation40_spill] sm:$0xff] %v7003_v30  ;;  %v484_v31 = vand.u32 15, %v262_v50  ;;  %v379_v34 = vand.u32 15, %v247_v23 }
  0x8a   : > { %8085 = vst [vmem:[#allocation36_spill] sm:$0xff] %v8084_v12  ;;  %8086 = vst [vmem:[#allocation37_spill] sm:$0xff] %v6972_v17 }
  0x8b   : > { %5546 = vmatmul.mubr.msk.f32.gmra.mrb[8].mxu1 %vm8080_vm5, %v6944_v58  ;;  %vm6994_vm5 = vcmp.lt.s32.totalorder %v470_v33, 15  ;;  %v249_v33 = vadd.s32 144, %v6565_v56  ;;  %vm8100_vm6 = vmmov %vm8089_vm8 }
  0x8c   : > { %5810 = vmatmul.mubr.msk.f32.gmra.mrb[24].mxu0 %vm8087_vm10, %v2888_v53  ;;  %5548 = vmatprep.mubr.msk.f32.mxu1 %vm8088_vm14, %v817_v51  ;;  %v819_v53 = vsel %vm6967_vm12, %v6972_v17, 0.0  ;;  %v8090_v51 = vmov 0  ;;  %vm6998_vm10 = vcmp.gt.s32.totalorder %v365_v61, 0  ;;  %vm8099_vm14 = vmmov %vm8089_vm8  ;;  %v7017_v61 = vld [vmem:[%s6514_s10 + $0x68] sm:$0xff] }
  0x8d   : > { %5812 = vmatprep.mubr.msk.f32.mxu0 %vm8089_vm8, %v6962_v57  ;;  %v8091_v51 = vsel %vm6994_vm5, 4294967295, %v8090_v51  ;;  %v8094_v42 = vsel %vm6998_vm10, 4294967295, %v8093_v42  ;;  %v7006_v57 = vld [vmem:[%s6514_s10 + $0xfa] sm:$0xff]  ;;  %vm8101_vm4 = vmmov %vm8100_vm6  ;;  %v821_v23 = vsel %vm6998_vm10, %v7009_v19, 0.0 }
  0x8e   : > { %8092 = vst [vmem:[#allocation38_spill] sm:$0xff] %v8091_v51  ;;  %8095 = vst [vmem:[#allocation39_spill] sm:$0xff] %v8094_v42  ;;  %v2892_v50 = vsel %vm6994_vm5, %v7006_v57, 0.0  ;;  %v2083_v42 = vld [vmem:[#allocation2 + $0xa8] sm:$0xff] }
  0x8f   : > { %8097 = vst [vmem:[#allocation41_spill] sm:$0xff] %v7006_v57  ;;  %5549 = vmatmul.mubr.msk.f32.gmra.mrb[10].mxu1 %vm8089_vm8, %v6981_v4  ;;  %vm7037_vm8 = vcmp.gt.s32.totalorder %v379_v34, 0  ;;  %v393_v57 = vand.u32 15, %v249_v33  ;;  %vm8110_vm5 = vmmov %vm8101_vm4  ;;  %v3287_v33 = vsel %vm6752_vm9, %v6822_v8, 0.0  ;;  %v7073_v8 = vld [vmem:[%s6514_s10 + $0x88] sm:$0xff] }
  0x90   : > { %5813 = vmatmul.mubr.msk.f32.gmra.mrb[26].mxu0 %vm8099_vm14, %v2890_v10  ;;  %5551 = vmatprep.mubr.msk.f32.mxu1 %vm8100_vm6, %v819_v53  ;;  %v251_v10 = vadd.s32 160, %v6565_v56  ;;  %v2861_v53 = vld [vmem:[%s6514_s10 + $0x102] sm:$0xff]  ;;  %vm7032_vm6 = vcmp.lt.s32.totalorder %v484_v31, 15  ;;  %v8106_v5 = vsel %vm7037_vm8, 4294967295, %v8105_v5  ;;  %vm8109_vm14 = vmmov %vm8101_vm4  ;;  %v7049_v31 = vld [vmem:[%s6514_s10 + $0x78] sm:$0xff]  ;;  %8118 = vst [vmem:[#allocation48_spill] sm:$0xff] %v7073_v8 }
  0x91   : > { %5815 = vmatprep.mubr.msk.f32.mxu0 %vm8101_vm4, %v7003_v30  ;;  %v8103_v6 = vsel %vm7032_vm6, 4294967295, %v8102_v6  ;;  %8107 = vst [vmem:[#allocation44_spill] sm:$0xff] %v8106_v5  ;;  %v7042_v30 = vld [vmem:[%s6514_s10 + $0x80] sm:$0xff]  ;;  %8111 = vst [vmem:[#allocation46_spill] sm:$0xff] %v7049_v31  ;;  %v2894_v34 = vsel %vm7032_vm6, %v2862_v28, 0.0  ;;  %v2085_v5 = vld [vmem:[#allocation2 + $0xb8] sm:$0xff] }
  0x92   : > { %8104 = vst [vmem:[#allocation43_spill] sm:$0xff] %v8103_v6  ;;  %8108 = vst [vmem:[#allocation45_spill] sm:$0xff] %v7042_v30  ;;  %v823_v51 = vsel %vm7037_vm8, %v7042_v30, 0.0  ;;  %v407_v59 = vand.u32 15, %v251_v10  ;;  %v3714_v28 = vld [vmem:[#allocation2 + $0x160] sm:$0xff]  ;;  %v3715_v6 = vld [vmem:[#allocation2 + $0x168] sm:$0xff] }
  0x93   : > { %5552 = vmatmul.mubr.msk.f32.gmra.mrb[12].mxu1 %vm8101_vm4, %v7017_v61  ;;  %vm8112_vm3 = vmmov %vm8101_vm4  ;;  %vm7060_vm4 = vcmp.gt.s32.totalorder %v393_v57, 0  ;;  %v255_v10 = vadd.s32 192, %v6565_v56  ;;  %v6089_v38 = vpack.c.bf16 %v3715_v6, %v3714_v28  ;;  %v4079_v28 = vld [vmem:[%s6514_s10 + $0x62] sm:$0xff] }
  0x94   : > { %5816 = vmatmul.mubr.msk.f32.gmra.mrb[28].mxu0 %vm8109_vm14, %v2892_v50  ;;  %5554 = vmatprep.mubr.msk.f32.mxu1 %vm8110_vm5, %v821_v23  ;;  %v7065_v23 = vld [vmem:[%s6514_s10 + $0x90] sm:$0xff]  ;;  %vm8116_vm5 = vmmov %vm8112_vm3 }
  0x95   : > { %5818 = vmatprep.mubr.msk.f32.mxu0 %vm8112_vm3, %v2861_v53  ;;  %8115 = vst [vmem:[#allocation47_spill] sm:$0xff] %v7065_v23  ;;  %v253_v53 = vadd.s32 176, %v6565_v56  ;;  %vm8117_vm14 = vmmov %vm8112_vm3  ;;  %v825_v57 = vsel %vm7060_vm4, %v7065_v23, 0.0  ;;  %v435_v6 = vand.u32 15, %v255_v10  ;;  %v4137_v10 = vld [vmem:[#allocation2 + $0x188] sm:$0xff] }
  0x96   : > { %vm8119_vm9 = vmmov %vm8112_vm3 }
  0x97   : > { %5555 = vmatmul.mubr.msk.f32.gmra.mrb[14].mxu1 %vm8112_vm3, %v7049_v31  ;;  %vm7083_vm3 = vcmp.gt.s32.totalorder %v407_v59, 0  ;;  %vm8125_vm11 = vmmov %vm8116_vm5  ;;  %vm7126_vm6 = vcmp.gt.s32.totalorder %v435_v6, 0 }
  0x98   : > { %5819 = vmatmul.mubr.msk.f32.gmra.mrb[30].mxu0 %vm8116_vm5, %v2894_v34  ;;  %5557 = vmatprep.mubr.msk.f32.mxu1 %vm8117_vm14, %v823_v51  ;;  %v7088_v51 = vld [vmem:[%s6514_s10 + $0xa0] sm:$0xff]  ;;  %v421_v34 = vand.u32 15, %v253_v53  ;;  %vm8124_vm14 = vmmov %vm8116_vm5  ;;  %v3291_v53 = vsel %vm6807_vm13, %v6896_v15, 0.0 }
  0x99   : > { %5833 = vmatprep.mubr.msk.f32.mxu0 %vm8119_vm9, %v3287_v33  ;;  %8122 = vst [vmem:[#allocation49_spill] sm:$0xff] %v7088_v51  ;;  %vm8123_vm9 = vmmov %vm8116_vm5  ;;  %v3716_v33 = vld [vmem:[#allocation2 + $0x170] sm:$0xff]  ;;  %v827_v59 = vsel %vm7083_vm3, %v7088_v51, 0.0  ;;  %v3303_v12 = vsel %vm7037_vm8, %v7088_v51, 0.0 }
  0x9a   : > { %vm8130_vm13 = vmmov %vm8116_vm5 }
  0x9b   : > { %5558 = vmatmul.mubr.msk.f32.gmra.mrb[16].mxu1 %vm8123_vm9, %v7073_v8  ;;  %vm7106_vm9 = vcmp.gt.s32.totalorder %v421_v34, 0  ;;  %v7120_v34 = vld [vmem:[%s6514_s10 + $0xa8] sm:$0xff] }
  0x9c   : > { %5834 = vmatmul.mubr.msk.f32.vlgmr.msra.gmra.mrb[0].mxu0 %vm8116_vm5, %v6867_v9  ;;  %5560 = vmatprep.mubr.msk.f32.mxu1 %vm8124_vm14, %v825_v57  ;;  %v7111_v57 = vld [vmem:[%s6514_s10 + $0xb0] sm:$0xff]  ;;  %v4136_v9 = vld [vmem:[#allocation2 + $0x180] sm:$0xff]  ;;  %vm8129_vm14 = vmmov %vm8116_vm5 }
  0x9d   : > { %6088 = vmatpush3.bf16.msra.mxu0 %v6660_v40  ;;  %5836 = vmatprep.mubr.msk.f32.mxu0 %vm8125_vm11, %v3289_v22  ;;  %v257_v40 = vadd.s32 208, %v6565_v56  ;;  %v6093_v22 = vpack.c.bf16 %v3717_v39, %v3716_v33  ;;  %vm8128_vm11 = vmmov %vm8116_vm5  ;;  %v829_v15 = vsel %vm7106_vm9, %v7111_v57, 0.0  ;;  %v8131_v39 = vmov 0 }
  0x9e   : > { %6090 = vmatprep.subr.bf16.mxu0 %v6089_v38  ;;  %v8132_v39 = vsel %vm7126_vm6, 4294967295, %v8131_v39  ;;  %v3293_v33 = vsel %vm6854_vm15, %v6936_v47, 0.0  ;;  %v2067_v50 = vsel %vm7083_vm3, %v7111_v57, 0.0 }
  0x9f   : > { %5561 = vmatmul.mubr.msk.f32.gmra.mrb[18].mxu1 %vm8128_vm11, %v7096_v49  ;;  %vm8134_vm11 = vmmov %vm8116_vm5 }
  0xa0   : > { %5837 = vmatmul.mubr.msk.f32.gmra.mrb[2].mxu0 %vm8116_vm5, %v6906_v16  ;;  %5563 = vmatprep.mubr.msk.f32.mxu1 %vm8129_vm14, %v827_v59  ;;  %v7134_v16 = vld [vmem:[%s6514_s10 + $0xc0] sm:$0xff]  ;;  %v449_v59 = vand.u32 15, %v257_v40  ;;  %vm8135_vm14 = vmmov %vm8116_vm5 }
  0xa1   : > { %5839 = vmatprep.mubr.msk.f32.mxu0 %vm8130_vm13, %v3291_v53  ;;  %6092 = vmatpush3.bf16.msra.mxu0 %v6089_v38  ;;  %v7137_v53 = vpack.c.bf16 %v4137_v10, %v4136_v9  ;;  %vm8133_vm13 = vmmov %vm8116_vm5  ;;  %v7145_v38 = vld [vmem:[%s6514_s10 + $0xb8] sm:$0xff]  ;;  %v831_v6 = vsel %vm7126_vm6, %v7134_v16, 0.0  ;;  %v3295_v9 = vsel %vm6891_vm0, %v6972_v17, 0.0  ;;  %v7159_v10 = vld [vmem:[%s6514_s10 + $0xd0] sm:$0xff]  ;;  %v2069_v41 = vsel %vm7106_vm9, %v7134_v16, 0.0 }
  0xa2   : > { %6094 = vmatprep.subr.bf16.mxu0 %v6093_v22  ;;  %vm8140_vm0 = vmmov %vm8116_vm5  ;;  %v7183_v17 = vld [vmem:[%s6514_s10 + $0xe0] sm:$0xff] }
  0xa3   : > { %5564 = vmatmul.mubr.msk.f32.gmra.mrb[20].mxu1 %vm8133_vm13, %v7120_v34  ;;  %vm7154_vm13 = vcmp.gt.s32.totalorder %v449_v59, 0  ;;  %vm8145_vm15 = vmmov %vm8140_vm0  ;;  %v4083_v40 = vld [vmem:[%s6514_s10 + $0x82] sm:$0xff] }
  0xa4   : > { %5840 = vmatmul.mubr.msk.f32.gmra.mrb[4].mxu0 %vm8134_vm11, %v6944_v58  ;;  %5566 = vmatprep.mubr.msk.f32.mxu1 %vm8116_vm5, %v829_v15  ;;  %v463_v15 = vand.u32 15, %v259_v60  ;;  %vm8138_vm11 = vmmov %vm8116_vm5  ;;  %v833_v60 = vsel %vm7154_vm13, %v7159_v10, 0.0 }
  0xa5   : > { %5842 = vmatprep.mubr.msk.f32.mxu0 %vm8135_vm14, %v3293_v33  ;;  %6096 = vmatpush3.bf16.msra.mxu0 %v6093_v22  ;;  %v261_v33 = vadd.s32 240, %v6565_v56  ;;  %vm8139_vm14 = vmmov %vm8116_vm5  ;;  %v7169_v22 = vld [vmem:[%s6514_s10 + $0xc8] sm:$0xff]  ;;  %v3297_v56 = vsel %vm6931_vm7, %v7009_v19, 0.0  ;;  %v8146_v19 = vmov 0 }
  0xa6   : > { %6098 = vmatprep.subr.bf16.mxu0 %v7137_v53  ;;  %vm8150_vm7 = vmmov %vm8140_vm0 }
  0xa7   : > { %5567 = vmatmul.mubr.msk.f32.gmra.mrb[22].mxu1 %vm8138_vm11, %v7145_v38  ;;  %vm7178_vm11 = vcmp.gt.s32.totalorder %v463_v15, 0 }
  0xa8   : > { %5843 = vmatmul.mubr.msk.f32.gmra.mrb[6].mxu0 %vm8116_vm5, %v6981_v4  ;;  %5569 = vmatprep.mubr.msk.f32.mxu1 %vm8139_vm14, %v831_v6  ;;  %v477_v6 = vand.u32 15, %v261_v33  ;;  %vm8143_vm5 = vmmov %vm8140_vm0  ;;  %v835_v15 = vsel %vm7178_vm11, %v7183_v17, 0.0  ;;  %v3299_v33 = vsel %vm6967_vm12, %v7042_v30, 0.0  ;;  %v3301_v30 = vsel %vm6998_vm10, %v7065_v23, 0.0  ;;  %v2082_v23 = vld [vmem:[#allocation2 + $0xa0] sm:$0xff] }
  0xa9   : > { %5845 = vmatprep.mubr.msk.f32.mxu0 %vm8140_vm0, %v3295_v9  ;;  %vm8144_vm14 = vmmov %vm8140_vm0  ;;  %v7191_v9 = vld [vmem:[%s6514_s10 + $0xd8] sm:$0xff]  ;;  %v6041_v51 = vpack.c.bf16 %v2083_v42, %v2082_v23  ;;  %v3307_v42 = vsel %vm7083_vm3, %v7134_v16, 0.0  ;;  %v3679_v23 = vld [vmem:[%s6514_s10 + $0x21] sm:$0xff] }
  0xaa   : > { %vm8151_vm12 = vmmov %vm8140_vm0 }
  0xab   : > { %5570 = vmatmul.mubr.msk.f32.gmra.mrb[24].mxu1 %vm8143_vm5, %v7169_v22  ;;  %vm7200_vm5 = vcmp.gt.s32.totalorder %v477_v6, 0 }
  0xac   : > { %5846 = vmatmul.mubr.msk.f32.gmra.mrb[8].mxu0 %vm8140_vm0, %v7017_v61  ;;  %5572 = vmatprep.mubr.msk.f32.mxu1 %vm8144_vm14, %v833_v60  ;;  %v8147_v19 = vsel %vm7200_vm5, 4294967295, %v8146_v19  ;;  %v7205_v60 = vld [vmem:[%s6514_s10 + $0xf0] sm:$0xff]  ;;  %vm8149_vm14 = vmmov %vm8140_vm0 }
  0xad   : > { %5848 = vmatprep.mubr.msk.f32.mxu0 %vm8145_vm15, %v3297_v56  ;;  %vm8148_vm15 = vmmov %vm8140_vm0  ;;  %v7213_v56 = vld [vmem:[%s6514_s10 + $0xe8] sm:$0xff]  ;;  %v837_v6 = vsel %vm7200_vm5, %v7205_v60, 0.0 }
  0xaf   : > { %5573 = vmatmul.mubr.msk.f32.gmra.mrb[26].mxu1 %vm8140_vm0, %v7191_v9 }
  0xb0   : > { %5849 = vmatmul.mubr.msk.f32.gmra.mrb[10].mxu0 %vm8148_vm15, %v7049_v31  ;;  %5575 = vmatprep.mubr.msk.f32.mxu1 %vm8149_vm14, %v835_v15  ;;  %vm8152_vm15 = vmmov %vm8140_vm0  ;;  %v7228_v15 = vld [vmem:[%s6514_s10 + $0xf8] sm:$0xff]  ;;  %v1528_v31 = vld [vmem:[%s6514_s10 + $0xa] sm:$0xff] }
  0xb1   : > { %5851 = vmatprep.mubr.msk.f32.mxu0 %vm8150_vm7, %v3299_v33  ;;  %vm8153_vm14 = vmmov %vm8140_vm0  ;;  %v1527_v33 = vld [vmem:[%s6514_s10 + $0x2] sm:$0xff] }
  0xb2   : > { %vm8154_vm7 = vmmov %vm8140_vm0 }
  0xb3   : > { %5576 = vmatmul.mubr.msk.f32.gmra.mrb[28].mxu1 %vm8151_vm12, %v7213_v56  ;;  %vm8155_vm12 = vmmov %vm8140_vm0 }
  0xb4   : > { %5852 = vmatmul.mubr.msk.f32.gmra.mrb[12].mxu0 %vm8140_vm0, %v7073_v8  ;;  %5578 = vmatprep.mubr.msk.f32.mxu1 %vm8152_vm15, %v837_v6  ;;  %v1624_v6 = vsel %vm6589_vm1, %v1528_v31, 0.0  ;;  %vm8156_vm15 = vmmov %vm8140_vm0  ;;  %v2084_v8 = vld [vmem:[#allocation2 + $0xb0] sm:$0xff]  ;;  %v1626_v31 = vsel %vm6609_vm2, %v6594_v3, 0.0  ;;  %vm8163_vm2 = vnez %v8012_v25  ;;  %v3309_v3 = vsel %vm7106_vm9, %v7159_v10, 0.0 }
  0xb5   : > { %5854 = vmatprep.mubr.msk.f32.mxu0 %vm8153_vm14, %v3301_v30  ;;  %v3305_v30 = vsel %vm7060_vm4, %v7111_v57, 0.0  ;;  %vm8157_vm14 = vmmov %vm8140_vm0  ;;  %v4078_v57 = vld [vmem:[%s6514_s10 + $0x5a] sm:$0xff] }
  0xb7   : > { %5579 = vmatmul.mubr.msk.f32.gmra.mrb[30].mxu1 %vm8154_vm7, %v7228_v15  ;;  %vm8158_vm7 = vmmov %vm8140_vm0 }
  0xb8   : > { %5855 = vmatmul.mubr.msk.f32.gmra.mrb[14].mxu0 %vm8155_vm12, %v7096_v49  ;;  %5593 = vmatprep.mubr.msk.f32.mxu1 %vm8140_vm0, %v1527_v33  ;;  %vm8159_vm12 = vmmov %vm8140_vm0  ;;  %v4139_v33 = vld [vmem:[#allocation2 + $0x198] sm:$0xff] }
  0xb9   : > { %5857 = vmatprep.mubr.msk.f32.mxu0 %vm8156_vm15, %v3303_v12  ;;  %v6045_v12 = vpack.c.bf16 %v2085_v5, %v2084_v8  ;;  %vm8160_vm15 = vmmov %vm8140_vm0  ;;  %v7299_v5 = vld [vmem:[%s6514_s10 + $0x100] sm:$0xff]  ;;  %v3285_v8 = vld [vmem:[%s6514_s10 + $0x110] sm:$0xff] }
  0xbb   : > { %5594 = vmatmul.mubr.msk.f32.vlgmr.msra.gmra.mrb[0].mxu1 %vm8157_vm14, %v1624_v6  ;;  %vm8161_vm14 = vmmov %vm8140_vm0 }
  0xbc   : > { %5858 = vmatmul.mubr.msk.f32.gmra.mrb[16].mxu0 %vm8158_vm7, %v7120_v34  ;;  %6040 = vmatpush3.bf16.msra.mxu1 %v6899_v32  ;;  %vm8162_vm7 = vmmov %vm8140_vm0  ;;  %v3317_v32 = vsel %vm7200_vm5, %v3285_v8, 0.0 }
  0xbd   : > { %5596 = vmatprep.mubr.msk.f32.mxu1 %vm8159_vm12, %v6587_v1  ;;  %5860 = vmatprep.mubr.msk.f32.mxu0 %vm8140_vm0, %v3305_v30  ;;  %v1628_v1 = vsel %vm8163_vm2, %v6614_v14, 0.0  ;;  %vm8164_vm12 = vmmov %vm8140_vm0  ;;  %v3311_v14 = vsel %vm7126_vm6, %v7183_v17, 0.0  ;;  %v3681_v30 = vld [vmem:[%s6514_s10 + $0x31] sm:$0xff] }
  0xbe   : > { %6042 = vmatprep.subr.bf16.mxu1 %v6041_v51  ;;  %vm8173_vm6 = vmmov %vm8140_vm0 }
  0xbf   : > { %5597 = vmatmul.mubr.msk.f32.gmra.mrb[2].mxu1 %vm8160_vm15, %v1626_v31  ;;  %vm8165_vm15 = vmmov %vm8140_vm0 }
  0xc0   : > { %5861 = vmatmul.mubr.msk.f32.gmra.mrb[18].mxu0 %vm8161_vm14, %v7145_v38  ;;  %5599 = vmatprep.mubr.msk.f32.mxu1 %vm8162_vm7, %v6607_v11  ;;  %vm8166_vm14 = vmmov %vm8140_vm0  ;;  %vm8167_vm7 = vnez %v8014_v36 }
  0xc1   : > { %5863 = vmatprep.mubr.msk.f32.mxu0 %vm8164_vm12, %v3307_v42  ;;  %6044 = vmatpush3.bf16.msra.mxu1 %v6041_v51  ;;  %v1630_v11 = vsel %vm8167_vm7, %v6636_v26, 0.0  ;;  %vm8168_vm12 = vmmov %vm8140_vm0  ;;  %vm8171_vm7 = vnez %v8016_v45  ;;  %v3313_v26 = vsel %vm7154_vm13, %v7205_v60, 0.0  ;;  %v4138_v51 = vld [vmem:[#allocation2 + $0x190] sm:$0xff]  ;;  %v4140_v42 = vld [vmem:[#allocation2 + $0x1a0] sm:$0xff] }
  0xc2   : > { %6046 = vmatprep.subr.bf16.mxu1 %v6045_v12  ;;  %v6101_v31 = vpack.c.bf16 %v4139_v33, %v4138_v51  ;;  %v3686_v51 = vld [vmem:[%s6514_s10 + $0x59] sm:$0xff]  ;;  %v3687_v33 = vld [vmem:[%s6514_s10 + $0x61] sm:$0xff] }
  0xc3   : > { %5600 = vmatmul.mubr.msk.f32.gmra.mrb[4].mxu1 %vm8140_vm0, %v1628_v1  ;;  %v8194_v1 = vld [vmem:[#allocation10_spill] sm:$0xff] }
  0xc4   : > { %5864 = vmatmul.mubr.msk.f32.gmra.mrb[20].mxu0 %vm8165_vm15, %v7169_v22  ;;  %5602 = vmatprep.mubr.msk.f32.mxu1 %vm8166_vm14, %v6629_v24  ;;  %vm8169_vm15 = vmmov %vm8140_vm0  ;;  %v1632_v24 = vsel %vm8171_vm7, %v6657_v37, 0.0  ;;  %v3315_v37 = vsel %vm7178_vm11, %v7299_v5, 0.0 }
  0xc5   : > { %5866 = vmatprep.mubr.msk.f32.mxu0 %vm8168_vm12, %v3309_v3  ;;  %6048 = vmatpush3.bf16.msra.mxu1 %v6045_v12  ;;  %vm8170_vm14 = vmmov %vm8140_vm0  ;;  %v4141_v12 = vld [vmem:[#allocation2 + $0x1a8] sm:$0xff]  ;;  %v8196_v3 = vld [vmem:[#allocation14_spill] sm:$0xff] }
  0xc6   : > { %6109 = vmatprep.subr.bf16.mxu1 %v6516_v7  ;;  %vm8172_vm12 = vmmov %vm8140_vm0 }
  0xc7   : > { %5603 = vmatmul.mubr.msk.f32.gmra.mrb[6].mxu1 %vm8140_vm0, %v1630_v11  ;;  %vm8176_vm7 = vmmov %vm8140_vm0  ;;  %v3682_v11 = vld [vmem:[%s6514_s10 + $0x39] sm:$0xff] }
  0xc8   : > { %5867 = vmatmul.mubr.msk.f32.gmra.mrb[22].mxu0 %vm8169_vm15, %v7191_v9  ;;  %5605 = vmatprep.mubr.msk.f32.mxu1 %vm8170_vm14, %v6650_v35  ;;  %vm8174_vm15 = vmmov %vm8140_vm0  ;;  %vm8175_vm14 = vnez %v8018_v54 }
  0xc9   : > { %5869 = vmatprep.mubr.msk.f32.mxu0 %vm8172_vm12, %v3311_v14  ;;  %v1634_v35 = vsel %vm8175_vm14, %v6680_v46, 0.0  ;;  %vm8178_vm12 = vmmov %vm8140_vm0  ;;  %v7323_v46 = vld [vmem:[%s6514_s10 + $0x108] sm:$0xff] }
  0xca   : > { %vm8180_vm14 = vmmov %vm8140_vm0  ;;  %v3683_v14 = vld [vmem:[%s6514_s10 + $0x41] sm:$0xff] }
  0xcb   : > { %5606 = vmatmul.mubr.msk.f32.gmra.mrb[8].mxu1 %vm8173_vm6, %v1632_v24  ;;  %vm8177_vm6 = vmmov %vm8140_vm0  ;;  %v6105_v24 = vpack.c.bf16 %v4141_v12, %v4140_v42  ;;  %v3688_v42 = vld [vmem:[%s6514_s10 + $0x69] sm:$0xff]  ;;  %v3689_v12 = vld [vmem:[%s6514_s10 + $0x71] sm:$0xff] }
  0xcc   : > { %5870 = vmatmul.mubr.msk.f32.gmra.mrb[24].mxu0 %vm8140_vm0, %v7213_v56  ;;  %5608 = vmatprep.mubr.msk.f32.mxu1 %vm8174_vm15, %v6673_v44  ;;  %vm8179_vm15 = vnez %v8020_v63 }
  0xcd   : > { %5872 = vmatprep.mubr.msk.f32.mxu0 %vm8176_vm7, %v3313_v26  ;;  %v1636_v44 = vsel %vm8179_vm15, %v6702_v55, 0.0  ;;  %vm8181_vm7 = vmmov %vm8140_vm0  ;;  %v3286_v55 = vld [vmem:[%s6514_s10 + $0x118] sm:$0xff]  ;;  %v8201_v26 = vld [vmem:[#allocation16_spill] sm:$0xff] }
  0xcf   : > { %5609 = vmatmul.mubr.msk.f32.gmra.mrb[10].mxu1 %vm8177_vm6, %v1634_v35  ;;  %vm8182_vm6 = vmmov %vm8140_vm0  ;;  %v8202_v35 = vld [vmem:[#allocation17_spill] sm:$0xff] }
  0xd0   : > { %5873 = vmatmul.mubr.msk.f32.gmra.mrb[26].mxu0 %vm8178_vm12, %v7228_v15  ;;  %5611 = vmatprep.mubr.msk.f32.mxu1 %vm8140_vm0, %v6695_v52  ;;  %vm8183_vm12 = vmmov %vm8140_vm0  ;;  %vm8184_vm0 = vnez %v8023_v20 }
  0xd1   : > { %5875 = vmatprep.mubr.msk.f32.mxu0 %vm8180_vm14, %v3315_v37  ;;  %v1638_v52 = vsel %vm8184_vm0, %v6723_v0, 0.0  ;;  %vm8185_vm14 = vmmov %vm8182_vm6  ;;  %v3680_v0 = vld [vmem:[%s6514_s10 + $0x29] sm:$0xff] }
  0xd2   : > { %vm8186_vm15 = vmmov %vm8182_vm6  ;;  %v8203_v37 = vld [vmem:[#allocation20_spill] sm:$0xff] }
  0xd3   : > { %5612 = vmatmul.mubr.msk.f32.gmra.mrb[12].mxu1 %vm8181_vm7, %v1636_v44  ;;  %vm8187_vm5 = vmmov %vm8182_vm6  ;;  %v3685_v44 = vld [vmem:[%s6514_s10 + $0x51] sm:$0xff] }
  0xd4   : > { %5876 = vmatmul.mubr.msk.f32.gmra.mrb[28].mxu0 %vm8182_vm6, %v7323_v46  ;;  %5614 = vmatprep.mubr.msk.f32.mxu1 %vm8183_vm12, %v6716_v62  ;;  %vm8188_vm7 = vmmov %vm8187_vm5  ;;  %v8189_v62 = vld [vmem:[#allocation11_spill] sm:$0xff] }
  0xd5   : > { %5878 = vmatprep.mubr.msk.f32.mxu0 %vm8185_vm14, %v3317_v32  ;;  %vm8190_vm6 = vnez %v8189_v62  ;;  %vm8191_vm12 = vmmov %vm8187_vm5  ;;  %v8208_v32 = vld [vmem:[#allocation21_spill] sm:$0xff] }
  0xd6   : > { %v1640_v6 = vsel %vm8190_vm6, %v6750_v21, 0.0  ;;  %vm8192_vm14 = vmmov %vm8187_vm5 }
  0xd7   : > { %5615 = vmatmul.mubr.msk.f32.gmra.mrb[14].mxu1 %vm8186_vm15, %v1638_v52  ;;  %vm8193_vm15 = vmmov %vm8187_vm5  ;;  %v8210_v52 = vld [vmem:[#allocation22_spill] sm:$0xff] }
  0xd8   : > { %5879 = vmatmul.mubr.msk.f32.gmra.mrb[30].mxu0 %vm8187_vm5, %v3286_v55  ;;  %5617 = vmatprep.mubr.msk.f32.mxu1 %vm8188_vm7, %v6743_v18  ;;  %v8195_v18 = vld [vmem:[#allocation12_spill] sm:$0xff]  ;;  %vm8197_vm7 = vnez %v8196_v3  ;;  %vm8205_vm6 = vmmov %vm8187_vm5  ;;  %v8211_v55 = vld [vmem:[#allocation25_spill] sm:$0xff] }
  0xd9   : > { %5893 = vmatprep.mubr.msk.f32.mxu0 %vm8191_vm12, %v3679_v23  ;;  %v1642_v21 = vsel %vm8197_vm7, %v8195_v18, 0.0  ;;  %vm8198_vm12 = vmmov %vm8187_vm5  ;;  %vm8204_vm7 = vnez %v8203_v37  ;;  %v8225_v18 = vld [vmem:[#allocation32_spill] sm:$0xff] }
  0xda   : > { %v1644_v8 = vsel %vm8204_vm7, %v8202_v35, 0.0  ;;  %vm8213_vm7 = vmmov %vm8205_vm6  ;;  %v8233_v35 = vld [vmem:[#allocation35_spill] sm:$0xff] }
  0xdb   : > { %5618 = vmatmul.mubr.msk.f32.gmra.mrb[16].mxu1 %vm8192_vm14, %v1640_v6  ;;  %vm8199_vm14 = vmmov %vm8187_vm5  ;;  %v8215_v6 = vld [vmem:[#allocation26_spill] sm:$0xff] }
  0xdc   : > { %5894 = vmatmul.mubr.msk.f32.vlgmr.msra.gmra.mrb[0].mxu0 %vm8193_vm15, %v3680_v0  ;;  %5620 = vmatprep.mubr.msk.f32.mxu1 %vm8187_vm5, %v8194_v1  ;;  %vm8200_vm15 = vmmov %vm8187_vm5  ;;  %v8217_v0 = vld [vmem:[#allocation27_spill] sm:$0xff]  ;;  %v8223_v1 = vld [vmem:[#allocation30_spill] sm:$0xff] }
  0xdd   : > { %6100 = vmatpush3.bf16.msra.mxu0 %v7137_v53  ;;  %5896 = vmatprep.mubr.msk.f32.mxu0 %vm8198_vm12, %v3681_v30  ;;  %v3684_v53 = vld [vmem:[%s6514_s10 + $0x49] sm:$0xff]  ;;  %vm8206_vm12 = vmmov %vm8187_vm5  ;;  %v8218_v30 = vld [vmem:[#allocation31_spill] sm:$0xff] }
  0xde   : > { %6102 = vmatprep.subr.bf16.mxu0 %v6101_v31  ;;  %vm8214_vm0 = vmmov %vm8205_vm6 }
  0xdf   : > { %5621 = vmatmul.mubr.msk.f32.gmra.mrb[18].mxu1 %vm8199_vm14, %v1642_v21  ;;  %vm8207_vm14 = vmmov %vm8187_vm5  ;;  %v8226_v21 = vld [vmem:[#allocation33_spill] sm:$0xff] }
  0xe0   : > { %5897 = vmatmul.mubr.msk.f32.gmra.mrb[2].mxu0 %vm8200_vm15, %v3682_v11  ;;  %5623 = vmatprep.mubr.msk.f32.mxu1 %vm8187_vm5, %v8201_v26  ;;  %vm8209_vm15 = vmmov %vm8187_vm5  ;;  %vm8212_vm5 = vnez %v8211_v55  ;;  %v8231_v26 = vld [vmem:[#allocation34_spill] sm:$0xff] }
  0xe1   : > { %5899 = vmatprep.mubr.msk.f32.mxu0 %vm8205_vm6, %v3683_v14  ;;  %6104 = vmatpush3.bf16.msra.mxu0 %v6101_v31  ;;  %v1646_v23 = vsel %vm8212_vm5, %v8210_v52, 0.0  ;;  %vm8222_vm5 = vmmov %vm8214_vm0  ;;  %v3690_v14 = vld [vmem:[%s6514_s10 + $0x79] sm:$0xff]  ;;  %v8238_v52 = vld [vmem:[#allocation40_spill] sm:$0xff] }
  0xe2   : > { %6106 = vmatprep.subr.bf16.mxu0 %v6105_v24 }
  0xe3   : > { %5624 = vmatmul.mubr.msk.f32.gmra.mrb[20].mxu1 %vm8206_vm12, %v1644_v8  ;;  %vm8216_vm12 = vmmov %vm8214_vm0  ;;  %v8234_v8 = vld [vmem:[#allocation38_spill] sm:$0xff] }
  0xe4   : > { %5900 = vmatmul.mubr.msk.f32.gmra.mrb[4].mxu0 %vm8207_vm14, %v3684_v53  ;;  %5626 = vmatprep.mubr.msk.f32.mxu1 %vm8209_vm15, %v8208_v32  ;;  %vm8219_vm14 = vnez %v8218_v30  ;;  %vm8220_vm15 = vmmov %vm8214_vm0  ;;  %v7409_v32 = vld [vmem:[%s6514_s10 + $0x91] sm:$0xff] }
  0xe5   : > { %5902 = vmatprep.mubr.msk.f32.mxu0 %vm8213_vm7, %v3685_v44  ;;  %6108 = vmatpush3.bf16.msra.mxu0 %v6105_v24  ;;  %v1648_v31 = vsel %vm8219_vm14, %v8217_v0, 0.0  ;;  %vm8221_vm7 = vmmov %vm8214_vm0  ;;  %v3691_v24 = vld [vmem:[%s6514_s10 + $0x81] sm:$0xff]  ;;  %v3692_v44 = vld [vmem:[%s6514_s10 + $0x89] sm:$0xff] }
  0xe6   : > { %vm8230_vm14 = vmmov %vm8222_vm5  ;;  %v7424_v0 = vld [vmem:[%s6514_s10 + $0xa1] sm:$0xff] }
  0xe7   : > { %5627 = vmatmul.mubr.msk.f32.gmra.mrb[22].mxu1 %vm8205_vm6, %v1646_v23  ;;  %vm8224_vm6 = vmmov %vm8214_vm0  ;;  %v8240_v23 = vld [vmem:[#allocation41_spill] sm:$0xff] }
  0xe8   : > { %5903 = vmatmul.mubr.msk.f32.gmra.mrb[6].mxu0 %vm8214_vm0, %v3686_v51  ;;  %5629 = vmatprep.mubr.msk.f32.mxu1 %vm8216_vm12, %v8215_v6  ;;  %vm8227_vm0 = vnez %v8226_v21  ;;  %vm8228_vm12 = vmmov %vm8222_vm5  ;;  %v8241_v51 = vld [vmem:[#allocation43_spill] sm:$0xff] }
  0xe9   : > { %5905 = vmatprep.mubr.msk.f32.mxu0 %vm8220_vm15, %v3687_v33  ;;  %v1650_v11 = vsel %vm8227_vm0, %v8225_v18, 0.0  ;;  %vm8229_vm15 = vmmov %vm8222_vm5  ;;  %v7421_v6 = vld [vmem:[%s6514_s10 + $0x99] sm:$0xff]  ;;  %v7440_v18 = vld [vmem:[%s6514_s10 + $0xb1] sm:$0xff] }
  0xea   : > { %vm8237_vm0 = vmmov %vm8224_vm6 }
  0xeb   : > { %5630 = vmatmul.mubr.msk.f32.gmra.mrb[24].mxu1 %vm8221_vm7, %v1648_v31  ;;  %vm8232_vm7 = vmmov %vm8222_vm5  ;;  %v8245_v31 = vld [vmem:[#allocation8_spill] sm:$0xff] }
  0xec   : > { %5906 = vmatmul.mubr.msk.f32.gmra.mrb[8].mxu0 %vm8222_vm5, %v3688_v42  ;;  %5632 = vmatprep.mubr.msk.f32.mxu1 %vm8224_vm6, %v8223_v1  ;;  %vm8235_vm5 = vnez %v8234_v8  ;;  %v8247_v42 = vld [vmem:[#allocation13_spill] sm:$0xff] }
  0xed   : > { %5908 = vmatprep.mubr.msk.f32.mxu0 %vm8228_vm12, %v3689_v12  ;;  %v1652_v53 = vsel %vm8235_vm5, %v8233_v35, 0.0  ;;  %vm8236_vm12 = vmmov %vm8224_vm6  ;;  %v7437_v1 = vld [vmem:[%s6514_s10 + $0xa9] sm:$0xff]  ;;  %v7458_v35 = vld [vmem:[%s6514_s10 + $0xc1] sm:$0xff] }
  0xef   : > { %5633 = vmatmul.mubr.msk.f32.gmra.mrb[26].mxu1 %vm8229_vm15, %v1650_v11  ;;  %vm8242_vm15 = vnez %v8241_v51  ;;  %v8251_v11 = vld [vmem:[#allocation19_spill] sm:$0xff] }
  0xf0   : > { %5909 = vmatmul.mubr.msk.f32.gmra.mrb[10].mxu0 %vm8230_vm14, %v3690_v14  ;;  %5635 = vmatprep.mubr.msk.f32.mxu1 %vm8232_vm7, %v8231_v26  ;;  %vm8239_vm14 = vmmov %vm8237_vm0  ;;  %v1654_v33 = vsel %vm8242_vm15, %v8240_v23, 0.0  ;;  %v8255_v14 = vld [vmem:[#allocation18_spill] sm:$0xff]  ;;  %v7473_v23 = vld [vmem:[%s6514_s10 + $0xc9] sm:$0xff] }
  0xf1   : > { %5911 = vmatprep.mubr.msk.f32.mxu0 %vm8224_vm6, %v3691_v24  ;;  %vm8243_vm7 = vmmov %vm8237_vm0  ;;  %v7455_v26 = vld [vmem:[%s6514_s10 + $0xb9] sm:$0xff] }
  0xf2   : > { %vm8244_vm6 = vmmov %vm8237_vm0 }
  0xf3   : > { %5636 = vmatmul.mubr.msk.f32.gmra.mrb[28].mxu1 %vm8236_vm12, %v1652_v53  ;;  %vm8246_vm12 = vnez %v8245_v31  ;;  %vm8250_vm15 = vmmov %vm8237_vm0  ;;  %v8259_v53 = vld [vmem:[#allocation5_spill] sm:$0xff]  ;;  %v8269_v31 = vld [vmem:[#allocation6_spill] sm:$0xff] }
  0xf4   : > { %5912 = vmatmul.mubr.msk.f32.gmra.mrb[12].mxu0 %vm8237_vm0, %v3692_v44  ;;  %5638 = vmatprep.mubr.msk.f32.mxu1 %vm8239_vm14, %v8238_v52  ;;  %v8248_v12 = vsel %vm8246_vm12, %v8247_v42, 0.0  ;;  %vm8249_vm14 = vmmov %vm8237_vm0  ;;  %v8260_v44 = vld [vmem:[#allocation24_spill] sm:$0xff]  ;;  %v8270_v42 = vld [vmem:[#allocation29_spill] sm:$0xff] }
  0xf5   : > { %5914 = vmatprep.mubr.msk.f32.mxu0 %vm8243_vm7, %v7409_v32  ;;  %vm8252_vm7 = vmmov %vm8237_vm0 }
  0xf7   : > { %5639 = vmatmul.mubr.msk.f32.gmra.mrb[30].mxu1 %vm8244_vm6, %v1654_v33  ;;  %vm8253_vm6 = vmmov %vm8237_vm0  ;;  %v7477_v33 = vld [vmem:[%s6514_s10 + $0xd1] sm:$0xff] }
  0xf8   : > { %5915 = vmatmul.mubr.msk.f32.gmra.mrb[14].mxu0 %vm8237_vm0, %v7421_v6  ;;  %5653 = vmatprep.mubr.msk.f32.mxu1 %vm8249_vm14, %v8248_v12  ;;  %vm8254_vm0 = vnez %v8034_v43  ;;  %vm8257_vm12 = vmmov %vm8253_vm6  ;;  %v8265_v43 = vld [vmem:[#allocation23_spill] sm:$0xff]  ;;  %v8274_v12 = vld [vmem:[#allocation28_spill] sm:$0xff] }
  0xf9   : > { %5917 = vmatprep.mubr.msk.f32.mxu0 %vm8250_vm15, %v7424_v0  ;;  %v8256_v24 = vsel %vm8254_vm0, %v8255_v14, 0.0  ;;  %vm8258_vm15 = vmmov %vm8253_vm6  ;;  %v7492_v14 = vld [vmem:[%s6514_s10 + $0xd9] sm:$0xff] }
  0xfa   : > { %vm8261_vm14 = vmmov %vm8253_vm6 }
  0xfb   : > { %5654 = vmatmul.mubr.msk.f32.vlgmr.msra.gmra.mrb[0].mxu1 %vm8252_vm7, %v8251_v11  ;;  %vm8262_vm7 = vmmov %vm8253_vm6 }
  0xfc   : > { %5918 = vmatmul.mubr.msk.f32.gmra.mrb[16].mxu0 %vm8253_vm6, %v7437_v1  ;;  %6112 = vmatpush3.bf16.msra.mxu1 %v6516_v7  ;;  %v8263_v7 = vld [vmem:[#allocation15_spill] sm:$0xff]  ;;  %vm8267_vm0 = vmmov %vm8262_vm7 }
  0xfd   : > { %5656 = vmatprep.mubr.msk.f32.mxu1 %vm8257_vm12, %v8256_v24  ;;  %5920 = vmatprep.mubr.msk.f32.mxu0 %vm8258_vm15, %v7440_v18  ;;  %vm8264_vm6 = vnez %v8263_v7  ;;  %vm8268_vm12 = vmmov %vm8267_vm0  ;;  %v7496_v24 = vld [vmem:[%s6514_s10 + $0xe1] sm:$0xff] }
  0xfe   : > { %6110 = vmatprep.subr.bf16.mxu1 %v8259_v53  ;;  %v8266_v52 = vsel %vm8264_vm6, %v8265_v43, 0.0  ;;  %vm8271_vm15 = vmmov %vm8267_vm0  ;;  %v8293_v7 = vld [vmem:[#allocation36_spill] sm:$0xff] }
  0xff   : > { %5657 = vmatmul.mubr.msk.f32.gmra.mrb[2].mxu1 %vm8261_vm14, %v8260_v44  ;;  %vm8272_vm14 = vmmov %vm8267_vm0  ;;  %v7524_v44 = vld [vmem:[%s6514_s10 + $0x101] sm:$0xff] }
 0x100   : > { %5921 = vmatmul.mubr.msk.f32.gmra.mrb[18].mxu0 %vm8262_vm7, %v7455_v26  ;;  %5659 = vmatprep.mubr.msk.f32.mxu1 %vm8267_vm0, %v8266_v52  ;;  %vm8273_vm7 = vnez %v8052_v48  ;;  %vm8276_vm6 = vmmov %vm8267_vm0  ;;  %v7538_v52 = vld [vmem:[%s6514_s10 + $0x109] sm:$0xff] }
 0x101   : > { %5923 = vmatprep.mubr.msk.f32.mxu0 %vm8268_vm12, %v7458_v35  ;;  %6113 = vmatpush3.bf16.msra.mxu1 %v8259_v53  ;;  %v8275_v11 = vsel %vm8273_vm7, %v8274_v12, 0.0  ;;  %vm8277_vm12 = vmmov %vm8267_vm0  ;;  %v7510_v53 = vld [vmem:[%s6514_s10 + $0xe9] sm:$0xff] }
 0x102   : > { %6111 = vmatprep.subr.bf16.mxu1 %v8269_v31  ;;  %vm8281_vm7 = vmmov %vm8267_vm0 }
 0x103   : > { %5660 = vmatmul.mubr.msk.f32.gmra.mrb[4].mxu1 %vm8271_vm15, %v8270_v42  ;;  %vm8278_vm15 = vmmov %vm8267_vm0 }
 0x104   : > { %5924 = vmatmul.mubr.msk.f32.gmra.mrb[20].mxu0 %vm8272_vm14, %v7473_v23  ;;  %5662 = vmatprep.mubr.msk.f32.mxu1 %vm8276_vm6, %v8275_v11  ;;  %vm8279_vm14 = vnez %v8061_v29  ;;  %vm8282_vm6 = vmmov %vm8267_vm0  ;;  %v8300_v11 = vld [vmem:[#allocation46_spill] sm:$0xff] }
 0x105   : > { %5926 = vmatprep.mubr.msk.f32.mxu0 %vm8267_vm0, %v7477_v33  ;;  %6114 = vmatpush3.bf16.msra.mxu1 %v8269_v31  ;;  %v8280_v48 = vsel %vm8279_vm14, %v6936_v47, 0.0  ;;  %vm8287_vm5 = vmmov %vm8267_vm0  ;;  %v8288_v47 = vld [vmem:[#allocation7_spill] sm:$0xff]  ;;  %v8298_v31 = vld [vmem:[#allocation45_spill] sm:$0xff] }
 0x106   : > { %vm8289_vm14 = vmmov %vm8267_vm0  ;;  %v2061_v12 = vsel %vm6998_vm10, %v8298_v31, 0.0  ;;  %v8312_v31 = vld [vmem:[#allocation49_spill] sm:$0xff] }
 0x107   : > { %5663 = vmatmul.mubr.msk.f32.gmra.mrb[6].mxu1 %vm8277_vm12, %v6944_v58  ;;  %vm8283_vm12 = vmmov %vm8267_vm0  ;;  %v8285_v58 = vld [vmem:[#allocation37_spill] sm:$0xff]  ;;  %v2065_v42 = vsel %vm7060_vm4, %v8312_v31, 0.0 }
 0x108   : > { %5927 = vmatmul.mubr.msk.f32.gmra.mrb[22].mxu0 %vm8278_vm15, %v7492_v14  ;;  %5665 = vmatprep.mubr.msk.f32.mxu1 %vm8281_vm7, %v8280_v48  ;;  %vm8284_vm15 = vnez %v8074_v27  ;;  %vm8290_vm7 = vmmov %vm8267_vm0  ;;  %v8295_v27 = vld [vmem:[#allocation42_spill] sm:$0xff] }
 0x109   : > { %5929 = vmatprep.mubr.msk.f32.mxu0 %vm8282_vm6, %v7496_v24  ;;  %v8286_v29 = vsel %vm8284_vm15, %v8285_v58, 0.0  ;;  %vm8292_vm6 = vmmov %vm8267_vm0  ;;  %v3710_v48 = vld [vmem:[%s6514_s10 + $0x119] sm:$0xff] }
 0x10a   : > { %vm8301_vm15 = vmmov %vm8287_vm5  ;;  %v8305_v58 = vld [vmem:[#allocation47_spill] sm:$0xff] }
 0x10b   : > { %5666 = vmatmul.mubr.msk.f32.gmra.mrb[8].mxu1 %vm8267_vm0, %v6981_v4  ;;  %v8291_v4 = vld [vmem:[#allocation9_spill] sm:$0xff]  ;;  %vm8294_vm0 = vnez %v8293_v7  ;;  %vm8308_vm10 = vmmov %vm8287_vm5 }
 0x10c   : > { %5930 = vmatmul.mubr.msk.f32.gmra.mrb[24].mxu0 %vm8283_vm12, %v7510_v53  ;;  %5668 = vmatprep.mubr.msk.f32.mxu1 %vm8287_vm5, %v8286_v29  ;;  %v8296_v43 = vsel %vm8294_vm0, %v8295_v27, 0.0  ;;  %vm8297_vm12 = vmmov %vm8287_vm5  ;;  %v4072_v7 = vld [vmem:[%s6514_s10 + $0x2a] sm:$0xff]  ;;  %v4101_v29 = vld [vmem:[%s6514_s10 + $0x112] sm:$0xff] }
 0x10d   : > { %5932 = vmatprep.mubr.msk.f32.mxu0 %vm8289_vm14, %v8288_v47  ;;  %vm8302_vm14 = vmmov %vm8287_vm5  ;;  %v2063_v47 = vsel %vm7037_vm8, %v8305_v58, 0.0  ;;  %v8307_v27 = vld [vmem:[#allocation48_spill] sm:$0xff] }
 0x10e   : > { %vm8309_vm0 = vmmov %vm8287_vm5  ;;  %v4100_v58 = vld [vmem:[%s6514_s10 + $0x10a] sm:$0xff] }
 0x10f   : > { %5669 = vmatmul.mubr.msk.f32.gmra.mrb[10].mxu1 %vm8290_vm7, %v7017_v61  ;;  %v3709_v61 = vld [vmem:[%s6514_s10 + $0x111] sm:$0xff]  ;;  %vm8303_vm7 = vmmov %vm8287_vm5 }
 0x110   : > { %5933 = vmatmul.mubr.msk.f32.gmra.mrb[26].mxu0 %vm8292_vm6, %v8291_v4  ;;  %5671 = vmatprep.mubr.msk.f32.mxu1 %vm8297_vm12, %v8296_v43  ;;  %vm8304_vm6 = vmmov %vm8287_vm5  ;;  %v4071_v4 = vld [vmem:[%s6514_s10 + $0x22] sm:$0xff]  ;;  %v4104_v43 = vsel %vm6589_vm1, %v4072_v7, 0.0 }
 0x111   : > { %5935 = vmatprep.mubr.msk.f32.mxu0 %vm8287_vm5, %v7524_v44  ;;  %vm8310_vm12 = vmmov %vm8309_vm0 }
 0x112   : > { %vm8311_vm5 = vmmov %vm8309_vm0 }
 0x113   : > { %5672 = vmatmul.mubr.msk.f32.gmra.mrb[12].mxu1 %vm8301_vm15, %v8300_v11  ;;  %vm8313_vm8 = vmmov %vm8309_vm0  ;;  %v4075_v11 = vld [vmem:[%s6514_s10 + $0x42] sm:$0xff] }
 0x114   : > { %5936 = vmatmul.mubr.msk.f32.gmra.mrb[28].mxu0 %vm8302_vm14, %v7538_v52  ;;  %5674 = vmatprep.mubr.msk.f32.mxu1 %vm8303_vm7, %v2061_v12  ;;  %v4073_v12 = vld [vmem:[%s6514_s10 + $0x32] sm:$0xff]  ;;  %vm8314_vm15 = vmmov %vm8309_vm0 }
 0x115   : > { %5938 = vmatprep.mubr.msk.f32.mxu0 %vm8304_vm6, %v3709_v61  ;;  %v4074_v61 = vld [vmem:[%s6514_s10 + $0x3a] sm:$0xff]  ;;  %vm8315_vm14 = vmmov %vm8309_vm0  ;;  %vm8317_vm6 = vnez %v8010_v13 }
 0x116   : > { %vm8316_vm7 = vmmov %vm8309_vm0  ;;  %v4106_v2 = vsel %vm8317_vm6, %v4074_v61, 0.0 }
 0x117   : > { %5675 = vmatmul.mubr.msk.f32.gmra.mrb[14].mxu1 %vm8308_vm10, %v8307_v27  ;;  %vm8318_vm1 = vmmov %vm8309_vm0 }
 0x118   : > { %5939 = vmatmul.mubr.msk.f32.gmra.mrb[30].mxu0 %vm8309_vm0, %v3710_v48  ;;  %5677 = vmatprep.mubr.msk.f32.mxu1 %vm8310_vm12, %v2063_v47  ;;  %v4076_v48 = vld [vmem:[%s6514_s10 + $0x4a] sm:$0xff]  ;;  %vm8319_vm4 = vmmov %vm8309_vm0  ;;  %v4102_v47 = vld [vmem:[%s6514_s10 + $0x11a] sm:$0xff] }
 0x119   : > { %5953 = vmatprep.mubr.msk.f32.mxu0 %vm8311_vm5, %v4071_v4  ;;  %vm8320_vm10 = vmmov %vm8309_vm0  ;;  %v4108_v13 = vsel %vm8163_vm2, %v4076_v48, 0.0  ;;  %vm8326_vm2 = vnez %v8132_v39  ;;  %v2073_v39 = vsel %vm7154_vm13, %v7183_v17, 0.0  ;;  %v2075_v17 = vsel %vm7178_vm11, %v7205_v60, 0.0  ;;  %v4086_v60 = vld [vmem:[%s6514_s10 + $0x9a] sm:$0xff] }
 0x11a   : > { %vm8321_vm3 = vmmov %vm8309_vm0  ;;  %v2071_v16 = vsel %vm8326_vm2, %v7159_v10, 0.0  ;;  %v4082_v10 = vld [vmem:[%s6514_s10 + $0x7a] sm:$0xff]  ;;  %vm8340_vm2 = vnez %v8020_v63 }
 0x11b   : > { %5678 = vmatmul.mubr.msk.f32.gmra.mrb[16].mxu1 %vm8313_vm8, %v7096_v49  ;;  %v4077_v49 = vld [vmem:[%s6514_s10 + $0x52] sm:$0xff]  ;;  %vm8322_vm12 = vmmov %vm8309_vm0 }
 0x11c   : > { %5954 = vmatmul.mubr.msk.f32.vlgmr.msra.gmra.mrb[0].mxu0 %vm8314_vm15, %v4104_v43  ;;  %5680 = vmatprep.mubr.msk.f32.mxu1 %vm8315_vm14, %v2065_v42  ;;  %vm8323_vm5 = vmmov %vm8309_vm0  ;;  %vm8325_vm15 = vnez %v8014_v36 }
 0x11d   : > { %5956 = vmatprep.mubr.msk.f32.mxu0 %vm8316_vm7, %v4073_v12  ;;  %vm8324_vm8 = vmmov %vm8309_vm0  ;;  %v4110_v25 = vsel %vm8325_vm15, %v4078_v57, 0.0 }
 0x11e   : > { %vm8327_vm9 = vmmov %vm8309_vm0 }
 0x11f   : > { %5681 = vmatmul.mubr.msk.f32.gmra.mrb[18].mxu1 %vm8318_vm1, %v7120_v34  ;;  %v4080_v34 = vld [vmem:[%s6514_s10 + $0x6a] sm:$0xff]  ;;  %vm8328_vm14 = vmmov %vm8309_vm0  ;;  %vm8331_vm1 = vnez %v8016_v45 }
 0x120   : > { %5957 = vmatmul.mubr.msk.f32.gmra.mrb[2].mxu0 %vm8319_vm4, %v4106_v2  ;;  %5683 = vmatprep.mubr.msk.f32.mxu1 %vm8320_vm10, %v2067_v50  ;;  %vm8329_vm7 = vmmov %vm8309_vm0  ;;  %v4112_v36 = vsel %vm8331_vm1, %v4080_v34, 0.0  ;;  %vm8346_vm1 = vnez %v8023_v20  ;;  %v4089_v20 = vld [vmem:[%s6514_s10 + $0xb2] sm:$0xff] }
 0x121   : > { %5959 = vmatprep.mubr.msk.f32.mxu0 %vm8309_vm0, %v4075_v11  ;;  %vm8330_vm6 = vmmov %vm8309_vm0  ;;  %v4118_v63 = vsel %vm8346_vm1, %v4086_v60, 0.0 }
 0x122   : > { %vm8332_vm4 = vmmov %vm8309_vm0 }
 0x123   : > { %5684 = vmatmul.mubr.msk.f32.gmra.mrb[20].mxu1 %vm8321_vm3, %v7145_v38  ;;  %v4081_v38 = vld [vmem:[%s6514_s10 + $0x72] sm:$0xff]  ;;  %vm8333_vm10 = vmmov %vm8309_vm0 }
 0x124   : > { %5960 = vmatmul.mubr.msk.f32.gmra.mrb[4].mxu0 %vm8322_vm12, %v4108_v13  ;;  %5686 = vmatprep.mubr.msk.f32.mxu1 %vm8323_vm5, %v2069_v41  ;;  %vm8334_vm3 = vmmov %vm8309_vm0  ;;  %vm8335_vm12 = vnez %v8018_v54 }
 0x125   : > { %5962 = vmatprep.mubr.msk.f32.mxu0 %vm8324_vm8, %v4077_v49  ;;  %v4114_v45 = vsel %vm8335_vm12, %v4082_v10, 0.0  ;;  %vm8336_vm13 = vmmov %vm8309_vm0  ;;  %vm8350_vm12 = vnez %v8189_v62  ;;  %v4091_v62 = vld [vmem:[%s6514_s10 + $0xc2] sm:$0xff] }
 0x126   : > { %vm8337_vm5 = vmmov %vm8309_vm0 }
 0x127   : > { %5687 = vmatmul.mubr.msk.f32.gmra.mrb[22].mxu1 %vm8327_vm9, %v7169_v22  ;;  %v4084_v22 = vld [vmem:[%s6514_s10 + $0x8a] sm:$0xff]  ;;  %vm8338_vm8 = vmmov %vm8309_vm0  ;;  %vm8341_vm9 = vnez %v8147_v19  ;;  %v4087_v19 = vld [vmem:[%s6514_s10 + $0xa2] sm:$0xff] }
 0x128   : > { %5963 = vmatmul.mubr.msk.f32.gmra.mrb[6].mxu0 %vm8328_vm14, %v4110_v25  ;;  %5689 = vmatprep.mubr.msk.f32.mxu1 %vm8329_vm7, %v2071_v16  ;;  %vm8339_vm15 = vmmov %vm8309_vm0  ;;  %v4116_v54 = vsel %vm8340_vm2, %v4084_v22, 0.0  ;;  %v2077_v59 = vsel %vm8341_vm9, %v7299_v5, 0.0  ;;  %v4090_v5 = vld [vmem:[%s6514_s10 + $0xba] sm:$0xff]  ;;  %vm8355_vm2 = vnez %v8196_v3  ;;  %v4093_v3 = vld [vmem:[%s6514_s10 + $0xd2] sm:$0xff] }
 0x129   : > { %5965 = vmatprep.mubr.msk.f32.mxu0 %vm8330_vm6, %v4079_v28  ;;  %vm8342_vm11 = vmmov %vm8309_vm0 }
 0x12a   : > { %vm8343_vm14 = vmmov %vm8309_vm0 }
 0x12b   : > { %5690 = vmatmul.mubr.msk.f32.gmra.mrb[24].mxu1 %vm8332_vm4, %v7191_v9  ;;  %v4085_v9 = vld [vmem:[%s6514_s10 + $0x92] sm:$0xff]  ;;  %vm8344_vm7 = vmmov %vm8309_vm0 }
 0x12c   : > { %5966 = vmatmul.mubr.msk.f32.gmra.mrb[8].mxu0 %vm8333_vm10, %v4112_v36  ;;  %5692 = vmatprep.mubr.msk.f32.mxu1 %vm8309_vm0, %v2073_v39  ;;  %vm8345_vm6 = vmmov %vm8309_vm0 }
 0x12d   : > { %5968 = vmatprep.mubr.msk.f32.mxu0 %vm8334_vm3, %v4081_v38  ;;  %vm8347_vm4 = vmmov %vm8309_vm0 }
 0x12e   : > { %vm8348_vm10 = vmmov %vm8309_vm0 }
 0x12f   : > { %5693 = vmatmul.mubr.msk.f32.gmra.mrb[26].mxu1 %vm8336_vm13, %v7213_v56  ;;  %v4088_v56 = vld [vmem:[%s6514_s10 + $0xaa] sm:$0xff]  ;;  %vm8349_vm3 = vmmov %vm8309_vm0 }
 0x130   : > { %5969 = vmatmul.mubr.msk.f32.gmra.mrb[10].mxu0 %vm8337_vm5, %v4114_v45  ;;  %5695 = vmatprep.mubr.msk.f32.mxu1 %vm8338_vm8, %v2075_v17  ;;  %vm8351_vm13 = vmmov %vm8309_vm0 }
 0x131   : > { %5971 = vmatprep.mubr.msk.f32.mxu0 %vm8339_vm15, %v4083_v40  ;;  %vm8352_vm5 = vmmov %vm8309_vm0 }
 0x132   : > { %vm8353_vm8 = vmmov %vm8309_vm0 }
 0x133   : > { %5696 = vmatmul.mubr.msk.f32.gmra.mrb[28].mxu1 %vm8342_vm11, %v7228_v15  ;;  %v4120_v15 = vsel %vm8350_vm12, %v4088_v56, 0.0  ;;  %vm8354_vm15 = vmmov %vm8309_vm0 }
 0x134   : > { %5972 = vmatmul.mubr.msk.f32.gmra.mrb[12].mxu0 %vm8343_vm14, %v4116_v54  ;;  %5698 = vmatprep.mubr.msk.f32.mxu1 %vm8344_vm7, %v2077_v59  ;;  %vm8356_vm9 = vmmov %vm8309_vm0 }
 0x135   : > { %5974 = vmatprep.mubr.msk.f32.mxu0 %vm8345_vm6, %v4085_v9  ;;  %vm8357_vm11 = vmmov %vm8309_vm0  ;;  %vm8360_vm6 = vnez %v8203_v37  ;;  %v4095_v37 = vld [vmem:[%s6514_s10 + $0xe2] sm:$0xff] }
 0x136   : > { %vm8358_vm14 = vmmov %vm8309_vm0 }
 0x137   : > { %5699 = vmatmul.mubr.msk.f32.gmra.mrb[30].mxu1 %vm8347_vm4, %v7323_v46  ;;  %v4122_v46 = vsel %vm8355_vm2, %v4090_v5, 0.0  ;;  %vm8359_vm7 = vmmov %vm8309_vm0 }
 0x138   : > { %5975 = vmatmul.mubr.msk.f32.gmra.mrb[14].mxu0 %vm8348_vm10, %v4118_v63  ;;  %5737 = vmatprep.mubr.msk.f32.mxu1 %vm8309_vm0, %v7409_v32  ;;  %v4092_v32 = vld [vmem:[%s6514_s10 + $0xca] sm:$0xff]  ;;  %vm8361_vm1 = vmmov %vm8309_vm0 }
 0x139   : > { %5977 = vmatprep.mubr.msk.f32.mxu0 %vm8349_vm3, %v4087_v19  ;;  %vm8362_vm4 = vmmov %vm8309_vm0  ;;  %vm8364_vm3 = vnez %v8211_v55 }
 0x13a   : > { %vm8363_vm10 = vmmov %vm8309_vm0 }
 0x13b   : > { %5738 = vmatmul.mubr.msk.f32.vlgmr.msra.gmra.mrb[16].mxu1 %vm8351_vm13, %v7421_v6  ;;  %v4124_v6 = vsel %vm8360_vm6, %v4092_v32, 0.0  ;;  %vm8365_vm12 = vmmov %vm8309_vm0 }
 0x13c   : > { %5978 = vmatmul.mubr.msk.f32.gmra.mrb[16].mxu0 %vm8352_vm5, %v4120_v15  ;;  %5740 = vmatprep.mubr.msk.f32.mxu1 %vm8353_vm8, %v7424_v0  ;;  %v4094_v0 = vld [vmem:[%s6514_s10 + $0xda] sm:$0xff]  ;;  %vm8366_vm13 = vmmov %vm8309_vm0 }
 0x13d   : > { %5980 = vmatprep.mubr.msk.f32.mxu0 %vm8354_vm15, %v4089_v20  ;;  %vm8367_vm5 = vmmov %vm8309_vm0  ;;  %vm8369_vm15 = vnez %v8218_v30  ;;  %v4099_v30 = vld [vmem:[%s6514_s10 + $0x102] sm:$0xff] }
 0x13e   : > { %vm8368_vm8 = vmmov %vm8309_vm0 }
 0x13f   : > { %5741 = vmatmul.mubr.msk.f32.gmra.mrb[18].mxu1 %vm8356_vm9, %v7437_v1  ;;  %v4126_v1 = vsel %vm8364_vm3, %v4094_v0, 0.0  ;;  %vm8370_vm2 = vmmov %vm8309_vm0 }
 0x140   : > { %5981 = vmatmul.mubr.msk.f32.gmra.mrb[18].mxu0 %vm8357_vm11, %v4122_v46  ;;  %5743 = vmatprep.mubr.msk.f32.mxu1 %vm8358_vm14, %v7440_v18  ;;  %v4096_v18 = vld [vmem:[%s6514_s10 + $0xea] sm:$0xff]  ;;  %vm8371_vm9 = vmmov %vm8309_vm0 }
 0x141   : > { %5983 = vmatprep.mubr.msk.f32.mxu0 %vm8359_vm7, %v4091_v62  ;;  %v4128_v55 = vsel %vm8369_vm15, %v4096_v18, 0.0  ;;  %vm8372_vm11 = vmmov %vm8309_vm0  ;;  %vm8374_vm7 = vnez %v8226_v21 }
 0x142   : > { %vm8373_vm14 = vmmov %vm8309_vm0 }
 0x143   : > { %5744 = vmatmul.mubr.msk.f32.gmra.mrb[20].mxu1 %vm8361_vm1, %v7455_v26  ;;  %v4097_v26 = vld [vmem:[%s6514_s10 + $0xf2] sm:$0xff]  ;;  %vm8375_vm6 = vmmov %vm8309_vm0 }
 0x144   : > { %5984 = vmatmul.mubr.msk.f32.gmra.mrb[20].mxu0 %vm8362_vm4, %v4124_v6  ;;  %5746 = vmatprep.mubr.msk.f32.mxu1 %vm8363_vm10, %v7458_v35  ;;  %v4098_v35 = vld [vmem:[%s6514_s10 + $0xfa] sm:$0xff]  ;;  %vm8376_vm1 = vmmov %vm8309_vm0 }
 0x145   : > { %5986 = vmatprep.mubr.msk.f32.mxu0 %vm8309_vm0, %v4093_v3  ;;  %vm8377_vm4 = vmmov %vm8309_vm0 }
 0x146   : > { %vm8378_vm10 = vmmov %vm8309_vm0  ;;  %vm8379_vm0 = vnez %v8234_v8 }
 0x147   : > { %5747 = vmatmul.mubr.msk.f32.gmra.mrb[22].mxu1 %vm8365_vm12, %v7473_v23  ;;  %v4130_v23 = vsel %vm8374_vm7, %v4098_v35, 0.0  ;;  %vm8380_vm3 = vmmov %vm8376_vm1 }
 0x148   : > { %5987 = vmatmul.mubr.msk.f32.gmra.mrb[22].mxu0 %vm8366_vm13, %v4126_v1  ;;  %5749 = vmatprep.mubr.msk.f32.mxu1 %vm8367_vm5, %v7477_v33  ;;  %v2467_v33 = vld [vmem:[%s6514_s10 + $0xf1] sm:$0xff]  ;;  %vm8381_vm12 = vmmov %vm8376_vm1 }
 0x149   : > { %5989 = vmatprep.mubr.msk.f32.mxu0 %vm8368_vm8, %v4095_v37  ;;  %vm8382_vm13 = vmmov %vm8376_vm1  ;;  %vm8384_vm8 = vnez %v8241_v51 }
 0x14a   : > { %vm8383_vm5 = vmmov %vm8376_vm1  ;;  %v4134_v21 = vsel %vm8384_vm8, %v4102_v47, 0.0 }
 0x14b   : > { %5750 = vmatmul.mubr.msk.f32.gmra.mrb[24].mxu1 %vm8370_vm2, %v7492_v14  ;;  %v2468_v14 = vld [vmem:[%s6514_s10 + $0xf9] sm:$0xff]  ;;  %vm8385_vm15 = vmmov %vm8376_vm1 }
 0x14c   : > { %5990 = vmatmul.mubr.msk.f32.gmra.mrb[24].mxu0 %vm8371_vm9, %v4128_v55  ;;  %5752 = vmatprep.mubr.msk.f32.mxu1 %vm8372_vm11, %v7496_v24  ;;  %v4132_v24 = vsel %vm8379_vm0, %v4100_v58, 0.0  ;;  %vm8386_vm2 = vmmov %vm8376_vm1  ;;  %vm4495_vm9 = vcmask 523264   ;;  %vm4597_vm11 = vcmask 516096  }
 0x14d   : > { %5992 = vmatprep.mubr.msk.f32.mxu0 %vm8373_vm14, %v4097_v26 }
 0x14f   : > { %5753 = vmatmul.mubr.msk.f32.gmra.mrb[26].mxu1 %vm8375_vm6, %v7510_v53 }
 0x150   : > { %5993 = vmatmul.mubr.msk.f32.gmra.mrb[26].mxu0 %vm8376_vm1, %v4130_v23  ;;  %5755 = vmatprep.mubr.msk.f32.mxu1 %vm8377_vm4, %v2467_v33 }
 0x151   : > { %5995 = vmatprep.mubr.msk.f32.mxu0 %vm8378_vm10, %v4099_v30 }
 0x153   : > { %5756 = vmatmul.mubr.msk.f32.gmra.mrb[28].mxu1 %vm8380_vm3, %v2468_v14 }
 0x154   : > { %5996 = vmatmul.mubr.msk.f32.gmra.mrb[28].mxu0 %vm8381_vm12, %v4132_v24  ;;  %5758 = vmatprep.mubr.msk.f32.mxu1 %vm8382_vm13, %v7524_v44 }
 0x155   : > { %5998 = vmatprep.mubr.msk.f32.mxu0 %vm8383_vm5, %v4101_v29 }
 0x157   : > { %5759 = vmatmul.mubr.msk.f32.gmra.mrb[30].mxu1 %vm8385_vm15, %v7538_v52 }
 0x158   : > { %5999 = vmatmul.mubr.msk.f32.gmra.mrb[30].mxu0 %vm8386_vm2, %v4134_v21 }
 0x1ce   : > { %v5655_v8 = vpop.f32.mrb[0].mxu1 }
 0x1cf   : > { %v2248_v53 = vpop.f32.mrb[1].mxu1 }
 0x1d2   : > { %v5658_v4 = vpop.f32.mrb[2].mxu1 }
 0x1d3   : > { %v2258_v7 = vpop.f32.mrb[3].mxu1 }
 0x1d6   : > { %v5661_v27 = vpop.f32.mrb[4].mxu1 }
 0x1d7   : > { %v2268_v43 = vpop.f32.mrb[5].mxu1 }
 0x1da   : > { %v5664_v31 = vpop.f32.mrb[6].mxu1 }
 0x1db   : > { %v2278_v42 = vpop.f32.mrb[7].mxu1 }
 0x1de   : > { %v7730_v44 = vpop.f32.mrb[8].mxu1 }
 0x1df   : > { %v7732_v12 = vpop.f32.mrb[9].mxu1 }
 0x1e2   : > { %v7734_v51 = vpop.f32.mrb[10].mxu1 }
 0x1e3   : > { %v7736_v61 = vpop.f32.mrb[11].mxu1 }
 0x1e6   : > { %v7738_v52 = vpop.f32.mrb[12].mxu1 }
 0x1e7   : > { %v7740_v2 = vpop.f32.mrb[13].mxu1 }
 0x1ea   : > { %v7742_v50 = vpop.f32.mrb[14].mxu1 }
 0x1eb   : > { %v7744_v11 = vpop.f32.mrb[15].mxu1 }
 0x1ef   : > { %v5955_v48 = vpop.f32.mrb[0].mxu0 }
 0x1f0   : > { %v6115_v13 = vadd.f32 %v5955_v48, %v5655_v8  ;;  %v4304_v41 = vpop.f32.mrb[1].mxu0 }
 0x1f1   : > { %v6116_v49 = vadd.f32 %v4304_v41, %v2248_v53 }
 0x1f2   : > { %4497 = vst.msk [vmem:[%s7750_s14 + $0x8] sm:$0xff] %vm4495_vm9, %v6115_v13  ;;  %v4529_v57 = vsel %vm4495_vm9, %v6115_v13, 0.0  ;;  %v4600_v25 = vmul.f32 %v6115_v13, %v6115_v13 }
 0x1f3   : > { %4496 = vst.msk [vmem:[%s7750_s14] sm:$0xff] %vm4495_vm9, %v6116_v49  ;;  %v4528_v16 = vsel %vm4495_vm9, %v6116_v49, 0.0  ;;  %v4599_v28 = vmul.f32 %v6116_v49, %v6116_v49  ;;  %v5958_v34 = vpop.f32.mrb[2].mxu0 }
 0x1f4   : > { %v4632_v36 = vsel %vm4495_vm9, %v4600_v25, 0.0  ;;  %v4530_v39 = vadd.f32 %v4529_v57, %v4528_v16  ;;  %v6117_v38 = vadd.f32 %v5958_v34, %v5658_v4  ;;  %v4314_v10 = vpop.f32.mrb[3].mxu0 }
 0x1f5   : > { %v4631_v45 = vsel %vm4495_vm9, %v4599_v28, 0.0  ;;  %v6118_v17 = vadd.f32 %v4314_v10, %v2258_v7 }
 0x1f6   : > { %v4633_v40 = vadd.f32 %v4632_v36, %v4631_v45  ;;  %4499 = vst.msk [vmem:[%s7750_s14 + $0x18] sm:$0xff] %vm4495_vm9, %v6117_v38  ;;  %v4602_v22 = vmul.f32 %v6117_v38, %v6117_v38  ;;  %v4533_v56 = vsel %vm4495_vm9, %v6117_v38, 0.0 }
 0x1f7   : > { %4498 = vst.msk [vmem:[%s7750_s14 + $0x10] sm:$0xff] %vm4495_vm9, %v6118_v17  ;;  %v4531_v54 = vsel %vm4495_vm9, %v6118_v17, 0.0  ;;  %v4601_v59 = vmul.f32 %v6118_v17, %v6118_v17  ;;  %v5961_v9 = vpop.f32.mrb[4].mxu0 }
 0x1f8   : > { %v4532_v60 = vadd.f32 %v4531_v54, %v4530_v39  ;;  %v6119_v63 = vadd.f32 %v5961_v9, %v5661_v27  ;;  %v4324_v19 = vpop.f32.mrb[5].mxu0  ;;  %v4636_v62 = vsel %vm4495_vm9, %v4602_v22, 0.0 }
 0x1f9   : > { %v4634_v15 = vsel %vm4495_vm9, %v4601_v59, 0.0  ;;  %v6120_v20 = vadd.f32 %v4324_v19, %v2268_v43 }
 0x1fa   : > { %v4635_v5 = vadd.f32 %v4634_v15, %v4633_v40  ;;  %4501 = vst.msk [vmem:[%s7750_s14 + $0x28] sm:$0xff] %vm4495_vm9, %v6119_v63  ;;  %v4534_v46 = vadd.f32 %v4533_v56, %v4532_v60  ;;  %v4604_v32 = vmul.f32 %v6119_v63, %v6119_v63  ;;  %v4537_v26 = vsel %vm4495_vm9, %v6119_v63, 0.0 }
 0x1fb   : > { %4500 = vst.msk [vmem:[%s7750_s14 + $0x20] sm:$0xff] %vm4495_vm9, %v6120_v20  ;;  %v4535_v6 = vsel %vm4495_vm9, %v6120_v20, 0.0  ;;  %v4603_v3 = vmul.f32 %v6120_v20, %v6120_v20  ;;  %v5964_v0 = vpop.f32.mrb[6].mxu0 }
 0x1fc   : > { %v4536_v1 = vadd.f32 %v4535_v6, %v4534_v46  ;;  %v4637_v37 = vadd.f32 %v4636_v62, %v4635_v5  ;;  %v6121_v18 = vadd.f32 %v5964_v0, %v5664_v31  ;;  %v4334_v55 = vpop.f32.mrb[7].mxu0  ;;  %v4640_v58 = vsel %vm4495_vm9, %v4604_v32, 0.0 }
 0x1fd   : > { %v4638_v35 = vsel %vm4495_vm9, %v4603_v3, 0.0  ;;  %v6122_v23 = vadd.f32 %v4334_v55, %v2278_v42 }
 0x1fe   : > { %v4639_v33 = vadd.f32 %v4638_v35, %v4637_v37  ;;  %4503 = vst.msk [vmem:[%s7750_s14 + $0x38] sm:$0xff] %vm4495_vm9, %v6121_v18  ;;  %v4538_v30 = vadd.f32 %v4537_v26, %v4536_v1  ;;  %v4606_v14 = vmul.f32 %v6121_v18, %v6121_v18  ;;  %v4541_v7 = vsel %vm4495_vm9, %v6121_v18, 0.0 }
 0x1ff   : > { %4502 = vst.msk [vmem:[%s7750_s14 + $0x30] sm:$0xff] %vm4495_vm9, %v6122_v23  ;;  %v4539_v24 = vsel %vm4495_vm9, %v6122_v23, 0.0  ;;  %v4605_v29 = vmul.f32 %v6122_v23, %v6122_v23  ;;  %v5967_v47 = vpop.f32.mrb[8].mxu0 }
 0x200   : > { %v4540_v21 = vadd.f32 %v4539_v24, %v4538_v30  ;;  %v4641_v8 = vadd.f32 %v4640_v58, %v4639_v33  ;;  %v6123_v53 = vadd.f32 %v5967_v47, %v7730_v44  ;;  %v4344_v4 = vpop.f32.mrb[9].mxu0  ;;  %v4644_v48 = vsel %vm4495_vm9, %v4606_v14, 0.0 }
 0x201   : > { %v4642_v27 = vsel %vm4495_vm9, %v4605_v29, 0.0  ;;  %v6124_v43 = vadd.f32 %v4344_v4, %v7732_v12 }
 0x202   : > { %v4643_v31 = vadd.f32 %v4642_v27, %v4641_v8  ;;  %4505 = vst.msk [vmem:[%s7750_s14 + $0x48] sm:$0xff] %vm4495_vm9, %v6123_v53  ;;  %v4542_v42 = vadd.f32 %v4541_v7, %v4540_v21  ;;  %v4608_v13 = vmul.f32 %v6123_v53, %v6123_v53  ;;  %v4545_v28 = vsel %vm4495_vm9, %v6123_v53, 0.0 }
 0x203   : > { %4504 = vst.msk [vmem:[%s7750_s14 + $0x40] sm:$0xff] %vm4495_vm9, %v6124_v43  ;;  %v4543_v44 = vsel %vm4495_vm9, %v6124_v43, 0.0  ;;  %v4607_v41 = vmul.f32 %v6124_v43, %v6124_v43  ;;  %v5970_v49 = vpop.f32.mrb[10].mxu0 }
 0x204   : > { %v4544_v57 = vadd.f32 %v4543_v44, %v4542_v42  ;;  %v4645_v25 = vadd.f32 %v4644_v48, %v4643_v31  ;;  %v6125_v16 = vadd.f32 %v5970_v49, %v7734_v51  ;;  %v4354_v12 = vpop.f32.mrb[11].mxu0  ;;  %v4648_v10 = vsel %vm4495_vm9, %v4608_v13, 0.0 }
 0x205   : > { %v4646_v34 = vsel %vm4495_vm9, %v4607_v41, 0.0  ;;  %v6126_v36 = vadd.f32 %v4354_v12, %v7736_v61 }
 0x206   : > { %v4647_v39 = vadd.f32 %v4646_v34, %v4645_v25  ;;  %4507 = vst.msk [vmem:[%s7750_s14 + $0x58] sm:$0xff] %vm4495_vm9, %v6125_v16  ;;  %v4546_v38 = vadd.f32 %v4545_v28, %v4544_v57  ;;  %v4610_v45 = vmul.f32 %v6125_v16, %v6125_v16  ;;  %v4549_v9 = vsel %vm4495_vm9, %v6125_v16, 0.0 }
 0x207   : > { %4506 = vst.msk [vmem:[%s7750_s14 + $0x50] sm:$0xff] %vm4495_vm9, %v6126_v36  ;;  %v4547_v51 = vsel %vm4495_vm9, %v6126_v36, 0.0  ;;  %v4609_v17 = vmul.f32 %v6126_v36, %v6126_v36  ;;  %v5973_v40 = vpop.f32.mrb[12].mxu0 }
 0x208   : > { %v4548_v22 = vadd.f32 %v4547_v51, %v4546_v38  ;;  %v4649_v54 = vadd.f32 %v4648_v10, %v4647_v39  ;;  %v6127_v59 = vadd.f32 %v5973_v40, %v7738_v52  ;;  %v4364_v61 = vpop.f32.mrb[13].mxu0  ;;  %v4652_v15 = vsel %vm4495_vm9, %v4610_v45, 0.0 }
 0x209   : > { %v4650_v60 = vsel %vm4495_vm9, %v4609_v17, 0.0  ;;  %v6128_v63 = vadd.f32 %v4364_v61, %v7740_v2 }
 0x20a   : > { %v4651_v19 = vadd.f32 %v4650_v60, %v4649_v54  ;;  %4509 = vst.msk [vmem:[%s7750_s14 + $0x68] sm:$0xff] %vm4495_vm9, %v6127_v59  ;;  %v4550_v56 = vadd.f32 %v4549_v9, %v4548_v22  ;;  %v4612_v20 = vmul.f32 %v6127_v59, %v6127_v59  ;;  %v4553_v3 = vsel %vm4495_vm9, %v6127_v59, 0.0 }
 0x20b   : > { %4508 = vst.msk [vmem:[%s7750_s14 + $0x60] sm:$0xff] %vm4495_vm9, %v6128_v63  ;;  %v4551_v5 = vsel %vm4495_vm9, %v6128_v63, 0.0  ;;  %v4611_v52 = vmul.f32 %v6128_v63, %v6128_v63  ;;  %v5976_v46 = vpop.f32.mrb[14].mxu0 }
 0x20c   : > { %v4552_v62 = vadd.f32 %v4551_v5, %v4550_v56  ;;  %v4653_v32 = vadd.f32 %v4652_v15, %v4651_v19  ;;  %v6129_v6 = vadd.f32 %v5976_v46, %v7742_v50  ;;  %v4374_v2 = vpop.f32.mrb[15].mxu0  ;;  %v4656_v26 = vsel %vm4495_vm9, %v4612_v20, 0.0 }
 0x20d   : > { %v4654_v0 = vsel %vm4495_vm9, %v4611_v52, 0.0  ;;  %v6130_v1 = vadd.f32 %v4374_v2, %v7744_v11 }
 0x20e   : > { %v4655_v37 = vadd.f32 %v4654_v0, %v4653_v32  ;;  %4511 = vst.msk [vmem:[%s7750_s14 + $0x78] sm:$0xff] %vm4495_vm9, %v6129_v6  ;;  %v4554_v18 = vadd.f32 %v4553_v3, %v4552_v62  ;;  %v5739_v55 = vpop.f32.mrb[16].mxu1  ;;  %v4614_v35 = vmul.f32 %v6129_v6, %v6129_v6  ;;  %v4557_v29 = vsel %vm4495_vm9, %v6129_v6, 0.0 }
 0x20f   : > { %4510 = vst.msk [vmem:[%s7750_s14 + $0x70] sm:$0xff] %vm4495_vm9, %v6130_v1  ;;  %v4555_v50 = vsel %vm4495_vm9, %v6130_v1, 0.0  ;;  %v4613_v23 = vmul.f32 %v6130_v1, %v6130_v1  ;;  %v5979_v33 = vpop.f32.mrb[16].mxu0  ;;  %v2720_v30 = vpop.f32.mrb[17].mxu1 }
 0x210   : > { %v4556_v58 = vadd.f32 %v4555_v50, %v4554_v18  ;;  %v4657_v14 = vadd.f32 %v4656_v26, %v4655_v37  ;;  %v6131_v11 = vadd.f32 %v5979_v33, %v5739_v55  ;;  %v4384_v24 = vpop.f32.mrb[17].mxu0  ;;  %v4660_v7 = vsel %vm4495_vm9, %v4614_v35, 0.0 }
 0x211   : > { %v4658_v47 = vsel %vm4495_vm9, %v4613_v23, 0.0  ;;  %v6132_v21 = vadd.f32 %v4384_v24, %v2720_v30 }
 0x212   : > { %v4659_v8 = vadd.f32 %v4658_v47, %v4657_v14  ;;  %4513 = vst.msk [vmem:[%s7750_s14 + $0x88] sm:$0xff] %vm4495_vm9, %v6131_v11  ;;  %v4558_v53 = vadd.f32 %v4557_v29, %v4556_v58  ;;  %v5742_v4 = vpop.f32.mrb[18].mxu1  ;;  %v4616_v27 = vmul.f32 %v6131_v11, %v6131_v11  ;;  %v4561_v57 = vsel %vm4495_vm9, %v6131_v11, 0.0 }
 0x213   : > { %4512 = vst.msk [vmem:[%s7750_s14 + $0x80] sm:$0xff] %vm4495_vm9, %v6132_v21  ;;  %v4559_v43 = vsel %vm4495_vm9, %v6132_v21, 0.0  ;;  %v4615_v31 = vmul.f32 %v6132_v21, %v6132_v21  ;;  %v5982_v42 = vpop.f32.mrb[18].mxu0  ;;  %v2730_v48 = vpop.f32.mrb[19].mxu1 }
 0x214   : > { %v4560_v13 = vadd.f32 %v4559_v43, %v4558_v53  ;;  %v4661_v44 = vadd.f32 %v4660_v7, %v4659_v8  ;;  %v6133_v41 = vadd.f32 %v5982_v42, %v5742_v4  ;;  %v4394_v49 = vpop.f32.mrb[19].mxu0  ;;  %v4664_v36 = vsel %vm4495_vm9, %v4616_v27, 0.0 }
 0x215   : > { %v4662_v25 = vsel %vm4495_vm9, %v4615_v31, 0.0  ;;  %v6134_v16 = vadd.f32 %v4394_v49, %v2730_v48 }
 0x216   : > { %v4663_v12 = vadd.f32 %v4662_v25, %v4661_v44  ;;  %4515 = vst.msk [vmem:[%s7750_s14 + $0x98] sm:$0xff] %vm4495_vm9, %v6133_v41  ;;  %v4562_v28 = vadd.f32 %v4561_v57, %v4560_v13  ;;  %v5745_v34 = vpop.f32.mrb[20].mxu1  ;;  %v4618_v39 = vmul.f32 %v6133_v41, %v6133_v41  ;;  %v4565_v59 = vsel %vm4495_vm9, %v6133_v41, 0.0 }
 0x217   : > { %4514 = vst.msk [vmem:[%s7750_s14 + $0x90] sm:$0xff] %vm4495_vm9, %v6134_v16  ;;  %v4563_v38 = vsel %vm4495_vm9, %v6134_v16, 0.0  ;;  %v4617_v10 = vmul.f32 %v6134_v16, %v6134_v16  ;;  %v5985_v45 = vpop.f32.mrb[20].mxu0  ;;  %v2740_v51 = vpop.f32.mrb[21].mxu1 }
 0x218   : > { %v4564_v17 = vadd.f32 %v4563_v38, %v4562_v28  ;;  %v4665_v40 = vadd.f32 %v4664_v36, %v4663_v12  ;;  %v6135_v22 = vadd.f32 %v5985_v45, %v5745_v34  ;;  %v4404_v54 = vpop.f32.mrb[21].mxu0  ;;  %v4668_v56 = vsel %vm4495_vm9, %v4618_v39, 0.0 }
 0x219   : > { %v4666_v61 = vsel %vm4495_vm9, %v4617_v10, 0.0  ;;  %v6136_v9 = vadd.f32 %v4404_v54, %v2740_v51 }
 0x21a   : > { %v4667_v60 = vadd.f32 %v4666_v61, %v4665_v40  ;;  %4517 = vst.msk [vmem:[%s7750_s14 + $0xa8] sm:$0xff] %vm4495_vm9, %v6135_v22  ;;  %v4566_v63 = vadd.f32 %v4565_v59, %v4564_v17  ;;  %v5748_v19 = vpop.f32.mrb[22].mxu1  ;;  %v4620_v15 = vmul.f32 %v6135_v22, %v6135_v22  ;;  %v4569_v3 = vsel %vm4495_vm9, %v6135_v22, 0.0 }
 0x21b   : > { %4516 = vst.msk [vmem:[%s7750_s14 + $0xa0] sm:$0xff] %vm4495_vm9, %v6136_v9  ;;  %v4567_v20 = vsel %vm4495_vm9, %v6136_v9, 0.0  ;;  %v4619_v5 = vmul.f32 %v6136_v9, %v6136_v9  ;;  %v5988_v52 = vpop.f32.mrb[22].mxu0  ;;  %v2750_v46 = vpop.f32.mrb[23].mxu1 }
 0x21c   : > { %v4568_v62 = vadd.f32 %v4567_v20, %v4566_v63  ;;  %v4669_v32 = vadd.f32 %v4668_v56, %v4667_v60  ;;  %v6137_v6 = vadd.f32 %v5988_v52, %v5748_v19  ;;  %v4414_v2 = vpop.f32.mrb[23].mxu0  ;;  %v4672_v26 = vsel %vm4495_vm9, %v4620_v15, 0.0 }
 0x21d   : > { %v4670_v0 = vsel %vm4495_vm9, %v4619_v5, 0.0  ;;  %v6138_v1 = vadd.f32 %v4414_v2, %v2750_v46 }
 0x21e   : > { %v4671_v37 = vadd.f32 %v4670_v0, %v4669_v32  ;;  %4519 = vst.msk [vmem:[%s7750_s14 + $0xb8] sm:$0xff] %vm4495_vm9, %v6137_v6  ;;  %v4570_v18 = vadd.f32 %v4569_v3, %v4568_v62  ;;  %v5751_v55 = vpop.f32.mrb[24].mxu1  ;;  %v4622_v35 = vmul.f32 %v6137_v6, %v6137_v6  ;;  %v4573_v29 = vsel %vm4495_vm9, %v6137_v6, 0.0 }
 0x21f   : > { %4518 = vst.msk [vmem:[%s7750_s14 + $0xb0] sm:$0xff] %vm4495_vm9, %v6138_v1  ;;  %v4571_v50 = vsel %vm4495_vm9, %v6138_v1, 0.0  ;;  %v4621_v23 = vmul.f32 %v6138_v1, %v6138_v1  ;;  %v5991_v33 = vpop.f32.mrb[24].mxu0  ;;  %v2760_v30 = vpop.f32.mrb[25].mxu1 }
 0x220   : > { %v4572_v58 = vadd.f32 %v4571_v50, %v4570_v18  ;;  %v4673_v14 = vadd.f32 %v4672_v26, %v4671_v37  ;;  %v6139_v11 = vadd.f32 %v5991_v33, %v5751_v55  ;;  %v4424_v24 = vpop.f32.mrb[25].mxu0  ;;  %v4676_v7 = vsel %vm4495_vm9, %v4622_v35, 0.0 }
 0x221   : > { %v4674_v47 = vsel %vm4495_vm9, %v4621_v23, 0.0  ;;  %v6140_v21 = vadd.f32 %v4424_v24, %v2760_v30 }
 0x222   : > { %v4675_v8 = vadd.f32 %v4674_v47, %v4673_v14  ;;  %4521 = vst.msk [vmem:[%s7750_s14 + $0xc8] sm:$0xff] %vm4495_vm9, %v6139_v11  ;;  %v4574_v53 = vadd.f32 %v4573_v29, %v4572_v58  ;;  %v5754_v4 = vpop.f32.mrb[26].mxu1  ;;  %v4624_v27 = vmul.f32 %v6139_v11, %v6139_v11  ;;  %v4577_v57 = vsel %vm4495_vm9, %v6139_v11, 0.0 }
 0x223   : > { %4520 = vst.msk [vmem:[%s7750_s14 + $0xc0] sm:$0xff] %vm4495_vm9, %v6140_v21  ;;  %v4575_v43 = vsel %vm4495_vm9, %v6140_v21, 0.0  ;;  %v4623_v31 = vmul.f32 %v6140_v21, %v6140_v21  ;;  %v5994_v42 = vpop.f32.mrb[26].mxu0  ;;  %v2770_v48 = vpop.f32.mrb[27].mxu1 }
 0x224   : > { %v4576_v13 = vadd.f32 %v4575_v43, %v4574_v53  ;;  %v4677_v44 = vadd.f32 %v4676_v7, %v4675_v8  ;;  %v6141_v41 = vadd.f32 %v5994_v42, %v5754_v4  ;;  %v4434_v49 = vpop.f32.mrb[27].mxu0  ;;  %v4680_v36 = vsel %vm4495_vm9, %v4624_v27, 0.0 }
 0x225   : > { %v4678_v25 = vsel %vm4495_vm9, %v4623_v31, 0.0  ;;  %v6142_v16 = vadd.f32 %v4434_v49, %v2770_v48 }
 0x226   : > { %v4679_v12 = vadd.f32 %v4678_v25, %v4677_v44  ;;  %4523 = vst.msk [vmem:[%s7750_s14 + $0xd8] sm:$0xff] %vm4495_vm9, %v6141_v41  ;;  %v4578_v28 = vadd.f32 %v4577_v57, %v4576_v13  ;;  %v5757_v34 = vpop.f32.mrb[28].mxu1  ;;  %v4626_v39 = vmul.f32 %v6141_v41, %v6141_v41  ;;  %v4581_v59 = vsel %vm4495_vm9, %v6141_v41, 0.0 }
 0x227   : > { %4522 = vst.msk [vmem:[%s7750_s14 + $0xd0] sm:$0xff] %vm4495_vm9, %v6142_v16  ;;  %v4579_v38 = vsel %vm4495_vm9, %v6142_v16, 0.0  ;;  %v4625_v10 = vmul.f32 %v6142_v16, %v6142_v16  ;;  %v5997_v45 = vpop.f32.mrb[28].mxu0  ;;  %v2780_v51 = vpop.f32.mrb[29].mxu1 }
 0x228   : > { %v4580_v17 = vadd.f32 %v4579_v38, %v4578_v28  ;;  %v4681_v40 = vadd.f32 %v4680_v36, %v4679_v12  ;;  %v6143_v22 = vadd.f32 %v5997_v45, %v5757_v34  ;;  %v4444_v54 = vpop.f32.mrb[29].mxu0  ;;  %v4684_v56 = vsel %vm4495_vm9, %v4626_v39, 0.0 }
 0x229   : > { %v4682_v61 = vsel %vm4495_vm9, %v4625_v10, 0.0  ;;  %v6144_v9 = vadd.f32 %v4444_v54, %v2780_v51 }
 0x22a   : > { %v4683_v60 = vadd.f32 %v4682_v61, %v4681_v40  ;;  %4525 = vst.msk [vmem:[%s7750_s14 + $0xe8] sm:$0xff] %vm4495_vm9, %v6143_v22  ;;  %v4582_v63 = vadd.f32 %v4581_v59, %v4580_v17  ;;  %v5760_v19 = vpop.f32.mrb[30].mxu1  ;;  %v4628_v15 = vmul.f32 %v6143_v22, %v6143_v22  ;;  %v4585_v3 = vsel %vm4495_vm9, %v6143_v22, 0.0 }
 0x22b   : > { %4524 = vst.msk [vmem:[%s7750_s14 + $0xe0] sm:$0xff] %vm4495_vm9, %v6144_v9  ;;  %v4583_v20 = vsel %vm4495_vm9, %v6144_v9, 0.0  ;;  %v4627_v5 = vmul.f32 %v6144_v9, %v6144_v9  ;;  %v6000_v52 = vpop.f32.mrb[30].mxu0  ;;  %v2790_v46 = vpop.f32.mrb[31].mxu1 }
 0x22c   : > { %v4584_v62 = vadd.f32 %v4583_v20, %v4582_v63  ;;  %v4685_v32 = vadd.f32 %v4684_v56, %v4683_v60  ;;  %v6145_v6 = vadd.f32 %v6000_v52, %v5760_v19  ;;  %v4454_v2 = vpop.f32.mrb[31].mxu0  ;;  %v4688_v26 = vsel %vm4495_vm9, %v4628_v15, 0.0 }
 0x22d   : > { %v4686_v0 = vsel %vm4495_vm9, %v4627_v5, 0.0  ;;  %v6146_v1 = vadd.f32 %v4454_v2, %v2790_v46 }
 0x22e   : > { %v4687_v37 = vadd.f32 %v4686_v0, %v4685_v32  ;;  %4527 = vst.msk [vmem:[%s7750_s14 + $0xf8] sm:$0xff] %vm4495_vm9, %v6145_v6  ;;  %v4630_v18 = vmul.f32 %v6145_v6, %v6145_v6  ;;  %v4586_v55 = vadd.f32 %v4585_v3, %v4584_v62  ;;  %v4589_v58 = vsel %vm4495_vm9, %v6145_v6, 0.0 }
 0x22f   : > { %4526 = vst.msk [vmem:[%s7750_s14 + $0xf0] sm:$0xff] %vm4495_vm9, %v6146_v1  ;;  %v4587_v35 = vsel %vm4495_vm9, %v6146_v1, 0.0  ;;  %v4629_v50 = vmul.f32 %v6146_v1, %v6146_v1 }
 0x230   : > { %v4692_v23 = vsel %vm4495_vm9, %v4630_v18, 0.0  ;;  %v4588_v33 = vadd.f32 %v4587_v35, %v4586_v55  ;;  %v4689_v30 = vadd.f32 %v4688_v26, %v4687_v37 }
 0x231   : > { %v4690_v14 = vsel %vm4495_vm9, %v4629_v50, 0.0 }
 0x232   : > { %v4590_v11 = vadd.f32 %v4589_v58, %v4588_v33  ;;  %v4691_v24 = vadd.f32 %v4690_v14, %v4689_v30 }
 0x234   : > { %v4591_v29 = vrot.slane %v4590_v11, 4  ;;  %v4693_v47 = vadd.f32 %v4692_v23, %v4691_v24 }
 0x236   : > { %v4592_v21 = vadd.f32 %v4591_v29, %v4590_v11  ;;  %v4694_v8 = vrot.slane %v4693_v47, 4 }
 0x238   : > { %v4593_v53 = vrot.slane %v4592_v21, 2  ;;  %v4695_v4 = vadd.f32 %v4694_v8, %v4693_v47 }
 0x23a   : > { %v4594_v7 = vadd.f32 %v4593_v53, %v4592_v21  ;;  %v4696_v27 = vrot.slane %v4695_v4, 2 }
 0x23c   : > { %v4595_v43 = vrot.slane %v4594_v7, 1  ;;  %v4697_v31 = vadd.f32 %v4696_v27, %v4695_v4 }
 0x23e   : > { %v4596_v42 = vadd.f32 %v4595_v43, %v4594_v7  ;;  %v4698_v48 = vrot.slane %v4697_v31, 1 }
 0x240   : > { %4598 = vst.msk [vmem:[%s226_s19] sm:$0x1] %vm4597_vm11, %v4596_v42  ;;  %v4699_v13 = vadd.f32 %v4698_v48, %v4697_v31 }
 0x242   : > { %4700 = vst.msk [vmem:[%s229_s22] sm:$0x1] %vm4597_vm11, %v4699_v13 }
 0x243 PF: > { %s16_s15 = sadd.s32 1, %s6431_s15  }
 0x244   : > { %p13_p3 = scmp.ge.s32.totalorder %s16_s15, 4  }
 0x246   :  { %15 = sbr.rel (!%p13_p3) target bundleno = 1 (0x1), region = 95 }
 0x24d   :  { %4746 = vsyncpa [#allocation3], 1 }
 0x24e   :  { %4748 = vsyncpa [#allocation3 + $0x1], 1 }

// kernel: encoder_forward.12
= control target key start
LH: loop header
LB: loop body
LE: loop exit
PB: predicated region body
PF: predicated region fallthrough
CT: control target
= control target key end

     0   :  { %10 = vsyncpa [#allocation3], 0  ;;  %s1985_s15 = smov 0   ;;  %s2151_s0 = inlined_call_operand.vmem [shape: f32[2,26,128], index: 0, kind: input, shape index: {}]   ;;  %s2152_s1 = inlined_call_operand.hbm [shape: f32[9,128,256], index: 1, kind: input, shape index: {}]   ;;  %s2153_s2 = inlined_call_operand.vmem [shape: f32[2,16,256], index: 2, kind: output, shape index: {0}]   ;;  %s2154_s3 = inlined_call_operand.vmem [shape: f32[2,1,256], index: 3, kind: output, shape index: {1}]   ;;  %s2155_s4 = inlined_call_operand.vmem [shape: f32[2,1,256], index: 4, kind: output, shape index: {2}]  }
   0x1 LB: > { %s1991_s16 = sadd.s32 4294967295, %s1953_s15   ;;  %p1529_p0 = scmp.ge.s32.totalorder %s1953_s15, 1  ;;  %s1953_s15 = sphi %s1985_s15, %s16_s15  }
   0x2   : > { %p146_p1 = scmp.lt.s32.totalorder %s1953_s15, 3  ;;  %s1955_s17 = smov [#allocation2]  }
   0x3   : > { %s158_s18 = sshll.u32 %s1955_s17, 4  ;;  %p2156_p3 = scmp.eq.s32.totalorder %s1991_s16, 0  ;;  %s159_s18 = int_to_ptr.vmem [resolvable:$true] %s158_s18 }
   0x4   : > { %p1995_p2 = pnand %p1529_p0, %p146_p1  ;;  %s1915_s23 = scalar_lea.hbm %s2152_s1, 36864 }
   0x5   : > { %p1916_p6 = scmp.ne.s32.totalorder %s2152_s1, %s1915_s23  ;;  %p1922_p10 = scmp.lt.u32.totalorder %s1915_s23, %s2152_s1 }
   0x6   : > { %s2158_s19 = scalar_select %p1995_p2, 1, 0 }
   0x7   : > { %p1896_p4 = pneg %p1995_p2 }
   0x9   : > { %p2004_p5 = pnand %p2156_p3, %p1896_p4 }
   0xb   : > { %p1917_p7 = pneg %p2004_p5 }
   0xd   : > { %p1918_p8 = pnand %p1917_p7, %p1916_p6 }
   0xf   : > { %p1919_p9 = pneg %p1918_p8 }
  0x11   : > { %p1924_p11 = pnand %p1922_p10, %p1919_p9 }
  0x13   : > { %1927 = shalt.err (!%p1924_p11)
}
  0x14   : > { %s1928_s28 = scalar_lea.vmem %s159_s18, 36864  ;;  %p1936_p1 = scmp.lt.s32.totalorder %s159_s18, %s159_s18 }
  0x15   : > { %p1929_p12 = scmp.ne.s32.totalorder %s159_s18, %s1928_s28  ;;  %p1937_p4 = scmp.lt.s32.totalorder %s1928_s28, %s1928_s28 }
  0x17   : > { %p1931_p13 = pnand %p1929_p12, %p1917_p7  ;;  %p1938_p3 = por %p1937_p4, %p1936_p1 }
  0x19   : > { %p1932_p0 = pneg %p1931_p13 }
  0x1b   : > { %p1939_p2 = pnand %p1938_p3, %p1932_p0 }
  0x1d   : > { %1942 = shalt.err (!%p1939_p2)
}
  0x1e   : > { %s1956_s29 = smov 256   ;;  %s1957_s30 = smov 16  }
  0x1f   : > { %1899 = dma.hbm_to_vmem [thread:$0]  (!%p2004_p5), %s2152_s1, 36864, %s159_s18, [#allocation3], %s1956_s29, %s1956_s29, %s1957_s30  }
  0x20   : > { %p2160_p6 = scmp.ne.s32.totalorder %s2158_s19, 0 }
  0x21   : > { %p2161_p8 = scmp.eq.s32.totalorder (!%p2160_p6), %s1991_s16, 0 }
  0x22   : > { %182 = sbr.rel (%p2160_p6) target bundleno = 445 (0x1bd), region = 28 }
  0x29   : > { %1948 = dma.done.wait (%p2161_p8), [#allocation3], 36864   ;;  %p2162_p7 = pmov %p2161_p8 }
  0x2a   : > { %v1958_v0 = vmov 0.0   ;;  %v309_v1 = vld [vmem:[#allocation2 + $0x108] sm:$0xff]  ;;  %v311_v2 = vld [vmem:[#allocation2 + $0x118] sm:$0xff]  ;;  %v308_v6 = vld [vmem:[#allocation2 + $0x100] sm:$0xff]  ;;  %p216_p2 = scmp.lt.s32.totalorder %s1991_s16, 1 }
  0x2b   : > { %1950 = vsyncadd (%p2162_p7), [#allocation3], 4294930432  ;;  %404 = vmatprep.mubr.f32.mxu1 %v1958_v0  ;;  %833 = vmatprep.mubr.f32.mxu0 %v1958_v0  ;;  %v738_v3 = vld [vmem:[#allocation2 + $0x408] sm:$0xff]  ;;  %v1556_v4 = vpack.c.bf16 %v311_v2, %v309_v1  ;;  %v740_v5 = vld [vmem:[#allocation2 + $0x418] sm:$0xff] }
  0x2c   : > { %v310_v7 = vld [vmem:[#allocation2 + $0x110] sm:$0xff]  ;;  %v1684_v8 = vpack.c.bf16 %v740_v5, %v738_v3  ;;  %v737_v10 = vld [vmem:[#allocation2 + $0x400] sm:$0xff]  ;;  %v313_v12 = vld [vmem:[#allocation2 + $0x128] sm:$0xff]  ;;  %s2172_s16 = smov (!%p216_p2, %s1991_s16), 1 }
  0x2d   : > { %v1558_v9 = vpack.c.bf16 %v310_v7, %v308_v6  ;;  %v739_v11 = vld [vmem:[#allocation2 + $0x410] sm:$0xff]  ;;  %1557 = vmatprep.subr.bf16.mxu1 %v1556_v4  ;;  %v315_v14 = vld [vmem:[#allocation2 + $0x138] sm:$0xff]  ;;  %v742_v15 = vld [vmem:[#allocation2 + $0x428] sm:$0xff]  ;;  %s1554_s7 = sshll.u32 %s2172_s16, 5  ;;  %s1538_s14 = sshll.u32 %s2172_s16, 1 }
  0x2e   : > { %v1686_v13 = vpack.c.bf16 %v739_v11, %v737_v10  ;;  %v744_v16 = vld [vmem:[#allocation2 + $0x438] sm:$0xff]  ;;  %1685 = vmatprep.subr.bf16.mxu0 %v1684_v8  ;;  %v1560_v17 = vpack.c.bf16 %v315_v14, %v313_v12  ;;  %v312_v19 = vld [vmem:[#allocation2 + $0x120] sm:$0xff]  ;;  %v314_v20 = vld [vmem:[#allocation2 + $0x130] sm:$0xff]  ;;  %s2044_s10 = scalar_lea.vmem %s2151_s0, %s1554_s7  ;;  %s225_s13 = scalar_lea.vmem %s2153_s2, %s1554_s7 }
  0x2f   : > { %1559 = vmatpush1.bf16.msra.mxu1 %v1558_v9  ;;  %v1688_v18 = vpack.c.bf16 %v744_v16, %v742_v15  ;;  %v741_v21 = vld [vmem:[#allocation2 + $0x420] sm:$0xff]  ;;  %v1562_v22 = vpack.c.bf16 %v314_v20, %v312_v19  ;;  %v743_v23 = vld [vmem:[#allocation2 + $0x430] sm:$0xff]  ;;  %v317_v24 = vld [vmem:[#allocation2 + $0x148] sm:$0xff]  ;;  %s229_s19 = scalar_lea.vmem %s2154_s3, %s1538_s14  ;;  %s233_s22 = scalar_lea.vmem %s2155_s4, %s1538_s14 }
  0x30   : > { %1687 = vmatpush1.bf16.msra.mxu0 %v1686_v13  ;;  %v319_v25 = vld [vmem:[#allocation2 + $0x158] sm:$0xff]  ;;  %1561 = vmatprep.subr.bf16.mxu1 %v1560_v17  ;;  %v1690_v26 = vpack.c.bf16 %v743_v23, %v741_v21  ;;  %v746_v28 = vld [vmem:[#allocation2 + $0x448] sm:$0xff]  ;;  %v316_v30 = vld [vmem:[#allocation2 + $0x140] sm:$0xff] }
  0x31   : > { %1689 = vmatprep.subr.bf16.mxu0 %v1688_v18  ;;  %v1564_v27 = vpack.c.bf16 %v319_v25, %v317_v24  ;;  %v748_v29 = vld [vmem:[#allocation2 + $0x458] sm:$0xff]  ;;  %v318_v32 = vld [vmem:[#allocation2 + $0x150] sm:$0xff]  ;;  %v745_v33 = vld [vmem:[#allocation2 + $0x440] sm:$0xff] }
  0x32   : > { %v1692_v31 = vpack.c.bf16 %v748_v29, %v746_v28  ;;  %v747_v34 = vld [vmem:[#allocation2 + $0x450] sm:$0xff]  ;;  %v1566_v35 = vpack.c.bf16 %v318_v32, %v316_v30  ;;  %v321_v36 = vld [vmem:[#allocation2 + $0x168] sm:$0xff]  ;;  %v323_v37 = vld [vmem:[#allocation2 + $0x178] sm:$0xff] }
  0x33   : > { %1563 = vmatpush1.bf16.msra.mxu1 %v1562_v22  ;;  %v750_v38 = vld [vmem:[#allocation2 + $0x468] sm:$0xff]  ;;  %v1694_v39 = vpack.c.bf16 %v747_v34, %v745_v33  ;;  %v1568_v40 = vpack.c.bf16 %v323_v37, %v321_v36  ;;  %v752_v41 = vld [vmem:[#allocation2 + $0x478] sm:$0xff]  ;;  %v320_v42 = vld [vmem:[#allocation2 + $0x160] sm:$0xff] }
  0x34   : > { %1691 = vmatpush1.bf16.msra.mxu0 %v1690_v26  ;;  %1565 = vmatprep.subr.bf16.mxu1 %v1564_v27  ;;  %v322_v43 = vld [vmem:[#allocation2 + $0x170] sm:$0xff]  ;;  %v1696_v44 = vpack.c.bf16 %v752_v41, %v750_v38  ;;  %v749_v45 = vld [vmem:[#allocation2 + $0x460] sm:$0xff]  ;;  %v325_v47 = vld [vmem:[#allocation2 + $0x188] sm:$0xff] }
  0x35   : > { %1693 = vmatprep.subr.bf16.mxu0 %v1692_v31  ;;  %v751_v46 = vld [vmem:[#allocation2 + $0x470] sm:$0xff]  ;;  %v327_v48 = vld [vmem:[#allocation2 + $0x198] sm:$0xff]  ;;  %v754_v49 = vld [vmem:[#allocation2 + $0x488] sm:$0xff]  ;;  %v1570_v51 = vpack.c.bf16 %v322_v43, %v320_v42 }
  0x36   : > { %v756_v50 = vld [vmem:[#allocation2 + $0x498] sm:$0xff]  ;;  %v1698_v52 = vpack.c.bf16 %v751_v46, %v749_v45  ;;  %v1572_v53 = vpack.c.bf16 %v327_v48, %v325_v47  ;;  %v324_v54 = vld [vmem:[#allocation2 + $0x180] sm:$0xff]  ;;  %v326_v55 = vld [vmem:[#allocation2 + $0x190] sm:$0xff] }
  0x37   : > { %1567 = vmatpush1.bf16.msra.mxu1 %v1566_v35  ;;  %v753_v56 = vld [vmem:[#allocation2 + $0x480] sm:$0xff]  ;;  %v1700_v57 = vpack.c.bf16 %v756_v50, %v754_v49  ;;  %v755_v58 = vld [vmem:[#allocation2 + $0x490] sm:$0xff]  ;;  %v329_v59 = vld [vmem:[#allocation2 + $0x1a8] sm:$0xff]  ;;  %v1574_v63 = vpack.c.bf16 %v326_v55, %v324_v54 }
  0x38   : > { %1695 = vmatpush1.bf16.msra.mxu0 %v1694_v39  ;;  %1569 = vmatprep.subr.bf16.mxu1 %v1568_v40  ;;  %v331_v60 = vld [vmem:[#allocation2 + $0x1b8] sm:$0xff]  ;;  %v758_v61 = vld [vmem:[#allocation2 + $0x4a8] sm:$0xff]  ;;  %v1702_v1 = vpack.c.bf16 %v755_v58, %v753_v56  ;;  %v328_v3 = vld [vmem:[#allocation2 + $0x1a0] sm:$0xff] }
  0x39   : > { %1697 = vmatprep.subr.bf16.mxu0 %v1696_v44  ;;  %v760_v62 = vld [vmem:[#allocation2 + $0x4b8] sm:$0xff]  ;;  %v1576_v2 = vpack.c.bf16 %v331_v60, %v329_v59  ;;  %v330_v4 = vld [vmem:[#allocation2 + $0x1b0] sm:$0xff]  ;;  %v757_v5 = vld [vmem:[#allocation2 + $0x4a0] sm:$0xff] }
  0x3a   : > { %v1704_v6 = vpack.c.bf16 %v760_v62, %v758_v61  ;;  %v759_v7 = vld [vmem:[#allocation2 + $0x4b0] sm:$0xff]  ;;  %v333_v8 = vld [vmem:[#allocation2 + $0x1c8] sm:$0xff]  ;;  %v335_v9 = vld [vmem:[#allocation2 + $0x1d8] sm:$0xff]  ;;  %v1578_v12 = vpack.c.bf16 %v330_v4, %v328_v3 }
  0x3b   : > { %1571 = vmatpush1.bf16.msra.mxu1 %v1570_v51  ;;  %v762_v10 = vld [vmem:[#allocation2 + $0x4c8] sm:$0xff]  ;;  %v764_v11 = vld [vmem:[#allocation2 + $0x4d8] sm:$0xff]  ;;  %v1706_v13 = vpack.c.bf16 %v759_v7, %v757_v5  ;;  %v1580_v14 = vpack.c.bf16 %v335_v9, %v333_v8  ;;  %v332_v15 = vld [vmem:[#allocation2 + $0x1c0] sm:$0xff] }
  0x3c   : > { %1699 = vmatpush1.bf16.msra.mxu0 %v1698_v52  ;;  %1573 = vmatprep.subr.bf16.mxu1 %v1572_v53  ;;  %v334_v16 = vld [vmem:[#allocation2 + $0x1d0] sm:$0xff]  ;;  %v761_v17 = vld [vmem:[#allocation2 + $0x4c0] sm:$0xff]  ;;  %v1708_v18 = vpack.c.bf16 %v764_v11, %v762_v10  ;;  %v337_v20 = vld [vmem:[#allocation2 + $0x1e8] sm:$0xff] }
  0x3d   : > { %1701 = vmatprep.subr.bf16.mxu0 %v1700_v57  ;;  %v763_v19 = vld [vmem:[#allocation2 + $0x4d0] sm:$0xff]  ;;  %v339_v21 = vld [vmem:[#allocation2 + $0x1f8] sm:$0xff]  ;;  %v766_v22 = vld [vmem:[#allocation2 + $0x4e8] sm:$0xff]  ;;  %v1582_v24 = vpack.c.bf16 %v334_v16, %v332_v15 }
  0x3e   : > { %v768_v23 = vld [vmem:[#allocation2 + $0x4f8] sm:$0xff]  ;;  %v1710_v25 = vpack.c.bf16 %v763_v19, %v761_v17  ;;  %v1584_v26 = vpack.c.bf16 %v339_v21, %v337_v20  ;;  %v336_v27 = vld [vmem:[#allocation2 + $0x1e0] sm:$0xff]  ;;  %v338_v28 = vld [vmem:[#allocation2 + $0x1f0] sm:$0xff] }
  0x3f   : > { %1575 = vmatpush1.bf16.msra.mxu1 %v1574_v63  ;;  %v765_v29 = vld [vmem:[#allocation2 + $0x4e0] sm:$0xff]  ;;  %v1712_v30 = vpack.c.bf16 %v768_v23, %v766_v22  ;;  %v767_v31 = vld [vmem:[#allocation2 + $0x4f0] sm:$0xff]  ;;  %v274_v32 = vld [vmem:[#allocation2 + $0x8] sm:$0xff]  ;;  %v1586_v36 = vpack.c.bf16 %v338_v28, %v336_v27 }
  0x40   : > { %1703 = vmatpush1.bf16.msra.mxu0 %v1702_v1  ;;  %1577 = vmatprep.subr.bf16.mxu1 %v1576_v2  ;;  %v276_v33 = vld [vmem:[#allocation2 + $0x18] sm:$0xff]  ;;  %v856_v34 = vld [vmem:[#allocation2 + $0x508] sm:$0xff]  ;;  %v1714_v37 = vpack.c.bf16 %v767_v31, %v765_v29  ;;  %v273_v39 = vld [vmem:[#allocation2] sm:$0xff] }
  0x41   : > { %1705 = vmatprep.subr.bf16.mxu0 %v1704_v6  ;;  %v858_v35 = vld [vmem:[#allocation2 + $0x518] sm:$0xff]  ;;  %v1588_v38 = vpack.c.bf16 %v276_v33, %v274_v32  ;;  %v275_v40 = vld [vmem:[#allocation2 + $0x10] sm:$0xff]  ;;  %v855_v41 = vld [vmem:[#allocation2 + $0x500] sm:$0xff] }
  0x42   : > { %v1716_v42 = vpack.c.bf16 %v858_v35, %v856_v34  ;;  %v857_v43 = vld [vmem:[#allocation2 + $0x510] sm:$0xff]  ;;  %v278_v44 = vld [vmem:[#allocation2 + $0x28] sm:$0xff]  ;;  %v280_v45 = vld [vmem:[#allocation2 + $0x38] sm:$0xff]  ;;  %v1590_v49 = vpack.c.bf16 %v275_v40, %v273_v39 }
  0x43   : > { %1579 = vmatpush1.bf16.msra.mxu1 %v1578_v12  ;;  %v860_v46 = vld [vmem:[#allocation2 + $0x528] sm:$0xff]  ;;  %v862_v47 = vld [vmem:[#allocation2 + $0x538] sm:$0xff]  ;;  %v1718_v51 = vpack.c.bf16 %v857_v43, %v855_v41  ;;  %v1592_v52 = vpack.c.bf16 %v280_v45, %v278_v44  ;;  %v277_v53 = vld [vmem:[#allocation2 + $0x20] sm:$0xff] }
  0x44   : > { %1707 = vmatpush1.bf16.msra.mxu0 %v1706_v13  ;;  %1581 = vmatprep.subr.bf16.mxu1 %v1580_v14  ;;  %v305_v48 = vld [vmem:[%s2044_s10 + $0x1] sm:$0xff]  ;;  %v279_v54 = vld [vmem:[#allocation2 + $0x30] sm:$0xff]  ;;  %v1720_v56 = vpack.c.bf16 %v862_v47, %v860_v46  ;;  %v284_v59 = vld [vmem:[#allocation2 + $0x58] sm:$0xff] }
  0x45   : > { %1709 = vmatprep.subr.bf16.mxu0 %v1708_v18  ;;  %v734_v50 = vld [vmem:[%s2044_s10 + $0x5] sm:$0xff]  ;;  %v861_v57 = vld [vmem:[#allocation2 + $0x530] sm:$0xff]  ;;  %v866_v61 = vld [vmem:[#allocation2 + $0x558] sm:$0xff]  ;;  %v1594_v62 = vpack.c.bf16 %v279_v54, %v277_v53 }
  0x46   : > { %v859_v55 = vld [vmem:[#allocation2 + $0x520] sm:$0xff]  ;;  %v282_v58 = vld [vmem:[#allocation2 + $0x48] sm:$0xff]  ;;  %v283_v3 = vld [vmem:[#allocation2 + $0x50] sm:$0xff] }
  0x47   : > { %1583 = vmatpush1.bf16.msra.mxu1 %v1582_v24  ;;  %v864_v60 = vld [vmem:[#allocation2 + $0x548] sm:$0xff]  ;;  %v1722_v63 = vpack.c.bf16 %v861_v57, %v859_v55  ;;  %v1596_v1 = vpack.c.bf16 %v284_v59, %v282_v58  ;;  %v281_v2 = vld [vmem:[#allocation2 + $0x40] sm:$0xff]  ;;  %v865_v6 = vld [vmem:[#allocation2 + $0x550] sm:$0xff] }
  0x48   : > { %1711 = vmatpush1.bf16.msra.mxu0 %v1710_v25  ;;  %1585 = vmatprep.subr.bf16.mxu1 %v1584_v26  ;;  %v863_v4 = vld [vmem:[#allocation2 + $0x540] sm:$0xff]  ;;  %v1724_v5 = vpack.c.bf16 %v866_v61, %v864_v60  ;;  %v286_v7 = vld [vmem:[#allocation2 + $0x68] sm:$0xff]  ;;  %v288_v8 = vld [vmem:[#allocation2 + $0x78] sm:$0xff]  ;;  %v1598_v11 = vpack.c.bf16 %v283_v3, %v281_v2 }
  0x49   : > { %1713 = vmatprep.subr.bf16.mxu0 %v1712_v30  ;;  %v868_v9 = vld [vmem:[#allocation2 + $0x568] sm:$0xff]  ;;  %v870_v10 = vld [vmem:[#allocation2 + $0x578] sm:$0xff]  ;;  %v285_v12 = vld [vmem:[#allocation2 + $0x60] sm:$0xff]  ;;  %v1726_v13 = vpack.c.bf16 %v865_v6, %v863_v4  ;;  %v1600_v14 = vpack.c.bf16 %v288_v8, %v286_v7 }
  0x4a   : > { %v287_v15 = vld [vmem:[#allocation2 + $0x70] sm:$0xff]  ;;  %v867_v16 = vld [vmem:[#allocation2 + $0x560] sm:$0xff]  ;;  %v1728_v18 = vpack.c.bf16 %v870_v10, %v868_v9  ;;  %v290_v19 = vld [vmem:[#allocation2 + $0x88] sm:$0xff] }
  0x4b   : > { %1587 = vmatpush1.bf16.msra.mxu1 %v1586_v36  ;;  %v869_v17 = vld [vmem:[#allocation2 + $0x570] sm:$0xff]  ;;  %v292_v20 = vld [vmem:[#allocation2 + $0x98] sm:$0xff]  ;;  %v872_v22 = vld [vmem:[#allocation2 + $0x588] sm:$0xff]  ;;  %v1602_v25 = vpack.c.bf16 %v287_v15, %v285_v12 }
  0x4c   : > { %1715 = vmatpush1.bf16.msra.mxu0 %v1714_v37  ;;  %1589 = vmatprep.subr.bf16.mxu1 %v1588_v38  ;;  %v2051_v21 = vld [vmem:[%s2044_s10 + $0x9] sm:$0xff]  ;;  %v874_v23 = vld [vmem:[#allocation2 + $0x598] sm:$0xff]  ;;  %v1730_v26 = vpack.c.bf16 %v869_v17, %v867_v16  ;;  %v1604_v27 = vpack.c.bf16 %v292_v20, %v290_v19  ;;  %v289_v28 = vld [vmem:[#allocation2 + $0x80] sm:$0xff] }
  0x4d   : > { %1717 = vmatprep.subr.bf16.mxu0 %v1716_v42  ;;  %v735_v24 = vld [vmem:[%s2044_s10 + $0xd] sm:$0xff]  ;;  %v871_v30 = vld [vmem:[#allocation2 + $0x580] sm:$0xff]  ;;  %v1732_v31 = vpack.c.bf16 %v874_v23, %v872_v22  ;;  %v296_v34 = vld [vmem:[#allocation2 + $0xb8] sm:$0xff] }
  0x4e   : > { %405 = vmatmul.mubr.f32.vlgmr.msra.gmra.mrb[0].mxu1 %v305_v48  ;;  %v291_v29 = vld [vmem:[#allocation2 + $0x90] sm:$0xff]  ;;  %v294_v33 = vld [vmem:[#allocation2 + $0xa8] sm:$0xff]  ;;  %v878_v36 = vld [vmem:[#allocation2 + $0x5b8] sm:$0xff] }
  0x4f   : > { %1591 = vmatpush1.bf16.msra.mxu1 %v1590_v49  ;;  %834 = vmatmul.mubr.f32.vlgmr.msra.gmra.mrb[0].mxu0 %v734_v50  ;;  %v873_v32 = vld [vmem:[#allocation2 + $0x590] sm:$0xff]  ;;  %v876_v35 = vld [vmem:[#allocation2 + $0x5a8] sm:$0xff]  ;;  %v1606_v37 = vpack.c.bf16 %v291_v29, %v289_v28  ;;  %v1608_v39 = vpack.c.bf16 %v296_v34, %v294_v33  ;;  %v293_v40 = vld [vmem:[#allocation2 + $0xa0] sm:$0xff]  ;;  %v234_v50 = vlaneseq }
  0x50   : > { %1719 = vmatpush1.bf16.msra.mxu0 %v1718_v51  ;;  %1593 = vmatprep.subr.bf16.mxu1 %v1592_v52  ;;  %v1734_v38 = vpack.c.bf16 %v873_v32, %v871_v30  ;;  %v295_v41 = vld [vmem:[#allocation2 + $0xb0] sm:$0xff]  ;;  %v875_v42 = vld [vmem:[#allocation2 + $0x5a0] sm:$0xff]  ;;  %v1736_v43 = vpack.c.bf16 %v878_v36, %v876_v35  ;;  %v298_v45 = vld [vmem:[#allocation2 + $0xc8] sm:$0xff] }
  0x51   : > { %1721 = vmatprep.subr.bf16.mxu0 %v1720_v56  ;;  %410 = vmatprep.mubr.f32.mxu1 %v1958_v0  ;;  %v877_v44 = vld [vmem:[#allocation2 + $0x5b0] sm:$0xff]  ;;  %v300_v46 = vld [vmem:[#allocation2 + $0xd8] sm:$0xff]  ;;  %v880_v47 = vld [vmem:[#allocation2 + $0x5c8] sm:$0xff]  ;;  %v1610_v49 = vpack.c.bf16 %v295_v41, %v293_v40  ;;  %vm1358_vm4 = vcmp.lt.s32.totalorder %v234_v50, 256 }
  0x52   : > { %839 = vmatprep.mubr.f32.mxu0 %v1958_v0  ;;  %411 = vmatmul.mubr.f32.gmra.mrb[2].mxu1 %v2051_v21  ;;  %v882_v48 = vld [vmem:[#allocation2 + $0x5d8] sm:$0xff]  ;;  %v1738_v51 = vpack.c.bf16 %v877_v44, %v875_v42  ;;  %v1612_v52 = vpack.c.bf16 %v300_v46, %v298_v45  ;;  %v297_v53 = vld [vmem:[#allocation2 + $0xc0] sm:$0xff]  ;;  %v299_v54 = vld [vmem:[#allocation2 + $0xd0] sm:$0xff] }
  0x53   : > { %1595 = vmatpush1.bf16.msra.mxu1 %v1594_v62  ;;  %840 = vmatmul.mubr.f32.gmra.mrb[2].mxu0 %v735_v24  ;;  %v879_v55 = vld [vmem:[#allocation2 + $0x5c0] sm:$0xff]  ;;  %v1740_v56 = vpack.c.bf16 %v882_v48, %v880_v47  ;;  %v881_v57 = vld [vmem:[#allocation2 + $0x5d0] sm:$0xff]  ;;  %v302_v58 = vld [vmem:[#allocation2 + $0xe8] sm:$0xff]  ;;  %v1614_v62 = vpack.c.bf16 %v299_v54, %v297_v53 }
  0x54   : > { %1723 = vmatpush1.bf16.msra.mxu0 %v1722_v63  ;;  %1597 = vmatprep.subr.bf16.mxu1 %v1596_v1  ;;  %v304_v59 = vld [vmem:[#allocation2 + $0xf8] sm:$0xff]  ;;  %v884_v60 = vld [vmem:[#allocation2 + $0x5e8] sm:$0xff]  ;;  %v2058_v63 = vshrl.u32 %v234_v50, 7  ;;  %v1742_v1 = vpack.c.bf16 %v881_v57, %v879_v55  ;;  %v301_v3 = vld [vmem:[#allocation2 + $0xe0] sm:$0xff] }
  0x55   : > { %1725 = vmatprep.subr.bf16.mxu0 %v1724_v5  ;;  %481 = vmatprep.mubr.f32.mxu1 %v1958_v0  ;;  %v886_v61 = vld [vmem:[#allocation2 + $0x5f8] sm:$0xff]  ;;  %v1616_v2 = vpack.c.bf16 %v304_v59, %v302_v58  ;;  %v303_v4 = vld [vmem:[#allocation2 + $0xf0] sm:$0xff]  ;;  %v883_v5 = vld [vmem:[#allocation2 + $0x5e0] sm:$0xff] }
  0x56   : > { %951 = vmatprep.mubr.f32.mxu0 %v1958_v0  ;;  %v1744_v6 = vpack.c.bf16 %v886_v61, %v884_v60  ;;  %v885_v7 = vld [vmem:[#allocation2 + $0x5f0] sm:$0xff]  ;;  %v504_v8 = vld [vmem:[#allocation2 + $0x208] sm:$0xff]  ;;  %v506_v9 = vld [vmem:[#allocation2 + $0x218] sm:$0xff]  ;;  %v1618_v12 = vpack.c.bf16 %v303_v4, %v301_v3 }
  0x57   : > { %1599 = vmatpush1.bf16.msra.mxu1 %v1598_v11  ;;  %v974_v10 = vld [vmem:[#allocation2 + $0x608] sm:$0xff]  ;;  %v976_v11 = vld [vmem:[#allocation2 + $0x618] sm:$0xff]  ;;  %v1746_v15 = vpack.c.bf16 %v885_v7, %v883_v5  ;;  %v1620_v16 = vpack.c.bf16 %v506_v9, %v504_v8  ;;  %v503_v17 = vld [vmem:[#allocation2 + $0x200] sm:$0xff] }
  0x58   : > { %1727 = vmatpush1.bf16.msra.mxu0 %v1726_v13  ;;  %1601 = vmatprep.subr.bf16.mxu1 %v1600_v14  ;;  %v241_v13 = vand.u32 3, %v2058_v63  ;;  %v236_v14 = vadd.s32 8, %v2058_v63  ;;  %v973_v19 = vld [vmem:[#allocation2 + $0x600] sm:$0xff]  ;;  %v1748_v20 = vpack.c.bf16 %v976_v11, %v974_v10  ;;  %v975_v22 = vld [vmem:[#allocation2 + $0x610] sm:$0xff]  ;;  %v508_v23 = vld [vmem:[#allocation2 + $0x228] sm:$0xff] }
  0x59   : > { %1729 = vmatprep.subr.bf16.mxu0 %v1728_v18  ;;  %v505_v18 = vld [vmem:[#allocation2 + $0x210] sm:$0xff]  ;;  %v510_v24 = vld [vmem:[#allocation2 + $0x238] sm:$0xff]  ;;  %v265_v28 = vld [vmem:[%s2044_s10] sm:$0xff]  ;;  %v1750_v33 = vpack.c.bf16 %v975_v22, %v973_v19 }
  0x5a   : > { %vm2062_vm0 = vcmp.gt.s32.totalorder %v241_v13, 0  ;;  %v1622_v29 = vpack.c.bf16 %v505_v18, %v503_v17  ;;  %v850_v30 = vld [vmem:[%s2044_s10 + $0x6] sm:$0xff]  ;;  %vm2068_vm1 = vcmp.lt.s32.totalorder %v241_v13, 3  ;;  %v1624_v34 = vpack.c.bf16 %v510_v24, %v508_v23  ;;  %v509_v36 = vld [vmem:[#allocation2 + $0x230] sm:$0xff]  ;;  %v514_v41 = vld [vmem:[#allocation2 + $0x258] sm:$0xff] }
  0x5b   : > { %1603 = vmatpush1.bf16.msra.mxu1 %v1602_v25  ;;  %v978_v25 = vld [vmem:[#allocation2 + $0x628] sm:$0xff]  ;;  %v507_v35 = vld [vmem:[#allocation2 + $0x220] sm:$0xff]  ;;  %v518_v58 = vld [vmem:[#allocation2 + $0x278] sm:$0xff] }
  0x5c   : > { %1731 = vmatpush1.bf16.msra.mxu0 %v1730_v26  ;;  %1605 = vmatprep.subr.bf16.mxu1 %v1604_v27  ;;  %v980_v26 = vld [vmem:[#allocation2 + $0x638] sm:$0xff]  ;;  %v512_v40 = vld [vmem:[#allocation2 + $0x248] sm:$0xff]  ;;  %v1626_v44 = vpack.c.bf16 %v509_v36, %v507_v35  ;;  %v511_v45 = vld [vmem:[#allocation2 + $0x240] sm:$0xff] }
  0x5d   : > { %1733 = vmatprep.subr.bf16.mxu0 %v1732_v31  ;;  %v248_v31 = vand.u32 3, %v236_v14  ;;  %v982_v42 = vld [vmem:[#allocation2 + $0x648] sm:$0xff]  ;;  %v988_v60 = vld [vmem:[#allocation2 + $0x678] sm:$0xff]  ;;  %v517_v3 = vld [vmem:[#allocation2 + $0x270] sm:$0xff] }
  0x5e   : > { %v2081_v47 = vld [vmem:[%s2044_s10 + $0x8] sm:$0xff]  ;;  %v985_v4 = vld [vmem:[#allocation2 + $0x660] sm:$0xff]  ;;  %v522_v8 = vld [vmem:[#allocation2 + $0x298] sm:$0xff] }
  0x5f   : > { %1607 = vmatpush1.bf16.msra.mxu1 %v1606_v37  ;;  %v977_v37 = vld [vmem:[#allocation2 + $0x620] sm:$0xff]  ;;  %vm2076_vm2 = vcmp.gt.s32.totalorder %v248_v31, 0  ;;  %vm2083_vm3 = vcmp.lt.s32.totalorder %v248_v31, 3  ;;  %v851_v54 = vld [vmem:[%s2044_s10 + $0xe] sm:$0xff]  ;;  %v992_v10 = vld [vmem:[#allocation2 + $0x698] sm:$0xff] }
  0x60   : > { %1735 = vmatpush1.bf16.msra.mxu0 %v1734_v38  ;;  %1609 = vmatprep.subr.bf16.mxu1 %v1608_v39  ;;  %v1752_v38 = vpack.c.bf16 %v980_v26, %v978_v25  ;;  %v979_v39 = vld [vmem:[#allocation2 + $0x630] sm:$0xff]  ;;  %v516_v57 = vld [vmem:[#allocation2 + $0x268] sm:$0xff]  ;;  %v519_v14 = vld [vmem:[#allocation2 + $0x280] sm:$0xff] }
  0x61   : > { %1737 = vmatprep.subr.bf16.mxu0 %v1736_v43  ;;  %v984_v43 = vld [vmem:[#allocation2 + $0x658] sm:$0xff]  ;;  %v1754_v48 = vpack.c.bf16 %v979_v39, %v977_v37  ;;  %v986_v59 = vld [vmem:[#allocation2 + $0x668] sm:$0xff]  ;;  %v991_v18 = vld [vmem:[#allocation2 + $0x690] sm:$0xff] }
  0x62   : > { %v1756_v55 = vpack.c.bf16 %v984_v43, %v982_v42  ;;  %v1760_v5 = vpack.c.bf16 %v988_v60, %v986_v59  ;;  %v520_v7 = vld [vmem:[#allocation2 + $0x288] sm:$0xff]  ;;  %v996_v23 = vld [vmem:[#allocation2 + $0x6b8] sm:$0xff]  ;;  %v529_v42 = vld [vmem:[#allocation2 + $0x2d0] sm:$0xff] }
  0x63   : > { %1611 = vmatpush1.bf16.msra.mxu1 %v1610_v49  ;;  %v1628_v49 = vpack.c.bf16 %v514_v41, %v512_v40  ;;  %v990_v9 = vld [vmem:[#allocation2 + $0x688] sm:$0xff]  ;;  %v1636_v13 = vpack.c.bf16 %v522_v8, %v520_v7  ;;  %v530_v35 = vld [vmem:[#allocation2 + $0x2d8] sm:$0xff]  ;;  %v527_v41 = vld [vmem:[#allocation2 + $0x2c0] sm:$0xff] }
  0x64   : > { %1739 = vmatpush1.bf16.msra.mxu0 %v1738_v51  ;;  %1613 = vmatprep.subr.bf16.mxu1 %v1612_v52  ;;  %v513_v51 = vld [vmem:[#allocation2 + $0x250] sm:$0xff]  ;;  %v981_v52 = vld [vmem:[#allocation2 + $0x640] sm:$0xff]  ;;  %v1764_v17 = vpack.c.bf16 %v992_v10, %v990_v9  ;;  %v524_v19 = vld [vmem:[#allocation2 + $0x2a8] sm:$0xff] }
  0x65   : > { %1741 = vmatprep.subr.bf16.mxu0 %v1740_v56  ;;  %v983_v56 = vld [vmem:[#allocation2 + $0x650] sm:$0xff]  ;;  %v1630_v61 = vpack.c.bf16 %v513_v51, %v511_v45  ;;  %v994_v22 = vld [vmem:[#allocation2 + $0x6a8] sm:$0xff]  ;;  %v1000_v37 = vld [vmem:[#allocation2 + $0x6d8] sm:$0xff] }
  0x66   : > { %v1768_v31 = vpack.c.bf16 %v996_v23, %v994_v22  ;;  %v998_v36 = vld [vmem:[#allocation2 + $0x6c8] sm:$0xff]  ;;  %v997_v43 = vld [vmem:[#allocation2 + $0x6c0] sm:$0xff]  ;;  %v999_v45 = vld [vmem:[#allocation2 + $0x6d0] sm:$0xff] }
  0x67   : > { %1615 = vmatpush1.bf16.msra.mxu1 %v1614_v62  ;;  %v1758_v62 = vpack.c.bf16 %v983_v56, %v981_v52  ;;  %v1002_v51 = vld [vmem:[#allocation2 + $0x6e8] sm:$0xff]  ;;  %v1004_v52 = vld [vmem:[#allocation2 + $0x6f8] sm:$0xff]  ;;  %v1001_v59 = vld [vmem:[#allocation2 + $0x6e0] sm:$0xff] }
  0x68   : > { %1743 = vmatpush1.bf16.msra.mxu0 %v1742_v1  ;;  %1617 = vmatprep.subr.bf16.mxu1 %v1616_v2  ;;  %v1632_v1 = vpack.c.bf16 %v518_v58, %v516_v57  ;;  %v515_v2 = vld [vmem:[#allocation2 + $0x260] sm:$0xff]  ;;  %v533_v58 = vld [vmem:[#allocation2 + $0x2f0] sm:$0xff]  ;;  %v1776_v60 = vpack.c.bf16 %v1004_v52, %v1002_v51 }
  0x69   : > { %1745 = vmatprep.subr.bf16.mxu0 %v1744_v6  ;;  %v987_v6 = vld [vmem:[#allocation2 + $0x670] sm:$0xff]  ;;  %v1634_v11 = vpack.c.bf16 %v517_v3, %v515_v2  ;;  %v531_v57 = vld [vmem:[#allocation2 + $0x2e0] sm:$0xff]  ;;  %v1090_v2 = vld [vmem:[#allocation2 + $0x708] sm:$0xff] }
  0x6a   : > { %v1092_v3 = vld [vmem:[#allocation2 + $0x718] sm:$0xff]  ;;  %v621_v7 = vld [vmem:[#allocation2 + $0x300] sm:$0xff]  ;;  %v623_v8 = vld [vmem:[#allocation2 + $0x310] sm:$0xff] }
  0x6b   : > { %1619 = vmatpush1.bf16.msra.mxu1 %v1618_v12  ;;  %v1762_v12 = vpack.c.bf16 %v987_v6, %v985_v4  ;;  %v1650_v4 = vpack.c.bf16 %v533_v58, %v531_v57  ;;  %v1089_v9 = vld [vmem:[#allocation2 + $0x700] sm:$0xff]  ;;  %v1780_v10 = vpack.c.bf16 %v1092_v3, %v1090_v2  ;;  %v627_v22 = vld [vmem:[#allocation2 + $0x330] sm:$0xff]  ;;  %v638_v57 = vld [vmem:[#allocation2 + $0x388] sm:$0xff] }
  0x6c   : > { %1747 = vmatpush1.bf16.msra.mxu0 %v1746_v15  ;;  %1621 = vmatprep.subr.bf16.mxu1 %v1620_v16  ;;  %v521_v15 = vld [vmem:[#allocation2 + $0x290] sm:$0xff]  ;;  %v989_v16 = vld [vmem:[#allocation2 + $0x680] sm:$0xff]  ;;  %v640_v58 = vld [vmem:[#allocation2 + $0x398] sm:$0xff] }
  0x6d   : > { %1749 = vmatprep.subr.bf16.mxu0 %v1748_v20  ;;  %v526_v20 = vld [vmem:[#allocation2 + $0x2b8] sm:$0xff]  ;;  %v1638_v24 = vpack.c.bf16 %v521_v15, %v519_v14  ;;  %v1766_v25 = vpack.c.bf16 %v991_v18, %v989_v16  ;;  %v1094_v14 = vld [vmem:[#allocation2 + $0x728] sm:$0xff]  ;;  %v1093_v23 = vld [vmem:[#allocation2 + $0x720] sm:$0xff] }
  0x6e   : > { %1540 = vmatmul.mubr.msk.f32.vlgmr.msra.gmra.mrb[0].mxu1 %vm2062_vm0, %v265_v28  ;;  %v1640_v26 = vpack.c.bf16 %v526_v20, %v524_v19  ;;  %v523_v28 = vld [vmem:[#allocation2 + $0x2a0] sm:$0xff]  ;;  %v1096_v15 = vld [vmem:[#allocation2 + $0x738] sm:$0xff]  ;;  %v635_v52 = vld [vmem:[#allocation2 + $0x370] sm:$0xff] }
  0x6f   : > { %1623 = vmatpush1.bf16.msra.mxu1 %v1622_v29  ;;  %1546 = vmatmul.mubr.msk.f32.vlgmr.msra.gmra.mrb[0].mxu0 %vm2068_vm1, %v850_v30  ;;  %v525_v29 = vld [vmem:[#allocation2 + $0x2b0] sm:$0xff]  ;;  %v993_v30 = vld [vmem:[#allocation2 + $0x6a0] sm:$0xff] }
  0x70   : > { %1751 = vmatpush1.bf16.msra.mxu0 %v1750_v33  ;;  %1625 = vmatprep.subr.bf16.mxu1 %v1624_v34  ;;  %v995_v33 = vld [vmem:[#allocation2 + $0x6b0] sm:$0xff]  ;;  %v528_v34 = vld [vmem:[#allocation2 + $0x2c8] sm:$0xff]  ;;  %v625_v20 = vld [vmem:[#allocation2 + $0x320] sm:$0xff] }
  0x71   : > { %1753 = vmatprep.subr.bf16.mxu0 %v1752_v38  ;;  %487 = vmatprep.mubr.f32.mxu1 %v1958_v0  ;;  %v1642_v38 = vpack.c.bf16 %v525_v29, %v523_v28  ;;  %v1770_v39 = vpack.c.bf16 %v995_v33, %v993_v30  ;;  %v1644_v40 = vpack.c.bf16 %v530_v35, %v528_v34  ;;  %v494_v16 = vld [vmem:[%s2044_s10 + $0x2] sm:$0xff]  ;;  %v632_v28 = vld [vmem:[#allocation2 + $0x358] sm:$0xff]  ;;  %v2104_v34 = vld [vmem:[%s2044_s10 + $0xa] sm:$0xff] }
  0x72   : > { %957 = vmatprep.mubr.f32.mxu0 %v1958_v0  ;;  %1541 = vmatmul.mubr.msk.f32.gmra.mrb[2].mxu1 %vm2076_vm2, %v2081_v47  ;;  %v1098_v29 = vld [vmem:[#allocation2 + $0x748] sm:$0xff]  ;;  %v1100_v30 = vld [vmem:[#allocation2 + $0x758] sm:$0xff]  ;;  %v629_v33 = vld [vmem:[#allocation2 + $0x340] sm:$0xff] }
  0x73   : > { %1627 = vmatpush1.bf16.msra.mxu1 %v1626_v44  ;;  %1547 = vmatmul.mubr.msk.f32.gmra.mrb[2].mxu0 %vm2083_vm3, %v851_v54  ;;  %v1772_v44 = vpack.c.bf16 %v1000_v37, %v998_v36  ;;  %v1646_v54 = vpack.c.bf16 %v529_v42, %v527_v41  ;;  %v631_v37 = vld [vmem:[#allocation2 + $0x350] sm:$0xff]  ;;  %v634_v42 = vld [vmem:[#allocation2 + $0x368] sm:$0xff]  ;;  %v633_v51 = vld [vmem:[#allocation2 + $0x360] sm:$0xff] }
  0x74   : > { %1755 = vmatpush1.bf16.msra.mxu0 %v1754_v48  ;;  %1629 = vmatprep.subr.bf16.mxu1 %v1628_v49  ;;  %v532_v48 = vld [vmem:[#allocation2 + $0x2e8] sm:$0xff]  ;;  %v534_v49 = vld [vmem:[#allocation2 + $0x2f8] sm:$0xff]  ;;  %v1099_v41 = vld [vmem:[#allocation2 + $0x750] sm:$0xff] }
  0x75   : > { %1757 = vmatprep.subr.bf16.mxu0 %v1756_v55  ;;  %599 = vmatprep.mubr.f32.mxu1 %v1958_v0  ;;  %v1774_v55 = vpack.c.bf16 %v999_v45, %v997_v43  ;;  %v1648_v56 = vpack.c.bf16 %v534_v49, %v532_v48  ;;  %v636_v43 = vld [vmem:[#allocation2 + $0x378] sm:$0xff]  ;;  %v1662_v45 = vpack.c.bf16 %v631_v37, %v629_v33  ;;  %v637_v2 = vld [vmem:[#allocation2 + $0x380] sm:$0xff]  ;;  %v639_v3 = vld [vmem:[#allocation2 + $0x390] sm:$0xff] }
  0x76   : > { %1069 = vmatprep.mubr.f32.mxu0 %v1958_v0  ;;  %v1664_v49 = vpack.c.bf16 %v636_v43, %v634_v42  ;;  %v1115_v33 = vld [vmem:[#allocation2 + $0x7d0] sm:$0xff]  ;;  %v1118_v37 = vld [vmem:[#allocation2 + $0x7e8] sm:$0xff]  ;;  %v649_v42 = vld [vmem:[#allocation2 + $0x3e0] sm:$0xff] }
  0x77   : > { %1631 = vmatpush1.bf16.msra.mxu1 %v1630_v61  ;;  %v1003_v61 = vld [vmem:[#allocation2 + $0x6f0] sm:$0xff] }
  0x78   : > { %1759 = vmatpush1.bf16.msra.mxu0 %v1758_v62  ;;  %1633 = vmatprep.subr.bf16.mxu1 %v1632_v1  ;;  %v622_v62 = vld [vmem:[#allocation2 + $0x308] sm:$0xff]  ;;  %v624_v1 = vld [vmem:[#allocation2 + $0x318] sm:$0xff]  ;;  %v651_v43 = vld [vmem:[#allocation2 + $0x3f0] sm:$0xff] }
  0x79   : > { %1761 = vmatprep.subr.bf16.mxu0 %v1760_v5  ;;  %v1778_v5 = vpack.c.bf16 %v1003_v61, %v1001_v59  ;;  %v1652_v6 = vpack.c.bf16 %v624_v1, %v622_v62  ;;  %v1106_v59 = vld [vmem:[#allocation2 + $0x788] sm:$0xff]  ;;  %v1666_v61 = vpack.c.bf16 %v635_v52, %v633_v51  ;;  %v1668_v1 = vpack.c.bf16 %v640_v58, %v638_v57  ;;  %v1214_v58 = vld [vmem:[#allocation2 + $0x838] sm:$0xff] }
  0x7a   : > { %v1682_v51 = vpack.c.bf16 %v651_v43, %v649_v42  ;;  %v1212_v57 = vld [vmem:[#allocation2 + $0x828] sm:$0xff] }
  0x7b   : > { %1635 = vmatpush1.bf16.msra.mxu1 %v1634_v11  ;;  %v1091_v11 = vld [vmem:[#allocation2 + $0x710] sm:$0xff] }
  0x7c   : > { %1763 = vmatpush1.bf16.msra.mxu0 %v1762_v12  ;;  %1637 = vmatprep.subr.bf16.mxu1 %v1636_v13  ;;  %v626_v12 = vld [vmem:[#allocation2 + $0x328] sm:$0xff]  ;;  %v628_v13 = vld [vmem:[#allocation2 + $0x338] sm:$0xff]  ;;  %v1782_v18 = vpack.c.bf16 %v1091_v11, %v1089_v9  ;;  %v1670_v11 = vpack.c.bf16 %v639_v3, %v637_v2 }
  0x7d   : > { %1765 = vmatprep.subr.bf16.mxu0 %v1764_v17  ;;  %v1654_v17 = vpack.c.bf16 %v623_v8, %v621_v7  ;;  %v1656_v19 = vpack.c.bf16 %v628_v13, %v626_v12  ;;  %v642_v7 = vld [vmem:[#allocation2 + $0x3a8] sm:$0xff]  ;;  %v644_v8 = vld [vmem:[#allocation2 + $0x3b8] sm:$0xff] }
  0x7e   : > { %v1110_v9 = vld [vmem:[#allocation2 + $0x7a8] sm:$0xff]  ;;  %v1672_v13 = vpack.c.bf16 %v644_v8, %v642_v7  ;;  %v1218_v3 = vld [vmem:[#allocation2 + $0x858] sm:$0xff]  ;;  %v1215_v8 = vld [vmem:[#allocation2 + $0x840] sm:$0xff] }
  0x7f   : > { %1639 = vmatpush1.bf16.msra.mxu1 %v1638_v24  ;;  %v1784_v24 = vpack.c.bf16 %v1096_v15, %v1094_v14  ;;  %v641_v14 = vld [vmem:[#allocation2 + $0x3a0] sm:$0xff]  ;;  %v643_v15 = vld [vmem:[#allocation2 + $0x3b0] sm:$0xff]  ;;  %v1216_v2 = vld [vmem:[#allocation2 + $0x848] sm:$0xff] }
  0x80   : > { %1767 = vmatpush1.bf16.msra.mxu0 %v1766_v25  ;;  %1641 = vmatprep.subr.bf16.mxu1 %v1640_v26  ;;  %v1095_v25 = vld [vmem:[#allocation2 + $0x730] sm:$0xff]  ;;  %v630_v26 = vld [vmem:[#allocation2 + $0x348] sm:$0xff]  ;;  %v1820_v7 = vpack.c.bf16 %v1218_v3, %v1216_v2 }
  0x81   : > { %1769 = vmatprep.subr.bf16.mxu0 %v1768_v31  ;;  %v1658_v31 = vpack.c.bf16 %v627_v22, %v625_v20  ;;  %v1786_v35 = vpack.c.bf16 %v1095_v25, %v1093_v23  ;;  %v1660_v36 = vpack.c.bf16 %v632_v28, %v630_v26  ;;  %v648_v20 = vld [vmem:[#allocation2 + $0x3d8] sm:$0xff]  ;;  %v1114_v22 = vld [vmem:[#allocation2 + $0x7c8] sm:$0xff]  ;;  %v645_v28 = vld [vmem:[#allocation2 + $0x3c0] sm:$0xff] }
  0x82   : > { %v1116_v23 = vld [vmem:[#allocation2 + $0x7d8] sm:$0xff] }
  0x83   : > { %1643 = vmatpush1.bf16.msra.mxu1 %v1642_v38  ;;  %v1097_v38 = vld [vmem:[#allocation2 + $0x740] sm:$0xff] }
  0x84   : > { %1771 = vmatpush1.bf16.msra.mxu0 %v1770_v39  ;;  %1645 = vmatprep.subr.bf16.mxu1 %v1644_v40  ;;  %v969_v39 = vld [vmem:[%s2044_s10 + $0x10] sm:$0xff]  ;;  %v1788_v40 = vpack.c.bf16 %v1100_v30, %v1098_v29  ;;  %v1790_v48 = vpack.c.bf16 %v1099_v41, %v1097_v38  ;;  %v1113_v30 = vld [vmem:[#allocation2 + $0x7c0] sm:$0xff]  ;;  %v1120_v38 = vld [vmem:[#allocation2 + $0x7f8] sm:$0xff] }
  0x85   : > { %1773 = vmatprep.subr.bf16.mxu0 %v1772_v44  ;;  %v1102_v44 = vld [vmem:[#allocation2 + $0x768] sm:$0xff]  ;;  %v647_v29 = vld [vmem:[#allocation2 + $0x3d0] sm:$0xff] }
  0x87   : > { %1647 = vmatpush1.bf16.msra.mxu1 %v1646_v54  ;;  %v1101_v54 = vld [vmem:[#allocation2 + $0x760] sm:$0xff] }
  0x88   : > { %1775 = vmatpush1.bf16.msra.mxu0 %v1774_v55  ;;  %1649 = vmatprep.subr.bf16.mxu1 %v1648_v56  ;;  %v1103_v56 = vld [vmem:[#allocation2 + $0x770] sm:$0xff] }
  0x89   : > { %1777 = vmatprep.subr.bf16.mxu0 %v1776_v60  ;;  %v1108_v60 = vld [vmem:[#allocation2 + $0x798] sm:$0xff]  ;;  %v1794_v62 = vpack.c.bf16 %v1103_v56, %v1101_v54  ;;  %v1209_v56 = vld [vmem:[#allocation2 + $0x810] sm:$0xff] }
  0x8b   : > { %1651 = vmatpush1.bf16.msra.mxu1 %v1650_v4  ;;  %v1105_v4 = vld [vmem:[#allocation2 + $0x780] sm:$0xff] }
  0x8c   : > { %1779 = vmatpush1.bf16.msra.mxu0 %v1778_v5  ;;  %1653 = vmatprep.subr.bf16.mxu1 %v1652_v6  ;;  %v1796_v5 = vpack.c.bf16 %v1108_v60, %v1106_v59  ;;  %v1107_v6 = vld [vmem:[#allocation2 + $0x790] sm:$0xff]  ;;  %v616_v59 = vld [vmem:[%s2044_s10 + $0x4] sm:$0xff] }
  0x8d   : > { %1781 = vmatprep.subr.bf16.mxu0 %v1780_v10  ;;  %v1112_v10 = vld [vmem:[#allocation2 + $0x7b8] sm:$0xff]  ;;  %v1798_v12 = vpack.c.bf16 %v1107_v6, %v1105_v4  ;;  %v617_v4 = vld [vmem:[%s2044_s10 + $0xc] sm:$0xff] }
  0x8e   : > { %1542 = vmatmul.mubr.msk.f32.vlgmr.msra.gmra.mrb[0].mxu1 %vm2068_vm1, %v494_v16  ;;  %v1109_v16 = vld [vmem:[#allocation2 + $0x7a0] sm:$0xff]  ;;  %v1087_v6 = vld [vmem:[%s2044_s10 + $0x11] sm:$0xff] }
  0x8f   : > { %1655 = vmatpush1.bf16.msra.mxu1 %v1654_v17  ;;  %1548 = vmatmul.mubr.msk.f32.vlgmr.msra.gmra.mrb[0].mxu0 %vm2062_vm0, %v2081_v47  ;;  %v1104_v47 = vld [vmem:[#allocation2 + $0x778] sm:$0xff]  ;;  %v1800_v17 = vpack.c.bf16 %v1112_v10, %v1110_v9  ;;  %v1217_v9 = vld [vmem:[#allocation2 + $0x850] sm:$0xff]  ;;  %v1220_v10 = vld [vmem:[#allocation2 + $0x868] sm:$0xff] }
  0x90   : > { %1783 = vmatpush1.bf16.msra.mxu0 %v1782_v18  ;;  %1657 = vmatprep.subr.bf16.mxu1 %v1656_v19  ;;  %v1792_v55 = vpack.c.bf16 %v1104_v47, %v1102_v44  ;;  %v1111_v18 = vld [vmem:[#allocation2 + $0x7b0] sm:$0xff]  ;;  %v646_v19 = vld [vmem:[#allocation2 + $0x3c8] sm:$0xff]  ;;  %v1117_v44 = vld [vmem:[#allocation2 + $0x7e0] sm:$0xff]  ;;  %v1808_v47 = vpack.c.bf16 %v1120_v38, %v1118_v37 }
  0x91   : > { %1785 = vmatprep.subr.bf16.mxu0 %v1784_v24  ;;  %605 = vmatprep.mubr.f32.mxu1 %v1958_v0  ;;  %v1674_v24 = vpack.c.bf16 %v643_v15, %v641_v14  ;;  %v1802_v25 = vpack.c.bf16 %v1111_v18, %v1109_v16  ;;  %v1676_v26 = vpack.c.bf16 %v648_v20, %v646_v19  ;;  %v1224_v14 = vld [vmem:[#allocation2 + $0x888] sm:$0xff]  ;;  %v1226_v15 = vld [vmem:[#allocation2 + $0x898] sm:$0xff]  ;;  %v1225_v18 = vld [vmem:[#allocation2 + $0x890] sm:$0xff] }
  0x92   : > { %1075 = vmatprep.mubr.f32.mxu0 %v1958_v0  ;;  %1543 = vmatmul.mubr.msk.f32.gmra.mrb[2].mxu1 %vm2083_vm3, %v2104_v34  ;;  %v1828_v46 = vpack.c.bf16 %v1226_v15, %v1224_v14  ;;  %v1228_v19 = vld [vmem:[#allocation2 + $0x8a8] sm:$0xff]  ;;  %v1230_v20 = vld [vmem:[#allocation2 + $0x8b8] sm:$0xff]  ;;  %v1235_v38 = vld [vmem:[#allocation2 + $0x8e0] sm:$0xff] }
  0x93   : > { %1659 = vmatpush1.bf16.msra.mxu1 %v1658_v31  ;;  %1549 = vmatmul.mubr.msk.f32.gmra.mrb[2].mxu0 %vm2076_vm2, %v969_v39  ;;  %v1804_v31 = vpack.c.bf16 %v1116_v23, %v1114_v22  ;;  %v1678_v39 = vpack.c.bf16 %v647_v29, %v645_v28  ;;  %v1832_v23 = vpack.c.bf16 %v1230_v20, %v1228_v19 }
  0x94   : > { %1787 = vmatpush1.bf16.msra.mxu0 %v1786_v35  ;;  %1661 = vmatprep.subr.bf16.mxu1 %v1660_v36  ;;  %v650_v35 = vld [vmem:[#allocation2 + $0x3e8] sm:$0xff]  ;;  %v652_v36 = vld [vmem:[#allocation2 + $0x3f8] sm:$0xff] }
  0x95   : > { %1789 = vmatprep.subr.bf16.mxu0 %v1788_v40  ;;  %717 = vmatprep.mubr.f32.mxu1 %v1958_v0  ;;  %v1806_v40 = vpack.c.bf16 %v1115_v33, %v1113_v30  ;;  %v1680_v41 = vpack.c.bf16 %v652_v36, %v650_v35  ;;  %v1231_v30 = vld [vmem:[#allocation2 + $0x8c0] sm:$0xff]  ;;  %v1236_v33 = vld [vmem:[#allocation2 + $0x8e8] sm:$0xff]  ;;  %v1238_v35 = vld [vmem:[#allocation2 + $0x8f8] sm:$0xff] }
  0x96   : > { %1185 = vmatprep.mubr.f32.mxu0 %v1958_v0  ;;  %v1840_v37 = vpack.c.bf16 %v1238_v35, %v1236_v33 }
  0x97   : > { %1663 = vmatpush1.bf16.msra.mxu1 %v1662_v45  ;;  %v1119_v45 = vld [vmem:[#allocation2 + $0x7f0] sm:$0xff] }
  0x98   : > { %1791 = vmatpush1.bf16.msra.mxu0 %v1790_v48  ;;  %1665 = vmatprep.subr.bf16.mxu1 %v1664_v49  ;;  %v1208_v48 = vld [vmem:[#allocation2 + $0x808] sm:$0xff]  ;;  %v1210_v49 = vld [vmem:[#allocation2 + $0x818] sm:$0xff]  ;;  %v1810_v52 = vpack.c.bf16 %v1119_v45, %v1117_v44 }
  0x99   : > { %1793 = vmatprep.subr.bf16.mxu0 %v1792_v55  ;;  %v1812_v54 = vpack.c.bf16 %v1210_v49, %v1208_v48  ;;  %v1207_v55 = vld [vmem:[#allocation2 + $0x800] sm:$0xff] }
  0x9a   : > { %v1814_v60 = vpack.c.bf16 %v1209_v56, %v1207_v55 }
  0x9b   : > { %1667 = vmatpush1.bf16.msra.mxu1 %v1666_v61  ;;  %v1211_v61 = vld [vmem:[#allocation2 + $0x820] sm:$0xff] }
  0x9c   : > { %1795 = vmatpush1.bf16.msra.mxu0 %v1794_v62  ;;  %1669 = vmatprep.subr.bf16.mxu1 %v1668_v1  ;;  %v1213_v62 = vld [vmem:[#allocation2 + $0x830] sm:$0xff]  ;;  %v1816_v1 = vpack.c.bf16 %v1214_v58, %v1212_v57 }
  0x9d   : > { %1797 = vmatprep.subr.bf16.mxu0 %v1796_v5  ;;  %v1818_v5 = vpack.c.bf16 %v1213_v62, %v1211_v61 }
  0x9f   : > { %1671 = vmatpush1.bf16.msra.mxu1 %v1670_v11  ;;  %v1222_v11 = vld [vmem:[#allocation2 + $0x878] sm:$0xff] }
  0xa0   : > { %1799 = vmatpush1.bf16.msra.mxu0 %v1798_v12  ;;  %1673 = vmatprep.subr.bf16.mxu1 %v1672_v13  ;;  %v1824_v27 = vpack.c.bf16 %v1222_v11, %v1220_v10  ;;  %v1219_v12 = vld [vmem:[#allocation2 + $0x860] sm:$0xff]  ;;  %v1221_v13 = vld [vmem:[#allocation2 + $0x870] sm:$0xff] }
  0xa1   : > { %1801 = vmatprep.subr.bf16.mxu0 %v1800_v17  ;;  %v1826_v16 = vpack.c.bf16 %v1221_v13, %v1219_v12  ;;  %v1223_v17 = vld [vmem:[#allocation2 + $0x880] sm:$0xff] }
  0xa2   : > { %v1830_v22 = vpack.c.bf16 %v1225_v18, %v1223_v17 }
  0xa3   : > { %1675 = vmatpush1.bf16.msra.mxu1 %v1674_v24  ;;  %v1227_v24 = vld [vmem:[#allocation2 + $0x8a0] sm:$0xff] }
  0xa4   : > { %1803 = vmatpush1.bf16.msra.mxu0 %v1802_v25  ;;  %1677 = vmatprep.subr.bf16.mxu1 %v1676_v26  ;;  %v1229_v25 = vld [vmem:[#allocation2 + $0x8b0] sm:$0xff]  ;;  %v1232_v26 = vld [vmem:[#allocation2 + $0x8c8] sm:$0xff] }
  0xa5   : > { %1805 = vmatprep.subr.bf16.mxu0 %v1804_v31  ;;  %v1834_v28 = vpack.c.bf16 %v1229_v25, %v1227_v24  ;;  %v1233_v31 = vld [vmem:[#allocation2 + $0x8d0] sm:$0xff] }
  0xa6   : > { %v1838_v36 = vpack.c.bf16 %v1233_v31, %v1231_v30 }
  0xa7   : > { %1679 = vmatpush1.bf16.msra.mxu1 %v1678_v39  ;;  %v1237_v39 = vld [vmem:[#allocation2 + $0x8f0] sm:$0xff] }
  0xa8   : > { %1807 = vmatpush1.bf16.msra.mxu0 %v1806_v40  ;;  %1681 = vmatprep.subr.bf16.mxu1 %v1680_v41  ;;  %v1842_v40 = vpack.c.bf16 %v1237_v39, %v1235_v38  ;;  %v1203_v41 = vld [vmem:[%s2044_s10 + $0x12] sm:$0xff] }
  0xa9   : > { %1809 = vmatprep.subr.bf16.mxu0 %v1808_v47 }
  0xab   : > { %1683 = vmatpush1.bf16.msra.mxu1 %v1682_v51 }
  0xac   : > { %1811 = vmatpush1.bf16.msra.mxu0 %v1810_v52  ;;  %1844 = vmatprep.subr.bf16.mxu1 %v1812_v54 }
  0xad   : > { %1813 = vmatprep.subr.bf16.mxu0 %v1812_v54 }
  0xae   : > { %1544 = vmatmul.mubr.msk.f32.vlgmr.msra.gmra.mrb[0].mxu1 %vm2062_vm0, %v616_v59 }
  0xaf   : > { %1186 = vmatmul.mubr.f32.vlgmr.msra.gmra.mrb[0].mxu0 %v2051_v21  ;;  %1852 = vmatpush1.bf16.msra.mxu1 %v1814_v60  ;;  %v1822_v21 = vpack.c.bf16 %v1217_v9, %v1215_v8  ;;  %v1959_v8 = vmov 1966171168  }
  0xb0   : > { %1815 = vmatpush1.bf16.msra.mxu0 %v1814_v60  ;;  %723 = vmatprep.mubr.f32.mxu1 %v1958_v0  ;;  %v1342_v9 = vunpack.c.l.s4 %v1959_v8 }
  0xb1   : > { %1191 = vmatprep.mubr.f32.mxu0 %v1958_v0  ;;  %1817 = vmatprep.subr.bf16.mxu0 %v1816_v1 }
  0xb2   : > { %1545 = vmatmul.mubr.msk.f32.gmra.mrb[2].mxu1 %vm2076_vm2, %v617_v4  ;;  %1845 = vmatprep.subr.bf16.mxu1 %v1816_v1 }
  0xb3   : > { %1192 = vmatmul.mubr.f32.gmra.mrb[2].mxu0 %v1087_v6  ;;  %1853 = vmatpush1.bf16.msra.mxu1 %v1818_v5 }
  0xb4   : > { %1819 = vmatpush1.bf16.msra.mxu0 %v1818_v5  ;;  %1846 = vmatprep.subr.bf16.mxu1 %v1820_v7 }
  0xb5   : > { %1821 = vmatprep.subr.bf16.mxu0 %v1820_v7  ;;  %1303 = vmatprep.mubr.f32.mxu0 %v1958_v0 }
  0xb6   : > { %1309 = vmatprep.mubr.f32.mxu1 %v1958_v0  ;;  %v1234_v0 = vld [vmem:[#allocation2 + $0x8d8] sm:$0xff] }
  0xb7   : > { %1854 = vmatpush1.bf16.msra.mxu1 %v1822_v21  ;;  %v1836_v29 = vpack.c.bf16 %v1234_v0, %v1232_v26 }
  0xb8   : > { %1823 = vmatpush1.bf16.msra.mxu0 %v1822_v21  ;;  %1847 = vmatprep.subr.bf16.mxu1 %v1824_v27 }
  0xb9   : > { %1825 = vmatprep.subr.bf16.mxu0 %v1824_v27 }
  0xbb   : > { %1855 = vmatpush1.bf16.msra.mxu1 %v1826_v16 }
  0xbc   : > { %1827 = vmatpush1.bf16.msra.mxu0 %v1826_v16  ;;  %1848 = vmatprep.subr.bf16.mxu1 %v1828_v46  ;;  %v1343_v16 = vunpack.c.0.s8 %v1342_v9 }
  0xbd   : > { %1829 = vmatprep.subr.bf16.mxu0 %v1828_v46 }
  0xbe   : > { %v1346_v25 = vsub.s32 %v1343_v16, %v2058_v63 }
  0xbf   : > { %1856 = vmatpush1.bf16.msra.mxu1 %v1830_v22 }
  0xc0   : > { %1831 = vmatpush1.bf16.msra.mxu0 %v1830_v22  ;;  %1849 = vmatprep.subr.bf16.mxu1 %v1832_v23 }
  0xc1   : > { %1833 = vmatprep.subr.bf16.mxu0 %v1832_v23 }
  0xc3   : > { %1857 = vmatpush1.bf16.msra.mxu1 %v1834_v28 }
  0xc4   : > { %1835 = vmatpush1.bf16.msra.mxu0 %v1834_v28  ;;  %1850 = vmatprep.subr.bf16.mxu1 %v1836_v29 }
  0xc5   : > { %1837 = vmatprep.subr.bf16.mxu0 %v1836_v29 }
  0xc7   : > { %1858 = vmatpush1.bf16.msra.mxu1 %v1838_v36 }
  0xc8   : > { %1839 = vmatpush1.bf16.msra.mxu0 %v1838_v36  ;;  %1851 = vmatprep.subr.bf16.mxu1 %v1840_v37 }
  0xc9   : > { %1841 = vmatprep.subr.bf16.mxu0 %v1840_v37 }
  0xcb   : > { %1859 = vmatpush1.bf16.msra.mxu1 %v1842_v40 }
  0xcc   : > { %1843 = vmatpush1.bf16.msra.mxu0 %v1842_v40 }
  0xce   : > { %1551 = vmatmul.mubr.msk.f32.vlgmr.msra.gmra.mrb[4].mxu1 %vm2083_vm3, %v1203_v41 }
  0xcf   : > { %1550 = vmatmul.mubr.msk.f32.vlgmr.msra.gmra.mrb[0].mxu0 %vm2068_vm1, %v2104_v34 }
 0x181   : > { %v719_v42 = vpop.f32.mrb[0].mxu1 }
 0x182   : > { %v721_v43 = vpop.f32.mrb[1].mxu1 }
 0x185   : > { %v725_v44 = vpop.f32.mrb[2].mxu1 }
 0x186   : > { %v1193_v47 = vpop.f32.mrb[2].mxu0  ;;  %v727_v45 = vpop.f32.mrb[3].mxu1 }
 0x187   : > { %v1862_v48 = vadd.f32 %v1193_v47, %v725_v44  ;;  %v1195_v49 = vpop.f32.mrb[3].mxu0 }
 0x188   : > { %v1864_v51 = vadd.f32 %v1195_v49, %v727_v45 }
 0x1a1   : > { %v1311_v52 = vpop.f32.mrb[4].mxu1 }
 0x1a2   : > { %v1305_v53 = vpop.f32.mrb[0].mxu0  ;;  %v1863_v54 = vadd.f32 %v1862_v48, %v1311_v52  ;;  %v1313_v55 = vpop.f32.mrb[5].mxu1 }
 0x1a3   : > { %v1860_v56 = vadd.f32 %v1305_v53, %v719_v42  ;;  %v1307_v32 = vpop.f32.mrb[1].mxu0  ;;  %v1865_v34 = vadd.f32 %v1864_v51, %v1313_v55 }
 0x1a4   : > { %1322 = vst [vmem:[%s225_s13 + $0x10] sm:$0xff] %v1863_v54  ;;  %v1363_v57 = vmul.f32 %v1863_v54, %v1863_v54  ;;  %v1861_v58 = vadd.f32 %v1307_v32, %v721_v43 }
 0x1a5   : > { %1320 = vst [vmem:[%s225_s13] sm:$0xff] %v1860_v56  ;;  %v1361_v59 = vmul.f32 %v1860_v56, %v1860_v56  ;;  %v1324_v60 = vadd.f32 %v1863_v54, %v1860_v56  ;;  %1323 = vst [vmem:[%s225_s13 + $0x18] sm:$0xff] %v1865_v34  ;;  %v1364_v61 = vmul.f32 %v1865_v34, %v1865_v34 }
 0x1a6   : > { %1321 = vst [vmem:[%s225_s13 + $0x8] sm:$0xff] %v1861_v58  ;;  %v1362_v62 = vmul.f32 %v1861_v58, %v1861_v58  ;;  %v1331_v1 = vadd.f32 %v1865_v34, %v1861_v58 }
 0x1a7   : > { %v1325_v2 = vrot.slane %v1324_v60, 4  ;;  %v1365_v3 = vadd.f32 %v1363_v57, %v1361_v59 }
 0x1a8   : > { %v1332_v4 = vrot.slane %v1331_v1, 4  ;;  %v1372_v5 = vadd.f32 %v1364_v61, %v1362_v62 }
 0x1a9   : > { %v1326_v6 = vadd.f32 %v1325_v2, %v1324_v60  ;;  %v1366_v7 = vrot.slane %v1365_v3, 4 }
 0x1aa   : > { %v1333_v10 = vadd.f32 %v1332_v4, %v1331_v1  ;;  %v1373_v11 = vrot.slane %v1372_v5, 4 }
 0x1ab   : > { %v1327_v21 = vrot.slane %v1326_v6, 2  ;;  %v1367_v27 = vadd.f32 %v1366_v7, %v1365_v3 }
 0x1ac   : > { %v1334_v12 = vrot.slane %v1333_v10, 2  ;;  %v1374_v13 = vadd.f32 %v1373_v11, %v1372_v5 }
 0x1ad   : > { %v1328_v14 = vadd.f32 %v1327_v21, %v1326_v6  ;;  %v1368_v15 = vrot.slane %v1367_v27, 2 }
 0x1ae   : > { %v1335_v46 = vadd.f32 %v1334_v12, %v1333_v10  ;;  %v1375_v17 = vrot.slane %v1374_v13, 2 }
 0x1af   : > { %v1329_v18 = vrot.slane %v1328_v14, 1  ;;  %v1369_v19 = vadd.f32 %v1368_v15, %v1367_v27 }
 0x1b0   : > { %v1336_v20 = vrot.slane %v1335_v46, 1  ;;  %v1376_v22 = vadd.f32 %v1375_v17, %v1374_v13 }
 0x1b1   : > { %v1330_v23 = vadd.f32 %v1329_v18, %v1328_v14  ;;  %v1370_v24 = vrot.slane %v1369_v19, 1 }
 0x1b2   : > { %v1337_v26 = vadd.f32 %v1336_v20, %v1335_v46  ;;  %v1377_v0 = vrot.slane %v1376_v22, 1 }
 0x1b3   : > { %v1371_v28 = vadd.f32 %v1370_v24, %v1369_v19 }
 0x1b4   : > { %v1340_v29 = vcombine.low %v1330_v23, %v1337_v26  ;;  %v1378_v30 = vadd.f32 %v1377_v0, %v1376_v22 }
 0x1b6   : > { %v1347_v31 = vrot.slane %v1340_v29, %v1346_v25  ;;  %v1381_v33 = vcombine.low %v1371_v28, %v1378_v30 }
 0x1b8   : > { %v1354_v35 = vrot.slane %v1347_v31, %v1346_v25  ;;  %v1388_v36 = vrot.slane %v1381_v33, %v1346_v25 }
 0x1ba   : > { %1360 = vst.msk [vmem:[%s229_s19] sm:$0x3] %vm1358_vm4, %v1354_v35  ;;  %v1395_v63 = vrot.slane %v1388_v36, %v1346_v25 }
 0x1bc   : > { %1397 = vst.msk [vmem:[%s233_s22] sm:$0x3] %vm1358_vm4, %v1395_v63 }
 0x1bd PF: > { %s16_s15 = sadd.s32 1, %s1953_s15  }
 0x1be   : > { %p13_p3 = scmp.ge.s32.totalorder %s16_s15, 4  }
 0x1c0   :  { %15 = sbr.rel (!%p13_p3) target bundleno = 1 (0x1), region = 95 }
 0x1c7   :  { %1447 = vsyncpa [#allocation3], 1 }
 0x1c8   :  { %1449 = vsyncpa [#allocation3 + $0x1], 1 }

// kernel: encoder_forward.13
= control target key start
LH: loop header
LB: loop body
LE: loop exit
PB: predicated region body
PF: predicated region fallthrough
CT: control target
= control target key end

     0   :  { %s615_s15 = smov 0   ;;  %s617_s16 = smov 0   ;;  %s665_s0 = inlined_call_operand.vmem [shape: f32[2,2,2,2,512], index: 0, kind: input, shape index: {}]   ;;  %s666_s1 = inlined_call_operand.vmem [shape: f32[1,512], index: 1, kind: input, shape index: {}]   ;;  %s667_s2 = inlined_call_operand.vmem [shape: f32[1,512], index: 2, kind: input, shape index: {}]   ;;  %s668_s3 = inlined_call_operand.vmem [shape: f32[2,2,2,2,512], index: 3, kind: output, shape index: {0}]   ;;  %s669_s4 = inlined_call_operand.vmem [shape: f32[2,2,2,256], index: 4, kind: output, shape index: {1}]  }
   0x1   :  { %s619_s17 = smov 0  }
   0x2 LB: > { %s27_s18 = sadd.s32 1, %s583_s16  ;;  %p528_p0 = scmp.ge.s32.totalorder %s587_s17, 1  ;;  %s587_s17 = sphi %s619_s17, %s15_s17   ;;  %s583_s16 = sphi %s617_s16, %s671_s16   ;;  %s579_s15 = sphi %s615_s15, %s670_s15  }
   0x3   : > { %p29_p1 = scmp.ge.s32.totalorder %s27_s18, 2  ;;  %p189_p2 = scmp.lt.s32.totalorder %s587_s17, 3 }
   0x5   : > { %s673_s18 = smov (%p29_p1, %s27_s18), 0  ;;  %p190_p3 = pnand %p528_p0, %p189_p2 }
   0x6   : > { %p236_p4 = scmp.lt.s32.totalorder (!%p190_p3), %s579_s15, 1  ;;  %v274_v0 = vlaneseq (!%p190_p3)  ;;  %v589_v1 = vmov (!%p190_p3), 1983009808   ;;  %v272_v4 = vld [vmem:[%s666_s1] sm:$0xf] (!%p190_p3) }
   0x7   : > { %193 = sbr.rel (%p190_p3) target bundleno = 33 (0x21), region = 32  ;;  %v293_v2 = vunpack.c.l.s4 (!%p190_p3), %v589_v1  ;;  %v312_v6 = vld [vmem:[%s667_s2] sm:$0xf] (!%p190_p3) }
   0x8   : > { %v275_v3 = vshrl.u32 (!%p190_p3), %v274_v0, 7 }
   0x9   : > { %v294_v5 = vunpack.c.0.s8 (!%p190_p3), %v293_v2 }
   0xa   : > { %v276_v7 = vsub.s32 (!%p190_p3), 0, %v275_v3  ;;  %v280_v8 = vsub.s32 (!%p190_p3), 1, %v275_v3  ;;  %v284_v9 = vsub.s32 (!%p190_p3), 2, %v275_v3  ;;  %v288_v10 = vsub.s32 (!%p190_p3), 3, %v275_v3 }
   0xb   : > { %v297_v11 = vsub.s32 (!%p190_p3), %v294_v5, %v275_v3 }
   0xc   : > { %v277_v12 = vrot.slane (!%p190_p3), %v272_v4, %v276_v7  ;;  %v281_v13 = vrot.slane (!%p190_p3), %v272_v4, %v280_v8  ;;  %v285_v14 = vrot.slane (!%p190_p3), %v272_v4, %v284_v9  ;;  %v289_v15 = vrot.slane (!%p190_p3), %v272_v4, %v288_v10 }
   0xd   : > { %v317_v16 = vrot.slane (!%p190_p3), %v312_v6, %v276_v7  ;;  %v321_v17 = vrot.slane (!%p190_p3), %v312_v6, %v280_v8  ;;  %v325_v18 = vrot.slane (!%p190_p3), %v312_v6, %v284_v9  ;;  %v329_v19 = vrot.slane (!%p190_p3), %v312_v6, %v288_v10 }
   0xe   : > { %s675_s15 = smov (!%p236_p4, %s579_s15), 1  ;;  %v290_v20 = vcombine.low %v277_v12, %v281_v13  ;;  %v291_v21 = vcombine.low %v285_v14, %v289_v15 }
   0xf   : > { %s537_s23 = sshll.u32 %s675_s15, 5  ;;  %v330_v22 = vcombine.low %v317_v16, %v321_v17  ;;  %v331_v23 = vcombine.low %v325_v18, %v329_v19  ;;  %s539_s30 = sshll.u32 %s675_s15, 3 }
  0x10   : > { %s244_s26 = scalar_lea.vmem %s665_s0, %s537_s23  ;;  %v298_v25 = vrot.slane %v290_v20, %v297_v11  ;;  %v305_v26 = vrot.slane %v291_v21, %v297_v11  ;;  %s255_s29 = scalar_lea.vmem %s668_s3, %s537_s23 }
  0x11   : > { %v268_v24 = vld [vmem:[%s244_s26] sm:$0xff]  ;;  %v338_v27 = vrot.slane %v330_v22, %v297_v11  ;;  %v345_v28 = vrot.slane %v331_v23, %v297_v11  ;;  %v269_v29 = vld [vmem:[%s244_s26 + $0x8] sm:$0xff]  ;;  %v270_v30 = vld [vmem:[%s244_s26 + $0x10] sm:$0xff]  ;;  %s266_s7 = scalar_lea.vmem %s669_s4, %s539_s30 }
  0x12   : > { %v271_v31 = vld [vmem:[%s244_s26 + $0x18] sm:$0xff]  ;;  %v306_v32 = vcombine.low %v298_v25, %v305_v26 }
  0x13   : > { %v346_v33 = vcombine.low %v338_v27, %v345_v28 }
  0x14   : > { %v308_v34 = vmul.f32 %v306_v32, %v268_v24  ;;  %v309_v35 = vmul.f32 %v306_v32, %v269_v29  ;;  %v310_v36 = vmul.f32 %v306_v32, %v270_v30  ;;  %v311_v37 = vmul.f32 %v306_v32, %v271_v31 }
  0x16   : > { %v348_v38 = vadd.f32 %v346_v33, %v308_v34  ;;  %v349_v39 = vadd.f32 %v346_v33, %v309_v35  ;;  %v350_v40 = vadd.f32 %v346_v33, %v310_v36  ;;  %v351_v41 = vadd.f32 %v346_v33, %v311_v37 }
  0x18   : > { %v352_v42 = vmax.f32 %v348_v38, 0.0  ;;  %v353_v43 = vmax.f32 %v349_v39, 0.0  ;;  %v354_v44 = vmax.f32 %v350_v40, 0.0  ;;  %v355_v45 = vmax.f32 %v351_v41, 0.0 }
  0x1a   : > { %356 = vst [vmem:[%s255_s29] sm:$0xff] %v352_v42  ;;  %357 = vst [vmem:[%s255_s29 + $0x8] sm:$0xff] %v353_v43  ;;  %v360_v46 = vmax.f32 %v352_v42, %v353_v43  ;;  %v361_v47 = vmax.f32 %v354_v44, %v355_v45 }
  0x1b   : > { %358 = vst [vmem:[%s255_s29 + $0x10] sm:$0xff] %v354_v44  ;;  %359 = vst [vmem:[%s255_s29 + $0x18] sm:$0xff] %v355_v45 }
  0x1c   : > { %v364_v48 = vrot.slane %v360_v46, 4  ;;  %v365_v49 = vrot.slane %v361_v47, 4 }
  0x1e   : > { %v368_v50 = vmax.f32 %v360_v46, %v364_v48  ;;  %v369_v51 = vmax.f32 %v361_v47, %v365_v49 }
  0x20   : > { %370 = vst [vmem:[%s266_s7] sm:$0xf] %v368_v50  ;;  %371 = vst [vmem:[%s266_s7 + $0x4] sm:$0xf] %v369_v51 }
  0x21 PF: > { %s15_s17 = sadd.s32 1, %s587_s17   ;;  %s670_s15 = smov %s583_s16 }
  0x22   : > { %p12_p5 = scmp.ge.s32.totalorder %s15_s17, 4   ;;  %s671_s16 = smov %s673_s18 }
  0x24   :  { %14 = sbr.rel (!%p12_p5) target bundleno = 2 (0x2), region = 74 }

// kernel: encoder_forward.15
= control target key start
LH: loop header
LB: loop body
LE: loop exit
PB: predicated region body
PF: predicated region fallthrough
CT: control target
= control target key end

     0   :  { %s374_s12 = smov 0   ;;  %s376_s13 = smov 0   ;;  %s406_s0 = inlined_call_operand.vmem [shape: f32[2,1,2,1,1024], index: 0, kind: input, shape index: {}]   ;;  %s407_s1 = inlined_call_operand.vmem [shape: f32[1,1024], index: 1, kind: input, shape index: {}]   ;;  %s408_s2 = inlined_call_operand.vmem [shape: f32[1,1024], index: 2, kind: input, shape index: {}]   ;;  %s409_s3 = inlined_call_operand.vmem [shape: f32[2,1,2,1,1024], index: 3, kind: output, shape index: {}]  }
   0x1   :  { %s378_s14 = smov 0  }
   0x2 LB: > { %s25_s15 = sadd.s32 1, %s348_s13  ;;  %p301_p0 = scmp.ge.s32.totalorder %s352_s14, 1  ;;  %s352_s14 = sphi %s378_s14, %s13_s14   ;;  %s348_s13 = sphi %s376_s13, %s411_s13   ;;  %s344_s12 = sphi %s374_s12, %s410_s12  }
   0x3   : > { %p27_p1 = scmp.ge.s32.totalorder %s25_s15, 2  ;;  %p156_p2 = scmp.lt.s32.totalorder %s352_s14, 3 }
   0x5   : > { %s413_s15 = smov (%p27_p1, %s25_s15), 0  ;;  %p157_p3 = pnand %p301_p0, %p156_p2 }
   0x6   : > { %p186_p4 = scmp.lt.s32.totalorder (!%p157_p3), %s344_s12, 1  ;;  %v204_v0 = vld [vmem:[%s407_s1] sm:$0xff] (!%p157_p3) }
   0x7   : > { %160 = sbr.rel (%p157_p3) target bundleno = 25 (0x19), region = 32  ;;  %v207_v3 = vld [vmem:[%s408_s2] sm:$0xff] (!%p157_p3) }
   0xe   : > { %s415_s12 = smov (!%p186_p4, %s344_s12), 1 }
   0xf   : > { %s302_s16 = sshll.u32 %s415_s12, 4 }
  0x10   : > { %s193_s21 = scalar_lea.vmem %s406_s0, %s302_s16  ;;  %s201_s26 = scalar_lea.vmem %s409_s3, %s302_s16 }
  0x11   : > { %v202_v1 = vld [vmem:[%s193_s21] sm:$0xff]  ;;  %v203_v2 = vld [vmem:[%s193_s21 + $0x8] sm:$0xff] }
  0x12   : > { %v205_v4 = vmul.f32 %v204_v0, %v202_v1  ;;  %v206_v5 = vmul.f32 %v204_v0, %v203_v2 }
  0x14   : > { %v208_v6 = vadd.f32 %v207_v3, %v205_v4  ;;  %v209_v7 = vadd.f32 %v207_v3, %v206_v5 }
  0x16   : > { %v210_v8 = vmax.f32 %v208_v6, 0.0  ;;  %v211_v9 = vmax.f32 %v209_v7, 0.0 }
  0x18   : > { %212 = vst [vmem:[%s201_s26] sm:$0xff] %v210_v8  ;;  %213 = vst [vmem:[%s201_s26 + $0x8] sm:$0xff] %v211_v9 }
  0x19 PF: > { %s13_s14 = sadd.s32 1, %s352_s14   ;;  %s410_s12 = smov %s348_s13 }
  0x1a   : > { %p10_p5 = scmp.ge.s32.totalorder %s13_s14, 4   ;;  %s411_s13 = smov %s413_s15 }
  0x1c   :  { %12 = sbr.rel (!%p10_p5) target bundleno = 2 (0x2), region = 62 }

// kernel: encoder_forward.14
= control target key start
LH: loop header
LB: loop body
LE: loop exit
PB: predicated region body
PF: predicated region fallthrough
CT: control target
= control target key end

     0   :  { %s5327_s15 = smov 0   ;;  %s8943_s0 = inlined_call_operand.vmem [shape: f32[2,10,256], index: 0, kind: input, shape index: {}]   ;;  %s8944_s1 = inlined_call_operand.vmem [shape: f32[9,256,512], index: 1, kind: input, shape index: {}]   ;;  %s8945_s2 = inlined_call_operand.vmem [shape: f32[2,4,512], index: 2, kind: output, shape index: {0}]   ;;  %s8946_s3 = inlined_call_operand.vmem [shape: f32[2,1,512], index: 3, kind: output, shape index: {1}]   ;;  %s8947_s4 = inlined_call_operand.vmem [shape: f32[2,1,512], index: 4, kind: output, shape index: {2}]  }
   0x1 LB: > { %s3037_s16 = sadd.s32 4294967295, %s5299_s15   ;;  %p3041_p0 = scmp.ge.s32.totalorder %s5299_s15, 1  ;;  %s5299_s15 = sphi %s5327_s15, %s15_s15  }
   0x2   : > { %p167_p1 = scmp.lt.s32.totalorder %s5299_s15, 3 }
   0x4   : > { %p168_p2 = pnand %p3041_p0, %p167_p1 }
   0x5   : > { %v3049_v0 = vld [vmem:[%s8944_s1 + $0x408] sm:$0xff] (!%p168_p2)  ;;  %v3051_v2 = vld [vmem:[%s8944_s1 + $0x418] sm:$0xff] (!%p168_p2)  ;;  %v3048_v5 = vld [vmem:[%s8944_s1 + $0x400] sm:$0xff] (!%p168_p2)  ;;  %p5541_p3 = scmp.lt.s32.totalorder (!%p168_p2), %s3037_s16, 1  ;;  %vm2336_vm2 = vcmask (!%p168_p2), 1042432   ;;  %vm2499_vm3 = vcmask (!%p168_p2), 1041408  }
   0x6   : > { %171 = sbr.rel (%p168_p2) target bundleno = 828 (0x33c), region = 28  ;;  %v3053_v1 = vld [vmem:[%s8944_s1 + $0x428] sm:$0xff] (!%p168_p2)  ;;  %v3055_v4 = vld [vmem:[%s8944_s1 + $0x438] sm:$0xff] (!%p168_p2)  ;;  %v3052_v6 = vld [vmem:[%s8944_s1 + $0x420] sm:$0xff] (!%p168_p2)  ;;  %vm2795_vm4 = vcmask (!%p168_p2), 1043456  }
   0x7   : > { %v4100_v3 = vpack.c.bf16 (!%p168_p2), %v3053_v1, %v3049_v0  ;;  %v4164_v7 = vpack.c.bf16 (!%p168_p2), %v3055_v4, %v3051_v2  ;;  %v4102_v8 = vpack.c.bf16 (!%p168_p2), %v3052_v6, %v3048_v5  ;;  %v3050_v9 = vld [vmem:[%s8944_s1 + $0x410] sm:$0xff] (!%p168_p2)  ;;  %v3057_v11 = vld [vmem:[%s8944_s1 + $0x448] sm:$0xff] (!%p168_p2)  ;;  %v3059_v14 = vld [vmem:[%s8944_s1 + $0x458] sm:$0xff] (!%p168_p2) }
   0x8   : > { %v3054_v10 = vld [vmem:[%s8944_s1 + $0x430] sm:$0xff] (!%p168_p2)  ;;  %v3061_v13 = vld [vmem:[%s8944_s1 + $0x468] sm:$0xff] (!%p168_p2)  ;;  %v3063_v15 = vld [vmem:[%s8944_s1 + $0x478] sm:$0xff] (!%p168_p2) }
   0x9   : > { %4101 = vmatprep.subr.bf16.mxu0 (!%p168_p2), %v4100_v3  ;;  %v4166_v12 = vpack.c.bf16 (!%p168_p2), %v3054_v10, %v3050_v9  ;;  %4165 = vmatprep.subr.bf16.mxu1 (!%p168_p2), %v4164_v7  ;;  %v4104_v16 = vpack.c.bf16 (!%p168_p2), %v3061_v13, %v3057_v11  ;;  %v4168_v17 = vpack.c.bf16 (!%p168_p2), %v3063_v15, %v3059_v14  ;;  %v3056_v18 = vld [vmem:[%s8944_s1 + $0x440] sm:$0xff] (!%p168_p2)  ;;  %v3058_v20 = vld [vmem:[%s8944_s1 + $0x450] sm:$0xff] (!%p168_p2)  ;;  %v3065_v23 = vld [vmem:[%s8944_s1 + $0x488] sm:$0xff] (!%p168_p2) }
   0xa   : > { %4103 = vmatpush1.bf16.msra.mxu0 (!%p168_p2), %v4102_v8  ;;  %v3060_v19 = vld [vmem:[%s8944_s1 + $0x460] sm:$0xff] (!%p168_p2)  ;;  %v3062_v22 = vld [vmem:[%s8944_s1 + $0x470] sm:$0xff] (!%p168_p2)  ;;  %v3069_v24 = vld [vmem:[%s8944_s1 + $0x4a8] sm:$0xff] (!%p168_p2) }
   0xb   : > { %4167 = vmatpush1.bf16.msra.mxu1 (!%p168_p2), %v4166_v12  ;;  %v4106_v21 = vpack.c.bf16 (!%p168_p2), %v3060_v19, %v3056_v18  ;;  %4105 = vmatprep.subr.bf16.mxu0 (!%p168_p2), %v4104_v16  ;;  %v4170_v25 = vpack.c.bf16 (!%p168_p2), %v3062_v22, %v3058_v20  ;;  %v4108_v26 = vpack.c.bf16 (!%p168_p2), %v3069_v24, %v3065_v23  ;;  %v3067_v27 = vld [vmem:[%s8944_s1 + $0x498] sm:$0xff] (!%p168_p2)  ;;  %v3064_v29 = vld [vmem:[%s8944_s1 + $0x480] sm:$0xff] (!%p168_p2)  ;;  %v3066_v32 = vld [vmem:[%s8944_s1 + $0x490] sm:$0xff] (!%p168_p2) }
   0xc   : > { %4169 = vmatprep.subr.bf16.mxu1 (!%p168_p2), %v4168_v17  ;;  %v3071_v28 = vld [vmem:[%s8944_s1 + $0x4b8] sm:$0xff] (!%p168_p2)  ;;  %v3068_v31 = vld [vmem:[%s8944_s1 + $0x4a0] sm:$0xff] (!%p168_p2)  ;;  %v3070_v33 = vld [vmem:[%s8944_s1 + $0x4b0] sm:$0xff] (!%p168_p2) }
   0xd   : > { %v4172_v30 = vpack.c.bf16 %v3071_v28, %v3067_v27  ;;  %v4110_v34 = vpack.c.bf16 %v3068_v31, %v3064_v29  ;;  %v3073_v35 = vld [vmem:[%s8944_s1 + $0x4c8] sm:$0xff]  ;;  %v3075_v37 = vld [vmem:[%s8944_s1 + $0x4d8] sm:$0xff]  ;;  %v4174_v38 = vpack.c.bf16 %v3070_v33, %v3066_v32  ;;  %v3072_v41 = vld [vmem:[%s8944_s1 + $0x4c0] sm:$0xff]  ;;  %s8954_s16 = smov (!%p5541_p3, %s3037_s16), 1 }
   0xe   : > { %4107 = vmatpush1.bf16.msra.mxu0 %v4106_v21  ;;  %v3077_v36 = vld [vmem:[%s8944_s1 + $0x4e8] sm:$0xff]  ;;  %v3079_v40 = vld [vmem:[%s8944_s1 + $0x4f8] sm:$0xff]  ;;  %v3076_v42 = vld [vmem:[%s8944_s1 + $0x4e0] sm:$0xff]  ;;  %s4098_s18 = sshll.u32 %s8954_s16, 5  ;;  %s3046_s21 = sshll.u32 %s8954_s16, 2 }
   0xf   : > { %4171 = vmatpush1.bf16.msra.mxu1 %v4170_v25  ;;  %4109 = vmatprep.subr.bf16.mxu0 %v4108_v26  ;;  %v4112_v39 = vpack.c.bf16 %v3077_v36, %v3073_v35  ;;  %v4176_v43 = vpack.c.bf16 %v3079_v40, %v3075_v37  ;;  %v3074_v44 = vld [vmem:[%s8944_s1 + $0x4d0] sm:$0xff]  ;;  %v3081_v46 = vld [vmem:[%s8944_s1 + $0x508] sm:$0xff]  ;;  %v3083_v48 = vld [vmem:[%s8944_s1 + $0x518] sm:$0xff]  ;;  %v4114_v50 = vpack.c.bf16 %v3076_v42, %v3072_v41  ;;  %s5627_s11 = scalar_lea.vmem %s8943_s0, %s4098_s18  ;;  %s214_s24 = scalar_lea.vmem %s8946_s3, %s3046_s21 }
  0x10   : > { %4173 = vmatprep.subr.bf16.mxu1 %v4172_v30  ;;  %v3078_v45 = vld [vmem:[%s8944_s1 + $0x4f0] sm:$0xff]  ;;  %v3085_v47 = vld [vmem:[%s8944_s1 + $0x528] sm:$0xff]  ;;  %v3087_v49 = vld [vmem:[%s8944_s1 + $0x538] sm:$0xff]  ;;  %s218_s27 = scalar_lea.vmem %s8947_s4, %s3046_s21 }
  0x11   : > { %v4178_v51 = vpack.c.bf16 %v3078_v45, %v3074_v44  ;;  %v4116_v52 = vpack.c.bf16 %v3085_v47, %v3081_v46  ;;  %v3080_v53 = vld [vmem:[%s8944_s1 + $0x500] sm:$0xff]  ;;  %v3082_v55 = vld [vmem:[%s8944_s1 + $0x510] sm:$0xff]  ;;  %v4180_v56 = vpack.c.bf16 %v3087_v49, %v3083_v48  ;;  %v3089_v58 = vld [vmem:[%s8944_s1 + $0x548] sm:$0xff] }
  0x12   : > { %4111 = vmatpush1.bf16.msra.mxu0 %v4110_v34  ;;  %v3084_v54 = vld [vmem:[%s8944_s1 + $0x520] sm:$0xff]  ;;  %v3086_v57 = vld [vmem:[%s8944_s1 + $0x530] sm:$0xff]  ;;  %v3093_v59 = vld [vmem:[%s8944_s1 + $0x568] sm:$0xff] }
  0x13   : > { %4175 = vmatpush1.bf16.msra.mxu1 %v4174_v38  ;;  %4113 = vmatprep.subr.bf16.mxu0 %v4112_v39  ;;  %v3091_v60 = vld [vmem:[%s8944_s1 + $0x558] sm:$0xff]  ;;  %v4118_v62 = vpack.c.bf16 %v3084_v54, %v3080_v53  ;;  %v4182_v63 = vpack.c.bf16 %v3086_v57, %v3082_v55  ;;  %v4120_v0 = vpack.c.bf16 %v3093_v59, %v3089_v58  ;;  %v3088_v1 = vld [vmem:[%s8944_s1 + $0x540] sm:$0xff]  ;;  %v3090_v3 = vld [vmem:[%s8944_s1 + $0x550] sm:$0xff] }
  0x14   : > { %4177 = vmatprep.subr.bf16.mxu1 %v4176_v43  ;;  %v3095_v61 = vld [vmem:[%s8944_s1 + $0x578] sm:$0xff]  ;;  %v3092_v2 = vld [vmem:[%s8944_s1 + $0x560] sm:$0xff]  ;;  %v3094_v5 = vld [vmem:[%s8944_s1 + $0x570] sm:$0xff] }
  0x15   : > { %v4184_v4 = vpack.c.bf16 %v3095_v61, %v3091_v60  ;;  %v3097_v6 = vld [vmem:[%s8944_s1 + $0x588] sm:$0xff]  ;;  %v3099_v8 = vld [vmem:[%s8944_s1 + $0x598] sm:$0xff]  ;;  %v4122_v10 = vpack.c.bf16 %v3092_v2, %v3088_v1  ;;  %v4186_v11 = vpack.c.bf16 %v3094_v5, %v3090_v3  ;;  %v3096_v13 = vld [vmem:[%s8944_s1 + $0x580] sm:$0xff] }
  0x16   : > { %4115 = vmatpush1.bf16.msra.mxu0 %v4114_v50  ;;  %v3101_v7 = vld [vmem:[%s8944_s1 + $0x5a8] sm:$0xff]  ;;  %v3103_v9 = vld [vmem:[%s8944_s1 + $0x5b8] sm:$0xff]  ;;  %v3100_v14 = vld [vmem:[%s8944_s1 + $0x5a0] sm:$0xff] }
  0x17   : > { %4179 = vmatpush1.bf16.msra.mxu1 %v4178_v51  ;;  %4117 = vmatprep.subr.bf16.mxu0 %v4116_v52  ;;  %v4124_v12 = vpack.c.bf16 %v3101_v7, %v3097_v6  ;;  %v3098_v15 = vld [vmem:[%s8944_s1 + $0x590] sm:$0xff]  ;;  %v4188_v16 = vpack.c.bf16 %v3103_v9, %v3099_v8  ;;  %v3105_v18 = vld [vmem:[%s8944_s1 + $0x5c8] sm:$0xff]  ;;  %v3107_v20 = vld [vmem:[%s8944_s1 + $0x5d8] sm:$0xff]  ;;  %v4126_v22 = vpack.c.bf16 %v3100_v14, %v3096_v13 }
  0x18   : > { %4181 = vmatprep.subr.bf16.mxu1 %v4180_v56  ;;  %v3102_v17 = vld [vmem:[%s8944_s1 + $0x5b0] sm:$0xff]  ;;  %v3109_v19 = vld [vmem:[%s8944_s1 + $0x5e8] sm:$0xff]  ;;  %v3111_v21 = vld [vmem:[%s8944_s1 + $0x5f8] sm:$0xff] }
  0x19   : > { %v4190_v23 = vpack.c.bf16 %v3102_v17, %v3098_v15  ;;  %v4128_v24 = vpack.c.bf16 %v3109_v19, %v3105_v18  ;;  %v3104_v25 = vld [vmem:[%s8944_s1 + $0x5c0] sm:$0xff]  ;;  %v3106_v27 = vld [vmem:[%s8944_s1 + $0x5d0] sm:$0xff]  ;;  %v4192_v28 = vpack.c.bf16 %v3111_v21, %v3107_v20  ;;  %v3113_v30 = vld [vmem:[%s8944_s1 + $0x608] sm:$0xff] }
  0x1a   : > { %4119 = vmatpush1.bf16.msra.mxu0 %v4118_v62  ;;  %v3108_v26 = vld [vmem:[%s8944_s1 + $0x5e0] sm:$0xff]  ;;  %v3110_v29 = vld [vmem:[%s8944_s1 + $0x5f0] sm:$0xff]  ;;  %v3117_v31 = vld [vmem:[%s8944_s1 + $0x628] sm:$0xff] }
  0x1b   : > { %4183 = vmatpush1.bf16.msra.mxu1 %v4182_v63  ;;  %4121 = vmatprep.subr.bf16.mxu0 %v4120_v0  ;;  %v3115_v32 = vld [vmem:[%s8944_s1 + $0x618] sm:$0xff]  ;;  %v4130_v34 = vpack.c.bf16 %v3108_v26, %v3104_v25  ;;  %v4194_v35 = vpack.c.bf16 %v3110_v29, %v3106_v27  ;;  %v4132_v36 = vpack.c.bf16 %v3117_v31, %v3113_v30  ;;  %v3112_v37 = vld [vmem:[%s8944_s1 + $0x600] sm:$0xff]  ;;  %v3114_v39 = vld [vmem:[%s8944_s1 + $0x610] sm:$0xff] }
  0x1c   : > { %4185 = vmatprep.subr.bf16.mxu1 %v4184_v4  ;;  %v3119_v33 = vld [vmem:[%s8944_s1 + $0x638] sm:$0xff]  ;;  %v3116_v38 = vld [vmem:[%s8944_s1 + $0x620] sm:$0xff]  ;;  %v3118_v41 = vld [vmem:[%s8944_s1 + $0x630] sm:$0xff] }
  0x1d   : > { %v4196_v40 = vpack.c.bf16 %v3119_v33, %v3115_v32  ;;  %v3121_v42 = vld [vmem:[%s8944_s1 + $0x648] sm:$0xff]  ;;  %v3123_v44 = vld [vmem:[%s8944_s1 + $0x658] sm:$0xff]  ;;  %v4134_v46 = vpack.c.bf16 %v3116_v38, %v3112_v37  ;;  %v4198_v47 = vpack.c.bf16 %v3118_v41, %v3114_v39  ;;  %v3120_v49 = vld [vmem:[%s8944_s1 + $0x640] sm:$0xff] }
  0x1e   : > { %4123 = vmatpush1.bf16.msra.mxu0 %v4122_v10  ;;  %v3125_v43 = vld [vmem:[%s8944_s1 + $0x668] sm:$0xff]  ;;  %v3127_v45 = vld [vmem:[%s8944_s1 + $0x678] sm:$0xff]  ;;  %v3124_v50 = vld [vmem:[%s8944_s1 + $0x660] sm:$0xff] }
  0x1f   : > { %4187 = vmatpush1.bf16.msra.mxu1 %v4186_v11  ;;  %4125 = vmatprep.subr.bf16.mxu0 %v4124_v12  ;;  %v4136_v48 = vpack.c.bf16 %v3125_v43, %v3121_v42  ;;  %v3122_v51 = vld [vmem:[%s8944_s1 + $0x650] sm:$0xff]  ;;  %v4200_v52 = vpack.c.bf16 %v3127_v45, %v3123_v44  ;;  %v3129_v54 = vld [vmem:[%s8944_s1 + $0x688] sm:$0xff]  ;;  %v3131_v56 = vld [vmem:[%s8944_s1 + $0x698] sm:$0xff]  ;;  %v4138_v58 = vpack.c.bf16 %v3124_v50, %v3120_v49 }
  0x20   : > { %4189 = vmatprep.subr.bf16.mxu1 %v4188_v16  ;;  %v3126_v53 = vld [vmem:[%s8944_s1 + $0x670] sm:$0xff]  ;;  %v3133_v55 = vld [vmem:[%s8944_s1 + $0x6a8] sm:$0xff]  ;;  %v3135_v57 = vld [vmem:[%s8944_s1 + $0x6b8] sm:$0xff] }
  0x21   : > { %v4202_v59 = vpack.c.bf16 %v3126_v53, %v3122_v51  ;;  %v4140_v60 = vpack.c.bf16 %v3133_v55, %v3129_v54  ;;  %v3128_v61 = vld [vmem:[%s8944_s1 + $0x680] sm:$0xff]  ;;  %v3130_v63 = vld [vmem:[%s8944_s1 + $0x690] sm:$0xff]  ;;  %v4204_v0 = vpack.c.bf16 %v3135_v57, %v3131_v56  ;;  %v3137_v2 = vld [vmem:[%s8944_s1 + $0x6c8] sm:$0xff] }
  0x22   : > { %4127 = vmatpush1.bf16.msra.mxu0 %v4126_v22  ;;  %v3132_v62 = vld [vmem:[%s8944_s1 + $0x6a0] sm:$0xff]  ;;  %v3134_v1 = vld [vmem:[%s8944_s1 + $0x6b0] sm:$0xff]  ;;  %v3141_v3 = vld [vmem:[%s8944_s1 + $0x6e8] sm:$0xff] }
  0x23   : > { %4191 = vmatpush1.bf16.msra.mxu1 %v4190_v23  ;;  %4129 = vmatprep.subr.bf16.mxu0 %v4128_v24  ;;  %v3139_v4 = vld [vmem:[%s8944_s1 + $0x6d8] sm:$0xff]  ;;  %v4142_v6 = vpack.c.bf16 %v3132_v62, %v3128_v61  ;;  %v3136_v7 = vld [vmem:[%s8944_s1 + $0x6c0] sm:$0xff]  ;;  %v4206_v8 = vpack.c.bf16 %v3134_v1, %v3130_v63  ;;  %v4144_v9 = vpack.c.bf16 %v3141_v3, %v3137_v2  ;;  %v3138_v11 = vld [vmem:[%s8944_s1 + $0x6d0] sm:$0xff] }
  0x24   : > { %4193 = vmatprep.subr.bf16.mxu1 %v4192_v28  ;;  %v3143_v5 = vld [vmem:[%s8944_s1 + $0x6f8] sm:$0xff]  ;;  %v3140_v10 = vld [vmem:[%s8944_s1 + $0x6e0] sm:$0xff]  ;;  %v3142_v12 = vld [vmem:[%s8944_s1 + $0x6f0] sm:$0xff] }
  0x25   : > { %v4208_v13 = vpack.c.bf16 %v3143_v5, %v3139_v4  ;;  %v3145_v14 = vld [vmem:[%s8944_s1 + $0x708] sm:$0xff]  ;;  %v3147_v17 = vld [vmem:[%s8944_s1 + $0x718] sm:$0xff]  ;;  %v4146_v20 = vpack.c.bf16 %v3140_v10, %v3136_v7  ;;  %v4210_v21 = vpack.c.bf16 %v3142_v12, %v3138_v11  ;;  %v3144_v23 = vld [vmem:[%s8944_s1 + $0x700] sm:$0xff] }
  0x26   : > { %4131 = vmatpush1.bf16.msra.mxu0 %v4130_v34  ;;  %v3149_v15 = vld [vmem:[%s8944_s1 + $0x728] sm:$0xff]  ;;  %v3151_v18 = vld [vmem:[%s8944_s1 + $0x738] sm:$0xff]  ;;  %v3148_v24 = vld [vmem:[%s8944_s1 + $0x720] sm:$0xff] }
  0x27   : > { %4195 = vmatpush1.bf16.msra.mxu1 %v4194_v35  ;;  %4133 = vmatprep.subr.bf16.mxu0 %v4132_v36  ;;  %v370_v16 = vld [vmem:[%s5627_s11 + $0x8] sm:$0x1e]  ;;  %v4148_v22 = vpack.c.bf16 %v3149_v15, %v3145_v14  ;;  %v3146_v25 = vld [vmem:[%s8944_s1 + $0x710] sm:$0xff]  ;;  %v4212_v26 = vpack.c.bf16 %v3151_v18, %v3147_v17  ;;  %v3155_v30 = vld [vmem:[%s8944_s1 + $0x758] sm:$0xff]  ;;  %v4150_v32 = vpack.c.bf16 %v3148_v24, %v3144_v23 }
  0x28   : > { %4197 = vmatprep.subr.bf16.mxu1 %v4196_v40  ;;  %v503_v19 = vrot.slane %v370_v16, 1  ;;  %v3150_v27 = vld [vmem:[%s8944_s1 + $0x730] sm:$0xff]  ;;  %v3153_v28 = vld [vmem:[%s8944_s1 + $0x748] sm:$0xff]  ;;  %v3159_v31 = vld [vmem:[%s8944_s1 + $0x778] sm:$0xff] }
  0x29   : > { %v3157_v29 = vld [vmem:[%s8944_s1 + $0x768] sm:$0xff]  ;;  %v4214_v33 = vpack.c.bf16 %v3150_v27, %v3146_v25  ;;  %v3152_v35 = vld [vmem:[%s8944_s1 + $0x740] sm:$0xff]  ;;  %v3154_v37 = vld [vmem:[%s8944_s1 + $0x750] sm:$0xff]  ;;  %v4216_v38 = vpack.c.bf16 %v3159_v31, %v3155_v30 }
  0x2a   : > { %4135 = vmatpush1.bf16.msra.mxu0 %v4134_v46  ;;  %570 = vmatprep.mubr.f32.mxu0 %v503_v19  ;;  %v4152_v34 = vpack.c.bf16 %v3157_v29, %v3153_v28  ;;  %v3156_v36 = vld [vmem:[%s8944_s1 + $0x760] sm:$0xff]  ;;  %v3158_v39 = vld [vmem:[%s8944_s1 + $0x770] sm:$0xff]  ;;  %v3161_v40 = vld [vmem:[%s8944_s1 + $0x788] sm:$0xff] }
  0x2b   : > { %4199 = vmatpush1.bf16.msra.mxu1 %v4198_v47  ;;  %4137 = vmatprep.subr.bf16.mxu0 %v4136_v48  ;;  %v3165_v41 = vld [vmem:[%s8944_s1 + $0x7a8] sm:$0xff]  ;;  %v3163_v42 = vld [vmem:[%s8944_s1 + $0x798] sm:$0xff]  ;;  %v4154_v44 = vpack.c.bf16 %v3156_v36, %v3152_v35  ;;  %v4218_v45 = vpack.c.bf16 %v3158_v39, %v3154_v37  ;;  %v3160_v47 = vld [vmem:[%s8944_s1 + $0x780] sm:$0xff] }
  0x2c   : > { %4201 = vmatprep.subr.bf16.mxu1 %v4200_v52  ;;  %641 = vmatprep.mubr.f32.mxu1 %v503_v19  ;;  %v3167_v43 = vld [vmem:[%s8944_s1 + $0x7b8] sm:$0xff]  ;;  %v4156_v46 = vpack.c.bf16 %v3165_v41, %v3161_v40  ;;  %v3164_v48 = vld [vmem:[%s8944_s1 + $0x7a0] sm:$0xff]  ;;  %v3162_v49 = vld [vmem:[%s8944_s1 + $0x790] sm:$0xff] }
  0x2d   : > { %v4220_v50 = vpack.c.bf16 %v3167_v43, %v3163_v42  ;;  %v3166_v51 = vld [vmem:[%s8944_s1 + $0x7b0] sm:$0xff]  ;;  %v3169_v52 = vld [vmem:[%s8944_s1 + $0x7c8] sm:$0xff]  ;;  %v3171_v54 = vld [vmem:[%s8944_s1 + $0x7d8] sm:$0xff]  ;;  %v4158_v56 = vpack.c.bf16 %v3164_v48, %v3160_v47  ;;  %v219_v43 = vlaneseq }
  0x2e   : > { %4139 = vmatpush1.bf16.msra.mxu0 %v4138_v58  ;;  %v3173_v53 = vld [vmem:[%s8944_s1 + $0x7e8] sm:$0xff]  ;;  %v3175_v55 = vld [vmem:[%s8944_s1 + $0x7f8] sm:$0xff]  ;;  %v4222_v57 = vpack.c.bf16 %v3166_v51, %v3162_v49  ;;  %v3170_v61 = vld [vmem:[%s8944_s1 + $0x7d0] sm:$0xff] }
  0x2f   : > { %4203 = vmatpush1.bf16.msra.mxu1 %v4202_v59  ;;  %4141 = vmatprep.subr.bf16.mxu0 %v4140_v60  ;;  %v4160_v58 = vpack.c.bf16 %v3173_v53, %v3169_v52  ;;  %v3168_v59 = vld [vmem:[%s8944_s1 + $0x7c0] sm:$0xff]  ;;  %v4224_v62 = vpack.c.bf16 %v3175_v55, %v3171_v54  ;;  %v3174_v63 = vld [vmem:[%s8944_s1 + $0x7f0] sm:$0xff]  ;;  %v246_v1 = vld [vmem:[%s8944_s1 + $0x28] sm:$0xff]  ;;  %vm2855_vm5 = vcmp.lt.s32.totalorder %v219_v43, 512 }
  0x30   : > { %4205 = vmatprep.subr.bf16.mxu1 %v4204_v0  ;;  %v3172_v60 = vld [vmem:[%s8944_s1 + $0x7e0] sm:$0xff]  ;;  %v242_v0 = vld [vmem:[%s8944_s1 + $0x8] sm:$0xff]  ;;  %v244_v2 = vld [vmem:[%s8944_s1 + $0x18] sm:$0xff] }
  0x31   : > { %v248_v3 = vld [vmem:[%s8944_s1 + $0x38] sm:$0xff]  ;;  %v4162_v4 = vpack.c.bf16 %v3172_v60, %v3168_v59  ;;  %v369_v5 = vld [vmem:[%s5627_s11] sm:$0x1e]  ;;  %v4228_v7 = vpack.c.bf16 %v246_v1, %v242_v0  ;;  %v243_v10 = vld [vmem:[%s8944_s1 + $0x10] sm:$0xff] }
  0x32   : > { %4143 = vmatpush1.bf16.msra.mxu0 %v4142_v6  ;;  %v4226_v6 = vpack.c.bf16 %v3174_v63, %v3170_v61  ;;  %v4292_v11 = vpack.c.bf16 %v248_v3, %v244_v2  ;;  %v247_v12 = vld [vmem:[%s8944_s1 + $0x30] sm:$0xff]  ;;  %v254_v14 = vld [vmem:[%s8944_s1 + $0x68] sm:$0xff]  ;;  %v502_v15 = vrot.slane %v369_v5, 1  ;;  %v252_v16 = vld [vmem:[%s8944_s1 + $0x58] sm:$0xff] }
  0x33   : > { %4207 = vmatpush1.bf16.msra.mxu1 %v4206_v8  ;;  %4145 = vmatprep.subr.bf16.mxu0 %v4144_v9  ;;  %v241_v8 = vld [vmem:[%s8944_s1] sm:$0xff]  ;;  %v256_v17 = vld [vmem:[%s8944_s1 + $0x78] sm:$0xff]  ;;  %v4294_v19 = vpack.c.bf16 %v247_v12, %v243_v10  ;;  %v251_v23 = vld [vmem:[%s8944_s1 + $0x50] sm:$0xff] }
  0x34   : > { %4209 = vmatprep.subr.bf16.mxu1 %v4208_v13  ;;  %v245_v9 = vld [vmem:[%s8944_s1 + $0x20] sm:$0xff]  ;;  %v250_v13 = vld [vmem:[%s8944_s1 + $0x48] sm:$0xff]  ;;  %v4296_v24 = vpack.c.bf16 %v256_v17, %v252_v16  ;;  %v255_v25 = vld [vmem:[%s8944_s1 + $0x70] sm:$0xff] }
  0x35   : > { %v4230_v18 = vpack.c.bf16 %v245_v9, %v241_v8  ;;  %v262_v27 = vld [vmem:[%s8944_s1 + $0xa8] sm:$0xff]  ;;  %v260_v28 = vld [vmem:[%s8944_s1 + $0x98] sm:$0xff]  ;;  %v4298_v31 = vpack.c.bf16 %v255_v25, %v251_v23  ;;  %v259_v35 = vld [vmem:[%s8944_s1 + $0x90] sm:$0xff] }
  0x36   : > { %4147 = vmatpush1.bf16.msra.mxu0 %v4146_v20  ;;  %v4232_v20 = vpack.c.bf16 %v254_v14, %v250_v13  ;;  %v264_v29 = vld [vmem:[%s8944_s1 + $0xb8] sm:$0xff]  ;;  %v263_v37 = vld [vmem:[%s8944_s1 + $0xb0] sm:$0xff]  ;;  %v270_v39 = vld [vmem:[%s8944_s1 + $0xe8] sm:$0xff] }
  0x37   : > { %4211 = vmatpush1.bf16.msra.mxu1 %v4210_v21  ;;  %4149 = vmatprep.subr.bf16.mxu0 %v4148_v22  ;;  %v249_v21 = vld [vmem:[%s8944_s1 + $0x40] sm:$0xff]  ;;  %v4300_v36 = vpack.c.bf16 %v264_v29, %v260_v28  ;;  %v268_v40 = vld [vmem:[%s8944_s1 + $0xd8] sm:$0xff]  ;;  %v267_v48 = vld [vmem:[%s8944_s1 + $0xd0] sm:$0xff] }
  0x38   : > { %4213 = vmatprep.subr.bf16.mxu1 %v4212_v26  ;;  %v253_v22 = vld [vmem:[%s8944_s1 + $0x60] sm:$0xff]  ;;  %v258_v26 = vld [vmem:[%s8944_s1 + $0x88] sm:$0xff]  ;;  %v272_v41 = vld [vmem:[%s8944_s1 + $0xf8] sm:$0xff] }
  0x39   : > { %v4234_v30 = vpack.c.bf16 %v253_v22, %v249_v21  ;;  %v269_v47 = vld [vmem:[%s8944_s1 + $0xe0] sm:$0xff]  ;;  %v4304_v49 = vpack.c.bf16 %v272_v41, %v268_v40  ;;  %v274_v51 = vld [vmem:[%s8944_s1 + $0x108] sm:$0xff]  ;;  %v276_v53 = vld [vmem:[%s8944_s1 + $0x118] sm:$0xff] }
  0x3a   : > { %4151 = vmatpush1.bf16.msra.mxu0 %v4150_v32  ;;  %v4236_v32 = vpack.c.bf16 %v262_v27, %v258_v26  ;;  %v278_v52 = vld [vmem:[%s8944_s1 + $0x128] sm:$0xff]  ;;  %v280_v54 = vld [vmem:[%s8944_s1 + $0x138] sm:$0xff]  ;;  %v273_v59 = vld [vmem:[%s8944_s1 + $0x100] sm:$0xff] }
  0x3b   : > { %4215 = vmatpush1.bf16.msra.mxu1 %v4214_v33  ;;  %4153 = vmatprep.subr.bf16.mxu0 %v4152_v34  ;;  %v257_v33 = vld [vmem:[%s8944_s1 + $0x80] sm:$0xff]  ;;  %v275_v61 = vld [vmem:[%s8944_s1 + $0x110] sm:$0xff]  ;;  %v282_v0 = vld [vmem:[%s8944_s1 + $0x148] sm:$0xff] }
  0x3c   : > { %4217 = vmatprep.subr.bf16.mxu1 %v4216_v38  ;;  %v261_v34 = vld [vmem:[%s8944_s1 + $0xa0] sm:$0xff]  ;;  %v266_v38 = vld [vmem:[%s8944_s1 + $0xc8] sm:$0xff]  ;;  %v279_v63 = vld [vmem:[%s8944_s1 + $0x130] sm:$0xff] }
  0x3d   : > { %v4238_v42 = vpack.c.bf16 %v261_v34, %v257_v33  ;;  %v277_v60 = vld [vmem:[%s8944_s1 + $0x120] sm:$0xff]  ;;  %v286_v1 = vld [vmem:[%s8944_s1 + $0x168] sm:$0xff]  ;;  %v284_v2 = vld [vmem:[%s8944_s1 + $0x158] sm:$0xff] }
  0x3e   : > { %4155 = vmatpush1.bf16.msra.mxu0 %v4154_v44  ;;  %v4302_v44 = vpack.c.bf16 %v263_v37, %v259_v35  ;;  %v288_v3 = vld [vmem:[%s8944_s1 + $0x178] sm:$0xff]  ;;  %v281_v8 = vld [vmem:[%s8944_s1 + $0x140] sm:$0xff]  ;;  %v283_v10 = vld [vmem:[%s8944_s1 + $0x150] sm:$0xff] }
  0x3f   : > { %4219 = vmatpush1.bf16.msra.mxu1 %v4218_v45  ;;  %4157 = vmatprep.subr.bf16.mxu0 %v4156_v46  ;;  %v4240_v45 = vpack.c.bf16 %v270_v39, %v266_v38  ;;  %v265_v46 = vld [vmem:[%s8944_s1 + $0xc0] sm:$0xff]  ;;  %v287_v12 = vld [vmem:[%s8944_s1 + $0x170] sm:$0xff]  ;;  %v290_v13 = vld [vmem:[%s8944_s1 + $0x188] sm:$0xff] }
  0x40   : > { %4221 = vmatprep.subr.bf16.mxu1 %v4220_v50  ;;  %v271_v50 = vld [vmem:[%s8944_s1 + $0xf0] sm:$0xff]  ;;  %v4242_v55 = vpack.c.bf16 %v269_v47, %v265_v46  ;;  %v285_v9 = vld [vmem:[%s8944_s1 + $0x160] sm:$0xff]  ;;  %v294_v14 = vld [vmem:[%s8944_s1 + $0x1a8] sm:$0xff] }
  0x41   : > { %v296_v16 = vld [vmem:[%s8944_s1 + $0x1b8] sm:$0xff]  ;;  %v4250_v17 = vpack.c.bf16 %v285_v9, %v281_v8  ;;  %v4252_v21 = vpack.c.bf16 %v294_v14, %v290_v13  ;;  %v293_v22 = vld [vmem:[%s8944_s1 + $0x1a0] sm:$0xff]  ;;  %v291_v23 = vld [vmem:[%s8944_s1 + $0x190] sm:$0xff] }
  0x42   : > { %4159 = vmatpush1.bf16.msra.mxu0 %v4158_v56  ;;  %v5848_v56 = vshrl.u32 %v219_v43, 7  ;;  %v298_v26 = vld [vmem:[%s8944_s1 + $0x1c8] sm:$0xff]  ;;  %v300_v29 = vld [vmem:[%s8944_s1 + $0x1d8] sm:$0xff]  ;;  %v297_v34 = vld [vmem:[%s8944_s1 + $0x1c0] sm:$0xff] }
  0x43   : > { %4223 = vmatpush1.bf16.msra.mxu1 %v4222_v57  ;;  %4161 = vmatprep.subr.bf16.mxu0 %v4160_v58  ;;  %v4306_v57 = vpack.c.bf16 %v271_v50, %v267_v48  ;;  %v4244_v58 = vpack.c.bf16 %v278_v52, %v274_v51  ;;  %v302_v27 = vld [vmem:[%s8944_s1 + $0x1e8] sm:$0xff]  ;;  %v301_v35 = vld [vmem:[%s8944_s1 + $0x1e0] sm:$0xff]  ;;  %v303_v38 = vld [vmem:[%s8944_s1 + $0x1f0] sm:$0xff] }
  0x44   : > { %4225 = vmatprep.subr.bf16.mxu1 %v4224_v62  ;;  %v4308_v62 = vpack.c.bf16 %v280_v54, %v276_v53  ;;  %v225_v5 = vand.u32 1, %v5848_v56  ;;  %v236_v28 = vld [vmem:[%s5627_s11 + $0x8] sm:$0xf]  ;;  %v4256_v33 = vpack.c.bf16 %v302_v27, %v298_v26  ;;  %v308_v41 = vld [vmem:[%s8944_s1 + $0x218] sm:$0xff]  ;;  %v305_v47 = vld [vmem:[%s8944_s1 + $0x200] sm:$0xff] }
  0x45   : > { %v306_v39 = vld [vmem:[%s8944_s1 + $0x208] sm:$0xff]  ;;  %v309_v48 = vld [vmem:[%s8944_s1 + $0x220] sm:$0xff]  ;;  %v311_v51 = vld [vmem:[%s8944_s1 + $0x230] sm:$0xff] }
  0x46   : > { %4163 = vmatpush1.bf16.msra.mxu0 %v4162_v4  ;;  %v4246_v4 = vpack.c.bf16 %v277_v60, %v273_v59  ;;  %vm5904_vm0 = vcmp.gt.s32.totalorder %v225_v5, 0  ;;  %v310_v40 = vld [vmem:[%s8944_s1 + $0x228] sm:$0xff]  ;;  %v316_v54 = vld [vmem:[%s8944_s1 + $0x258] sm:$0xff]  ;;  %v313_v60 = vld [vmem:[%s8944_s1 + $0x240] sm:$0xff]  ;;  %vm6206_vm1 = vcmp.lt.s32.totalorder %v225_v5, 1 }
  0x47   : > { %4227 = vmatpush1.bf16.msra.mxu1 %v4226_v6  ;;  %4229 = vmatprep.subr.bf16.mxu0 %v4228_v7  ;;  %v4310_v6 = vpack.c.bf16 %v279_v63, %v275_v61  ;;  %v4248_v7 = vpack.c.bf16 %v286_v1, %v282_v0  ;;  %v4260_v46 = vpack.c.bf16 %v310_v40, %v306_v39  ;;  %v314_v52 = vld [vmem:[%s8944_s1 + $0x248] sm:$0xff]  ;;  %v317_v61 = vld [vmem:[%s8944_s1 + $0x260] sm:$0xff]  ;;  %v319_v0 = vld [vmem:[%s8944_s1 + $0x270] sm:$0xff] }
  0x48   : > { %4293 = vmatprep.subr.bf16.mxu1 %v4292_v11  ;;  %v4312_v11 = vpack.c.bf16 %v288_v3, %v284_v2  ;;  %v318_v53 = vld [vmem:[%s8944_s1 + $0x268] sm:$0xff]  ;;  %v324_v3 = vld [vmem:[%s8944_s1 + $0x298] sm:$0xff]  ;;  %v321_v9 = vld [vmem:[%s8944_s1 + $0x280] sm:$0xff] }
  0x49   : > { %571 = vmatmul.mubr.f32.vlgmr.msra.gmra.mrb[0].mxu0 %v502_v15  ;;  %v4264_v59 = vpack.c.bf16 %v318_v53, %v314_v52  ;;  %v322_v1 = vld [vmem:[%s8944_s1 + $0x288] sm:$0xff]  ;;  %v327_v13 = vld [vmem:[%s8944_s1 + $0x2b0] sm:$0xff]  ;;  %v3200_v5 = vld [vmem:[%s8944_s1 + $0x8a0] sm:$0xff] }
  0x4a   : > { %642 = vmatmul.mubr.f32.vlgmr.msra.gmra.mrb[0].mxu1 %v502_v15  ;;  %4231 = vmatpush1.bf16.msra.mxu0 %v4230_v18  ;;  %v292_v15 = vld [vmem:[%s8944_s1 + $0x198] sm:$0xff]  ;;  %v289_v18 = vld [vmem:[%s8944_s1 + $0x180] sm:$0xff]  ;;  %v326_v2 = vld [vmem:[%s8944_s1 + $0x2a8] sm:$0xff] }
  0x4b   : > { %4295 = vmatpush1.bf16.msra.mxu1 %v4294_v19  ;;  %4233 = vmatprep.subr.bf16.mxu0 %v4232_v20  ;;  %v4314_v20 = vpack.c.bf16 %v287_v12, %v283_v10  ;;  %v4316_v25 = vpack.c.bf16 %v296_v16, %v292_v15  ;;  %v4268_v8 = vpack.c.bf16 %v326_v2, %v322_v1  ;;  %v325_v10 = vld [vmem:[%s8944_s1 + $0x2a0] sm:$0xff]  ;;  %v330_v14 = vld [vmem:[%s8944_s1 + $0x2c8] sm:$0xff]  ;;  %v332_v16 = vld [vmem:[%s8944_s1 + $0x2d8] sm:$0xff] }
  0x4c   : > { %4297 = vmatprep.subr.bf16.mxu1 %v4296_v24  ;;  %v295_v24 = vld [vmem:[%s8944_s1 + $0x1b0] sm:$0xff]  ;;  %3176 = vmatprep.mubr.msk.f32.mxu0 %vm5904_vm0, %v236_v28  ;;  %v334_v15 = vld [vmem:[%s8944_s1 + $0x2e8] sm:$0xff] }
  0x4d   : > { %3178 = vmatprep.mubr.msk.f32.mxu1 %vm5904_vm0, %v236_v28  ;;  %v335_v26 = vld [vmem:[%s8944_s1 + $0x2f0] sm:$0xff]  ;;  %v338_v27 = vld [vmem:[%s8944_s1 + $0x308] sm:$0xff] }
  0x4e   : > { %4235 = vmatpush1.bf16.msra.mxu0 %v4234_v30  ;;  %v304_v30 = vld [vmem:[%s8944_s1 + $0x1f8] sm:$0xff]  ;;  %v342_v28 = vld [vmem:[%s8944_s1 + $0x328] sm:$0xff] }
  0x4f   : > { %4299 = vmatpush1.bf16.msra.mxu1 %v4298_v31  ;;  %4237 = vmatprep.subr.bf16.mxu0 %v4236_v32  ;;  %v4254_v31 = vpack.c.bf16 %v293_v22, %v289_v18  ;;  %v4318_v32 = vpack.c.bf16 %v295_v24, %v291_v23  ;;  %v4320_v37 = vpack.c.bf16 %v304_v30, %v300_v29  ;;  %v329_v22 = vld [vmem:[%s8944_s1 + $0x2c0] sm:$0xff]  ;;  %v331_v24 = vld [vmem:[%s8944_s1 + $0x2d0] sm:$0xff]  ;;  %v340_v29 = vld [vmem:[%s8944_s1 + $0x318] sm:$0xff] }
  0x50   : > { %4301 = vmatprep.subr.bf16.mxu1 %v4300_v36  ;;  %v299_v36 = vld [vmem:[%s8944_s1 + $0x1d0] sm:$0xff]  ;;  %v4270_v18 = vpack.c.bf16 %v325_v10, %v321_v9  ;;  %v333_v23 = vld [vmem:[%s8944_s1 + $0x2e0] sm:$0xff]  ;;  %v344_v30 = vld [vmem:[%s8944_s1 + $0x338] sm:$0xff] }
  0x51   : > { %v346_v39 = vld [vmem:[%s8944_s1 + $0x348] sm:$0xff]  ;;  %v361_v9 = vld [vmem:[%s8944_s1 + $0x3c0] sm:$0xff] }
  0x52   : > { %4239 = vmatpush1.bf16.msra.mxu0 %v4238_v42  ;;  %v312_v42 = vld [vmem:[%s8944_s1 + $0x238] sm:$0xff]  ;;  %v350_v40 = vld [vmem:[%s8944_s1 + $0x368] sm:$0xff]  ;;  %v365_v10 = vld [vmem:[%s8944_s1 + $0x3e0] sm:$0xff] }
  0x53   : > { %4303 = vmatpush1.bf16.msra.mxu1 %v4302_v44  ;;  %4241 = vmatprep.subr.bf16.mxu0 %v4240_v45  ;;  %v4258_v44 = vpack.c.bf16 %v301_v35, %v297_v34  ;;  %v4322_v45 = vpack.c.bf16 %v303_v38, %v299_v36  ;;  %v4324_v50 = vpack.c.bf16 %v312_v42, %v308_v41  ;;  %v337_v34 = vld [vmem:[%s8944_s1 + $0x300] sm:$0xff]  ;;  %v339_v36 = vld [vmem:[%s8944_s1 + $0x310] sm:$0xff]  ;;  %v348_v41 = vld [vmem:[%s8944_s1 + $0x358] sm:$0xff] }
  0x54   : > { %4305 = vmatprep.subr.bf16.mxu1 %v4304_v49  ;;  %v307_v49 = vld [vmem:[%s8944_s1 + $0x210] sm:$0xff]  ;;  %v341_v35 = vld [vmem:[%s8944_s1 + $0x320] sm:$0xff]  ;;  %v352_v42 = vld [vmem:[%s8944_s1 + $0x378] sm:$0xff] }
  0x55   : > { %v343_v38 = vld [vmem:[%s8944_s1 + $0x330] sm:$0xff]  ;;  %v354_v52 = vld [vmem:[%s8944_s1 + $0x388] sm:$0xff] }
  0x56   : > { %4243 = vmatpush1.bf16.msra.mxu0 %v4242_v55  ;;  %v320_v55 = vld [vmem:[%s8944_s1 + $0x278] sm:$0xff]  ;;  %v358_v53 = vld [vmem:[%s8944_s1 + $0x3a8] sm:$0xff] }
  0x57   : > { %4307 = vmatpush1.bf16.msra.mxu1 %v4306_v57  ;;  %4245 = vmatprep.subr.bf16.mxu0 %v4244_v58  ;;  %v4262_v57 = vpack.c.bf16 %v309_v48, %v305_v47  ;;  %v4326_v58 = vpack.c.bf16 %v311_v51, %v307_v49  ;;  %v4328_v63 = vpack.c.bf16 %v320_v55, %v316_v54  ;;  %v345_v47 = vld [vmem:[%s8944_s1 + $0x340] sm:$0xff]  ;;  %v347_v49 = vld [vmem:[%s8944_s1 + $0x350] sm:$0xff]  ;;  %v356_v54 = vld [vmem:[%s8944_s1 + $0x398] sm:$0xff] }
  0x58   : > { %4309 = vmatprep.subr.bf16.mxu1 %v4308_v62  ;;  %v315_v62 = vld [vmem:[%s8944_s1 + $0x250] sm:$0xff]  ;;  %v349_v48 = vld [vmem:[%s8944_s1 + $0x360] sm:$0xff]  ;;  %v360_v55 = vld [vmem:[%s8944_s1 + $0x3b8] sm:$0xff] }
  0x59   : > { %v351_v51 = vld [vmem:[%s8944_s1 + $0x370] sm:$0xff]  ;;  %v362_v1 = vld [vmem:[%s8944_s1 + $0x3c8] sm:$0xff] }
  0x5a   : > { %4247 = vmatpush1.bf16.msra.mxu0 %v4246_v4  ;;  %v328_v4 = vld [vmem:[%s8944_s1 + $0x2b8] sm:$0xff]  ;;  %v366_v2 = vld [vmem:[%s8944_s1 + $0x3e8] sm:$0xff] }
  0x5b   : > { %4311 = vmatpush1.bf16.msra.mxu1 %v4310_v6  ;;  %4249 = vmatprep.subr.bf16.mxu0 %v4248_v7  ;;  %v4266_v6 = vpack.c.bf16 %v317_v61, %v313_v60  ;;  %v4330_v7 = vpack.c.bf16 %v319_v0, %v315_v62  ;;  %v4332_v12 = vpack.c.bf16 %v328_v4, %v324_v3  ;;  %v353_v60 = vld [vmem:[%s8944_s1 + $0x380] sm:$0xff]  ;;  %v355_v62 = vld [vmem:[%s8944_s1 + $0x390] sm:$0xff]  ;;  %v364_v3 = vld [vmem:[%s8944_s1 + $0x3d8] sm:$0xff] }
  0x5c   : > { %4313 = vmatprep.subr.bf16.mxu1 %v4312_v11  ;;  %v323_v11 = vld [vmem:[%s8944_s1 + $0x290] sm:$0xff]  ;;  %v357_v61 = vld [vmem:[%s8944_s1 + $0x3a0] sm:$0xff]  ;;  %v368_v4 = vld [vmem:[%s8944_s1 + $0x3f8] sm:$0xff] }
  0x5d   : > { %v359_v0 = vld [vmem:[%s8944_s1 + $0x3b0] sm:$0xff] }
  0x5e   : > { %4251 = vmatpush1.bf16.msra.mxu0 %v4250_v17  ;;  %v336_v17 = vld [vmem:[%s8944_s1 + $0x2f8] sm:$0xff] }
  0x5f   : > { %4315 = vmatpush1.bf16.msra.mxu1 %v4314_v20  ;;  %4253 = vmatprep.subr.bf16.mxu0 %v4252_v21  ;;  %v4334_v20 = vpack.c.bf16 %v327_v13, %v323_v11  ;;  %v4272_v21 = vpack.c.bf16 %v334_v15, %v330_v14  ;;  %v363_v11 = vld [vmem:[%s8944_s1 + $0x3d0] sm:$0xff]  ;;  %v3181_v14 = vld [vmem:[%s8944_s1 + $0x808] sm:$0xff] }
  0x60   : > { %4317 = vmatprep.subr.bf16.mxu1 %v4316_v25  ;;  %v4336_v25 = vpack.c.bf16 %v336_v17, %v332_v16  ;;  %v367_v13 = vld [vmem:[%s8944_s1 + $0x3f0] sm:$0xff]  ;;  %v3185_v15 = vld [vmem:[%s8944_s1 + $0x828] sm:$0xff]  ;;  %v3183_v16 = vld [vmem:[%s8944_s1 + $0x818] sm:$0xff] }
  0x61   : > { %v3187_v17 = vld [vmem:[%s8944_s1 + $0x838] sm:$0xff] }
  0x62   : > { %4255 = vmatpush1.bf16.msra.mxu0 %v4254_v31  ;;  %v4274_v31 = vpack.c.bf16 %v333_v23, %v329_v22  ;;  %v3180_v22 = vld [vmem:[%s8944_s1 + $0x800] sm:$0xff] }
  0x63   : > { %4319 = vmatpush1.bf16.msra.mxu1 %v4318_v32  ;;  %4257 = vmatprep.subr.bf16.mxu0 %v4256_v33  ;;  %v4338_v32 = vpack.c.bf16 %v335_v26, %v331_v24  ;;  %v4276_v33 = vpack.c.bf16 %v342_v28, %v338_v27  ;;  %v3184_v23 = vld [vmem:[%s8944_s1 + $0x820] sm:$0xff]  ;;  %v3182_v24 = vld [vmem:[%s8944_s1 + $0x810] sm:$0xff]  ;;  %v3189_v27 = vld [vmem:[%s8944_s1 + $0x848] sm:$0xff] }
  0x64   : > { %4321 = vmatprep.subr.bf16.mxu1 %v4320_v37  ;;  %v4340_v37 = vpack.c.bf16 %v344_v30, %v340_v29  ;;  %v3186_v26 = vld [vmem:[%s8944_s1 + $0x830] sm:$0xff]  ;;  %v3193_v28 = vld [vmem:[%s8944_s1 + $0x868] sm:$0xff]  ;;  %v3191_v29 = vld [vmem:[%s8944_s1 + $0x858] sm:$0xff] }
  0x65   : > { %v3195_v30 = vld [vmem:[%s8944_s1 + $0x878] sm:$0xff] }
  0x66   : > { %4259 = vmatpush1.bf16.msra.mxu0 %v4258_v44  ;;  %v4278_v44 = vpack.c.bf16 %v341_v35, %v337_v34  ;;  %v4422_v34 = vpack.c.bf16 %v3186_v26, %v3182_v24  ;;  %v4360_v35 = vpack.c.bf16 %v3193_v28, %v3189_v27  ;;  %v3224_v26 = vld [vmem:[%s8944_s1 + $0x960] sm:$0xff]  ;;  %v3222_v27 = vld [vmem:[%s8944_s1 + $0x950] sm:$0xff] }
  0x67   : > { %4323 = vmatpush1.bf16.msra.mxu1 %v4322_v45  ;;  %4261 = vmatprep.subr.bf16.mxu0 %v4260_v46  ;;  %v4342_v45 = vpack.c.bf16 %v343_v38, %v339_v36  ;;  %v4280_v46 = vpack.c.bf16 %v350_v40, %v346_v39  ;;  %v3192_v36 = vld [vmem:[%s8944_s1 + $0x860] sm:$0xff]  ;;  %v791_v38 = vld [vmem:[%s5627_s11 + $0x8] sm:$0x3c]  ;;  %v4424_v39 = vpack.c.bf16 %v3195_v30, %v3191_v29  ;;  %v3194_v40 = vld [vmem:[%s8944_s1 + $0x870] sm:$0xff] }
  0x68   : > { %4325 = vmatprep.subr.bf16.mxu1 %v4324_v50  ;;  %v4344_v50 = vpack.c.bf16 %v352_v42, %v348_v41  ;;  %v3197_v41 = vld [vmem:[%s8944_s1 + $0x888] sm:$0xff]  ;;  %v3226_v29 = vld [vmem:[%s8944_s1 + $0x970] sm:$0xff] }
  0x69   : > { %v3201_v42 = vld [vmem:[%s8944_s1 + $0x8a8] sm:$0xff] }
  0x6a   : > { %4263 = vmatpush1.bf16.msra.mxu0 %v4262_v57  ;;  %v4282_v57 = vpack.c.bf16 %v349_v48, %v345_v47  ;;  %v3229_v30 = vld [vmem:[%s8944_s1 + $0x988] sm:$0xff] }
  0x6b   : > { %4327 = vmatpush1.bf16.msra.mxu1 %v4326_v58  ;;  %4265 = vmatprep.subr.bf16.mxu0 %v4264_v59  ;;  %v4346_v58 = vpack.c.bf16 %v351_v51, %v347_v49  ;;  %v4284_v59 = vpack.c.bf16 %v358_v53, %v354_v52  ;;  %v3196_v51 = vld [vmem:[%s8944_s1 + $0x880] sm:$0xff]  ;;  %v3198_v52 = vld [vmem:[%s8944_s1 + $0x890] sm:$0xff] }
  0x6c   : > { %4329 = vmatprep.subr.bf16.mxu1 %v4328_v63  ;;  %v4348_v63 = vpack.c.bf16 %v360_v55, %v356_v54  ;;  %v3202_v54 = vld [vmem:[%s8944_s1 + $0x8b0] sm:$0xff]  ;;  %v3205_v55 = vld [vmem:[%s8944_s1 + $0x8c8] sm:$0xff] }
  0x6e   : > { %4267 = vmatpush1.bf16.msra.mxu0 %v4266_v6  ;;  %v4286_v6 = vpack.c.bf16 %v357_v61, %v353_v60  ;;  %v4366_v60 = vpack.c.bf16 %v3200_v5, %v3196_v51  ;;  %v4430_v61 = vpack.c.bf16 %v3202_v54, %v3198_v52  ;;  %v3236_v5 = vld [vmem:[%s8944_s1 + $0x9c0] sm:$0xff] }
  0x6f   : > { %4331 = vmatpush1.bf16.msra.mxu1 %v4330_v7  ;;  %4269 = vmatprep.subr.bf16.mxu0 %v4268_v8  ;;  %v4350_v7 = vpack.c.bf16 %v359_v0, %v355_v62  ;;  %v4288_v8 = vpack.c.bf16 %v366_v2, %v362_v1  ;;  %v3208_v0 = vld [vmem:[%s8944_s1 + $0x8e0] sm:$0xff]  ;;  %v3206_v1 = vld [vmem:[%s8944_s1 + $0x8d0] sm:$0xff] }
  0x70   : > { %4333 = vmatprep.subr.bf16.mxu1 %v4332_v12  ;;  %v4352_v12 = vpack.c.bf16 %v368_v4, %v364_v3  ;;  %v3210_v3 = vld [vmem:[%s8944_s1 + $0x8f0] sm:$0xff]  ;;  %v3213_v4 = vld [vmem:[%s8944_s1 + $0x908] sm:$0xff]  ;;  %v3240_v52 = vld [vmem:[%s8944_s1 + $0x9e0] sm:$0xff] }
  0x72   : > { %4271 = vmatpush1.bf16.msra.mxu0 %v4270_v18  ;;  %v4290_v18 = vpack.c.bf16 %v365_v10, %v361_v9  ;;  %v4434_v10 = vpack.c.bf16 %v3210_v3, %v3206_v1  ;;  %v3248_v1 = vld [vmem:[%s8944_s1 + $0xa20] sm:$0xff] }
  0x73   : > { %4335 = vmatpush1.bf16.msra.mxu1 %v4334_v20  ;;  %4273 = vmatprep.subr.bf16.mxu0 %v4272_v21  ;;  %v4354_v20 = vpack.c.bf16 %v367_v13, %v363_v11  ;;  %v4356_v21 = vpack.c.bf16 %v3185_v15, %v3181_v14  ;;  %v3216_v13 = vld [vmem:[%s8944_s1 + $0x920] sm:$0xff]  ;;  %v3214_v14 = vld [vmem:[%s8944_s1 + $0x910] sm:$0xff] }
  0x74   : > { %4337 = vmatprep.subr.bf16.mxu1 %v4336_v25  ;;  %v4420_v25 = vpack.c.bf16 %v3187_v17, %v3183_v16  ;;  %v3218_v16 = vld [vmem:[%s8944_s1 + $0x930] sm:$0xff]  ;;  %v3221_v17 = vld [vmem:[%s8944_s1 + $0x948] sm:$0xff] }
  0x76   : > { %4275 = vmatpush1.bf16.msra.mxu0 %v4274_v31  ;;  %v235_v31 = vld [vmem:[%s5627_s11] sm:$0xf] }
  0x77   : > { %4339 = vmatpush1.bf16.msra.mxu1 %v4338_v32  ;;  %4277 = vmatprep.subr.bf16.mxu0 %v4276_v33  ;;  %v4358_v32 = vpack.c.bf16 %v3184_v23, %v3180_v22  ;;  %v3188_v33 = vld [vmem:[%s8944_s1 + $0x840] sm:$0xff]  ;;  %v4438_v23 = vpack.c.bf16 %v3218_v16, %v3214_v14 }
  0x78   : > { %4341 = vmatprep.subr.bf16.mxu1 %v4340_v37  ;;  %v3190_v37 = vld [vmem:[%s8944_s1 + $0x850] sm:$0xff]  ;;  %v4362_v48 = vpack.c.bf16 %v3192_v36, %v3188_v33  ;;  %v3235_v33 = vld [vmem:[%s8944_s1 + $0x9b8] sm:$0xff]  ;;  %v3256_v14 = vld [vmem:[%s8944_s1 + $0xa60] sm:$0xff] }
  0x79   : > { %v4426_v49 = vpack.c.bf16 %v3194_v40, %v3190_v37  ;;  %v3228_v37 = vld [vmem:[%s8944_s1 + $0x980] sm:$0xff] }
  0x7a   : > { %4279 = vmatpush1.bf16.msra.mxu0 %v4278_v44  ;;  %v6194_v44 = vrot.slane %v791_v38, 2  ;;  %v3232_v38 = vld [vmem:[%s8944_s1 + $0x9a0] sm:$0xff] }
  0x7b   : > { %4343 = vmatpush1.bf16.msra.mxu1 %v4342_v45  ;;  %4281 = vmatprep.subr.bf16.mxu0 %v4280_v46  ;;  %v3199_v45 = vld [vmem:[%s8944_s1 + $0x898] sm:$0xff] }
  0x7c   : > { %4345 = vmatprep.subr.bf16.mxu1 %v4344_v50  ;;  %v3203_v46 = vld [vmem:[%s8944_s1 + $0x8b8] sm:$0xff]  ;;  %v4364_v50 = vpack.c.bf16 %v3201_v42, %v3197_v41  ;;  %v3234_v41 = vld [vmem:[%s8944_s1 + $0x9b0] sm:$0xff]  ;;  %v3237_v42 = vld [vmem:[%s8944_s1 + $0x9c8] sm:$0xff] }
  0x7d   : > { %v4428_v53 = vpack.c.bf16 %v3203_v46, %v3199_v45  ;;  %v3241_v45 = vld [vmem:[%s8944_s1 + $0x9e8] sm:$0xff]  ;;  %v3239_v46 = vld [vmem:[%s8944_s1 + $0x9d8] sm:$0xff] }
  0x7e   : > { %4283 = vmatpush1.bf16.msra.mxu0 %v4282_v57  ;;  %v3209_v57 = vld [vmem:[%s8944_s1 + $0x8e8] sm:$0xff]  ;;  %v4384_v51 = vpack.c.bf16 %v3241_v45, %v3237_v42  ;;  %v3274_v42 = vld [vmem:[%s8944_s1 + $0xaf0] sm:$0xff] }
  0x7f   : > { %4347 = vmatpush1.bf16.msra.mxu1 %v4346_v58  ;;  %4285 = vmatprep.subr.bf16.mxu0 %v4284_v59  ;;  %v3207_v58 = vld [vmem:[%s8944_s1 + $0x8d8] sm:$0xff]  ;;  %v4368_v62 = vpack.c.bf16 %v3209_v57, %v3205_v55  ;;  %v3242_v55 = vld [vmem:[%s8944_s1 + $0x9f0] sm:$0xff]  ;;  %v3245_v57 = vld [vmem:[%s8944_s1 + $0xa08] sm:$0xff] }
  0x80   : > { %4349 = vmatprep.subr.bf16.mxu1 %v4348_v63  ;;  %v3211_v59 = vld [vmem:[%s8944_s1 + $0x8f8] sm:$0xff]  ;;  %v3204_v63 = vld [vmem:[%s8944_s1 + $0x8c0] sm:$0xff]  ;;  %v3277_v45 = vld [vmem:[%s8944_s1 + $0xb08] sm:$0xff] }
  0x81   : > { %v4432_v2 = vpack.c.bf16 %v3211_v59, %v3207_v58  ;;  %v4370_v9 = vpack.c.bf16 %v3208_v0, %v3204_v63  ;;  %v3249_v58 = vld [vmem:[%s8944_s1 + $0xa28] sm:$0xff]  ;;  %v3247_v59 = vld [vmem:[%s8944_s1 + $0xa18] sm:$0xff]  ;;  %v3244_v0 = vld [vmem:[%s8944_s1 + $0xa00] sm:$0xff] }
  0x82   : > { %4287 = vmatpush1.bf16.msra.mxu0 %v4286_v6  ;;  %v3217_v6 = vld [vmem:[%s8944_s1 + $0x928] sm:$0xff]  ;;  %v4388_v63 = vpack.c.bf16 %v3249_v58, %v3245_v57  ;;  %v3282_v57 = vld [vmem:[%s8944_s1 + $0xb30] sm:$0xff] }
  0x83   : > { %4351 = vmatpush1.bf16.msra.mxu1 %v4350_v7  ;;  %4289 = vmatprep.subr.bf16.mxu0 %v4288_v8  ;;  %v3215_v7 = vld [vmem:[%s8944_s1 + $0x918] sm:$0xff]  ;;  %v4372_v11 = vpack.c.bf16 %v3217_v6, %v3213_v4  ;;  %v3250_v4 = vld [vmem:[%s8944_s1 + $0xa30] sm:$0xff]  ;;  %v3253_v6 = vld [vmem:[%s8944_s1 + $0xa48] sm:$0xff] }
  0x84   : > { %4353 = vmatprep.subr.bf16.mxu1 %v4352_v12  ;;  %v3219_v8 = vld [vmem:[%s8944_s1 + $0x938] sm:$0xff]  ;;  %v3212_v12 = vld [vmem:[%s8944_s1 + $0x900] sm:$0xff]  ;;  %v3285_v58 = vld [vmem:[%s8944_s1 + $0xb48] sm:$0xff] }
  0x85   : > { %v4436_v15 = vpack.c.bf16 %v3219_v8, %v3215_v7  ;;  %v4374_v22 = vpack.c.bf16 %v3216_v13, %v3212_v12  ;;  %v3257_v7 = vld [vmem:[%s8944_s1 + $0xa68] sm:$0xff]  ;;  %v3255_v8 = vld [vmem:[%s8944_s1 + $0xa58] sm:$0xff]  ;;  %v3252_v13 = vld [vmem:[%s8944_s1 + $0xa40] sm:$0xff] }
  0x86   : > { %4291 = vmatpush1.bf16.msra.mxu0 %v4290_v18  ;;  %v3225_v18 = vld [vmem:[%s8944_s1 + $0x968] sm:$0xff]  ;;  %v4392_v12 = vpack.c.bf16 %v3257_v7, %v3253_v6  ;;  %v3290_v6 = vld [vmem:[%s8944_s1 + $0xb70] sm:$0xff] }
  0x87   : > { %4355 = vmatpush1.bf16.msra.mxu1 %v4354_v20  ;;  %4357 = vmatprep.subr.bf16.mxu0 %v4356_v21  ;;  %v3223_v20 = vld [vmem:[%s8944_s1 + $0x958] sm:$0xff]  ;;  %v4376_v24 = vpack.c.bf16 %v3225_v18, %v3221_v17  ;;  %v3258_v17 = vld [vmem:[%s8944_s1 + $0xa70] sm:$0xff]  ;;  %v3261_v18 = vld [vmem:[%s8944_s1 + $0xa88] sm:$0xff] }
  0x88   : > { %4421 = vmatprep.subr.bf16.mxu1 %v4420_v25  ;;  %v3227_v21 = vld [vmem:[%s8944_s1 + $0x978] sm:$0xff]  ;;  %v3220_v25 = vld [vmem:[%s8944_s1 + $0x940] sm:$0xff]  ;;  %v3293_v7 = vld [vmem:[%s8944_s1 + $0xb88] sm:$0xff] }
  0x89   : > { %3177 = vmatmul.mubr.msk.f32.vlgmr.msra.gmra.mrb[0].mxu0 %vm5904_vm0, %v235_v31  ;;  %v4440_v28 = vpack.c.bf16 %v3227_v21, %v3223_v20  ;;  %v3265_v20 = vld [vmem:[%s8944_s1 + $0xaa8] sm:$0xff]  ;;  %v3263_v21 = vld [vmem:[%s8944_s1 + $0xa98] sm:$0xff] }
  0x8a   : > { %3179 = vmatmul.mubr.msk.f32.vlgmr.msra.gmra.mrb[0].mxu1 %vm5904_vm0, %v235_v31  ;;  %4359 = vmatpush1.bf16.msra.mxu0 %v4358_v32  ;;  %v3233_v31 = vld [vmem:[%s8944_s1 + $0x9a8] sm:$0xff]  ;;  %v3231_v32 = vld [vmem:[%s8944_s1 + $0x998] sm:$0xff] }
  0x8b   : > { %4423 = vmatpush1.bf16.msra.mxu1 %v4422_v34  ;;  %4361 = vmatprep.subr.bf16.mxu0 %v4360_v35  ;;  %v4378_v34 = vpack.c.bf16 %v3224_v26, %v3220_v25  ;;  %v4442_v35 = vpack.c.bf16 %v3226_v29, %v3222_v27  ;;  %v4380_v36 = vpack.c.bf16 %v3233_v31, %v3229_v30  ;;  %v3260_v26 = vld [vmem:[%s8944_s1 + $0xa80] sm:$0xff]  ;;  %v3266_v30 = vld [vmem:[%s8944_s1 + $0xab0] sm:$0xff]  ;;  %v3269_v31 = vld [vmem:[%s8944_s1 + $0xac8] sm:$0xff] }
  0x8c   : > { %4425 = vmatprep.subr.bf16.mxu1 %v4424_v39  ;;  %3308 = vmatprep.mubr.msk.f32.mxu0 %vm6206_vm1, %v6194_v44  ;;  %v3230_v39 = vld [vmem:[%s8944_s1 + $0x990] sm:$0xff]  ;;  %v4444_v40 = vpack.c.bf16 %v3235_v33, %v3231_v32  ;;  %v4396_v25 = vpack.c.bf16 %v3265_v20, %v3261_v18  ;;  %v3264_v27 = vld [vmem:[%s8944_s1 + $0xaa0] sm:$0xff]  ;;  %v3273_v32 = vld [vmem:[%s8944_s1 + $0xae8] sm:$0xff] }
  0x8d   : > { %3310 = vmatprep.mubr.msk.f32.mxu1 %vm6206_vm1, %v6194_v44  ;;  %v3271_v33 = vld [vmem:[%s8944_s1 + $0xad8] sm:$0xff]  ;;  %v3298_v18 = vld [vmem:[%s8944_s1 + $0xbb0] sm:$0xff]  ;;  %v3301_v20 = vld [vmem:[%s8944_s1 + $0xbc8] sm:$0xff] }
  0x8e   : > { %4363 = vmatpush1.bf16.msra.mxu0 %v4362_v48  ;;  %v3243_v48 = vld [vmem:[%s8944_s1 + $0x9f8] sm:$0xff] }
  0x8f   : > { %4427 = vmatpush1.bf16.msra.mxu1 %v4426_v49  ;;  %4365 = vmatprep.subr.bf16.mxu0 %v4364_v50  ;;  %v4382_v49 = vpack.c.bf16 %v3232_v38, %v3228_v37  ;;  %v4446_v50 = vpack.c.bf16 %v3234_v41, %v3230_v39  ;;  %v4448_v54 = vpack.c.bf16 %v3243_v48, %v3239_v46  ;;  %v3268_v38 = vld [vmem:[%s8944_s1 + $0xac0] sm:$0xff]  ;;  %v3281_v46 = vld [vmem:[%s8944_s1 + $0xb28] sm:$0xff]  ;;  %v3279_v48 = vld [vmem:[%s8944_s1 + $0xb18] sm:$0xff] }
  0x90   : > { %4429 = vmatprep.subr.bf16.mxu1 %v4428_v53  ;;  %v3238_v53 = vld [vmem:[%s8944_s1 + $0x9d0] sm:$0xff]  ;;  %v4400_v37 = vpack.c.bf16 %v3273_v32, %v3269_v31  ;;  %v3272_v39 = vld [vmem:[%s8944_s1 + $0xae0] sm:$0xff]  ;;  %v3313_v32 = vld [vmem:[%s8944_s1 + $0xc08] sm:$0xff] }
  0x91   : > { %v3306_v31 = vld [vmem:[%s8944_s1 + $0xbf0] sm:$0xff] }
  0x92   : > { %4367 = vmatpush1.bf16.msra.mxu0 %v4366_v60  ;;  %v3251_v60 = vld [vmem:[%s8944_s1 + $0xa38] sm:$0xff] }
  0x93   : > { %4431 = vmatpush1.bf16.msra.mxu1 %v4430_v61  ;;  %4369 = vmatprep.subr.bf16.mxu0 %v4368_v62  ;;  %v4386_v61 = vpack.c.bf16 %v3240_v52, %v3236_v5  ;;  %v4450_v62 = vpack.c.bf16 %v3242_v55, %v3238_v53  ;;  %v4452_v3 = vpack.c.bf16 %v3251_v60, %v3247_v59  ;;  %v3276_v52 = vld [vmem:[%s8944_s1 + $0xb00] sm:$0xff]  ;;  %v3289_v59 = vld [vmem:[%s8944_s1 + $0xb68] sm:$0xff]  ;;  %v3287_v60 = vld [vmem:[%s8944_s1 + $0xb58] sm:$0xff] }
  0x94   : > { %4433 = vmatprep.subr.bf16.mxu1 %v4432_v2  ;;  %v3246_v2 = vld [vmem:[%s8944_s1 + $0xa10] sm:$0xff]  ;;  %v4404_v5 = vpack.c.bf16 %v3281_v46, %v3277_v45  ;;  %v3280_v53 = vld [vmem:[%s8944_s1 + $0xb20] sm:$0xff] }
  0x95   : > { %v3318_v46 = vld [vmem:[%s8944_s1 + $0xc30] sm:$0xff] }
  0x96   : > { %4371 = vmatpush1.bf16.msra.mxu0 %v4370_v9  ;;  %v3259_v9 = vld [vmem:[%s8944_s1 + $0xa78] sm:$0xff] }
  0x97   : > { %4435 = vmatpush1.bf16.msra.mxu1 %v4434_v10  ;;  %4373 = vmatprep.subr.bf16.mxu0 %v4372_v11  ;;  %v4390_v10 = vpack.c.bf16 %v3248_v1, %v3244_v0  ;;  %v4454_v11 = vpack.c.bf16 %v3250_v4, %v3246_v2  ;;  %v4456_v16 = vpack.c.bf16 %v3259_v9, %v3255_v8  ;;  %v3284_v1 = vld [vmem:[%s8944_s1 + $0xb40] sm:$0xff]  ;;  %v3297_v8 = vld [vmem:[%s8944_s1 + $0xba8] sm:$0xff]  ;;  %v3295_v9 = vld [vmem:[%s8944_s1 + $0xb98] sm:$0xff] }
  0x98   : > { %4437 = vmatprep.subr.bf16.mxu1 %v4436_v15  ;;  %v3254_v15 = vld [vmem:[%s8944_s1 + $0xa50] sm:$0xff]  ;;  %v4408_v0 = vpack.c.bf16 %v3289_v59, %v3285_v58  ;;  %v3288_v2 = vld [vmem:[%s8944_s1 + $0xb60] sm:$0xff] }
  0x99   : > { %v3322_v58 = vld [vmem:[%s8944_s1 + $0xc50] sm:$0xff] }
  0x9a   : > { %4375 = vmatpush1.bf16.msra.mxu0 %v4374_v22  ;;  %v3267_v22 = vld [vmem:[%s8944_s1 + $0xab8] sm:$0xff] }
  0x9b   : > { %4439 = vmatpush1.bf16.msra.mxu1 %v4438_v23  ;;  %4377 = vmatprep.subr.bf16.mxu0 %v4376_v24  ;;  %v4394_v23 = vpack.c.bf16 %v3256_v14, %v3252_v13  ;;  %v4458_v24 = vpack.c.bf16 %v3258_v17, %v3254_v15  ;;  %v4460_v29 = vpack.c.bf16 %v3267_v22, %v3263_v21  ;;  %v3292_v14 = vld [vmem:[%s8944_s1 + $0xb80] sm:$0xff]  ;;  %v3305_v21 = vld [vmem:[%s8944_s1 + $0xbe8] sm:$0xff]  ;;  %v3303_v22 = vld [vmem:[%s8944_s1 + $0xbd8] sm:$0xff] }
  0x9c   : > { %4441 = vmatprep.subr.bf16.mxu1 %v4440_v28  ;;  %v3262_v28 = vld [vmem:[%s8944_s1 + $0xa90] sm:$0xff]  ;;  %v4412_v13 = vpack.c.bf16 %v3297_v8, %v3293_v7  ;;  %v3296_v15 = vld [vmem:[%s8944_s1 + $0xba0] sm:$0xff] }
  0x9d   : > { %v3330_v7 = vld [vmem:[%s8944_s1 + $0xc90] sm:$0xff] }
  0x9e   : > { %4379 = vmatpush1.bf16.msra.mxu0 %v4378_v34  ;;  %v3275_v34 = vld [vmem:[%s8944_s1 + $0xaf8] sm:$0xff] }
  0x9f   : > { %4443 = vmatpush1.bf16.msra.mxu1 %v4442_v35  ;;  %4381 = vmatprep.subr.bf16.mxu0 %v4380_v36  ;;  %v4398_v35 = vpack.c.bf16 %v3264_v27, %v3260_v26  ;;  %v4462_v36 = vpack.c.bf16 %v3266_v30, %v3262_v28  ;;  %v4464_v41 = vpack.c.bf16 %v3275_v34, %v3271_v33  ;;  %v3300_v27 = vld [vmem:[%s8944_s1 + $0xbc0] sm:$0xff]  ;;  %v3317_v33 = vld [vmem:[%s8944_s1 + $0xc28] sm:$0xff]  ;;  %v3315_v34 = vld [vmem:[%s8944_s1 + $0xc18] sm:$0xff] }
  0xa0   : > { %4445 = vmatprep.subr.bf16.mxu1 %v4444_v40  ;;  %v3270_v40 = vld [vmem:[%s8944_s1 + $0xad0] sm:$0xff]  ;;  %v4416_v26 = vpack.c.bf16 %v3305_v21, %v3301_v20  ;;  %v3304_v28 = vld [vmem:[%s8944_s1 + $0xbe0] sm:$0xff] }
  0xa1   : > { %v3338_v20 = vld [vmem:[%s8944_s1 + $0xcd0] sm:$0xff] }
  0xa2   : > { %4383 = vmatpush1.bf16.msra.mxu0 %v4382_v49  ;;  %v3283_v49 = vld [vmem:[%s8944_s1 + $0xb38] sm:$0xff]  ;;  %v3342_v21 = vld [vmem:[%s8944_s1 + $0xcf0] sm:$0xff] }
  0xa3   : > { %4447 = vmatpush1.bf16.msra.mxu1 %v4446_v50  ;;  %4385 = vmatprep.subr.bf16.mxu0 %v4384_v51  ;;  %v4402_v50 = vpack.c.bf16 %v3272_v39, %v3268_v38  ;;  %v4466_v51 = vpack.c.bf16 %v3274_v42, %v3270_v40  ;;  %v4468_v55 = vpack.c.bf16 %v3283_v49, %v3279_v48  ;;  %v3312_v40 = vld [vmem:[%s8944_s1 + $0xc00] sm:$0xff]  ;;  %v3314_v42 = vld [vmem:[%s8944_s1 + $0xc10] sm:$0xff]  ;;  %v3321_v48 = vld [vmem:[%s8944_s1 + $0xc48] sm:$0xff] }
  0xa4   : > { %4449 = vmatprep.subr.bf16.mxu1 %v4448_v54  ;;  %v3278_v54 = vld [vmem:[%s8944_s1 + $0xb10] sm:$0xff]  ;;  %v4484_v39 = vpack.c.bf16 %v3317_v33, %v3313_v32  ;;  %v3325_v49 = vld [vmem:[%s8944_s1 + $0xc68] sm:$0xff] }
  0xa5   : > { %v3350_v33 = vld [vmem:[%s8944_s1 + $0xd30] sm:$0xff] }
  0xa6   : > { %4387 = vmatpush1.bf16.msra.mxu0 %v4386_v61  ;;  %v3291_v61 = vld [vmem:[%s8944_s1 + $0xb78] sm:$0xff] }
  0xa7   : > { %4451 = vmatpush1.bf16.msra.mxu1 %v4450_v62  ;;  %4389 = vmatprep.subr.bf16.mxu0 %v4388_v63  ;;  %v4406_v62 = vpack.c.bf16 %v3280_v53, %v3276_v52  ;;  %v4470_v63 = vpack.c.bf16 %v3282_v57, %v3278_v54  ;;  %v4472_v4 = vpack.c.bf16 %v3291_v61, %v3287_v60  ;;  %v3324_v57 = vld [vmem:[%s8944_s1 + $0xc60] sm:$0xff]  ;;  %v3326_v60 = vld [vmem:[%s8944_s1 + $0xc70] sm:$0xff]  ;;  %v3329_v61 = vld [vmem:[%s8944_s1 + $0xc88] sm:$0xff] }
  0xa8   : > { %4453 = vmatprep.subr.bf16.mxu1 %v4452_v3  ;;  %v3286_v3 = vld [vmem:[%s8944_s1 + $0xb50] sm:$0xff]  ;;  %v4550_v53 = vpack.c.bf16 %v3318_v46, %v3314_v42  ;;  %v4488_v54 = vpack.c.bf16 %v3325_v49, %v3321_v48  ;;  %v3356_v42 = vld [vmem:[%s8944_s1 + $0xd60] sm:$0xff]  ;;  %v3361_v49 = vld [vmem:[%s8944_s1 + $0xd88] sm:$0xff] }
  0xa9   : > { %v3358_v48 = vld [vmem:[%s8944_s1 + $0xd70] sm:$0xff] }
  0xaa   : > { %4391 = vmatpush1.bf16.msra.mxu0 %v4390_v10  ;;  %v3299_v10 = vld [vmem:[%s8944_s1 + $0xbb8] sm:$0xff] }
  0xab   : > { %4455 = vmatpush1.bf16.msra.mxu1 %v4454_v11  ;;  %4393 = vmatprep.subr.bf16.mxu0 %v4392_v12  ;;  %v4410_v11 = vpack.c.bf16 %v3288_v2, %v3284_v1  ;;  %v4474_v12 = vpack.c.bf16 %v3290_v6, %v3286_v3  ;;  %v4476_v17 = vpack.c.bf16 %v3299_v10, %v3295_v9  ;;  %v3332_v6 = vld [vmem:[%s8944_s1 + $0xca0] sm:$0xff]  ;;  %v3334_v9 = vld [vmem:[%s8944_s1 + $0xcb0] sm:$0xff]  ;;  %v3337_v10 = vld [vmem:[%s8944_s1 + $0xcc8] sm:$0xff] }
  0xac   : > { %4457 = vmatprep.subr.bf16.mxu1 %v4456_v16  ;;  %v3294_v16 = vld [vmem:[%s8944_s1 + $0xb90] sm:$0xff]  ;;  %v4554_v2 = vpack.c.bf16 %v3326_v60, %v3322_v58  ;;  %v3364_v58 = vld [vmem:[%s8944_s1 + $0xda0] sm:$0xff] }
  0xae   : > { %4395 = vmatpush1.bf16.msra.mxu0 %v4394_v23  ;;  %v3307_v23 = vld [vmem:[%s8944_s1 + $0xbf8] sm:$0xff] }
  0xaf   : > { %4459 = vmatpush1.bf16.msra.mxu1 %v4458_v24  ;;  %4397 = vmatprep.subr.bf16.mxu0 %v4396_v25  ;;  %v4414_v24 = vpack.c.bf16 %v3296_v15, %v3292_v14  ;;  %v4478_v25 = vpack.c.bf16 %v3298_v18, %v3294_v16  ;;  %v4480_v30 = vpack.c.bf16 %v3307_v23, %v3303_v22  ;;  %v3340_v18 = vld [vmem:[%s8944_s1 + $0xce0] sm:$0xff]  ;;  %v3345_v22 = vld [vmem:[%s8944_s1 + $0xd08] sm:$0xff] }
  0xb0   : > { %4461 = vmatprep.subr.bf16.mxu1 %v4460_v29  ;;  %v3302_v29 = vld [vmem:[%s8944_s1 + $0xbd0] sm:$0xff]  ;;  %v4558_v15 = vpack.c.bf16 %v3334_v9, %v3330_v7  ;;  %v3349_v23 = vld [vmem:[%s8944_s1 + $0xd28] sm:$0xff]  ;;  %v3372_v7 = vld [vmem:[%s8944_s1 + $0xde0] sm:$0xff] }
  0xb1   : > { %v4482_v38 = vpack.c.bf16 %v3306_v31, %v3302_v29  ;;  %v3344_v29 = vld [vmem:[%s8944_s1 + $0xd00] sm:$0xff]  ;;  %v3346_v31 = vld [vmem:[%s8944_s1 + $0xd10] sm:$0xff] }
  0xb2   : > { %4399 = vmatpush1.bf16.msra.mxu0 %v4398_v35  ;;  %v3319_v35 = vld [vmem:[%s8944_s1 + $0xc38] sm:$0xff] }
  0xb3   : > { %4463 = vmatpush1.bf16.msra.mxu1 %v4462_v36  ;;  %4401 = vmatprep.subr.bf16.mxu0 %v4400_v37  ;;  %v4418_v36 = vpack.c.bf16 %v3304_v28, %v3300_v27  ;;  %v790_v37 = vld [vmem:[%s5627_s11] sm:$0x3c]  ;;  %v4548_v45 = vpack.c.bf16 %v3319_v35, %v3315_v34  ;;  %v4562_v27 = vpack.c.bf16 %v3342_v21, %v3338_v20  ;;  %v3353_v34 = vld [vmem:[%s8944_s1 + $0xd48] sm:$0xff] }
  0xb4   : > { %4465 = vmatprep.subr.bf16.mxu1 %v4464_v41  ;;  %v3316_v41 = vld [vmem:[%s8944_s1 + $0xc20] sm:$0xff]  ;;  %v4500_v28 = vpack.c.bf16 %v3349_v23, %v3345_v22  ;;  %v3357_v35 = vld [vmem:[%s8944_s1 + $0xd68] sm:$0xff]  ;;  %v3382_v22 = vld [vmem:[%s8944_s1 + $0xe30] sm:$0xff] }
  0xb5   : > { %v4486_v52 = vpack.c.bf16 %v3316_v41, %v3312_v40  ;;  %v4504_v40 = vpack.c.bf16 %v3357_v35, %v3353_v34  ;;  %v3352_v41 = vld [vmem:[%s8944_s1 + $0xd40] sm:$0xff]  ;;  %v3385_v23 = vld [vmem:[%s8944_s1 + $0xe48] sm:$0xff]  ;;  %v3390_v34 = vld [vmem:[%s8944_s1 + $0xe70] sm:$0xff] }
  0xb6   : > { %4403 = vmatpush1.bf16.msra.mxu0 %v4402_v50  ;;  %v6573_v50 = vrot.slane %v790_v37, 2  ;;  %v3359_v37 = vld [vmem:[%s8944_s1 + $0xd78] sm:$0xff]  ;;  %v3380_v20 = vld [vmem:[%s8944_s1 + $0xe20] sm:$0xff]  ;;  %v3393_v35 = vld [vmem:[%s8944_s1 + $0xe88] sm:$0xff] }
  0xb7   : > { %4467 = vmatpush1.bf16.msra.mxu1 %v4466_v51  ;;  %4405 = vmatprep.subr.bf16.mxu0 %v4404_v5  ;;  %v3323_v51 = vld [vmem:[%s8944_s1 + $0xc58] sm:$0xff] }
  0xb8   : > { %4469 = vmatprep.subr.bf16.mxu1 %v4468_v55  ;;  %v3327_v5 = vld [vmem:[%s8944_s1 + $0xc78] sm:$0xff]  ;;  %v3320_v55 = vld [vmem:[%s8944_s1 + $0xc40] sm:$0xff] }
  0xb9   : > { %v4552_v59 = vpack.c.bf16 %v3327_v5, %v3323_v51  ;;  %v4490_v1 = vpack.c.bf16 %v3324_v57, %v3320_v55  ;;  %v3365_v51 = vld [vmem:[%s8944_s1 + $0xda8] sm:$0xff]  ;;  %v3363_v5 = vld [vmem:[%s8944_s1 + $0xd98] sm:$0xff]  ;;  %v3360_v57 = vld [vmem:[%s8944_s1 + $0xd80] sm:$0xff] }
  0xba   : > { %4407 = vmatpush1.bf16.msra.mxu0 %v4406_v62  ;;  %v3333_v62 = vld [vmem:[%s8944_s1 + $0xca8] sm:$0xff]  ;;  %v4508_v55 = vpack.c.bf16 %v3365_v51, %v3361_v49  ;;  %v3398_v49 = vld [vmem:[%s8944_s1 + $0xeb0] sm:$0xff] }
  0xbb   : > { %4471 = vmatpush1.bf16.msra.mxu1 %v4470_v63  ;;  %4409 = vmatprep.subr.bf16.mxu0 %v4408_v0  ;;  %v3331_v63 = vld [vmem:[%s8944_s1 + $0xc98] sm:$0xff]  ;;  %v4492_v3 = vpack.c.bf16 %v3333_v62, %v3329_v61  ;;  %v3366_v61 = vld [vmem:[%s8944_s1 + $0xdb0] sm:$0xff]  ;;  %v3369_v62 = vld [vmem:[%s8944_s1 + $0xdc8] sm:$0xff] }
  0xbc   : > { %4473 = vmatprep.subr.bf16.mxu1 %v4472_v4  ;;  %v3335_v0 = vld [vmem:[%s8944_s1 + $0xcb8] sm:$0xff]  ;;  %v3328_v4 = vld [vmem:[%s8944_s1 + $0xc80] sm:$0xff]  ;;  %v3401_v51 = vld [vmem:[%s8944_s1 + $0xec8] sm:$0xff] }
  0xbd   : > { %v4556_v8 = vpack.c.bf16 %v3335_v0, %v3331_v63  ;;  %v4494_v14 = vpack.c.bf16 %v3332_v6, %v3328_v4  ;;  %v3373_v63 = vld [vmem:[%s8944_s1 + $0xde8] sm:$0xff]  ;;  %v3371_v0 = vld [vmem:[%s8944_s1 + $0xdd8] sm:$0xff]  ;;  %v3368_v6 = vld [vmem:[%s8944_s1 + $0xdc0] sm:$0xff] }
  0xbe   : > { %4411 = vmatpush1.bf16.msra.mxu0 %v4410_v11  ;;  %v3341_v11 = vld [vmem:[%s8944_s1 + $0xce8] sm:$0xff]  ;;  %v4512_v4 = vpack.c.bf16 %v3373_v63, %v3369_v62  ;;  %v3406_v62 = vld [vmem:[%s8944_s1 + $0xef0] sm:$0xff] }
  0xbf   : > { %4475 = vmatpush1.bf16.msra.mxu1 %v4474_v12  ;;  %4413 = vmatprep.subr.bf16.mxu0 %v4412_v13  ;;  %v3339_v12 = vld [vmem:[%s8944_s1 + $0xcd8] sm:$0xff]  ;;  %v4496_v16 = vpack.c.bf16 %v3341_v11, %v3337_v10  ;;  %v3374_v10 = vld [vmem:[%s8944_s1 + $0xdf0] sm:$0xff]  ;;  %v3377_v11 = vld [vmem:[%s8944_s1 + $0xe08] sm:$0xff] }
  0xc0   : > { %4477 = vmatprep.subr.bf16.mxu1 %v4476_v17  ;;  %v3343_v13 = vld [vmem:[%s8944_s1 + $0xcf8] sm:$0xff]  ;;  %v3336_v17 = vld [vmem:[%s8944_s1 + $0xcc0] sm:$0xff]  ;;  %v3409_v63 = vld [vmem:[%s8944_s1 + $0xf08] sm:$0xff] }
  0xc2   : > { %4415 = vmatpush1.bf16.msra.mxu0 %v4414_v24  ;;  %v3347_v24 = vld [vmem:[%s8944_s1 + $0xd18] sm:$0xff] }
  0xc3   : > { %4479 = vmatpush1.bf16.msra.mxu1 %v4478_v25  ;;  %4417 = vmatprep.subr.bf16.mxu0 %v4416_v26  ;;  %v3351_v25 = vld [vmem:[%s8944_s1 + $0xd38] sm:$0xff]  ;;  %v4498_v26 = vpack.c.bf16 %v3340_v18, %v3336_v17  ;;  %v3376_v18 = vld [vmem:[%s8944_s1 + $0xe00] sm:$0xff] }
  0xc4   : > { %4481 = vmatprep.subr.bf16.mxu1 %v4480_v30  ;;  %v3348_v30 = vld [vmem:[%s8944_s1 + $0xd20] sm:$0xff]  ;;  %v4564_v32 = vpack.c.bf16 %v3351_v25, %v3347_v24  ;;  %v3389_v24 = vld [vmem:[%s8944_s1 + $0xe68] sm:$0xff]  ;;  %v3387_v25 = vld [vmem:[%s8944_s1 + $0xe58] sm:$0xff] }
  0xc6   : > { %4419 = vmatpush1.bf16.msra.mxu0 %v4418_v36  ;;  %v3355_v36 = vld [vmem:[%s8944_s1 + $0xd58] sm:$0xff] }
  0xc7   : > { %4483 = vmatpush1.bf16.msra.mxu1 %v4482_v38  ;;  %4485 = vmatprep.subr.bf16.mxu0 %v4484_v39  ;;  %v4502_v38 = vpack.c.bf16 %v3348_v30, %v3344_v29  ;;  %v4566_v39 = vpack.c.bf16 %v3350_v33, %v3346_v31  ;;  %v4568_v46 = vpack.c.bf16 %v3359_v37, %v3355_v36  ;;  %v3384_v30 = vld [vmem:[%s8944_s1 + $0xe40] sm:$0xff]  ;;  %v3397_v36 = vld [vmem:[%s8944_s1 + $0xea8] sm:$0xff]  ;;  %v3395_v37 = vld [vmem:[%s8944_s1 + $0xe98] sm:$0xff] }
  0xc8   : > { %4549 = vmatprep.subr.bf16.mxu1 %v4548_v45  ;;  %v3354_v45 = vld [vmem:[%s8944_s1 + $0xd50] sm:$0xff]  ;;  %v4520_v29 = vpack.c.bf16 %v3389_v24, %v3385_v23  ;;  %v3388_v31 = vld [vmem:[%s8944_s1 + $0xe60] sm:$0xff]  ;;  %v3425_v24 = vld [vmem:[%s8944_s1 + $0xf88] sm:$0xff] }
  0xc9   : > { %3309 = vmatmul.mubr.msk.f32.vlgmr.msra.gmra.mrb[0].mxu0 %vm6206_vm1, %v6573_v50  ;;  %v3422_v23 = vld [vmem:[%s8944_s1 + $0xf70] sm:$0xff] }
  0xca   : > { %3311 = vmatmul.mubr.msk.f32.vlgmr.msra.gmra.mrb[0].mxu1 %vm6206_vm1, %v6573_v50  ;;  %4487 = vmatpush1.bf16.msra.mxu0 %v4486_v52  ;;  %v3367_v52 = vld [vmem:[%s8944_s1 + $0xdb8] sm:$0xff] }
  0xcb   : > { %4551 = vmatpush1.bf16.msra.mxu1 %v4550_v53  ;;  %4489 = vmatprep.subr.bf16.mxu0 %v4488_v54  ;;  %v4506_v53 = vpack.c.bf16 %v3356_v42, %v3352_v41  ;;  %v4570_v54 = vpack.c.bf16 %v3358_v48, %v3354_v45  ;;  %v4572_v60 = vpack.c.bf16 %v3367_v52, %v3363_v5  ;;  %v3392_v42 = vld [vmem:[%s8944_s1 + $0xe80] sm:$0xff]  ;;  %v3405_v5 = vld [vmem:[%s8944_s1 + $0xee8] sm:$0xff]  ;;  %v3403_v52 = vld [vmem:[%s8944_s1 + $0xed8] sm:$0xff] }
  0xcc   : > { %4553 = vmatprep.subr.bf16.mxu1 %v4552_v59  ;;  %3440 = vmatprep.mubr.msk.f32.mxu0 %vm5904_vm0, %v6194_v44  ;;  %v3362_v59 = vld [vmem:[%s8944_s1 + $0xd90] sm:$0xff]  ;;  %v4524_v41 = vpack.c.bf16 %v3397_v36, %v3393_v35  ;;  %v3396_v45 = vld [vmem:[%s8944_s1 + $0xea0] sm:$0xff]  ;;  %v3433_v36 = vld [vmem:[%s8944_s1 + $0xfc8] sm:$0xff] }
  0xcd   : > { %3442 = vmatprep.mubr.msk.f32.mxu1 %vm5904_vm0, %v6194_v44  ;;  %v4560_v44 = vpack.c.bf16 %v3343_v13, %v3339_v12  ;;  %v3381_v12 = vld [vmem:[%s8944_s1 + $0xe28] sm:$0xff]  ;;  %v3379_v13 = vld [vmem:[%s8944_s1 + $0xe18] sm:$0xff]  ;;  %v3430_v35 = vld [vmem:[%s8944_s1 + $0xfb0] sm:$0xff] }
  0xce   : > { %4491 = vmatpush1.bf16.msra.mxu0 %v4490_v1  ;;  %v3375_v1 = vld [vmem:[%s8944_s1 + $0xdf8] sm:$0xff]  ;;  %v4516_v17 = vpack.c.bf16 %v3381_v12, %v3377_v11  ;;  %v3414_v11 = vld [vmem:[%s8944_s1 + $0xf30] sm:$0xff]  ;;  %v3417_v12 = vld [vmem:[%s8944_s1 + $0xf48] sm:$0xff] }
  0xcf   : > { %4555 = vmatpush1.bf16.msra.mxu1 %v4554_v2  ;;  %4493 = vmatprep.subr.bf16.mxu0 %v4492_v3  ;;  %v4510_v2 = vpack.c.bf16 %v3364_v58, %v3360_v57  ;;  %v4574_v3 = vpack.c.bf16 %v3366_v61, %v3362_v59  ;;  %v4576_v9 = vpack.c.bf16 %v3375_v1, %v3371_v0  ;;  %v3400_v58 = vld [vmem:[%s8944_s1 + $0xec0] sm:$0xff]  ;;  %v3413_v0 = vld [vmem:[%s8944_s1 + $0xf28] sm:$0xff]  ;;  %v3411_v1 = vld [vmem:[%s8944_s1 + $0xf18] sm:$0xff] }
  0xd0   : > { %4557 = vmatprep.subr.bf16.mxu1 %v4556_v8  ;;  %v3370_v8 = vld [vmem:[%s8944_s1 + $0xdd0] sm:$0xff]  ;;  %v4528_v57 = vpack.c.bf16 %v3405_v5, %v3401_v51  ;;  %v3404_v59 = vld [vmem:[%s8944_s1 + $0xee0] sm:$0xff]  ;;  %v3445_v5 = vld [vmem:[%s8944_s1 + $0x1008] sm:$0xff] }
  0xd1   : > { %v3438_v51 = vld [vmem:[%s8944_s1 + $0xff0] sm:$0xff] }
  0xd2   : > { %4495 = vmatpush1.bf16.msra.mxu0 %v4494_v14  ;;  %v3383_v14 = vld [vmem:[%s8944_s1 + $0xe38] sm:$0xff] }
  0xd3   : > { %4559 = vmatpush1.bf16.msra.mxu1 %v4558_v15  ;;  %4497 = vmatprep.subr.bf16.mxu0 %v4496_v16  ;;  %v4514_v15 = vpack.c.bf16 %v3372_v7, %v3368_v6  ;;  %v4578_v16 = vpack.c.bf16 %v3374_v10, %v3370_v8  ;;  %v4580_v21 = vpack.c.bf16 %v3383_v14, %v3379_v13  ;;  %v3408_v7 = vld [vmem:[%s8944_s1 + $0xf00] sm:$0xff]  ;;  %v3421_v13 = vld [vmem:[%s8944_s1 + $0xf68] sm:$0xff]  ;;  %v3419_v14 = vld [vmem:[%s8944_s1 + $0xf58] sm:$0xff] }
  0xd4   : > { %4561 = vmatprep.subr.bf16.mxu1 %v4560_v44  ;;  %v3378_v44 = vld [vmem:[%s8944_s1 + $0xe10] sm:$0xff]  ;;  %v4532_v6 = vpack.c.bf16 %v3413_v0, %v3409_v63  ;;  %v3412_v8 = vld [vmem:[%s8944_s1 + $0xf20] sm:$0xff]  ;;  %v3453_v0 = vld [vmem:[%s8944_s1 + $0x1048] sm:$0xff] }
  0xd5   : > { %v3450_v63 = vld [vmem:[%s8944_s1 + $0x1030] sm:$0xff] }
  0xd6   : > { %4499 = vmatpush1.bf16.msra.mxu0 %v4498_v26  ;;  %v3391_v26 = vld [vmem:[%s8944_s1 + $0xe78] sm:$0xff] }
  0xd7   : > { %4563 = vmatpush1.bf16.msra.mxu1 %v4562_v27  ;;  %4501 = vmatprep.subr.bf16.mxu0 %v4500_v28  ;;  %v4518_v27 = vpack.c.bf16 %v3380_v20, %v3376_v18  ;;  %v4582_v28 = vpack.c.bf16 %v3382_v22, %v3378_v44  ;;  %v4584_v33 = vpack.c.bf16 %v3391_v26, %v3387_v25  ;;  %v3416_v20 = vld [vmem:[%s8944_s1 + $0xf40] sm:$0xff]  ;;  %v3429_v25 = vld [vmem:[%s8944_s1 + $0xfa8] sm:$0xff]  ;;  %v3427_v26 = vld [vmem:[%s8944_s1 + $0xf98] sm:$0xff] }
  0xd8   : > { %4565 = vmatprep.subr.bf16.mxu1 %v4564_v32  ;;  %v3386_v32 = vld [vmem:[%s8944_s1 + $0xe50] sm:$0xff]  ;;  %v4536_v18 = vpack.c.bf16 %v3421_v13, %v3417_v12  ;;  %v3420_v44 = vld [vmem:[%s8944_s1 + $0xf60] sm:$0xff] }
  0xd9   : > { %v3458_v13 = vld [vmem:[%s8944_s1 + $0x1070] sm:$0xff] }
  0xda   : > { %4503 = vmatpush1.bf16.msra.mxu0 %v4502_v38  ;;  %v3399_v38 = vld [vmem:[%s8944_s1 + $0xeb8] sm:$0xff] }
  0xdb   : > { %4567 = vmatpush1.bf16.msra.mxu1 %v4566_v39  ;;  %4505 = vmatprep.subr.bf16.mxu0 %v4504_v40  ;;  %v4522_v39 = vpack.c.bf16 %v3388_v31, %v3384_v30  ;;  %v4586_v40 = vpack.c.bf16 %v3390_v34, %v3386_v32  ;;  %v4588_v48 = vpack.c.bf16 %v3399_v38, %v3395_v37  ;;  %v3424_v31 = vld [vmem:[%s8944_s1 + $0xf80] sm:$0xff]  ;;  %v3437_v37 = vld [vmem:[%s8944_s1 + $0xfe8] sm:$0xff]  ;;  %v3435_v38 = vld [vmem:[%s8944_s1 + $0xfd8] sm:$0xff] }
  0xdc   : > { %4569 = vmatprep.subr.bf16.mxu1 %v4568_v46  ;;  %v3394_v46 = vld [vmem:[%s8944_s1 + $0xe90] sm:$0xff]  ;;  %v4540_v30 = vpack.c.bf16 %v3429_v25, %v3425_v24  ;;  %v3428_v32 = vld [vmem:[%s8944_s1 + $0xfa0] sm:$0xff] }
  0xdd   : > { %v3462_v24 = vld [vmem:[%s8944_s1 + $0x1090] sm:$0xff] }
  0xde   : > { %4507 = vmatpush1.bf16.msra.mxu0 %v4506_v53  ;;  %v3407_v53 = vld [vmem:[%s8944_s1 + $0xef8] sm:$0xff]  ;;  %v3466_v25 = vld [vmem:[%s8944_s1 + $0x10b0] sm:$0xff] }
  0xdf   : > { %4571 = vmatpush1.bf16.msra.mxu1 %v4570_v54  ;;  %4509 = vmatprep.subr.bf16.mxu0 %v4508_v55  ;;  %v4526_v54 = vpack.c.bf16 %v3396_v45, %v3392_v42  ;;  %v4590_v55 = vpack.c.bf16 %v3398_v49, %v3394_v46  ;;  %v4592_v61 = vpack.c.bf16 %v3407_v53, %v3403_v52  ;;  %v3432_v45 = vld [vmem:[%s8944_s1 + $0xfc0] sm:$0xff]  ;;  %v3449_v52 = vld [vmem:[%s8944_s1 + $0x1028] sm:$0xff]  ;;  %v3447_v53 = vld [vmem:[%s8944_s1 + $0x1018] sm:$0xff] }
  0xe0   : > { %4573 = vmatprep.subr.bf16.mxu1 %v4572_v60  ;;  %v3402_v60 = vld [vmem:[%s8944_s1 + $0xed0] sm:$0xff]  ;;  %v4544_v42 = vpack.c.bf16 %v3437_v37, %v3433_v36  ;;  %v3436_v46 = vld [vmem:[%s8944_s1 + $0xfe0] sm:$0xff] }
  0xe1   : > { %v3474_v37 = vld [vmem:[%s8944_s1 + $0x10f0] sm:$0xff] }
  0xe2   : > { %4511 = vmatpush1.bf16.msra.mxu0 %v4510_v2  ;;  %v3415_v2 = vld [vmem:[%s8944_s1 + $0xf38] sm:$0xff] }
  0xe3   : > { %4575 = vmatpush1.bf16.msra.mxu1 %v4574_v3  ;;  %4513 = vmatprep.subr.bf16.mxu0 %v4512_v4  ;;  %v4530_v3 = vpack.c.bf16 %v3404_v59, %v3400_v58  ;;  %v4594_v4 = vpack.c.bf16 %v3406_v62, %v3402_v60  ;;  %v4596_v10 = vpack.c.bf16 %v3415_v2, %v3411_v1  ;;  %v3444_v59 = vld [vmem:[%s8944_s1 + $0x1000] sm:$0xff]  ;;  %v3457_v1 = vld [vmem:[%s8944_s1 + $0x1068] sm:$0xff]  ;;  %v3455_v2 = vld [vmem:[%s8944_s1 + $0x1058] sm:$0xff] }
  0xe4   : > { %4577 = vmatprep.subr.bf16.mxu1 %v4576_v9  ;;  %v3410_v9 = vld [vmem:[%s8944_s1 + $0xf10] sm:$0xff]  ;;  %v4612_v58 = vpack.c.bf16 %v3449_v52, %v3445_v5  ;;  %v3448_v60 = vld [vmem:[%s8944_s1 + $0x1020] sm:$0xff] }
  0xe5   : > { %v3482_v52 = vld [vmem:[%s8944_s1 + $0x1130] sm:$0xff] }
  0xe6   : > { %4515 = vmatpush1.bf16.msra.mxu0 %v4514_v15  ;;  %v3423_v15 = vld [vmem:[%s8944_s1 + $0xf78] sm:$0xff] }
  0xe7   : > { %4579 = vmatpush1.bf16.msra.mxu1 %v4578_v16  ;;  %4517 = vmatprep.subr.bf16.mxu0 %v4516_v17  ;;  %v4534_v16 = vpack.c.bf16 %v3412_v8, %v3408_v7  ;;  %v4598_v17 = vpack.c.bf16 %v3414_v11, %v3410_v9  ;;  %v4600_v22 = vpack.c.bf16 %v3423_v15, %v3419_v14  ;;  %v3452_v9 = vld [vmem:[%s8944_s1 + $0x1040] sm:$0xff]  ;;  %v3454_v11 = vld [vmem:[%s8944_s1 + $0x1050] sm:$0xff]  ;;  %v3461_v14 = vld [vmem:[%s8944_s1 + $0x1088] sm:$0xff] }
  0xe8   : > { %4581 = vmatprep.subr.bf16.mxu1 %v4580_v21  ;;  %v3418_v21 = vld [vmem:[%s8944_s1 + $0xf50] sm:$0xff]  ;;  %v4616_v8 = vpack.c.bf16 %v3457_v1, %v3453_v0  ;;  %v3465_v15 = vld [vmem:[%s8944_s1 + $0x10a8] sm:$0xff] }
  0xe9   : > { %v3490_v1 = vld [vmem:[%s8944_s1 + $0x1170] sm:$0xff] }
  0xea   : > { %4519 = vmatpush1.bf16.msra.mxu0 %v4518_v27  ;;  %v3431_v27 = vld [vmem:[%s8944_s1 + $0xfb8] sm:$0xff] }
  0xeb   : > { %4583 = vmatpush1.bf16.msra.mxu1 %v4582_v28  ;;  %4521 = vmatprep.subr.bf16.mxu0 %v4520_v29  ;;  %v4538_v28 = vpack.c.bf16 %v3420_v44, %v3416_v20  ;;  %v4602_v29 = vpack.c.bf16 %v3422_v23, %v3418_v21  ;;  %v4604_v34 = vpack.c.bf16 %v3431_v27, %v3427_v26  ;;  %v3464_v23 = vld [vmem:[%s8944_s1 + $0x10a0] sm:$0xff]  ;;  %v3469_v26 = vld [vmem:[%s8944_s1 + $0x10c8] sm:$0xff] }
  0xec   : > { %4585 = vmatprep.subr.bf16.mxu1 %v4584_v33  ;;  %v3426_v33 = vld [vmem:[%s8944_s1 + $0xf90] sm:$0xff]  ;;  %v4682_v44 = vpack.c.bf16 %v3458_v13, %v3454_v11  ;;  %v4620_v21 = vpack.c.bf16 %v3465_v15, %v3461_v14  ;;  %v3473_v27 = vld [vmem:[%s8944_s1 + $0x10e8] sm:$0xff]  ;;  %v3496_v11 = vld [vmem:[%s8944_s1 + $0x11a0] sm:$0xff] }
  0xed   : > { %v3498_v14 = vld [vmem:[%s8944_s1 + $0x11b0] sm:$0xff]  ;;  %v3501_v15 = vld [vmem:[%s8944_s1 + $0x11c8] sm:$0xff] }
  0xee   : > { %4523 = vmatpush1.bf16.msra.mxu0 %v4522_v39  ;;  %v3439_v39 = vld [vmem:[%s8944_s1 + $0xff8] sm:$0xff] }
  0xef   : > { %4587 = vmatpush1.bf16.msra.mxu1 %v4586_v40  ;;  %4525 = vmatprep.subr.bf16.mxu0 %v4524_v41  ;;  %v4542_v40 = vpack.c.bf16 %v3428_v32, %v3424_v31  ;;  %v4606_v41 = vpack.c.bf16 %v3430_v35, %v3426_v33  ;;  %v4608_v49 = vpack.c.bf16 %v3439_v39, %v3435_v38  ;;  %v3468_v33 = vld [vmem:[%s8944_s1 + $0x10c0] sm:$0xff]  ;;  %v3470_v35 = vld [vmem:[%s8944_s1 + $0x10d0] sm:$0xff]  ;;  %v3477_v38 = vld [vmem:[%s8944_s1 + $0x1108] sm:$0xff] }
  0xf0   : > { %4589 = vmatprep.subr.bf16.mxu1 %v4588_v48  ;;  %v3434_v48 = vld [vmem:[%s8944_s1 + $0xfd0] sm:$0xff]  ;;  %v4686_v31 = vpack.c.bf16 %v3466_v25, %v3462_v24  ;;  %v4624_v32 = vpack.c.bf16 %v3473_v27, %v3469_v26  ;;  %v3481_v39 = vld [vmem:[%s8944_s1 + $0x1128] sm:$0xff] }
  0xf1   : > { %v3502_v24 = vld [vmem:[%s8944_s1 + $0x11d0] sm:$0xff]  ;;  %v3509_v26 = vld [vmem:[%s8944_s1 + $0x1208] sm:$0xff] }
  0xf2   : > { %4527 = vmatpush1.bf16.msra.mxu0 %v4526_v54  ;;  %v3451_v54 = vld [vmem:[%s8944_s1 + $0x1038] sm:$0xff]  ;;  %v3506_v25 = vld [vmem:[%s8944_s1 + $0x11f0] sm:$0xff]  ;;  %v3513_v27 = vld [vmem:[%s8944_s1 + $0x1228] sm:$0xff] }
  0xf3   : > { %4591 = vmatpush1.bf16.msra.mxu1 %v4590_v55  ;;  %4529 = vmatprep.subr.bf16.mxu0 %v4528_v57  ;;  %v4546_v55 = vpack.c.bf16 %v3436_v46, %v3432_v45  ;;  %v4610_v57 = vpack.c.bf16 %v3438_v51, %v3434_v48  ;;  %v4676_v62 = vpack.c.bf16 %v3451_v54, %v3447_v53  ;;  %v3476_v48 = vld [vmem:[%s8944_s1 + $0x1100] sm:$0xff]  ;;  %v3478_v51 = vld [vmem:[%s8944_s1 + $0x1110] sm:$0xff]  ;;  %v3485_v53 = vld [vmem:[%s8944_s1 + $0x1148] sm:$0xff] }
  0xf4   : > { %4593 = vmatprep.subr.bf16.mxu1 %v4592_v61  ;;  %v3446_v61 = vld [vmem:[%s8944_s1 + $0x1010] sm:$0xff]  ;;  %v4690_v45 = vpack.c.bf16 %v3474_v37, %v3470_v35  ;;  %v4628_v46 = vpack.c.bf16 %v3481_v39, %v3477_v38  ;;  %v3489_v54 = vld [vmem:[%s8944_s1 + $0x1168] sm:$0xff] }
  0xf5   : > { %v4678_v7 = vpack.c.bf16 %v3450_v63, %v3446_v61  ;;  %v3484_v61 = vld [vmem:[%s8944_s1 + $0x1140] sm:$0xff]  ;;  %v3486_v63 = vld [vmem:[%s8944_s1 + $0x1150] sm:$0xff]  ;;  %v3517_v38 = vld [vmem:[%s8944_s1 + $0x1248] sm:$0xff] }
  0xf6   : > { %4531 = vmatpush1.bf16.msra.mxu0 %v4530_v3  ;;  %v3459_v3 = vld [vmem:[%s8944_s1 + $0x1078] sm:$0xff]  ;;  %v3510_v35 = vld [vmem:[%s8944_s1 + $0x1210] sm:$0xff]  ;;  %v3521_v39 = vld [vmem:[%s8944_s1 + $0x1268] sm:$0xff] }
  0xf7   : > { %4595 = vmatpush1.bf16.msra.mxu1 %v4594_v4  ;;  %4533 = vmatprep.subr.bf16.mxu0 %v4532_v6  ;;  %v1355_v4 = vld [vmem:[%s5627_s11 + $0x8] sm:$0x78]  ;;  %v4614_v6 = vpack.c.bf16 %v3448_v60, %v3444_v59  ;;  %v4680_v12 = vpack.c.bf16 %v3459_v3, %v3455_v2  ;;  %v4694_v59 = vpack.c.bf16 %v3482_v52, %v3478_v51  ;;  %v3514_v37 = vld [vmem:[%s8944_s1 + $0x1230] sm:$0xff] }
  0xf8   : > { %4597 = vmatprep.subr.bf16.mxu1 %v4596_v10  ;;  %v3456_v10 = vld [vmem:[%s8944_s1 + $0x1060] sm:$0xff]  ;;  %v4632_v60 = vpack.c.bf16 %v3489_v54, %v3485_v53  ;;  %v3493_v2 = vld [vmem:[%s8944_s1 + $0x1188] sm:$0xff]  ;;  %v3518_v51 = vld [vmem:[%s8944_s1 + $0x1250] sm:$0xff] }
  0xf9   : > { %v4618_v20 = vpack.c.bf16 %v3456_v10, %v3452_v9  ;;  %v3497_v3 = vld [vmem:[%s8944_s1 + $0x11a8] sm:$0xff]  ;;  %v3492_v10 = vld [vmem:[%s8944_s1 + $0x1180] sm:$0xff]  ;;  %v3522_v52 = vld [vmem:[%s8944_s1 + $0x1270] sm:$0xff] }
  0xfa   : > { %4535 = vmatpush1.bf16.msra.mxu0 %v4534_v16  ;;  %v1488_v16 = vrot.slane %v1355_v4, 3  ;;  %v3495_v4 = vld [vmem:[%s8944_s1 + $0x1198] sm:$0xff]  ;;  %v4636_v9 = vpack.c.bf16 %v3497_v3, %v3493_v2  ;;  %v3525_v53 = vld [vmem:[%s8944_s1 + $0x1288] sm:$0xff] }
  0xfb   : > { %4599 = vmatpush1.bf16.msra.mxu1 %v4598_v17  ;;  %4537 = vmatprep.subr.bf16.mxu0 %v4536_v18  ;;  %v3463_v17 = vld [vmem:[%s8944_s1 + $0x1098] sm:$0xff]  ;;  %v3529_v54 = vld [vmem:[%s8944_s1 + $0x12a8] sm:$0xff] }
  0xfc   : > { %4601 = vmatprep.subr.bf16.mxu1 %v4600_v22  ;;  %v3467_v18 = vld [vmem:[%s8944_s1 + $0x10b8] sm:$0xff]  ;;  %v3460_v22 = vld [vmem:[%s8944_s1 + $0x1080] sm:$0xff]  ;;  %v3533_v2 = vld [vmem:[%s8944_s1 + $0x12c8] sm:$0xff] }
  0xfd   : > { %v3537_v3 = vld [vmem:[%s8944_s1 + $0x12e8] sm:$0xff] }
  0xfe   : > { %4539 = vmatpush1.bf16.msra.mxu0 %v4538_v28  ;;  %v3471_v28 = vld [vmem:[%s8944_s1 + $0x10d8] sm:$0xff] }
  0xff   : > { %4603 = vmatpush1.bf16.msra.mxu1 %v4602_v29  ;;  %4541 = vmatprep.subr.bf16.mxu0 %v4540_v30  ;;  %v3475_v29 = vld [vmem:[%s8944_s1 + $0x10f8] sm:$0xff]  ;;  %v4622_v30 = vpack.c.bf16 %v3464_v23, %v3460_v22  ;;  %v3500_v22 = vld [vmem:[%s8944_s1 + $0x11c0] sm:$0xff] }
 0x100   : > { %4605 = vmatprep.subr.bf16.mxu1 %v4604_v34  ;;  %v3472_v34 = vld [vmem:[%s8944_s1 + $0x10e0] sm:$0xff]  ;;  %v4688_v36 = vpack.c.bf16 %v3475_v29, %v3471_v28  ;;  %v3511_v28 = vld [vmem:[%s8944_s1 + $0x1218] sm:$0xff] }
 0x101   : > { %v3504_v23 = vld [vmem:[%s8944_s1 + $0x11e0] sm:$0xff]  ;;  %v3515_v29 = vld [vmem:[%s8944_s1 + $0x1238] sm:$0xff] }
 0x102   : > { %4543 = vmatpush1.bf16.msra.mxu0 %v4542_v40  ;;  %v3479_v40 = vld [vmem:[%s8944_s1 + $0x1118] sm:$0xff] }
 0x103   : > { %4607 = vmatpush1.bf16.msra.mxu1 %v4606_v41  ;;  %4545 = vmatprep.subr.bf16.mxu0 %v4544_v42  ;;  %v3483_v41 = vld [vmem:[%s8944_s1 + $0x1138] sm:$0xff]  ;;  %v4626_v42 = vpack.c.bf16 %v3472_v34, %v3468_v33  ;;  %v3508_v33 = vld [vmem:[%s8944_s1 + $0x1200] sm:$0xff] }
 0x104   : > { %4609 = vmatprep.subr.bf16.mxu1 %v4608_v49  ;;  %v3480_v49 = vld [vmem:[%s8944_s1 + $0x1120] sm:$0xff]  ;;  %v4692_v5 = vpack.c.bf16 %v3483_v41, %v3479_v40  ;;  %v3519_v40 = vld [vmem:[%s8944_s1 + $0x1258] sm:$0xff] }
 0x105   : > { %v3512_v34 = vld [vmem:[%s8944_s1 + $0x1220] sm:$0xff]  ;;  %v3523_v41 = vld [vmem:[%s8944_s1 + $0x1278] sm:$0xff] }
 0x106   : > { %4547 = vmatpush1.bf16.msra.mxu0 %v4546_v55  ;;  %v3487_v55 = vld [vmem:[%s8944_s1 + $0x1158] sm:$0xff] }
 0x107   : > { %4611 = vmatpush1.bf16.msra.mxu1 %v4610_v57  ;;  %4613 = vmatprep.subr.bf16.mxu0 %v4612_v58  ;;  %v3491_v57 = vld [vmem:[%s8944_s1 + $0x1178] sm:$0xff]  ;;  %v4630_v58 = vpack.c.bf16 %v3480_v49, %v3476_v48  ;;  %v3516_v48 = vld [vmem:[%s8944_s1 + $0x1240] sm:$0xff] }
 0x108   : > { %4677 = vmatprep.subr.bf16.mxu1 %v4676_v62  ;;  %v3488_v62 = vld [vmem:[%s8944_s1 + $0x1160] sm:$0xff]  ;;  %v4696_v0 = vpack.c.bf16 %v3491_v57, %v3487_v55  ;;  %v3527_v55 = vld [vmem:[%s8944_s1 + $0x1298] sm:$0xff] }
 0x109   : > { %3441 = vmatmul.mubr.msk.f32.vlgmr.msra.gmra.mrb[0].mxu0 %vm5904_vm0, %v6573_v50  ;;  %v3520_v49 = vld [vmem:[%s8944_s1 + $0x1260] sm:$0xff]  ;;  %v3531_v57 = vld [vmem:[%s8944_s1 + $0x12b8] sm:$0xff] }
 0x10a   : > { %3443 = vmatmul.mubr.msk.f32.vlgmr.msra.gmra.mrb[0].mxu1 %vm5904_vm0, %v6573_v50  ;;  %4615 = vmatpush1.bf16.msra.mxu0 %v4614_v6  ;;  %v4684_v50 = vpack.c.bf16 %v3467_v18, %v3463_v17  ;;  %v3499_v6 = vld [vmem:[%s8944_s1 + $0x11b8] sm:$0xff] }
 0x10b   : > { %4679 = vmatpush1.bf16.msra.mxu1 %v4678_v7  ;;  %4617 = vmatprep.subr.bf16.mxu0 %v4616_v8  ;;  %v4634_v7 = vpack.c.bf16 %v3488_v62, %v3484_v61  ;;  %v4698_v8 = vpack.c.bf16 %v3490_v1, %v3486_v63  ;;  %v4700_v13 = vpack.c.bf16 %v3499_v6, %v3495_v4  ;;  %v3503_v17 = vld [vmem:[%s8944_s1 + $0x11d8] sm:$0xff]  ;;  %v3524_v61 = vld [vmem:[%s8944_s1 + $0x1280] sm:$0xff]  ;;  %v3526_v63 = vld [vmem:[%s8944_s1 + $0x1290] sm:$0xff] }
 0x10c   : > { %4681 = vmatprep.subr.bf16.mxu1 %v4680_v12  ;;  %1555 = vmatprep.mubr.f32.mxu0 %v1488_v16  ;;  %v3494_v12 = vld [vmem:[%s8944_s1 + $0x1190] sm:$0xff]  ;;  %v3507_v18 = vld [vmem:[%s8944_s1 + $0x11f8] sm:$0xff]  ;;  %v3528_v62 = vld [vmem:[%s8944_s1 + $0x12a0] sm:$0xff] }
 0x10d   : > { %1626 = vmatprep.mubr.f32.mxu1 %v1488_v16  ;;  %v3505_v16 = vld [vmem:[%s8944_s1 + $0x11e8] sm:$0xff]  ;;  %v3530_v1 = vld [vmem:[%s8944_s1 + $0x12b0] sm:$0xff]  ;;  %v3535_v4 = vld [vmem:[%s8944_s1 + $0x12d8] sm:$0xff] }
 0x10e   : > { %4619 = vmatpush1.bf16.msra.mxu0 %v4618_v20  ;;  %v4638_v20 = vpack.c.bf16 %v3496_v11, %v3492_v10  ;;  %v3539_v6 = vld [vmem:[%s8944_s1 + $0x12f8] sm:$0xff]  ;;  %v3532_v10 = vld [vmem:[%s8944_s1 + $0x12c0] sm:$0xff] }
 0x10f   : > { %4683 = vmatpush1.bf16.msra.mxu1 %v4682_v44  ;;  %4621 = vmatprep.subr.bf16.mxu0 %v4620_v21  ;;  %v4702_v44 = vpack.c.bf16 %v3498_v14, %v3494_v12  ;;  %v4640_v21 = vpack.c.bf16 %v3505_v16, %v3501_v15  ;;  %v3536_v11 = vld [vmem:[%s8944_s1 + $0x12e0] sm:$0xff]  ;;  %v3534_v12 = vld [vmem:[%s8944_s1 + $0x12d0] sm:$0xff]  ;;  %v3541_v15 = vld [vmem:[%s8944_s1 + $0x1308] sm:$0xff] }
 0x110   : > { %4685 = vmatprep.subr.bf16.mxu1 %v4684_v50  ;;  %v4704_v50 = vpack.c.bf16 %v3507_v18, %v3503_v17  ;;  %v3538_v14 = vld [vmem:[%s8944_s1 + $0x12f0] sm:$0xff]  ;;  %v3545_v16 = vld [vmem:[%s8944_s1 + $0x1328] sm:$0xff]  ;;  %v3543_v17 = vld [vmem:[%s8944_s1 + $0x1318] sm:$0xff] }
 0x111   : > { %v3547_v18 = vld [vmem:[%s8944_s1 + $0x1338] sm:$0xff] }
 0x112   : > { %4623 = vmatpush1.bf16.msra.mxu0 %v4622_v30  ;;  %v4642_v30 = vpack.c.bf16 %v3504_v23, %v3500_v22  ;;  %v3540_v22 = vld [vmem:[%s8944_s1 + $0x1300] sm:$0xff] }
 0x113   : > { %4687 = vmatpush1.bf16.msra.mxu1 %v4686_v31  ;;  %4625 = vmatprep.subr.bf16.mxu0 %v4624_v32  ;;  %v4706_v31 = vpack.c.bf16 %v3506_v25, %v3502_v24  ;;  %v4644_v32 = vpack.c.bf16 %v3513_v27, %v3509_v26  ;;  %v3544_v23 = vld [vmem:[%s8944_s1 + $0x1320] sm:$0xff]  ;;  %v3542_v24 = vld [vmem:[%s8944_s1 + $0x1310] sm:$0xff]  ;;  %v3549_v26 = vld [vmem:[%s8944_s1 + $0x1348] sm:$0xff] }
 0x114   : > { %4689 = vmatprep.subr.bf16.mxu1 %v4688_v36  ;;  %v4708_v36 = vpack.c.bf16 %v3515_v29, %v3511_v28  ;;  %v3546_v25 = vld [vmem:[%s8944_s1 + $0x1330] sm:$0xff]  ;;  %v3553_v27 = vld [vmem:[%s8944_s1 + $0x1368] sm:$0xff]  ;;  %v3551_v28 = vld [vmem:[%s8944_s1 + $0x1358] sm:$0xff] }
 0x115   : > { %v3555_v29 = vld [vmem:[%s8944_s1 + $0x1378] sm:$0xff] }
 0x116   : > { %4627 = vmatpush1.bf16.msra.mxu0 %v4626_v42  ;;  %v4646_v42 = vpack.c.bf16 %v3512_v34, %v3508_v33  ;;  %v3548_v33 = vld [vmem:[%s8944_s1 + $0x1340] sm:$0xff] }
 0x117   : > { %4691 = vmatpush1.bf16.msra.mxu1 %v4690_v45  ;;  %4629 = vmatprep.subr.bf16.mxu0 %v4628_v46  ;;  %v4710_v45 = vpack.c.bf16 %v3514_v37, %v3510_v35  ;;  %v4648_v46 = vpack.c.bf16 %v3521_v39, %v3517_v38  ;;  %v3552_v34 = vld [vmem:[%s8944_s1 + $0x1360] sm:$0xff]  ;;  %v3550_v35 = vld [vmem:[%s8944_s1 + $0x1350] sm:$0xff]  ;;  %v3557_v38 = vld [vmem:[%s8944_s1 + $0x1388] sm:$0xff] }
 0x118   : > { %4693 = vmatprep.subr.bf16.mxu1 %v4692_v5  ;;  %v4712_v5 = vpack.c.bf16 %v3523_v41, %v3519_v40  ;;  %v3554_v37 = vld [vmem:[%s8944_s1 + $0x1370] sm:$0xff]  ;;  %v3561_v39 = vld [vmem:[%s8944_s1 + $0x13a8] sm:$0xff]  ;;  %v3559_v40 = vld [vmem:[%s8944_s1 + $0x1398] sm:$0xff] }
 0x119   : > { %v3563_v41 = vld [vmem:[%s8944_s1 + $0x13b8] sm:$0xff] }
 0x11a   : > { %4631 = vmatpush1.bf16.msra.mxu0 %v4630_v58  ;;  %v4650_v58 = vpack.c.bf16 %v3520_v49, %v3516_v48  ;;  %v3556_v48 = vld [vmem:[%s8944_s1 + $0x1380] sm:$0xff] }
 0x11b   : > { %4695 = vmatpush1.bf16.msra.mxu1 %v4694_v59  ;;  %4633 = vmatprep.subr.bf16.mxu0 %v4632_v60  ;;  %v4714_v59 = vpack.c.bf16 %v3522_v52, %v3518_v51  ;;  %v4652_v60 = vpack.c.bf16 %v3529_v54, %v3525_v53  ;;  %v3560_v49 = vld [vmem:[%s8944_s1 + $0x13a0] sm:$0xff]  ;;  %v3558_v51 = vld [vmem:[%s8944_s1 + $0x1390] sm:$0xff]  ;;  %v3565_v53 = vld [vmem:[%s8944_s1 + $0x13c8] sm:$0xff] }
 0x11c   : > { %4697 = vmatprep.subr.bf16.mxu1 %v4696_v0  ;;  %v4716_v0 = vpack.c.bf16 %v3531_v57, %v3527_v55  ;;  %v3562_v52 = vld [vmem:[%s8944_s1 + $0x13b0] sm:$0xff]  ;;  %v3569_v54 = vld [vmem:[%s8944_s1 + $0x13e8] sm:$0xff]  ;;  %v3567_v55 = vld [vmem:[%s8944_s1 + $0x13d8] sm:$0xff] }
 0x11d   : > { %v3571_v57 = vld [vmem:[%s8944_s1 + $0x13f8] sm:$0xff] }
 0x11e   : > { %4635 = vmatpush1.bf16.msra.mxu0 %v4634_v7  ;;  %v4654_v7 = vpack.c.bf16 %v3528_v62, %v3524_v61  ;;  %v3564_v61 = vld [vmem:[%s8944_s1 + $0x13c0] sm:$0xff] }
 0x11f   : > { %4699 = vmatpush1.bf16.msra.mxu1 %v4698_v8  ;;  %4637 = vmatprep.subr.bf16.mxu0 %v4636_v9  ;;  %v4718_v8 = vpack.c.bf16 %v3530_v1, %v3526_v63  ;;  %v4656_v9 = vpack.c.bf16 %v3537_v3, %v3533_v2  ;;  %v3568_v62 = vld [vmem:[%s8944_s1 + $0x13e0] sm:$0xff]  ;;  %v3566_v63 = vld [vmem:[%s8944_s1 + $0x13d0] sm:$0xff]  ;;  %v3573_v2 = vld [vmem:[%s8944_s1 + $0x1408] sm:$0xff] }
 0x120   : > { %4701 = vmatprep.subr.bf16.mxu1 %v4700_v13  ;;  %v4720_v13 = vpack.c.bf16 %v3539_v6, %v3535_v4  ;;  %v3570_v1 = vld [vmem:[%s8944_s1 + $0x13f0] sm:$0xff]  ;;  %v3577_v3 = vld [vmem:[%s8944_s1 + $0x1428] sm:$0xff]  ;;  %v3575_v4 = vld [vmem:[%s8944_s1 + $0x1418] sm:$0xff] }
 0x121   : > { %v3579_v6 = vld [vmem:[%s8944_s1 + $0x1438] sm:$0xff] }
 0x122   : > { %4639 = vmatpush1.bf16.msra.mxu0 %v4638_v20  ;;  %v4658_v20 = vpack.c.bf16 %v3536_v11, %v3532_v10  ;;  %v4740_v10 = vpack.c.bf16 %v3577_v3, %v3573_v2  ;;  %v3572_v11 = vld [vmem:[%s8944_s1 + $0x1400] sm:$0xff]  ;;  %v3606_v3 = vld [vmem:[%s8944_s1 + $0x1510] sm:$0xff] }
 0x123   : > { %4703 = vmatpush1.bf16.msra.mxu1 %v4702_v44  ;;  %4641 = vmatprep.subr.bf16.mxu0 %v4640_v21  ;;  %v4722_v44 = vpack.c.bf16 %v3538_v14, %v3534_v12  ;;  %v4660_v21 = vpack.c.bf16 %v3545_v16, %v3541_v15  ;;  %v3576_v12 = vld [vmem:[%s8944_s1 + $0x1420] sm:$0xff]  ;;  %v4804_v14 = vpack.c.bf16 %v3579_v6, %v3575_v4  ;;  %v3578_v15 = vld [vmem:[%s8944_s1 + $0x1430] sm:$0xff]  ;;  %v3581_v16 = vld [vmem:[%s8944_s1 + $0x1448] sm:$0xff] }
 0x124   : > { %4705 = vmatprep.subr.bf16.mxu1 %v4704_v50  ;;  %v4724_v50 = vpack.c.bf16 %v3547_v18, %v3543_v17  ;;  %v3585_v17 = vld [vmem:[%s8944_s1 + $0x1468] sm:$0xff]  ;;  %v3608_v2 = vld [vmem:[%s8944_s1 + $0x1520] sm:$0xff]  ;;  %v3610_v6 = vld [vmem:[%s8944_s1 + $0x1530] sm:$0xff] }
 0x126   : > { %4643 = vmatpush1.bf16.msra.mxu0 %v4642_v30  ;;  %v4662_v30 = vpack.c.bf16 %v3544_v23, %v3540_v22  ;;  %v4742_v22 = vpack.c.bf16 %v3576_v12, %v3572_v11  ;;  %v4822_v12 = vpack.c.bf16 %v3610_v6, %v3606_v3  ;;  %v3648_v3 = vld [vmem:[%s8944_s1 + $0x1660] sm:$0xff] }
 0x127   : > { %4707 = vmatpush1.bf16.msra.mxu1 %v4706_v31  ;;  %4645 = vmatprep.subr.bf16.mxu0 %v4644_v32  ;;  %v4726_v31 = vpack.c.bf16 %v3546_v25, %v3542_v24  ;;  %v4664_v32 = vpack.c.bf16 %v3553_v27, %v3549_v26  ;;  %v4744_v24 = vpack.c.bf16 %v3585_v17, %v3581_v16  ;;  %v3584_v25 = vld [vmem:[%s8944_s1 + $0x1460] sm:$0xff]  ;;  %v3582_v26 = vld [vmem:[%s8944_s1 + $0x1450] sm:$0xff] }
 0x128   : > { %4709 = vmatprep.subr.bf16.mxu1 %v4708_v36  ;;  %v4728_v36 = vpack.c.bf16 %v3555_v29, %v3551_v28  ;;  %v3586_v28 = vld [vmem:[%s8944_s1 + $0x1470] sm:$0xff]  ;;  %v3589_v29 = vld [vmem:[%s8944_s1 + $0x1488] sm:$0xff] }
 0x129   : > { %v3614_v16 = vld [vmem:[%s8944_s1 + $0x1550] sm:$0xff] }
 0x12a   : > { %4647 = vmatpush1.bf16.msra.mxu0 %v4646_v42  ;;  %v4666_v42 = vpack.c.bf16 %v3552_v34, %v3548_v33  ;;  %v3595_v33 = vld [vmem:[%s8944_s1 + $0x14b8] sm:$0xff] }
 0x12b   : > { %4711 = vmatpush1.bf16.msra.mxu1 %v4710_v45  ;;  %4649 = vmatprep.subr.bf16.mxu0 %v4648_v46  ;;  %v4730_v45 = vpack.c.bf16 %v3554_v37, %v3550_v35  ;;  %v4668_v46 = vpack.c.bf16 %v3561_v39, %v3557_v38  ;;  %v4810_v35 = vpack.c.bf16 %v3586_v28, %v3582_v26  ;;  %v3588_v37 = vld [vmem:[%s8944_s1 + $0x1480] sm:$0xff]  ;;  %v3590_v39 = vld [vmem:[%s8944_s1 + $0x1490] sm:$0xff] }
 0x12c   : > { %4713 = vmatprep.subr.bf16.mxu1 %v4712_v5  ;;  %v4732_v5 = vpack.c.bf16 %v3563_v41, %v3559_v40  ;;  %v3592_v38 = vld [vmem:[%s8944_s1 + $0x14a0] sm:$0xff]  ;;  %v3594_v41 = vld [vmem:[%s8944_s1 + $0x14b0] sm:$0xff] }
 0x12d   : > { %v3624_v26 = vld [vmem:[%s8944_s1 + $0x15a0] sm:$0xff] }
 0x12e   : > { %4651 = vmatpush1.bf16.msra.mxu0 %v4650_v58  ;;  %v4670_v58 = vpack.c.bf16 %v3560_v49, %v3556_v48  ;;  %v3603_v48 = vld [vmem:[%s8944_s1 + $0x14f8] sm:$0xff]  ;;  %v4750_v49 = vpack.c.bf16 %v3592_v38, %v3588_v37  ;;  %v3628_v38 = vld [vmem:[%s8944_s1 + $0x15c0] sm:$0xff] }
 0x12f   : > { %4715 = vmatpush1.bf16.msra.mxu1 %v4714_v59  ;;  %4653 = vmatprep.subr.bf16.mxu0 %v4652_v60  ;;  %v4734_v59 = vpack.c.bf16 %v3562_v52, %v3558_v51  ;;  %v4672_v60 = vpack.c.bf16 %v3569_v54, %v3565_v53  ;;  %v4814_v51 = vpack.c.bf16 %v3594_v41, %v3590_v39  ;;  %v3596_v52 = vld [vmem:[%s8944_s1 + $0x14c0] sm:$0xff]  ;;  %v3598_v54 = vld [vmem:[%s8944_s1 + $0x14d0] sm:$0xff] }
 0x130   : > { %4717 = vmatprep.subr.bf16.mxu1 %v4716_v0  ;;  %v4736_v0 = vpack.c.bf16 %v3571_v57, %v3567_v55  ;;  %v3600_v53 = vld [vmem:[%s8944_s1 + $0x14e0] sm:$0xff]  ;;  %v3602_v57 = vld [vmem:[%s8944_s1 + $0x14f0] sm:$0xff] }
 0x131   : > { %v3632_v39 = vld [vmem:[%s8944_s1 + $0x15e0] sm:$0xff] }
 0x132   : > { %4655 = vmatpush1.bf16.msra.mxu0 %v4654_v7  ;;  %v4674_v7 = vpack.c.bf16 %v3568_v62, %v3564_v61  ;;  %v3611_v61 = vld [vmem:[%s8944_s1 + $0x1538] sm:$0xff]  ;;  %v4754_v62 = vpack.c.bf16 %v3600_v53, %v3596_v52  ;;  %v3636_v53 = vld [vmem:[%s8944_s1 + $0x1600] sm:$0xff] }
 0x133   : > { %4719 = vmatpush1.bf16.msra.mxu1 %v4718_v8  ;;  %4657 = vmatprep.subr.bf16.mxu0 %v4656_v9  ;;  %v1354_v8 = vld [vmem:[%s5627_s11] sm:$0x78]  ;;  %v4738_v9 = vpack.c.bf16 %v3570_v1, %v3566_v63  ;;  %v4818_v63 = vpack.c.bf16 %v3602_v57, %v3598_v54 }
 0x134   : > { %4721 = vmatprep.subr.bf16.mxu1 %v4720_v13  ;;  %v3574_v13 = vld [vmem:[%s8944_s1 + $0x1410] sm:$0xff]  ;;  %v1487_v18 = vrot.slane %v1354_v8, 3  ;;  %v3604_v1 = vld [vmem:[%s8944_s1 + $0x1500] sm:$0xff]  ;;  %v3617_v8 = vld [vmem:[%s8944_s1 + $0x1568] sm:$0xff] }
 0x135   : > { %v4806_v23 = vpack.c.bf16 %v3578_v15, %v3574_v13  ;;  %v4758_v11 = vpack.c.bf16 %v3608_v2, %v3604_v1  ;;  %v3616_v15 = vld [vmem:[%s8944_s1 + $0x1560] sm:$0xff] }
 0x136   : > { %4659 = vmatpush1.bf16.msra.mxu0 %v4658_v20  ;;  %v3583_v20 = vld [vmem:[%s8944_s1 + $0x1458] sm:$0xff]  ;;  %v3640_v54 = vld [vmem:[%s8944_s1 + $0x1620] sm:$0xff] }
 0x137   : > { %4723 = vmatpush1.bf16.msra.mxu1 %v4722_v44  ;;  %4661 = vmatprep.subr.bf16.mxu0 %v4660_v21  ;;  %v3587_v44 = vld [vmem:[%s8944_s1 + $0x1478] sm:$0xff]  ;;  %v1638_v21 = vld [vmem:[%s5627_s11 + $0x8] sm:$0xf0]  ;;  %v3644_v2 = vld [vmem:[%s8944_s1 + $0x1640] sm:$0xff] }
 0x138   : > { %4725 = vmatprep.subr.bf16.mxu1 %v4724_v50  ;;  %v3580_v50 = vld [vmem:[%s8944_s1 + $0x1440] sm:$0xff]  ;;  %v4808_v27 = vpack.c.bf16 %v3587_v44, %v3583_v20  ;;  %v3621_v20 = vld [vmem:[%s8944_s1 + $0x1588] sm:$0xff] }
 0x139   : > { %v4746_v34 = vpack.c.bf16 %v3584_v25, %v3580_v50  ;;  %v3625_v44 = vld [vmem:[%s8944_s1 + $0x15a8] sm:$0xff]  ;;  %v3620_v25 = vld [vmem:[%s8944_s1 + $0x1580] sm:$0xff] }
 0x13a   : > { %4663 = vmatpush1.bf16.msra.mxu0 %v4662_v30  ;;  %v3593_v30 = vld [vmem:[%s8944_s1 + $0x14a8] sm:$0xff]  ;;  %v4764_v50 = vpack.c.bf16 %v3625_v44, %v3621_v20  ;;  %v3658_v20 = vld [vmem:[%s8944_s1 + $0x16b0] sm:$0xff] }
 0x13b   : > { %4727 = vmatpush1.bf16.msra.mxu1 %v4726_v31  ;;  %4665 = vmatprep.subr.bf16.mxu0 %v4664_v32  ;;  %v7388_v31 = vrot.slane %v1638_v21, 4  ;;  %v3591_v32 = vld [vmem:[%s8944_s1 + $0x1498] sm:$0xff]  ;;  %v3661_v44 = vld [vmem:[%s8944_s1 + $0x16c8] sm:$0xff] }
 0x13c   : > { %4729 = vmatprep.subr.bf16.mxu1 %v4728_v36  ;;  %v4748_v36 = vpack.c.bf16 %v3593_v30, %v3589_v29  ;;  %v4812_v40 = vpack.c.bf16 %v3595_v33, %v3591_v32  ;;  %v3623_v21 = vld [vmem:[%s8944_s1 + $0x1598] sm:$0xff]  ;;  %v3626_v29 = vld [vmem:[%s8944_s1 + $0x15b0] sm:$0xff]  ;;  %v3629_v30 = vld [vmem:[%s8944_s1 + $0x15c8] sm:$0xff] }
 0x13d   : > { %v3633_v32 = vld [vmem:[%s8944_s1 + $0x15e8] sm:$0xff]  ;;  %v3631_v33 = vld [vmem:[%s8944_s1 + $0x15d8] sm:$0xff] }
 0x13e   : > { %4667 = vmatpush1.bf16.msra.mxu0 %v4666_v42  ;;  %v3597_v42 = vld [vmem:[%s8944_s1 + $0x14c8] sm:$0xff]  ;;  %v4768_v37 = vpack.c.bf16 %v3633_v32, %v3629_v30  ;;  %v3666_v30 = vld [vmem:[%s8944_s1 + $0x16f0] sm:$0xff] }
 0x13f   : > { %4731 = vmatpush1.bf16.msra.mxu1 %v4730_v45  ;;  %4669 = vmatprep.subr.bf16.mxu0 %v4668_v46  ;;  %v3601_v45 = vld [vmem:[%s8944_s1 + $0x14e8] sm:$0xff]  ;;  %v3599_v46 = vld [vmem:[%s8944_s1 + $0x14d8] sm:$0xff] }
 0x140   : > { %4733 = vmatprep.subr.bf16.mxu1 %v4732_v5  ;;  %v4752_v5 = vpack.c.bf16 %v3601_v45, %v3597_v42  ;;  %v4816_v55 = vpack.c.bf16 %v3603_v48, %v3599_v46  ;;  %v3634_v42 = vld [vmem:[%s8944_s1 + $0x15f0] sm:$0xff]  ;;  %v3637_v45 = vld [vmem:[%s8944_s1 + $0x1608] sm:$0xff]  ;;  %v3639_v48 = vld [vmem:[%s8944_s1 + $0x1618] sm:$0xff] }
 0x141   : > { %v3641_v46 = vld [vmem:[%s8944_s1 + $0x1628] sm:$0xff] }
 0x142   : > { %4671 = vmatpush1.bf16.msra.mxu0 %v4670_v58  ;;  %v3605_v58 = vld [vmem:[%s8944_s1 + $0x1508] sm:$0xff]  ;;  %v4772_v52 = vpack.c.bf16 %v3641_v46, %v3637_v45  ;;  %v3674_v45 = vld [vmem:[%s8944_s1 + $0x1730] sm:$0xff] }
 0x143   : > { %4735 = vmatpush1.bf16.msra.mxu1 %v4734_v59  ;;  %4673 = vmatprep.subr.bf16.mxu0 %v4672_v60  ;;  %v3609_v59 = vld [vmem:[%s8944_s1 + $0x1528] sm:$0xff]  ;;  %v3607_v60 = vld [vmem:[%s8944_s1 + $0x1518] sm:$0xff] }
 0x144   : > { %4737 = vmatprep.subr.bf16.mxu1 %v4736_v0  ;;  %v4756_v0 = vpack.c.bf16 %v3609_v59, %v3605_v58  ;;  %v4820_v4 = vpack.c.bf16 %v3611_v61, %v3607_v60  ;;  %v3642_v58 = vld [vmem:[%s8944_s1 + $0x1630] sm:$0xff]  ;;  %v3645_v59 = vld [vmem:[%s8944_s1 + $0x1648] sm:$0xff]  ;;  %v3647_v61 = vld [vmem:[%s8944_s1 + $0x1658] sm:$0xff] }
 0x145   : > { %v3649_v60 = vld [vmem:[%s8944_s1 + $0x1668] sm:$0xff] }
 0x146   : > { %4675 = vmatpush1.bf16.msra.mxu0 %v4674_v7  ;;  %v3613_v7 = vld [vmem:[%s8944_s1 + $0x1548] sm:$0xff]  ;;  %v4776_v1 = vpack.c.bf16 %v3649_v60, %v3645_v59  ;;  %v3682_v59 = vld [vmem:[%s8944_s1 + $0x1770] sm:$0xff] }
 0x147   : > { %4739 = vmatpush1.bf16.msra.mxu1 %v4738_v9  ;;  %4741 = vmatprep.subr.bf16.mxu0 %v4740_v10  ;;  %v3615_v9 = vld [vmem:[%s8944_s1 + $0x1558] sm:$0xff]  ;;  %v4760_v13 = vpack.c.bf16 %v3617_v8, %v3613_v7  ;;  %v3650_v7 = vld [vmem:[%s8944_s1 + $0x1670] sm:$0xff]  ;;  %v3653_v8 = vld [vmem:[%s8944_s1 + $0x1688] sm:$0xff] }
 0x148   : > { %4805 = vmatprep.subr.bf16.mxu1 %v4804_v14  ;;  %v3619_v10 = vld [vmem:[%s8944_s1 + $0x1578] sm:$0xff]  ;;  %v3612_v14 = vld [vmem:[%s8944_s1 + $0x1540] sm:$0xff]  ;;  %v3669_v32 = vld [vmem:[%s8944_s1 + $0x1708] sm:$0xff] }
 0x149   : > { %1556 = vmatmul.mubr.f32.vlgmr.msra.gmra.mrb[0].mxu0 %v1487_v18  ;;  %v4824_v17 = vpack.c.bf16 %v3619_v10, %v3615_v9  ;;  %v3657_v9 = vld [vmem:[%s8944_s1 + $0x16a8] sm:$0xff]  ;;  %v3655_v10 = vld [vmem:[%s8944_s1 + $0x1698] sm:$0xff] }
 0x14a   : > { %1627 = vmatmul.mubr.f32.vlgmr.msra.gmra.mrb[0].mxu1 %v1487_v18  ;;  %4743 = vmatpush1.bf16.msra.mxu0 %v4742_v22  ;;  %v3618_v18 = vld [vmem:[%s8944_s1 + $0x1570] sm:$0xff]  ;;  %v3627_v22 = vld [vmem:[%s8944_s1 + $0x15b8] sm:$0xff]  ;;  %v3677_v46 = vld [vmem:[%s8944_s1 + $0x1748] sm:$0xff] }
 0x14b   : > { %4807 = vmatpush1.bf16.msra.mxu1 %v4806_v23  ;;  %4745 = vmatprep.subr.bf16.mxu0 %v4744_v24  ;;  %v4762_v23 = vpack.c.bf16 %v3616_v15, %v3612_v14  ;;  %v4826_v24 = vpack.c.bf16 %v3618_v18, %v3614_v16  ;;  %v4828_v28 = vpack.c.bf16 %v3627_v22, %v3623_v21  ;;  %v3652_v15 = vld [vmem:[%s8944_s1 + $0x1680] sm:$0xff]  ;;  %v3665_v21 = vld [vmem:[%s8944_s1 + $0x16e8] sm:$0xff]  ;;  %v3663_v22 = vld [vmem:[%s8944_s1 + $0x16d8] sm:$0xff] }
 0x14c   : > { %4809 = vmatprep.subr.bf16.mxu1 %v4808_v27  ;;  %3700 = vmatprep.mubr.msk.f32.mxu0 %vm6206_vm1, %v7388_v31  ;;  %v3622_v27 = vld [vmem:[%s8944_s1 + $0x1590] sm:$0xff]  ;;  %v4780_v14 = vpack.c.bf16 %v3657_v9, %v3653_v8  ;;  %v3656_v16 = vld [vmem:[%s8944_s1 + $0x16a0] sm:$0xff]  ;;  %v3685_v60 = vld [vmem:[%s8944_s1 + $0x1788] sm:$0xff] }
 0x14d   : > { %3702 = vmatprep.mubr.msk.f32.mxu1 %vm6206_vm1, %v7388_v31  ;;  %v3690_v8 = vld [vmem:[%s8944_s1 + $0x17b0] sm:$0xff]  ;;  %v3693_v9 = vld [vmem:[%s8944_s1 + $0x17c8] sm:$0xff] }
 0x14e   : > { %4747 = vmatpush1.bf16.msra.mxu0 %v4746_v34  ;;  %v3635_v34 = vld [vmem:[%s8944_s1 + $0x15f8] sm:$0xff] }
 0x14f   : > { %4811 = vmatpush1.bf16.msra.mxu1 %v4810_v35  ;;  %4749 = vmatprep.subr.bf16.mxu0 %v4748_v36  ;;  %v4766_v35 = vpack.c.bf16 %v3624_v26, %v3620_v25  ;;  %v4830_v36 = vpack.c.bf16 %v3626_v29, %v3622_v27  ;;  %v4832_v41 = vpack.c.bf16 %v3635_v34, %v3631_v33  ;;  %v3660_v26 = vld [vmem:[%s8944_s1 + $0x16c0] sm:$0xff]  ;;  %v3673_v33 = vld [vmem:[%s8944_s1 + $0x1728] sm:$0xff]  ;;  %v3671_v34 = vld [vmem:[%s8944_s1 + $0x1718] sm:$0xff] }
 0x150   : > { %4813 = vmatprep.subr.bf16.mxu1 %v4812_v40  ;;  %v3630_v40 = vld [vmem:[%s8944_s1 + $0x15d0] sm:$0xff]  ;;  %v4784_v25 = vpack.c.bf16 %v3665_v21, %v3661_v44  ;;  %v3664_v27 = vld [vmem:[%s8944_s1 + $0x16e0] sm:$0xff]  ;;  %v3705_v21 = vld [vmem:[%s8944_s1 + $0x1808] sm:$0xff] }
 0x151   : > { %v3698_v44 = vld [vmem:[%s8944_s1 + $0x17f0] sm:$0xff] }
 0x152   : > { %4751 = vmatpush1.bf16.msra.mxu0 %v4750_v49  ;;  %v3643_v49 = vld [vmem:[%s8944_s1 + $0x1638] sm:$0xff] }
 0x153   : > { %4815 = vmatpush1.bf16.msra.mxu1 %v4814_v51  ;;  %4753 = vmatprep.subr.bf16.mxu0 %v4752_v5  ;;  %v4770_v51 = vpack.c.bf16 %v3632_v39, %v3628_v38  ;;  %v4834_v5 = vpack.c.bf16 %v3634_v42, %v3630_v40  ;;  %v4836_v57 = vpack.c.bf16 %v3643_v49, %v3639_v48  ;;  %v3668_v39 = vld [vmem:[%s8944_s1 + $0x1700] sm:$0xff]  ;;  %v3681_v48 = vld [vmem:[%s8944_s1 + $0x1768] sm:$0xff]  ;;  %v3679_v49 = vld [vmem:[%s8944_s1 + $0x1758] sm:$0xff] }
 0x154   : > { %4817 = vmatprep.subr.bf16.mxu1 %v4816_v55  ;;  %v3638_v55 = vld [vmem:[%s8944_s1 + $0x1610] sm:$0xff]  ;;  %v4788_v38 = vpack.c.bf16 %v3673_v33, %v3669_v32  ;;  %v3672_v40 = vld [vmem:[%s8944_s1 + $0x1720] sm:$0xff] }
 0x155   : > { %v3710_v33 = vld [vmem:[%s8944_s1 + $0x1830] sm:$0xff] }
 0x156   : > { %4755 = vmatpush1.bf16.msra.mxu0 %v4754_v62  ;;  %v3651_v62 = vld [vmem:[%s8944_s1 + $0x1678] sm:$0xff] }
 0x157   : > { %4819 = vmatpush1.bf16.msra.mxu1 %v4818_v63  ;;  %4757 = vmatprep.subr.bf16.mxu0 %v4756_v0  ;;  %v4774_v63 = vpack.c.bf16 %v3640_v54, %v3636_v53  ;;  %v4838_v0 = vpack.c.bf16 %v3642_v58, %v3638_v55  ;;  %v4840_v6 = vpack.c.bf16 %v3651_v62, %v3647_v61  ;;  %v3676_v54 = vld [vmem:[%s8944_s1 + $0x1740] sm:$0xff]  ;;  %v3689_v61 = vld [vmem:[%s8944_s1 + $0x17a8] sm:$0xff]  ;;  %v3687_v62 = vld [vmem:[%s8944_s1 + $0x1798] sm:$0xff] }
 0x158   : > { %4821 = vmatprep.subr.bf16.mxu1 %v4820_v4  ;;  %v3646_v4 = vld [vmem:[%s8944_s1 + $0x1650] sm:$0xff]  ;;  %v4792_v53 = vpack.c.bf16 %v3681_v48, %v3677_v46  ;;  %v3680_v55 = vld [vmem:[%s8944_s1 + $0x1760] sm:$0xff] }
 0x159   : > { %v3714_v46 = vld [vmem:[%s8944_s1 + $0x1850] sm:$0xff] }
 0x15a   : > { %4759 = vmatpush1.bf16.msra.mxu0 %v4758_v11  ;;  %v3659_v11 = vld [vmem:[%s8944_s1 + $0x16b8] sm:$0xff] }
 0x15b   : > { %4823 = vmatpush1.bf16.msra.mxu1 %v4822_v12  ;;  %4761 = vmatprep.subr.bf16.mxu0 %v4760_v13  ;;  %v4778_v12 = vpack.c.bf16 %v3648_v3, %v3644_v2  ;;  %v4842_v13 = vpack.c.bf16 %v3650_v7, %v3646_v4  ;;  %v4844_v18 = vpack.c.bf16 %v3659_v11, %v3655_v10  ;;  %v3684_v3 = vld [vmem:[%s8944_s1 + $0x1780] sm:$0xff]  ;;  %v3697_v10 = vld [vmem:[%s8944_s1 + $0x17e8] sm:$0xff]  ;;  %v3695_v11 = vld [vmem:[%s8944_s1 + $0x17d8] sm:$0xff] }
 0x15c   : > { %4825 = vmatprep.subr.bf16.mxu1 %v4824_v17  ;;  %v3654_v17 = vld [vmem:[%s8944_s1 + $0x1690] sm:$0xff]  ;;  %v4796_v2 = vpack.c.bf16 %v3689_v61, %v3685_v60  ;;  %v3688_v4 = vld [vmem:[%s8944_s1 + $0x17a0] sm:$0xff] }
 0x15d   : > { %v3722_v60 = vld [vmem:[%s8944_s1 + $0x1890] sm:$0xff] }
 0x15e   : > { %4763 = vmatpush1.bf16.msra.mxu0 %v4762_v23  ;;  %v3667_v23 = vld [vmem:[%s8944_s1 + $0x16f8] sm:$0xff] }
 0x15f   : > { %4827 = vmatpush1.bf16.msra.mxu1 %v4826_v24  ;;  %4765 = vmatprep.subr.bf16.mxu0 %v4764_v50  ;;  %v4782_v24 = vpack.c.bf16 %v3656_v16, %v3652_v15  ;;  %v4846_v50 = vpack.c.bf16 %v3658_v20, %v3654_v17  ;;  %v4848_v29 = vpack.c.bf16 %v3667_v23, %v3663_v22  ;;  %v3692_v16 = vld [vmem:[%s8944_s1 + $0x17c0] sm:$0xff]  ;;  %v3709_v22 = vld [vmem:[%s8944_s1 + $0x1828] sm:$0xff]  ;;  %v3707_v23 = vld [vmem:[%s8944_s1 + $0x1818] sm:$0xff] }
 0x160   : > { %4829 = vmatprep.subr.bf16.mxu1 %v4828_v28  ;;  %v3662_v28 = vld [vmem:[%s8944_s1 + $0x16d0] sm:$0xff]  ;;  %v4800_v15 = vpack.c.bf16 %v3697_v10, %v3693_v9  ;;  %v3696_v17 = vld [vmem:[%s8944_s1 + $0x17e0] sm:$0xff] }
 0x161   : > { %v3730_v9 = vld [vmem:[%s8944_s1 + $0x18d0] sm:$0xff] }
 0x162   : > { %4767 = vmatpush1.bf16.msra.mxu0 %v4766_v35  ;;  %v3675_v35 = vld [vmem:[%s8944_s1 + $0x1738] sm:$0xff]  ;;  %v3734_v10 = vld [vmem:[%s8944_s1 + $0x18f0] sm:$0xff] }
 0x163   : > { %4831 = vmatpush1.bf16.msra.mxu1 %v4830_v36  ;;  %4769 = vmatprep.subr.bf16.mxu0 %v4768_v37  ;;  %v4786_v36 = vpack.c.bf16 %v3664_v27, %v3660_v26  ;;  %v4850_v37 = vpack.c.bf16 %v3666_v30, %v3662_v28  ;;  %v4852_v42 = vpack.c.bf16 %v3675_v35, %v3671_v34  ;;  %v3704_v28 = vld [vmem:[%s8944_s1 + $0x1800] sm:$0xff]  ;;  %v3706_v30 = vld [vmem:[%s8944_s1 + $0x1810] sm:$0xff]  ;;  %v3713_v34 = vld [vmem:[%s8944_s1 + $0x1848] sm:$0xff] }
 0x164   : > { %4833 = vmatprep.subr.bf16.mxu1 %v4832_v41  ;;  %v3670_v41 = vld [vmem:[%s8944_s1 + $0x1710] sm:$0xff]  ;;  %v4868_v27 = vpack.c.bf16 %v3709_v22, %v3705_v21  ;;  %v3717_v35 = vld [vmem:[%s8944_s1 + $0x1868] sm:$0xff] }
 0x165   : > { %v3742_v22 = vld [vmem:[%s8944_s1 + $0x1930] sm:$0xff] }
 0x166   : > { %4771 = vmatpush1.bf16.msra.mxu0 %v4770_v51  ;;  %v3683_v51 = vld [vmem:[%s8944_s1 + $0x1778] sm:$0xff] }
 0x167   : > { %4835 = vmatpush1.bf16.msra.mxu1 %v4834_v5  ;;  %4773 = vmatprep.subr.bf16.mxu0 %v4772_v52  ;;  %v4790_v5 = vpack.c.bf16 %v3672_v40, %v3668_v39  ;;  %v4854_v52 = vpack.c.bf16 %v3674_v45, %v3670_v41  ;;  %v4856_v58 = vpack.c.bf16 %v3683_v51, %v3679_v49  ;;  %v3716_v45 = vld [vmem:[%s8944_s1 + $0x1860] sm:$0xff]  ;;  %v3718_v49 = vld [vmem:[%s8944_s1 + $0x1870] sm:$0xff]  ;;  %v3721_v51 = vld [vmem:[%s8944_s1 + $0x1888] sm:$0xff] }
 0x168   : > { %4837 = vmatprep.subr.bf16.mxu1 %v4836_v57  ;;  %v3678_v57 = vld [vmem:[%s8944_s1 + $0x1750] sm:$0xff]  ;;  %v4934_v40 = vpack.c.bf16 %v3710_v33, %v3706_v30  ;;  %v4872_v41 = vpack.c.bf16 %v3717_v35, %v3713_v34  ;;  %v3748_v30 = vld [vmem:[%s8944_s1 + $0x1960] sm:$0xff]  ;;  %v3753_v35 = vld [vmem:[%s8944_s1 + $0x1988] sm:$0xff] }
 0x169   : > { %v3750_v34 = vld [vmem:[%s8944_s1 + $0x1970] sm:$0xff] }
 0x16a   : > { %4775 = vmatpush1.bf16.msra.mxu0 %v4774_v63  ;;  %v3691_v63 = vld [vmem:[%s8944_s1 + $0x17b8] sm:$0xff] }
 0x16b   : > { %4839 = vmatpush1.bf16.msra.mxu1 %v4838_v0  ;;  %4777 = vmatprep.subr.bf16.mxu0 %v4776_v1  ;;  %v4794_v0 = vpack.c.bf16 %v3680_v55, %v3676_v54  ;;  %v4858_v1 = vpack.c.bf16 %v3682_v59, %v3678_v57  ;;  %v4860_v7 = vpack.c.bf16 %v3691_v63, %v3687_v62  ;;  %v3724_v59 = vld [vmem:[%s8944_s1 + $0x18a0] sm:$0xff]  ;;  %v3726_v62 = vld [vmem:[%s8944_s1 + $0x18b0] sm:$0xff]  ;;  %v3729_v63 = vld [vmem:[%s8944_s1 + $0x18c8] sm:$0xff] }
 0x16c   : > { %4841 = vmatprep.subr.bf16.mxu1 %v4840_v6  ;;  %v3686_v6 = vld [vmem:[%s8944_s1 + $0x1790] sm:$0xff]  ;;  %v4938_v55 = vpack.c.bf16 %v3718_v49, %v3714_v46  ;;  %v3756_v46 = vld [vmem:[%s8944_s1 + $0x19a0] sm:$0xff] }
 0x16e   : > { %4779 = vmatpush1.bf16.msra.mxu0 %v4778_v12  ;;  %v3699_v12 = vld [vmem:[%s8944_s1 + $0x17f8] sm:$0xff] }
 0x16f   : > { %4843 = vmatpush1.bf16.msra.mxu1 %v4842_v13  ;;  %4781 = vmatprep.subr.bf16.mxu0 %v4780_v14  ;;  %v4798_v13 = vpack.c.bf16 %v3688_v4, %v3684_v3  ;;  %v4862_v14 = vpack.c.bf16 %v3690_v8, %v3686_v6  ;;  %v4864_v20 = vpack.c.bf16 %v3699_v12, %v3695_v11  ;;  %v3732_v8 = vld [vmem:[%s8944_s1 + $0x18e0] sm:$0xff]  ;;  %v3737_v11 = vld [vmem:[%s8944_s1 + $0x1908] sm:$0xff] }
 0x170   : > { %4845 = vmatprep.subr.bf16.mxu1 %v4844_v18  ;;  %v3694_v18 = vld [vmem:[%s8944_s1 + $0x17d0] sm:$0xff]  ;;  %v4942_v4 = vpack.c.bf16 %v3726_v62, %v3722_v60  ;;  %v3741_v12 = vld [vmem:[%s8944_s1 + $0x1928] sm:$0xff]  ;;  %v3764_v60 = vld [vmem:[%s8944_s1 + $0x19e0] sm:$0xff] }
 0x171   : > { %v4866_v26 = vpack.c.bf16 %v3698_v44, %v3694_v18  ;;  %v3736_v18 = vld [vmem:[%s8944_s1 + $0x1900] sm:$0xff]  ;;  %v3738_v44 = vld [vmem:[%s8944_s1 + $0x1910] sm:$0xff] }
 0x172   : > { %4783 = vmatpush1.bf16.msra.mxu0 %v4782_v24  ;;  %v3711_v24 = vld [vmem:[%s8944_s1 + $0x1838] sm:$0xff] }
 0x173   : > { %4847 = vmatpush1.bf16.msra.mxu1 %v4846_v50  ;;  %4785 = vmatprep.subr.bf16.mxu0 %v4784_v25  ;;  %v4802_v50 = vpack.c.bf16 %v3696_v17, %v3692_v16  ;;  %v1637_v25 = vld [vmem:[%s5627_s11] sm:$0xf0]  ;;  %v4932_v32 = vpack.c.bf16 %v3711_v24, %v3707_v23  ;;  %v4946_v16 = vpack.c.bf16 %v3734_v10, %v3730_v9  ;;  %v3745_v23 = vld [vmem:[%s8944_s1 + $0x1948] sm:$0xff] }
 0x174   : > { %4849 = vmatprep.subr.bf16.mxu1 %v4848_v29  ;;  %v3708_v29 = vld [vmem:[%s8944_s1 + $0x1820] sm:$0xff]  ;;  %v4884_v17 = vpack.c.bf16 %v3741_v12, %v3737_v11  ;;  %v3749_v24 = vld [vmem:[%s8944_s1 + $0x1968] sm:$0xff]  ;;  %v3774_v11 = vld [vmem:[%s8944_s1 + $0x1a30] sm:$0xff] }
 0x175   : > { %v4870_v39 = vpack.c.bf16 %v3708_v29, %v3704_v28  ;;  %v4888_v28 = vpack.c.bf16 %v3749_v24, %v3745_v23  ;;  %v3744_v29 = vld [vmem:[%s8944_s1 + $0x1940] sm:$0xff]  ;;  %v3777_v12 = vld [vmem:[%s8944_s1 + $0x1a48] sm:$0xff]  ;;  %v3782_v23 = vld [vmem:[%s8944_s1 + $0x1a70] sm:$0xff] }
 0x176   : > { %4787 = vmatpush1.bf16.msra.mxu0 %v4786_v36  ;;  %v7757_v36 = vrot.slane %v1637_v25, 4  ;;  %v3751_v25 = vld [vmem:[%s8944_s1 + $0x1978] sm:$0xff]  ;;  %v3772_v9 = vld [vmem:[%s8944_s1 + $0x1a20] sm:$0xff]  ;;  %v3785_v24 = vld [vmem:[%s8944_s1 + $0x1a88] sm:$0xff] }
 0x177   : > { %4851 = vmatpush1.bf16.msra.mxu1 %v4850_v37  ;;  %4789 = vmatprep.subr.bf16.mxu0 %v4788_v38  ;;  %v3715_v37 = vld [vmem:[%s8944_s1 + $0x1858] sm:$0xff] }
 0x178   : > { %4853 = vmatprep.subr.bf16.mxu1 %v4852_v42  ;;  %v3719_v38 = vld [vmem:[%s8944_s1 + $0x1878] sm:$0xff]  ;;  %v3712_v42 = vld [vmem:[%s8944_s1 + $0x1840] sm:$0xff] }
 0x179   : > { %v4936_v48 = vpack.c.bf16 %v3719_v38, %v3715_v37  ;;  %v4874_v54 = vpack.c.bf16 %v3716_v45, %v3712_v42  ;;  %v3757_v37 = vld [vmem:[%s8944_s1 + $0x19a8] sm:$0xff]  ;;  %v3755_v38 = vld [vmem:[%s8944_s1 + $0x1998] sm:$0xff]  ;;  %v3752_v45 = vld [vmem:[%s8944_s1 + $0x1980] sm:$0xff] }
 0x17a   : > { %4791 = vmatpush1.bf16.msra.mxu0 %v4790_v5  ;;  %v3725_v5 = vld [vmem:[%s8944_s1 + $0x18a8] sm:$0xff]  ;;  %v4892_v42 = vpack.c.bf16 %v3757_v37, %v3753_v35  ;;  %v3790_v35 = vld [vmem:[%s8944_s1 + $0x1ab0] sm:$0xff] }
 0x17b   : > { %4855 = vmatpush1.bf16.msra.mxu1 %v4854_v52  ;;  %4793 = vmatprep.subr.bf16.mxu0 %v4792_v53  ;;  %v3723_v52 = vld [vmem:[%s8944_s1 + $0x1898] sm:$0xff]  ;;  %v4876_v57 = vpack.c.bf16 %v3725_v5, %v3721_v51  ;;  %v3758_v51 = vld [vmem:[%s8944_s1 + $0x19b0] sm:$0xff]  ;;  %v3761_v5 = vld [vmem:[%s8944_s1 + $0x19c8] sm:$0xff] }
 0x17c   : > { %4857 = vmatprep.subr.bf16.mxu1 %v4856_v58  ;;  %v3727_v53 = vld [vmem:[%s8944_s1 + $0x18b8] sm:$0xff]  ;;  %v3720_v58 = vld [vmem:[%s8944_s1 + $0x1880] sm:$0xff]  ;;  %v3793_v37 = vld [vmem:[%s8944_s1 + $0x1ac8] sm:$0xff] }
 0x17d   : > { %v4940_v61 = vpack.c.bf16 %v3727_v53, %v3723_v52  ;;  %v4878_v3 = vpack.c.bf16 %v3724_v59, %v3720_v58  ;;  %v3765_v52 = vld [vmem:[%s8944_s1 + $0x19e8] sm:$0xff]  ;;  %v3763_v53 = vld [vmem:[%s8944_s1 + $0x19d8] sm:$0xff]  ;;  %v3760_v59 = vld [vmem:[%s8944_s1 + $0x19c0] sm:$0xff] }
 0x17e   : > { %4795 = vmatpush1.bf16.msra.mxu0 %v4794_v0  ;;  %v3733_v0 = vld [vmem:[%s8944_s1 + $0x18e8] sm:$0xff]  ;;  %v4896_v58 = vpack.c.bf16 %v3765_v52, %v3761_v5  ;;  %v3798_v5 = vld [vmem:[%s8944_s1 + $0x1af0] sm:$0xff] }
 0x17f   : > { %4859 = vmatpush1.bf16.msra.mxu1 %v4858_v1  ;;  %4797 = vmatprep.subr.bf16.mxu0 %v4796_v2  ;;  %v3731_v1 = vld [vmem:[%s8944_s1 + $0x18d8] sm:$0xff]  ;;  %v4880_v6 = vpack.c.bf16 %v3733_v0, %v3729_v63  ;;  %v3766_v63 = vld [vmem:[%s8944_s1 + $0x19f0] sm:$0xff]  ;;  %v3769_v0 = vld [vmem:[%s8944_s1 + $0x1a08] sm:$0xff] }
 0x180   : > { %4861 = vmatprep.subr.bf16.mxu1 %v4860_v7  ;;  %v3735_v2 = vld [vmem:[%s8944_s1 + $0x18f8] sm:$0xff]  ;;  %v3728_v7 = vld [vmem:[%s8944_s1 + $0x18c0] sm:$0xff]  ;;  %v3801_v52 = vld [vmem:[%s8944_s1 + $0x1b08] sm:$0xff] }
 0x182   : > { %4799 = vmatpush1.bf16.msra.mxu0 %v4798_v13  ;;  %v3739_v13 = vld [vmem:[%s8944_s1 + $0x1918] sm:$0xff] }
 0x183   : > { %4863 = vmatpush1.bf16.msra.mxu1 %v4862_v14  ;;  %4801 = vmatprep.subr.bf16.mxu0 %v4800_v15  ;;  %v3743_v14 = vld [vmem:[%s8944_s1 + $0x1938] sm:$0xff]  ;;  %v4882_v15 = vpack.c.bf16 %v3732_v8, %v3728_v7  ;;  %v3768_v8 = vld [vmem:[%s8944_s1 + $0x1a00] sm:$0xff] }
 0x184   : > { %4865 = vmatprep.subr.bf16.mxu1 %v4864_v20  ;;  %v3740_v20 = vld [vmem:[%s8944_s1 + $0x1920] sm:$0xff]  ;;  %v4948_v21 = vpack.c.bf16 %v3743_v14, %v3739_v13  ;;  %v3781_v13 = vld [vmem:[%s8944_s1 + $0x1a68] sm:$0xff]  ;;  %v3779_v14 = vld [vmem:[%s8944_s1 + $0x1a58] sm:$0xff] }
 0x186   : > { %4803 = vmatpush1.bf16.msra.mxu0 %v4802_v50  ;;  %v3747_v50 = vld [vmem:[%s8944_s1 + $0x1958] sm:$0xff] }
 0x187   : > { %4867 = vmatpush1.bf16.msra.mxu1 %v4866_v26  ;;  %4869 = vmatprep.subr.bf16.mxu0 %v4868_v27  ;;  %v4886_v26 = vpack.c.bf16 %v3740_v20, %v3736_v18  ;;  %v4950_v27 = vpack.c.bf16 %v3742_v22, %v3738_v44  ;;  %v4952_v33 = vpack.c.bf16 %v3751_v25, %v3747_v50  ;;  %v3776_v20 = vld [vmem:[%s8944_s1 + $0x1a40] sm:$0xff]  ;;  %v3789_v50 = vld [vmem:[%s8944_s1 + $0x1aa8] sm:$0xff]  ;;  %v3787_v25 = vld [vmem:[%s8944_s1 + $0x1a98] sm:$0xff] }
 0x188   : > { %4933 = vmatprep.subr.bf16.mxu1 %v4932_v32  ;;  %v3746_v32 = vld [vmem:[%s8944_s1 + $0x1950] sm:$0xff]  ;;  %v4904_v18 = vpack.c.bf16 %v3781_v13, %v3777_v12  ;;  %v3780_v44 = vld [vmem:[%s8944_s1 + $0x1a60] sm:$0xff]  ;;  %v3817_v13 = vld [vmem:[%s8944_s1 + $0x1b88] sm:$0xff] }
 0x189   : > { %3701 = vmatmul.mubr.msk.f32.vlgmr.msra.gmra.mrb[0].mxu0 %vm6206_vm1, %v7757_v36  ;;  %v3814_v12 = vld [vmem:[%s8944_s1 + $0x1b70] sm:$0xff] }
 0x18a   : > { %3703 = vmatmul.mubr.msk.f32.vlgmr.msra.gmra.mrb[0].mxu1 %vm6206_vm1, %v7757_v36  ;;  %4871 = vmatpush1.bf16.msra.mxu0 %v4870_v39  ;;  %v3759_v39 = vld [vmem:[%s8944_s1 + $0x19b8] sm:$0xff] }
 0x18b   : > { %4935 = vmatpush1.bf16.msra.mxu1 %v4934_v40  ;;  %4873 = vmatprep.subr.bf16.mxu0 %v4872_v41  ;;  %v4890_v40 = vpack.c.bf16 %v3748_v30, %v3744_v29  ;;  %v4954_v41 = vpack.c.bf16 %v3750_v34, %v3746_v32  ;;  %v4956_v49 = vpack.c.bf16 %v3759_v39, %v3755_v38  ;;  %v3784_v30 = vld [vmem:[%s8944_s1 + $0x1a80] sm:$0xff]  ;;  %v3797_v38 = vld [vmem:[%s8944_s1 + $0x1ae8] sm:$0xff]  ;;  %v3795_v39 = vld [vmem:[%s8944_s1 + $0x1ad8] sm:$0xff] }
 0x18c   : > { %4937 = vmatprep.subr.bf16.mxu1 %v4936_v48  ;;  %3832 = vmatprep.mubr.msk.f32.mxu0 %vm5904_vm0, %v7388_v31  ;;  %v3754_v48 = vld [vmem:[%s8944_s1 + $0x1990] sm:$0xff]  ;;  %v4908_v29 = vpack.c.bf16 %v3789_v50, %v3785_v24  ;;  %v3788_v32 = vld [vmem:[%s8944_s1 + $0x1aa0] sm:$0xff]  ;;  %v3825_v50 = vld [vmem:[%s8944_s1 + $0x1bc8] sm:$0xff] }
 0x18d   : > { %3834 = vmatprep.mubr.msk.f32.mxu1 %vm5904_vm0, %v7388_v31  ;;  %v4944_v31 = vpack.c.bf16 %v3735_v2, %v3731_v1  ;;  %v3773_v1 = vld [vmem:[%s8944_s1 + $0x1a28] sm:$0xff]  ;;  %v3771_v2 = vld [vmem:[%s8944_s1 + $0x1a18] sm:$0xff]  ;;  %v3822_v24 = vld [vmem:[%s8944_s1 + $0x1bb0] sm:$0xff] }
 0x18e   : > { %4875 = vmatpush1.bf16.msra.mxu0 %v4874_v54  ;;  %v3767_v54 = vld [vmem:[%s8944_s1 + $0x19f8] sm:$0xff]  ;;  %v4900_v7 = vpack.c.bf16 %v3773_v1, %v3769_v0  ;;  %v3806_v0 = vld [vmem:[%s8944_s1 + $0x1b30] sm:$0xff]  ;;  %v3809_v1 = vld [vmem:[%s8944_s1 + $0x1b48] sm:$0xff] }
 0x18f   : > { %4939 = vmatpush1.bf16.msra.mxu1 %v4938_v55  ;;  %4877 = vmatprep.subr.bf16.mxu0 %v4876_v57  ;;  %v4894_v55 = vpack.c.bf16 %v3756_v46, %v3752_v45  ;;  %v4958_v57 = vpack.c.bf16 %v3758_v51, %v3754_v48  ;;  %v4960_v62 = vpack.c.bf16 %v3767_v54, %v3763_v53  ;;  %v3792_v46 = vld [vmem:[%s8944_s1 + $0x1ac0] sm:$0xff]  ;;  %v3805_v53 = vld [vmem:[%s8944_s1 + $0x1b28] sm:$0xff]  ;;  %v3803_v54 = vld [vmem:[%s8944_s1 + $0x1b18] sm:$0xff] }
 0x190   : > { %4941 = vmatprep.subr.bf16.mxu1 %v4940_v61  ;;  %v3762_v61 = vld [vmem:[%s8944_s1 + $0x19d0] sm:$0xff]  ;;  %v4912_v45 = vpack.c.bf16 %v3797_v38, %v3793_v37  ;;  %v3796_v48 = vld [vmem:[%s8944_s1 + $0x1ae0] sm:$0xff]  ;;  %v3837_v38 = vld [vmem:[%s8944_s1 + $0x1c08] sm:$0xff] }
 0x191   : > { %v3830_v37 = vld [vmem:[%s8944_s1 + $0x1bf0] sm:$0xff] }
 0x192   : > { %4879 = vmatpush1.bf16.msra.mxu0 %v4878_v3  ;;  %v3775_v3 = vld [vmem:[%s8944_s1 + $0x1a38] sm:$0xff] }
 0x193   : > { %4943 = vmatpush1.bf16.msra.mxu1 %v4942_v4  ;;  %4881 = vmatprep.subr.bf16.mxu0 %v4880_v6  ;;  %v4898_v4 = vpack.c.bf16 %v3764_v60, %v3760_v59  ;;  %v4962_v6 = vpack.c.bf16 %v3766_v63, %v3762_v61  ;;  %v4964_v10 = vpack.c.bf16 %v3775_v3, %v3771_v2  ;;  %v3800_v60 = vld [vmem:[%s8944_s1 + $0x1b00] sm:$0xff]  ;;  %v3813_v2 = vld [vmem:[%s8944_s1 + $0x1b68] sm:$0xff]  ;;  %v3811_v3 = vld [vmem:[%s8944_s1 + $0x1b58] sm:$0xff] }
 0x194   : > { %4945 = vmatprep.subr.bf16.mxu1 %v4944_v31  ;;  %v3770_v31 = vld [vmem:[%s8944_s1 + $0x1a10] sm:$0xff]  ;;  %v4916_v59 = vpack.c.bf16 %v3805_v53, %v3801_v52  ;;  %v3804_v61 = vld [vmem:[%s8944_s1 + $0x1b20] sm:$0xff] }
 0x195   : > { %v3838_v52 = vld [vmem:[%s8944_s1 + $0x1c10] sm:$0xff] }
 0x196   : > { %4883 = vmatpush1.bf16.msra.mxu0 %v4882_v15  ;;  %v3783_v15 = vld [vmem:[%s8944_s1 + $0x1a78] sm:$0xff] }
 0x197   : > { %4947 = vmatpush1.bf16.msra.mxu1 %v4946_v16  ;;  %4885 = vmatprep.subr.bf16.mxu0 %v4884_v17  ;;  %v4902_v16 = vpack.c.bf16 %v3772_v9, %v3768_v8  ;;  %v4966_v17 = vpack.c.bf16 %v3774_v11, %v3770_v31  ;;  %v4968_v22 = vpack.c.bf16 %v3783_v15, %v3779_v14  ;;  %v3808_v9 = vld [vmem:[%s8944_s1 + $0x1b40] sm:$0xff]  ;;  %v3821_v14 = vld [vmem:[%s8944_s1 + $0x1ba8] sm:$0xff]  ;;  %v3819_v15 = vld [vmem:[%s8944_s1 + $0x1b98] sm:$0xff] }
 0x198   : > { %4949 = vmatprep.subr.bf16.mxu1 %v4948_v21  ;;  %v3778_v21 = vld [vmem:[%s8944_s1 + $0x1a50] sm:$0xff]  ;;  %v4920_v8 = vpack.c.bf16 %v3813_v2, %v3809_v1  ;;  %v3812_v31 = vld [vmem:[%s8944_s1 + $0x1b60] sm:$0xff] }
 0x199   : > { %v3844_v1 = vld [vmem:[%s8944_s1 + $0x1c40] sm:$0xff] }
 0x19a   : > { %4887 = vmatpush1.bf16.msra.mxu0 %v4886_v26  ;;  %v3791_v26 = vld [vmem:[%s8944_s1 + $0x1ab8] sm:$0xff]  ;;  %v3848_v2 = vld [vmem:[%s8944_s1 + $0x1c60] sm:$0xff] }
 0x19b   : > { %4951 = vmatpush1.bf16.msra.mxu1 %v4950_v27  ;;  %4889 = vmatprep.subr.bf16.mxu0 %v4888_v28  ;;  %v4906_v27 = vpack.c.bf16 %v3780_v44, %v3776_v20  ;;  %v4970_v28 = vpack.c.bf16 %v3782_v23, %v3778_v21  ;;  %v4972_v34 = vpack.c.bf16 %v3791_v26, %v3787_v25  ;;  %v3816_v44 = vld [vmem:[%s8944_s1 + $0x1b80] sm:$0xff]  ;;  %v3829_v25 = vld [vmem:[%s8944_s1 + $0x1be8] sm:$0xff]  ;;  %v3827_v26 = vld [vmem:[%s8944_s1 + $0x1bd8] sm:$0xff] }
 0x19c   : > { %4953 = vmatprep.subr.bf16.mxu1 %v4952_v33  ;;  %v3786_v33 = vld [vmem:[%s8944_s1 + $0x1a90] sm:$0xff]  ;;  %v4924_v20 = vpack.c.bf16 %v3821_v14, %v3817_v13  ;;  %v3820_v21 = vld [vmem:[%s8944_s1 + $0x1ba0] sm:$0xff] }
 0x19d   : > { %v3852_v14 = vld [vmem:[%s8944_s1 + $0x1c80] sm:$0xff] }
 0x19e   : > { %4891 = vmatpush1.bf16.msra.mxu0 %v4890_v40  ;;  %v3799_v40 = vld [vmem:[%s8944_s1 + $0x1af8] sm:$0xff] }
 0x19f   : > { %4955 = vmatpush1.bf16.msra.mxu1 %v4954_v41  ;;  %4893 = vmatprep.subr.bf16.mxu0 %v4892_v42  ;;  %v4910_v41 = vpack.c.bf16 %v3788_v32, %v3784_v30  ;;  %v4974_v42 = vpack.c.bf16 %v3790_v35, %v3786_v33  ;;  %v4976_v51 = vpack.c.bf16 %v3799_v40, %v3795_v39  ;;  %v3824_v32 = vld [vmem:[%s8944_s1 + $0x1bc0] sm:$0xff]  ;;  %v3841_v39 = vld [vmem:[%s8944_s1 + $0x1c28] sm:$0xff]  ;;  %v3839_v40 = vld [vmem:[%s8944_s1 + $0x1c18] sm:$0xff] }
 0x1a0   : > { %4957 = vmatprep.subr.bf16.mxu1 %v4956_v49  ;;  %v3794_v49 = vld [vmem:[%s8944_s1 + $0x1ad0] sm:$0xff]  ;;  %v4928_v30 = vpack.c.bf16 %v3829_v25, %v3825_v50  ;;  %v3828_v33 = vld [vmem:[%s8944_s1 + $0x1be0] sm:$0xff] }
 0x1a1   : > { %v3864_v50 = vld [vmem:[%s8944_s1 + $0x1ce0] sm:$0xff]  ;;  %v3862_v25 = vld [vmem:[%s8944_s1 + $0x1cd0] sm:$0xff] }
 0x1a2   : > { %4895 = vmatpush1.bf16.msra.mxu0 %v4894_v55  ;;  %v3807_v55 = vld [vmem:[%s8944_s1 + $0x1b38] sm:$0xff] }
 0x1a3   : > { %4959 = vmatpush1.bf16.msra.mxu1 %v4958_v57  ;;  %4897 = vmatprep.subr.bf16.mxu0 %v4896_v58  ;;  %v4914_v57 = vpack.c.bf16 %v3796_v48, %v3792_v46  ;;  %v4978_v58 = vpack.c.bf16 %v3798_v5, %v3794_v49  ;;  %v4980_v63 = vpack.c.bf16 %v3807_v55, %v3803_v54  ;;  %v2202_v46 = vld [vmem:[%s5627_s11 + $0x18] sm:$0x1]  ;;  %v3840_v5 = vld [vmem:[%s8944_s1 + $0x1c20] sm:$0xff]  ;;  %v3842_v54 = vld [vmem:[%s8944_s1 + $0x1c30] sm:$0xff] }
 0x1a4   : > { %4961 = vmatprep.subr.bf16.mxu1 %v4960_v62  ;;  %v3802_v62 = vld [vmem:[%s8944_s1 + $0x1b10] sm:$0xff]  ;;  %v4996_v49 = vpack.c.bf16 %v3841_v39, %v3837_v38  ;;  %v3845_v55 = vld [vmem:[%s8944_s1 + $0x1c48] sm:$0xff]  ;;  %v3872_v38 = vld [vmem:[%s8944_s1 + $0x1d20] sm:$0xff] }
 0x1a5   : > { %v3870_v39 = vld [vmem:[%s8944_s1 + $0x1d10] sm:$0xff] }
 0x1a6   : > { %4899 = vmatpush1.bf16.msra.mxu0 %v4898_v4  ;;  %v3815_v4 = vld [vmem:[%s8944_s1 + $0x1b78] sm:$0xff] }
 0x1a7   : > { %4963 = vmatpush1.bf16.msra.mxu1 %v4962_v6  ;;  %4901 = vmatprep.subr.bf16.mxu0 %v4900_v7  ;;  %v4918_v6 = vpack.c.bf16 %v3804_v61, %v3800_v60  ;;  %v4982_v7 = vpack.c.bf16 %v3806_v0, %v3802_v62  ;;  %v4984_v11 = vpack.c.bf16 %v3815_v4, %v3811_v3  ;;  %v2341_v61 = vrot.slane %v2202_v46, 5  ;;  %v3846_v3 = vld [vmem:[%s8944_s1 + $0x1c50] sm:$0xff]  ;;  %v3879_v46 = vld [vmem:[%s8944_s1 + $0x1d58] sm:$0xff] }
 0x1a8   : > { %4965 = vmatprep.subr.bf16.mxu1 %v4964_v10  ;;  %v3810_v10 = vld [vmem:[%s8944_s1 + $0x1b50] sm:$0xff] }
 0x1aa   : > { %4903 = vmatpush1.bf16.msra.mxu0 %v4902_v16  ;;  %v3823_v16 = vld [vmem:[%s8944_s1 + $0x1bb8] sm:$0xff] }
 0x1ab   : > { %4967 = vmatpush1.bf16.msra.mxu1 %v4966_v17  ;;  %4905 = vmatprep.subr.bf16.mxu0 %v4904_v18  ;;  %v4922_v17 = vpack.c.bf16 %v3812_v31, %v3808_v9  ;;  %v4986_v18 = vpack.c.bf16 %v3814_v12, %v3810_v10  ;;  %v4988_v23 = vpack.c.bf16 %v3823_v16, %v3819_v15  ;;  %v3855_v9 = vld [vmem:[%s8944_s1 + $0x1c98] sm:$0xff]  ;;  %v3856_v15 = vld [vmem:[%s8944_s1 + $0x1ca0] sm:$0xff]  ;;  %v3854_v16 = vld [vmem:[%s8944_s1 + $0x1c90] sm:$0xff] }
 0x1ac   : > { %4969 = vmatprep.subr.bf16.mxu1 %v4968_v22  ;;  %v3818_v22 = vld [vmem:[%s8944_s1 + $0x1b90] sm:$0xff]  ;;  %v3859_v31 = vld [vmem:[%s8944_s1 + $0x1cb8] sm:$0xff] }
 0x1ad   : > { %v5068_v19 = vpack.c.bf16 %v3859_v31, %v3855_v9  ;;  %v3895_v9 = vld [vmem:[%s8944_s1 + $0x1dd8] sm:$0xff] }
 0x1ae   : > { %4907 = vmatpush1.bf16.msra.mxu0 %v4906_v27  ;;  %v3831_v27 = vld [vmem:[%s8944_s1 + $0x1bf8] sm:$0xff] }
 0x1af   : > { %4971 = vmatpush1.bf16.msra.mxu1 %v4970_v28  ;;  %4909 = vmatprep.subr.bf16.mxu0 %v4908_v29  ;;  %v4926_v28 = vpack.c.bf16 %v3820_v21, %v3816_v44  ;;  %v4990_v29 = vpack.c.bf16 %v3822_v24, %v3818_v22  ;;  %v4992_v35 = vpack.c.bf16 %v3831_v27, %v3827_v26  ;;  %v3867_v44 = vld [vmem:[%s8944_s1 + $0x1cf8] sm:$0xff]  ;;  %v3860_v24 = vld [vmem:[%s8944_s1 + $0x1cc0] sm:$0xff]  ;;  %v3866_v27 = vld [vmem:[%s8944_s1 + $0x1cf0] sm:$0xff] }
 0x1b0   : > { %4973 = vmatprep.subr.bf16.mxu1 %v4972_v34  ;;  %v3826_v34 = vld [vmem:[%s8944_s1 + $0x1bd0] sm:$0xff]  ;;  %v5006_v21 = vpack.c.bf16 %v3856_v15, %v3852_v14  ;;  %v3899_v31 = vld [vmem:[%s8944_s1 + $0x1df8] sm:$0xff]  ;;  %v3896_v14 = vld [vmem:[%s8944_s1 + $0x1de0] sm:$0xff] }
 0x1b1   : > { %v4994_v48 = vpack.c.bf16 %v3830_v37, %v3826_v34  ;;  %v5074_v34 = vpack.c.bf16 %v3866_v27, %v3862_v25  ;;  %v3868_v37 = vld [vmem:[%s8944_s1 + $0x1d00] sm:$0xff]  ;;  %v3894_v15 = vld [vmem:[%s8944_s1 + $0x1dd0] sm:$0xff]  ;;  %v3909_v27 = vld [vmem:[%s8944_s1 + $0x1e48] sm:$0xff] }
 0x1b2   : > { %4911 = vmatpush1.bf16.msra.mxu0 %v4910_v41  ;;  %v3843_v41 = vld [vmem:[%s8944_s1 + $0x1c38] sm:$0xff] }
 0x1b3   : > { %4975 = vmatpush1.bf16.msra.mxu1 %v4974_v42  ;;  %4913 = vmatprep.subr.bf16.mxu0 %v4912_v45  ;;  %v4930_v42 = vpack.c.bf16 %v3828_v33, %v3824_v32  ;;  %v2200_v45 = vld [vmem:[%s5627_s11 + $0x8] sm:$0xe0]  ;;  %v5060_v53 = vpack.c.bf16 %v3843_v41, %v3839_v40  ;;  %v3875_v32 = vld [vmem:[%s8944_s1 + $0x1d38] sm:$0xff]  ;;  %v5010_v33 = vpack.c.bf16 %v3864_v50, %v3860_v24  ;;  %v3874_v41 = vld [vmem:[%s8944_s1 + $0x1d30] sm:$0xff] }
 0x1b4   : > { %4977 = vmatprep.subr.bf16.mxu1 %v4976_v51  ;;  %v3836_v51 = vld [vmem:[%s8944_s1 + $0x1c00] sm:$0xff]  ;;  %v2340_v60 = vrot.slane %v2200_v45, 5  ;;  %v3881_v45 = vld [vmem:[%s8944_s1 + $0x1d68] sm:$0xff]  ;;  %v3902_v50 = vld [vmem:[%s8944_s1 + $0x1e10] sm:$0xff] }
 0x1b5   : > { %v4998_v62 = vpack.c.bf16 %v3840_v5, %v3836_v51  ;;  %v5078_v51 = vpack.c.bf16 %v3874_v41, %v3870_v39  ;;  %v3904_v24 = vld [vmem:[%s8944_s1 + $0x1e20] sm:$0xff]  ;;  %v3917_v41 = vld [vmem:[%s8944_s1 + $0x1e88] sm:$0xff] }
 0x1b6   : > { %4915 = vmatpush1.bf16.msra.mxu0 %v4914_v57  ;;  %v3849_v57 = vld [vmem:[%s8944_s1 + $0x1c68] sm:$0xff]  ;;  %v2342_v10 = vsel %vm2336_vm2, %v2340_v60, %v2341_v61  ;;  %v3887_v60 = vld [vmem:[%s8944_s1 + $0x1d98] sm:$0xff] }
 0x1b7   : > { %4979 = vmatpush1.bf16.msra.mxu1 %v4978_v58  ;;  %4917 = vmatprep.subr.bf16.mxu0 %v4916_v59  ;;  %v3847_v58 = vld [vmem:[%s8944_s1 + $0x1c58] sm:$0xff]  ;;  %v5000_v0 = vpack.c.bf16 %v3849_v57, %v3845_v55  ;;  %v3882_v57 = vld [vmem:[%s8944_s1 + $0x1d70] sm:$0xff] }
 0x1b8   : > { %4981 = vmatprep.subr.bf16.mxu1 %v4980_v63  ;;  %v3851_v59 = vld [vmem:[%s8944_s1 + $0x1c78] sm:$0xff]  ;;  %v5062_v63 = vpack.c.bf16 %v3842_v54, %v3838_v52  ;;  %v3876_v52 = vld [vmem:[%s8944_s1 + $0x1d40] sm:$0xff]  ;;  %v3878_v54 = vld [vmem:[%s8944_s1 + $0x1d50] sm:$0xff] }
 0x1b9   : > { %v5064_v4 = vpack.c.bf16 %v3851_v59, %v3847_v58  ;;  %v3885_v58 = vld [vmem:[%s8944_s1 + $0x1d88] sm:$0xff]  ;;  %v3891_v61 = vld [vmem:[%s8944_s1 + $0x1db8] sm:$0xff] }
 0x1ba   : > { %4919 = vmatpush1.bf16.msra.mxu0 %v4918_v6  ;;  %v3850_v6 = vld [vmem:[%s8944_s1 + $0x1c70] sm:$0xff]  ;;  %v3889_v59 = vld [vmem:[%s8944_s1 + $0x1da8] sm:$0xff] }
 0x1bb   : > { %4983 = vmatpush1.bf16.msra.mxu1 %v4982_v7  ;;  %4921 = vmatprep.subr.bf16.mxu0 %v4920_v8  ;;  %v3853_v7 = vld [vmem:[%s8944_s1 + $0x1c88] sm:$0xff]  ;;  %v5066_v12 = vpack.c.bf16 %v3850_v6, %v3846_v3  ;;  %v3886_v3 = vld [vmem:[%s8944_s1 + $0x1d90] sm:$0xff] }
 0x1bc   : > { %4985 = vmatprep.subr.bf16.mxu1 %v4984_v11  ;;  %v3857_v8 = vld [vmem:[%s8944_s1 + $0x1ca8] sm:$0xff]  ;;  %v5002_v11 = vpack.c.bf16 %v3848_v2, %v3844_v1  ;;  %v3884_v1 = vld [vmem:[%s8944_s1 + $0x1d80] sm:$0xff]  ;;  %v3890_v6 = vld [vmem:[%s8944_s1 + $0x1db0] sm:$0xff] }
 0x1bd   : > { %v5004_v13 = vpack.c.bf16 %v3857_v8, %v3853_v7  ;;  %v3888_v2 = vld [vmem:[%s8944_s1 + $0x1da0] sm:$0xff]  ;;  %v3893_v7 = vld [vmem:[%s8944_s1 + $0x1dc8] sm:$0xff] }
 0x1be   : > { %4923 = vmatpush1.bf16.msra.mxu0 %v4922_v17  ;;  %v3861_v17 = vld [vmem:[%s8944_s1 + $0x1cc8] sm:$0xff] }
 0x1bf   : > { %4987 = vmatpush1.bf16.msra.mxu1 %v4986_v18  ;;  %4925 = vmatprep.subr.bf16.mxu0 %v4924_v20  ;;  %v3865_v18 = vld [vmem:[%s8944_s1 + $0x1ce8] sm:$0xff]  ;;  %v3863_v20 = vld [vmem:[%s8944_s1 + $0x1cd8] sm:$0xff] }
 0x1c0   : > { %4989 = vmatprep.subr.bf16.mxu1 %v4988_v23  ;;  %v5008_v23 = vpack.c.bf16 %v3865_v18, %v3861_v17  ;;  %v5072_v26 = vpack.c.bf16 %v3867_v44, %v3863_v20  ;;  %v3897_v8 = vld [vmem:[%s8944_s1 + $0x1de8] sm:$0xff]  ;;  %v3903_v18 = vld [vmem:[%s8944_s1 + $0x1e18] sm:$0xff] }
 0x1c1   : > { %v3905_v17 = vld [vmem:[%s8944_s1 + $0x1e28] sm:$0xff]  ;;  %v3907_v20 = vld [vmem:[%s8944_s1 + $0x1e38] sm:$0xff] }
 0x1c2   : > { %4927 = vmatpush1.bf16.msra.mxu0 %v4926_v28  ;;  %v3869_v28 = vld [vmem:[%s8944_s1 + $0x1d08] sm:$0xff]  ;;  %v5092_v25 = vpack.c.bf16 %v3907_v20, %v3903_v18  ;;  %v3947_v18 = vld [vmem:[%s8944_s1 + $0x1f78] sm:$0xff] }
 0x1c3   : > { %4991 = vmatpush1.bf16.msra.mxu1 %v4990_v29  ;;  %4929 = vmatprep.subr.bf16.mxu0 %v4928_v30  ;;  %v3873_v29 = vld [vmem:[%s8944_s1 + $0x1d28] sm:$0xff]  ;;  %v3871_v30 = vld [vmem:[%s8944_s1 + $0x1d18] sm:$0xff] }
 0x1c4   : > { %4993 = vmatprep.subr.bf16.mxu1 %v4992_v35  ;;  %v5012_v35 = vpack.c.bf16 %v3873_v29, %v3869_v28  ;;  %v5076_v40 = vpack.c.bf16 %v3875_v32, %v3871_v30  ;;  %v3913_v28 = vld [vmem:[%s8944_s1 + $0x1e68] sm:$0xff]  ;;  %v3911_v29 = vld [vmem:[%s8944_s1 + $0x1e58] sm:$0xff] }
 0x1c5   : > { %v3915_v30 = vld [vmem:[%s8944_s1 + $0x1e78] sm:$0xff] }
 0x1c6   : > { %4931 = vmatpush1.bf16.msra.mxu0 %v4930_v42  ;;  %v3877_v42 = vld [vmem:[%s8944_s1 + $0x1d48] sm:$0xff]  ;;  %v5096_v39 = vpack.c.bf16 %v3915_v30, %v3911_v29  ;;  %v3955_v29 = vld [vmem:[%s8944_s1 + $0x1fb8] sm:$0xff] }
 0x1c7   : > { %4995 = vmatpush1.bf16.msra.mxu1 %v4994_v48  ;;  %4997 = vmatprep.subr.bf16.mxu0 %v4996_v49  ;;  %v3883_v48 = vld [vmem:[%s8944_s1 + $0x1d78] sm:$0xff]  ;;  %v5014_v49 = vpack.c.bf16 %v3872_v38, %v3868_v37  ;;  %v5016_v5 = vpack.c.bf16 %v3881_v45, %v3877_v42  ;;  %v3912_v37 = vld [vmem:[%s8944_s1 + $0x1e60] sm:$0xff]  ;;  %v3910_v38 = vld [vmem:[%s8944_s1 + $0x1e50] sm:$0xff] }
 0x1c8   : > { %5061 = vmatprep.subr.bf16.mxu1 %v5060_v53  ;;  %v3880_v53 = vld [vmem:[%s8944_s1 + $0x1d60] sm:$0xff]  ;;  %v5080_v55 = vpack.c.bf16 %v3883_v48, %v3879_v46  ;;  %v3921_v42 = vld [vmem:[%s8944_s1 + $0x1ea8] sm:$0xff]  ;;  %v3919_v45 = vld [vmem:[%s8944_s1 + $0x1e98] sm:$0xff] }
 0x1c9   : > { %3833 = vmatmul.mubr.msk.f32.vlgmr.msra.gmra.mrb[0].mxu0 %vm5904_vm0, %v7757_v36  ;;  %v3923_v46 = vld [vmem:[%s8944_s1 + $0x1eb8] sm:$0xff] }
 0x1ca   : > { %3835 = vmatmul.mubr.msk.f32.vlgmr.msra.gmra.mrb[0].mxu1 %vm5904_vm0, %v7757_v36  ;;  %4999 = vmatpush1.bf16.msra.mxu0 %v4998_v62  ;;  %v3858_v36 = vld [vmem:[%s8944_s1 + $0x1cb0] sm:$0xff]  ;;  %v5018_v62 = vpack.c.bf16 %v3880_v53, %v3876_v52  ;;  %v3920_v52 = vld [vmem:[%s8944_s1 + $0x1ea0] sm:$0xff] }
 0x1cb   : > { %5063 = vmatpush1.bf16.msra.mxu1 %v5062_v63  ;;  %5001 = vmatprep.subr.bf16.mxu0 %v5000_v0  ;;  %v5070_v22 = vpack.c.bf16 %v3858_v36, %v3854_v16  ;;  %v5082_v63 = vpack.c.bf16 %v3882_v57, %v3878_v54  ;;  %v5020_v0 = vpack.c.bf16 %v3889_v59, %v3885_v58  ;;  %v3901_v36 = vld [vmem:[%s8944_s1 + $0x1e08] sm:$0xff]  ;;  %v3918_v53 = vld [vmem:[%s8944_s1 + $0x1e90] sm:$0xff]  ;;  %v3927_v59 = vld [vmem:[%s8944_s1 + $0x1ed8] sm:$0xff] }
 0x1cc   : > { %5065 = vmatprep.subr.bf16.mxu1 %v5064_v4  ;;  %2409 = vmatprep.mubr.f32.mxu0 %v2342_v10  ;;  %v5084_v4 = vpack.c.bf16 %v3891_v61, %v3887_v60  ;;  %v5088_v16 = vpack.c.bf16 %v3899_v31, %v3895_v9  ;;  %v5100_v54 = vpack.c.bf16 %v3923_v46, %v3919_v45  ;;  %v3925_v57 = vld [vmem:[%s8944_s1 + $0x1ec8] sm:$0xff]  ;;  %v3931_v60 = vld [vmem:[%s8944_s1 + $0x1ef8] sm:$0xff] }
 0x1cd   : > { %2480 = vmatprep.mubr.f32.mxu1 %v2342_v10  ;;  %v5022_v10 = vpack.c.bf16 %v3888_v2, %v3884_v1  ;;  %v3929_v58 = vld [vmem:[%s8944_s1 + $0x1ee8] sm:$0xff]  ;;  %v3928_v1 = vld [vmem:[%s8944_s1 + $0x1ee0] sm:$0xff]  ;;  %v3926_v2 = vld [vmem:[%s8944_s1 + $0x1ed0] sm:$0xff] }
 0x1ce   : > { %5003 = vmatpush1.bf16.msra.mxu0 %v5002_v11  ;;  %v5086_v11 = vpack.c.bf16 %v3890_v6, %v3886_v3  ;;  %v5104_v3 = vpack.c.bf16 %v3931_v60, %v3927_v59  ;;  %v3933_v6 = vld [vmem:[%s8944_s1 + $0x1f08] sm:$0xff]  ;;  %v3939_v9 = vld [vmem:[%s8944_s1 + $0x1f38] sm:$0xff] }
 0x1cf   : > { %5067 = vmatpush1.bf16.msra.mxu1 %v5066_v12  ;;  %5005 = vmatprep.subr.bf16.mxu0 %v5004_v13  ;;  %v5024_v12 = vpack.c.bf16 %v3897_v8, %v3893_v7  ;;  %v3892_v13 = vld [vmem:[%s8944_s1 + $0x1dc0] sm:$0xff]  ;;  %v3937_v7 = vld [vmem:[%s8944_s1 + $0x1f28] sm:$0xff]  ;;  %v3935_v8 = vld [vmem:[%s8944_s1 + $0x1f18] sm:$0xff] }
 0x1d0   : > { %5069 = vmatprep.subr.bf16.mxu1 %v5068_v19  ;;  %v3898_v19 = vld [vmem:[%s8944_s1 + $0x1df0] sm:$0xff]  ;;  %v5026_v44 = vpack.c.bf16 %v3896_v14, %v3892_v13  ;;  %v3936_v13 = vld [vmem:[%s8944_s1 + $0x1f20] sm:$0xff]  ;;  %v3963_v45 = vld [vmem:[%s8944_s1 + $0x1ff8] sm:$0xff] }
 0x1d1   : > { %v3934_v14 = vld [vmem:[%s8944_s1 + $0x1f10] sm:$0xff]  ;;  %v3969_v59 = vld [vmem:[%s8944_s1 + $0x2028] sm:$0xff]  ;;  %v3967_v60 = vld [vmem:[%s8944_s1 + $0x2018] sm:$0xff] }
 0x1d2   : > { %5007 = vmatpush1.bf16.msra.mxu0 %v5006_v21  ;;  %v5090_v21 = vpack.c.bf16 %v3898_v19, %v3894_v15  ;;  %v5108_v15 = vpack.c.bf16 %v3939_v9, %v3935_v8  ;;  %v3941_v19 = vld [vmem:[%s8944_s1 + $0x1f48] sm:$0xff]  ;;  %v3966_v8 = vld [vmem:[%s8944_s1 + $0x2010] sm:$0xff] }
 0x1d3   : > { %5071 = vmatpush1.bf16.msra.mxu1 %v5070_v22  ;;  %5009 = vmatprep.subr.bf16.mxu0 %v5008_v23  ;;  %v5028_v22 = vpack.c.bf16 %v3905_v17, %v3901_v36  ;;  %v3900_v23 = vld [vmem:[%s8944_s1 + $0x1e00] sm:$0xff]  ;;  %v3945_v36 = vld [vmem:[%s8944_s1 + $0x1f68] sm:$0xff]  ;;  %v3943_v17 = vld [vmem:[%s8944_s1 + $0x1f58] sm:$0xff] }
 0x1d4   : > { %5073 = vmatprep.subr.bf16.mxu1 %v5072_v26  ;;  %v3906_v26 = vld [vmem:[%s8944_s1 + $0x1e30] sm:$0xff]  ;;  %v5030_v32 = vpack.c.bf16 %v3904_v24, %v3900_v23  ;;  %v3944_v23 = vld [vmem:[%s8944_s1 + $0x1f60] sm:$0xff] }
 0x1d5   : > { %v3942_v24 = vld [vmem:[%s8944_s1 + $0x1f50] sm:$0xff] }
 0x1d6   : > { %5011 = vmatpush1.bf16.msra.mxu0 %v5010_v33  ;;  %v5094_v33 = vpack.c.bf16 %v3906_v26, %v3902_v50  ;;  %v5112_v50 = vpack.c.bf16 %v3947_v18, %v3943_v17  ;;  %v3949_v26 = vld [vmem:[%s8944_s1 + $0x1f88] sm:$0xff]  ;;  %v3972_v18 = vld [vmem:[%s8944_s1 + $0x2040] sm:$0xff] }
 0x1d7   : > { %5075 = vmatpush1.bf16.msra.mxu1 %v5074_v34  ;;  %5013 = vmatprep.subr.bf16.mxu0 %v5012_v35  ;;  %v5032_v34 = vpack.c.bf16 %v3913_v28, %v3909_v27  ;;  %v3908_v35 = vld [vmem:[%s8944_s1 + $0x1e40] sm:$0xff]  ;;  %v3953_v27 = vld [vmem:[%s8944_s1 + $0x1fa8] sm:$0xff]  ;;  %v3951_v28 = vld [vmem:[%s8944_s1 + $0x1f98] sm:$0xff] }
 0x1d8   : > { %5077 = vmatprep.subr.bf16.mxu1 %v5076_v40  ;;  %v3914_v40 = vld [vmem:[%s8944_s1 + $0x1e70] sm:$0xff]  ;;  %v5034_v48 = vpack.c.bf16 %v3912_v37, %v3908_v35  ;;  %v3952_v35 = vld [vmem:[%s8944_s1 + $0x1fa0] sm:$0xff] }
 0x1d9   : > { %v3950_v37 = vld [vmem:[%s8944_s1 + $0x1f90] sm:$0xff] }
 0x1da   : > { %5015 = vmatpush1.bf16.msra.mxu0 %v5014_v49  ;;  %v5098_v49 = vpack.c.bf16 %v3914_v40, %v3910_v38  ;;  %v5116_v38 = vpack.c.bf16 %v3955_v29, %v3951_v28  ;;  %v3957_v40 = vld [vmem:[%s8944_s1 + $0x1fc8] sm:$0xff] }
 0x1db   : > { %5079 = vmatpush1.bf16.msra.mxu1 %v5078_v51  ;;  %5017 = vmatprep.subr.bf16.mxu0 %v5016_v5  ;;  %v5036_v51 = vpack.c.bf16 %v3921_v42, %v3917_v41  ;;  %v3916_v5 = vld [vmem:[%s8944_s1 + $0x1e80] sm:$0xff]  ;;  %v3961_v41 = vld [vmem:[%s8944_s1 + $0x1fe8] sm:$0xff]  ;;  %v3959_v42 = vld [vmem:[%s8944_s1 + $0x1fd8] sm:$0xff] }
 0x1dc   : > { %5081 = vmatprep.subr.bf16.mxu1 %v5080_v55  ;;  %v3922_v55 = vld [vmem:[%s8944_s1 + $0x1eb0] sm:$0xff]  ;;  %v5038_v61 = vpack.c.bf16 %v3920_v52, %v3916_v5  ;;  %v5056_v5 = vpack.c.bf16 %v3961_v41, %v3957_v40  ;;  %v3995_v40 = vld [vmem:[%s8944_s1 + $0x20f8] sm:$0xff] }
 0x1dd   : > { %v3958_v52 = vld [vmem:[%s8944_s1 + $0x1fd0] sm:$0xff] }
 0x1de   : > { %5019 = vmatpush1.bf16.msra.mxu0 %v5018_v62  ;;  %v5102_v62 = vpack.c.bf16 %v3922_v55, %v3918_v53  ;;  %v2199_v53 = vld [vmem:[%s5627_s11] sm:$0xe0]  ;;  %v5120_v55 = vpack.c.bf16 %v3963_v45, %v3959_v42 }
 0x1df   : > { %5083 = vmatpush1.bf16.msra.mxu1 %v5082_v63  ;;  %5021 = vmatprep.subr.bf16.mxu0 %v5020_v0  ;;  %v5040_v63 = vpack.c.bf16 %v3929_v58, %v3925_v57  ;;  %v3924_v0 = vld [vmem:[%s8944_s1 + $0x1ec0] sm:$0xff]  ;;  %v3962_v57 = vld [vmem:[%s8944_s1 + $0x1ff0] sm:$0xff]  ;;  %v3965_v58 = vld [vmem:[%s8944_s1 + $0x2008] sm:$0xff] }
 0x1e0   : > { %5085 = vmatprep.subr.bf16.mxu1 %v5084_v4  ;;  %v3930_v4 = vld [vmem:[%s8944_s1 + $0x1ef0] sm:$0xff]  ;;  %v5042_v31 = vpack.c.bf16 %v3928_v1, %v3924_v0  ;;  %v2492_v1 = vld [vmem:[%s5627_s11 + $0x8] sm:$0xc0] }
 0x1e2   : > { %5023 = vmatpush1.bf16.msra.mxu0 %v5022_v10  ;;  %v5106_v10 = vpack.c.bf16 %v3930_v4, %v3926_v2  ;;  %v2494_v2 = vld [vmem:[%s5627_s11 + $0x18] sm:$0x3]  ;;  %v5124_v4 = vpack.c.bf16 %v3969_v59, %v3965_v58 }
 0x1e3   : > { %5087 = vmatpush1.bf16.msra.mxu1 %v5086_v11  ;;  %5025 = vmatprep.subr.bf16.mxu0 %v5024_v12  ;;  %v5044_v11 = vpack.c.bf16 %v3937_v7, %v3933_v6  ;;  %v3932_v12 = vld [vmem:[%s8944_s1 + $0x1f00] sm:$0xff] }
 0x1e4   : > { %5089 = vmatprep.subr.bf16.mxu1 %v5088_v16  ;;  %v3938_v16 = vld [vmem:[%s8944_s1 + $0x1f30] sm:$0xff]  ;;  %v5046_v20 = vpack.c.bf16 %v3936_v13, %v3932_v12  ;;  %v3964_v6 = vld [vmem:[%s8944_s1 + $0x2000] sm:$0xff]  ;;  %v3975_v12 = vld [vmem:[%s8944_s1 + $0x2058] sm:$0xff] }
 0x1e5   : > { %v3968_v7 = vld [vmem:[%s8944_s1 + $0x2020] sm:$0xff]  ;;  %v3979_v13 = vld [vmem:[%s8944_s1 + $0x2078] sm:$0xff] }
 0x1e6   : > { %5027 = vmatpush1.bf16.msra.mxu0 %v5026_v44  ;;  %v5110_v44 = vpack.c.bf16 %v3938_v16, %v3934_v14  ;;  %v2503_v14 = vrot.slane %v2492_v1, 6  ;;  %v4005_v1 = vld [vmem:[%s8944_s1 + $0x2148] sm:$0xff] }
 0x1e7   : > { %5091 = vmatpush1.bf16.msra.mxu1 %v5090_v21  ;;  %5029 = vmatprep.subr.bf16.mxu0 %v5028_v22  ;;  %v5048_v21 = vpack.c.bf16 %v3945_v36, %v3941_v19  ;;  %v3940_v22 = vld [vmem:[%s8944_s1 + $0x1f40] sm:$0xff]  ;;  %v5126_v19 = vpack.c.bf16 %v3968_v7, %v3964_v6 }
 0x1e8   : > { %5093 = vmatprep.subr.bf16.mxu1 %v5092_v25  ;;  %v3946_v25 = vld [vmem:[%s8944_s1 + $0x1f70] sm:$0xff]  ;;  %v5050_v30 = vpack.c.bf16 %v3944_v23, %v3940_v22  ;;  %v3981_v23 = vld [vmem:[%s8944_s1 + $0x2088] sm:$0xff] }
 0x1e9   : > { %v3978_v22 = vld [vmem:[%s8944_s1 + $0x2070] sm:$0xff] }
 0x1ea   : > { %5031 = vmatpush1.bf16.msra.mxu0 %v5030_v32  ;;  %v5114_v32 = vpack.c.bf16 %v3946_v25, %v3942_v24  ;;  %v3985_v24 = vld [vmem:[%s8944_s1 + $0x20a8] sm:$0xff]  ;;  %v3987_v25 = vld [vmem:[%s8944_s1 + $0x20b8] sm:$0xff] }
 0x1eb   : > { %5095 = vmatpush1.bf16.msra.mxu1 %v5094_v33  ;;  %5033 = vmatprep.subr.bf16.mxu0 %v5032_v34  ;;  %v5052_v33 = vpack.c.bf16 %v3953_v27, %v3949_v26  ;;  %v3948_v34 = vld [vmem:[%s8944_s1 + $0x1f80] sm:$0xff]  ;;  %v5132_v29 = vpack.c.bf16 %v3985_v24, %v3981_v23  ;;  %v4021_v23 = vld [vmem:[%s8944_s1 + $0x21c8] sm:$0xff] }
 0x1ec   : > { %5097 = vmatprep.subr.bf16.mxu1 %v5096_v39  ;;  %v3954_v39 = vld [vmem:[%s8944_s1 + $0x1fb0] sm:$0xff]  ;;  %v5054_v46 = vpack.c.bf16 %v3952_v35, %v3948_v34  ;;  %v4025_v24 = vld [vmem:[%s8944_s1 + $0x21e8] sm:$0xff] }
 0x1ed   : > { %v3986_v35 = vld [vmem:[%s8944_s1 + $0x20b0] sm:$0xff] }
 0x1ee   : > { %5035 = vmatpush1.bf16.msra.mxu0 %v5034_v48  ;;  %v3956_v48 = vld [vmem:[%s8944_s1 + $0x1fc0] sm:$0xff] }
 0x1ef   : > { %5099 = vmatpush1.bf16.msra.mxu1 %v5098_v49  ;;  %5037 = vmatprep.subr.bf16.mxu0 %v5036_v51  ;;  %v3960_v49 = vld [vmem:[%s8944_s1 + $0x1fe0] sm:$0xff]  ;;  %v5118_v51 = vpack.c.bf16 %v3954_v39, %v3950_v37  ;;  %v3989_v37 = vld [vmem:[%s8944_s1 + $0x20c8] sm:$0xff]  ;;  %v3991_v39 = vld [vmem:[%s8944_s1 + $0x20d8] sm:$0xff] }
 0x1f0   : > { %5101 = vmatprep.subr.bf16.mxu1 %v5100_v54  ;;  %v2201_v54 = vld [vmem:[%s5627_s11 + $0x10] sm:$0x1] }
 0x1f1   : > { %v2338_v0 = vrot.slane %v2201_v54, 5  ;;  %v3999_v54 = vld [vmem:[%s8944_s1 + $0x2118] sm:$0xff] }
 0x1f2   : > { %5039 = vmatpush1.bf16.msra.mxu0 %v5038_v61  ;;  %v3971_v61 = vld [vmem:[%s8944_s1 + $0x2038] sm:$0xff] }
 0x1f3   : > { %5103 = vmatpush1.bf16.msra.mxu1 %v5102_v62  ;;  %5041 = vmatprep.subr.bf16.mxu0 %v5040_v63  ;;  %v5058_v62 = vpack.c.bf16 %v3960_v49, %v3956_v48  ;;  %v2337_v63 = vrot.slane %v2199_v53, 5  ;;  %v5188_v9 = vpack.c.bf16 %v3971_v61, %v3967_v60  ;;  %v3992_v48 = vld [vmem:[%s8944_s1 + $0x20e0] sm:$0xff]  ;;  %v3990_v49 = vld [vmem:[%s8944_s1 + $0x20d0] sm:$0xff]  ;;  %v4001_v53 = vld [vmem:[%s8944_s1 + $0x2128] sm:$0xff] }
 0x1f4   : > { %5105 = vmatprep.subr.bf16.mxu1 %v5104_v3  ;;  %v5122_v3 = vpack.c.bf16 %v3962_v57, %v3958_v52  ;;  %v3997_v52 = vld [vmem:[%s8944_s1 + $0x2108] sm:$0xff]  ;;  %v3996_v60 = vld [vmem:[%s8944_s1 + $0x2100] sm:$0xff] }
 0x1f5   : > { %v2339_v16 = vsel %vm2336_vm2, %v2337_v63, %v2338_v0  ;;  %v5140_v59 = vpack.c.bf16 %v4001_v53, %v3997_v52  ;;  %v4000_v61 = vld [vmem:[%s8944_s1 + $0x2120] sm:$0xff]  ;;  %v4002_v0 = vld [vmem:[%s8944_s1 + $0x2130] sm:$0xff]  ;;  %v4041_v52 = vld [vmem:[%s8944_s1 + $0x2268] sm:$0xff] }
 0x1f6   : > { %5043 = vmatpush1.bf16.msra.mxu0 %v5042_v31  ;;  %v3970_v31 = vld [vmem:[%s8944_s1 + $0x2030] sm:$0xff]  ;;  %v5142_v6 = vpack.c.bf16 %v4000_v61, %v3996_v60  ;;  %v4039_v53 = vld [vmem:[%s8944_s1 + $0x2258] sm:$0xff]  ;;  %v4040_v60 = vld [vmem:[%s8944_s1 + $0x2260] sm:$0xff] }
 0x1f7   : > { %5107 = vmatpush1.bf16.msra.mxu1 %v5106_v10  ;;  %5045 = vmatprep.subr.bf16.mxu0 %v5044_v11  ;;  %v3973_v10 = vld [vmem:[%s8944_s1 + $0x2048] sm:$0xff]  ;;  %v5190_v36 = vpack.c.bf16 %v3970_v31, %v3966_v8  ;;  %v4008_v31 = vld [vmem:[%s8944_s1 + $0x2160] sm:$0xff]  ;;  %v4038_v61 = vld [vmem:[%s8944_s1 + $0x2250] sm:$0xff] }
 0x1f8   : > { %5109 = vmatprep.subr.bf16.mxu1 %v5108_v15  ;;  %v3977_v11 = vld [vmem:[%s8944_s1 + $0x2068] sm:$0xff]  ;;  %v2504_v15 = vrot.slane %v2494_v2, 6 }
 0x1f9   : > { %v5128_v17 = vpack.c.bf16 %v3977_v11, %v3973_v10  ;;  %v4009_v2 = vld [vmem:[%s8944_s1 + $0x2168] sm:$0xff]  ;;  %v4006_v10 = vld [vmem:[%s8944_s1 + $0x2150] sm:$0xff] }
 0x1fa   : > { %5047 = vmatpush1.bf16.msra.mxu0 %v5046_v20  ;;  %v3976_v20 = vld [vmem:[%s8944_s1 + $0x2060] sm:$0xff]  ;;  %v2505_v26 = vsel %vm2499_vm3, %v2503_v14, %v2504_v15  ;;  %v5144_v8 = vpack.c.bf16 %v4009_v2, %v4005_v1  ;;  %v4017_v14 = vld [vmem:[%s8944_s1 + $0x21a8] sm:$0xff]  ;;  %v4015_v15 = vld [vmem:[%s8944_s1 + $0x2198] sm:$0xff] }
 0x1fb   : > { %5111 = vmatpush1.bf16.msra.mxu1 %v5110_v44  ;;  %5049 = vmatprep.subr.bf16.mxu0 %v5048_v21  ;;  %v3974_v44 = vld [vmem:[%s8944_s1 + $0x2050] sm:$0xff]  ;;  %v5192_v21 = vpack.c.bf16 %v3979_v13, %v3975_v12  ;;  %v5130_v27 = vpack.c.bf16 %v3976_v20, %v3972_v18  ;;  %v4013_v13 = vld [vmem:[%s8944_s1 + $0x2188] sm:$0xff]  ;;  %v4012_v18 = vld [vmem:[%s8944_s1 + $0x2180] sm:$0xff] }
 0x1fc   : > { %5113 = vmatprep.subr.bf16.mxu1 %v5112_v50  ;;  %v3983_v50 = vld [vmem:[%s8944_s1 + $0x2098] sm:$0xff]  ;;  %v5194_v28 = vpack.c.bf16 %v3978_v22, %v3974_v44  ;;  %v4010_v12 = vld [vmem:[%s8944_s1 + $0x2170] sm:$0xff]  ;;  %v4016_v20 = vld [vmem:[%s8944_s1 + $0x21a0] sm:$0xff] }
 0x1fd   : > { %v5196_v34 = vpack.c.bf16 %v3987_v25, %v3983_v50  ;;  %v4014_v44 = vld [vmem:[%s8944_s1 + $0x2190] sm:$0xff]  ;;  %v4023_v50 = vld [vmem:[%s8944_s1 + $0x21d8] sm:$0xff]  ;;  %v4049_v1 = vld [vmem:[%s8944_s1 + $0x22a8] sm:$0xff] }
 0x1fe   : > { %5051 = vmatpush1.bf16.msra.mxu0 %v5050_v30  ;;  %v3980_v30 = vld [vmem:[%s8944_s1 + $0x2080] sm:$0xff]  ;;  %v4018_v22 = vld [vmem:[%s8944_s1 + $0x21b0] sm:$0xff]  ;;  %v4027_v25 = vld [vmem:[%s8944_s1 + $0x21f8] sm:$0xff] }
 0x1ff   : > { %5115 = vmatpush1.bf16.msra.mxu1 %v5114_v32  ;;  %5053 = vmatprep.subr.bf16.mxu0 %v5052_v33  ;;  %v3984_v32 = vld [vmem:[%s8944_s1 + $0x20a0] sm:$0xff]  ;;  %v3982_v33 = vld [vmem:[%s8944_s1 + $0x2090] sm:$0xff]  ;;  %v4047_v2 = vld [vmem:[%s8944_s1 + $0x2298] sm:$0xff] }
 0x200   : > { %5117 = vmatprep.subr.bf16.mxu1 %v5116_v38  ;;  %v3993_v38 = vld [vmem:[%s8944_s1 + $0x20e8] sm:$0xff]  ;;  %v5134_v41 = vpack.c.bf16 %v3984_v32, %v3980_v30  ;;  %v5198_v42 = vpack.c.bf16 %v3986_v35, %v3982_v33  ;;  %v4024_v30 = vld [vmem:[%s8944_s1 + $0x21e0] sm:$0xff]  ;;  %v4022_v32 = vld [vmem:[%s8944_s1 + $0x21d0] sm:$0xff]  ;;  %v5216_v33 = vpack.c.bf16 %v4027_v25, %v4023_v50 }
 0x201   : > { %v5136_v45 = vpack.c.bf16 %v3993_v38, %v3989_v37  ;;  %v4029_v35 = vld [vmem:[%s8944_s1 + $0x2208] sm:$0xff]  ;;  %v4031_v38 = vld [vmem:[%s8944_s1 + $0x2218] sm:$0xff] }
 0x202   : > { %5055 = vmatpush1.bf16.msra.mxu0 %v5054_v46  ;;  %v3988_v46 = vld [vmem:[%s8944_s1 + $0x20c0] sm:$0xff]  ;;  %v4033_v37 = vld [vmem:[%s8944_s1 + $0x2228] sm:$0xff]  ;;  %v4067_v50 = vld [vmem:[%s8944_s1 + $0x2338] sm:$0xff] }
 0x203   : > { %5119 = vmatpush1.bf16.msra.mxu1 %v5118_v51  ;;  %5057 = vmatprep.subr.bf16.mxu0 %v5056_v5  ;;  %v5200_v51 = vpack.c.bf16 %v3995_v40, %v3991_v39  ;;  %v3994_v5 = vld [vmem:[%s8944_s1 + $0x20f0] sm:$0xff]  ;;  %v5138_v57 = vpack.c.bf16 %v3992_v48, %v3988_v46  ;;  %v4035_v39 = vld [vmem:[%s8944_s1 + $0x2238] sm:$0xff]  ;;  %v4032_v46 = vld [vmem:[%s8944_s1 + $0x2220] sm:$0xff] }
 0x204   : > { %5121 = vmatprep.subr.bf16.mxu1 %v5120_v55  ;;  %v4003_v55 = vld [vmem:[%s8944_s1 + $0x2138] sm:$0xff]  ;;  %v5202_v58 = vpack.c.bf16 %v3994_v5, %v3990_v49  ;;  %v4030_v48 = vld [vmem:[%s8944_s1 + $0x2210] sm:$0xff]  ;;  %v5220_v49 = vpack.c.bf16 %v4035_v39, %v4031_v38  ;;  %v4037_v5 = vld [vmem:[%s8944_s1 + $0x2248] sm:$0xff] }
 0x205   : > { %v5204_v63 = vpack.c.bf16 %v4003_v55, %v3999_v54  ;;  %v4043_v54 = vld [vmem:[%s8944_s1 + $0x2278] sm:$0xff] }
 0x206   : > { %5059 = vmatpush1.bf16.msra.mxu0 %v5058_v62  ;;  %v3998_v62 = vld [vmem:[%s8944_s1 + $0x2110] sm:$0xff]  ;;  %v4075_v38 = vld [vmem:[%s8944_s1 + $0x2378] sm:$0xff] }
 0x207   : > { %5123 = vmatpush1.bf16.msra.mxu1 %v5122_v3  ;;  %5125 = vmatprep.subr.bf16.mxu0 %v5124_v4  ;;  %v4007_v3 = vld [vmem:[%s8944_s1 + $0x2158] sm:$0xff]  ;;  %v5206_v7 = vpack.c.bf16 %v4002_v0, %v3998_v62  ;;  %v5224_v62 = vpack.c.bf16 %v4043_v54, %v4039_v53  ;;  %v4045_v0 = vld [vmem:[%s8944_s1 + $0x2288] sm:$0xff] }
 0x208   : > { %5189 = vmatprep.subr.bf16.mxu1 %v5188_v9  ;;  %v4011_v4 = vld [vmem:[%s8944_s1 + $0x2178] sm:$0xff]  ;;  %v4004_v9 = vld [vmem:[%s8944_s1 + $0x2140] sm:$0xff] }
 0x209   : > { %2410 = vmatmul.mubr.f32.vlgmr.msra.gmra.mrb[0].mxu0 %v2339_v16  ;;  %v5208_v11 = vpack.c.bf16 %v4011_v4, %v4007_v3  ;;  %v4051_v3 = vld [vmem:[%s8944_s1 + $0x22b8] sm:$0xff] }
 0x20a   : > { %2481 = vmatmul.mubr.f32.vlgmr.msra.gmra.mrb[0].mxu1 %v2339_v16  ;;  %5127 = vmatpush1.bf16.msra.mxu0 %v5126_v19  ;;  %v4019_v16 = vld [vmem:[%s8944_s1 + $0x21b8] sm:$0xff]  ;;  %v5146_v19 = vpack.c.bf16 %v4008_v31, %v4004_v9  ;;  %v4048_v9 = vld [vmem:[%s8944_s1 + $0x22a0] sm:$0xff]  ;;  %v4046_v31 = vld [vmem:[%s8944_s1 + $0x2290] sm:$0xff] }
 0x20b   : > { %5191 = vmatpush1.bf16.msra.mxu1 %v5190_v36  ;;  %5129 = vmatprep.subr.bf16.mxu0 %v5128_v17  ;;  %v5210_v36 = vpack.c.bf16 %v4010_v12, %v4006_v10  ;;  %v5148_v17 = vpack.c.bf16 %v4017_v14, %v4013_v13  ;;  %v5228_v10 = vpack.c.bf16 %v4051_v3, %v4047_v2  ;;  %v4053_v12 = vld [vmem:[%s8944_s1 + $0x22c8] sm:$0xff]  ;;  %v4055_v14 = vld [vmem:[%s8944_s1 + $0x22d8] sm:$0xff] }
 0x20c   : > { %5193 = vmatprep.subr.bf16.mxu1 %v5192_v21  ;;  %4092 = vmatprep.mubr.msk.f32.mxu0 %vm6206_vm1, %v2505_v26  ;;  %v5212_v21 = vpack.c.bf16 %v4019_v16, %v4015_v15  ;;  %v4057_v13 = vld [vmem:[%s8944_s1 + $0x22e8] sm:$0xff]  ;;  %v4059_v15 = vld [vmem:[%s8944_s1 + $0x22f8] sm:$0xff] }
 0x20d   : > { %4094 = vmatprep.mubr.msk.f32.mxu1 %vm6206_vm1, %v2505_v26  ;;  %v5150_v26 = vpack.c.bf16 %v4016_v20, %v4012_v18  ;;  %v4056_v18 = vld [vmem:[%s8944_s1 + $0x22e0] sm:$0xff]  ;;  %v4054_v20 = vld [vmem:[%s8944_s1 + $0x22d0] sm:$0xff]  ;;  %v4083_v53 = vld [vmem:[%s8944_s1 + $0x23b8] sm:$0xff] }
 0x20e   : > { %5131 = vmatpush1.bf16.msra.mxu0 %v5130_v27  ;;  %v5214_v27 = vpack.c.bf16 %v4018_v22, %v4014_v44  ;;  %v5232_v44 = vpack.c.bf16 %v4059_v15, %v4055_v14  ;;  %v4061_v22 = vld [vmem:[%s8944_s1 + $0x2308] sm:$0xff]  ;;  %v4091_v2 = vld [vmem:[%s8944_s1 + $0x23f8] sm:$0xff] }
 0x20f   : > { %5195 = vmatpush1.bf16.msra.mxu1 %v5194_v28  ;;  %5133 = vmatprep.subr.bf16.mxu0 %v5132_v29  ;;  %v5152_v28 = vpack.c.bf16 %v4025_v24, %v4021_v23  ;;  %v4020_v29 = vld [vmem:[%s8944_s1 + $0x21c0] sm:$0xff]  ;;  %v4065_v23 = vld [vmem:[%s8944_s1 + $0x2328] sm:$0xff]  ;;  %v4063_v24 = vld [vmem:[%s8944_s1 + $0x2318] sm:$0xff] }
 0x210   : > { %5197 = vmatprep.subr.bf16.mxu1 %v5196_v34  ;;  %v4026_v34 = vld [vmem:[%s8944_s1 + $0x21f0] sm:$0xff]  ;;  %v5154_v40 = vpack.c.bf16 %v4024_v30, %v4020_v29  ;;  %v4064_v29 = vld [vmem:[%s8944_s1 + $0x2320] sm:$0xff] }
 0x211   : > { %v4062_v30 = vld [vmem:[%s8944_s1 + $0x2310] sm:$0xff] }
 0x212   : > { %5135 = vmatpush1.bf16.msra.mxu0 %v5134_v41  ;;  %v5218_v41 = vpack.c.bf16 %v4026_v34, %v4022_v32  ;;  %v5236_v32 = vpack.c.bf16 %v4067_v50, %v4063_v24  ;;  %v4069_v34 = vld [vmem:[%s8944_s1 + $0x2348] sm:$0xff] }
 0x213   : > { %5199 = vmatpush1.bf16.msra.mxu1 %v5198_v42  ;;  %5137 = vmatprep.subr.bf16.mxu0 %v5136_v45  ;;  %v5156_v42 = vpack.c.bf16 %v4033_v37, %v4029_v35  ;;  %v4028_v45 = vld [vmem:[%s8944_s1 + $0x2200] sm:$0xff]  ;;  %v4073_v35 = vld [vmem:[%s8944_s1 + $0x2368] sm:$0xff]  ;;  %v4071_v37 = vld [vmem:[%s8944_s1 + $0x2358] sm:$0xff] }
 0x214   : > { %5201 = vmatprep.subr.bf16.mxu1 %v5200_v51  ;;  %v4034_v51 = vld [vmem:[%s8944_s1 + $0x2230] sm:$0xff]  ;;  %v5158_v55 = vpack.c.bf16 %v4032_v46, %v4028_v45  ;;  %v4072_v45 = vld [vmem:[%s8944_s1 + $0x2360] sm:$0xff] }
 0x215   : > { %v4070_v46 = vld [vmem:[%s8944_s1 + $0x2350] sm:$0xff] }
 0x216   : > { %5139 = vmatpush1.bf16.msra.mxu0 %v5138_v57  ;;  %v5222_v57 = vpack.c.bf16 %v4034_v51, %v4030_v48  ;;  %v5240_v48 = vpack.c.bf16 %v4075_v38, %v4071_v37  ;;  %v4077_v51 = vld [vmem:[%s8944_s1 + $0x2388] sm:$0xff] }
 0x217   : > { %5203 = vmatpush1.bf16.msra.mxu1 %v5202_v58  ;;  %5141 = vmatprep.subr.bf16.mxu0 %v5140_v59  ;;  %v5160_v58 = vpack.c.bf16 %v4041_v52, %v4037_v5  ;;  %v4036_v59 = vld [vmem:[%s8944_s1 + $0x2240] sm:$0xff]  ;;  %v4081_v5 = vld [vmem:[%s8944_s1 + $0x23a8] sm:$0xff]  ;;  %v4079_v52 = vld [vmem:[%s8944_s1 + $0x2398] sm:$0xff] }
 0x218   : > { %5205 = vmatprep.subr.bf16.mxu1 %v5204_v63  ;;  %v4042_v63 = vld [vmem:[%s8944_s1 + $0x2270] sm:$0xff]  ;;  %v5162_v4 = vpack.c.bf16 %v4040_v60, %v4036_v59  ;;  %v4080_v59 = vld [vmem:[%s8944_s1 + $0x23a0] sm:$0xff] }
 0x219   : > { %v4078_v60 = vld [vmem:[%s8944_s1 + $0x2390] sm:$0xff] }
 0x21a   : > { %5143 = vmatpush1.bf16.msra.mxu0 %v5142_v6  ;;  %v5226_v6 = vpack.c.bf16 %v4042_v63, %v4038_v61  ;;  %v5244_v61 = vpack.c.bf16 %v4083_v53, %v4079_v52  ;;  %v4085_v63 = vld [vmem:[%s8944_s1 + $0x23c8] sm:$0xff] }
 0x21b   : > { %5207 = vmatpush1.bf16.msra.mxu1 %v5206_v7  ;;  %5145 = vmatprep.subr.bf16.mxu0 %v5144_v8  ;;  %v5164_v7 = vpack.c.bf16 %v4049_v1, %v4045_v0  ;;  %v4044_v8 = vld [vmem:[%s8944_s1 + $0x2280] sm:$0xff]  ;;  %v4089_v0 = vld [vmem:[%s8944_s1 + $0x23e8] sm:$0xff]  ;;  %v4087_v1 = vld [vmem:[%s8944_s1 + $0x23d8] sm:$0xff] }
 0x21c   : > { %5209 = vmatprep.subr.bf16.mxu1 %v5208_v11  ;;  %v4050_v11 = vld [vmem:[%s8944_s1 + $0x22b0] sm:$0xff]  ;;  %v5166_v16 = vpack.c.bf16 %v4048_v9, %v4044_v8  ;;  %v4088_v8 = vld [vmem:[%s8944_s1 + $0x23e0] sm:$0xff] }
 0x21d   : > { %v2491_v9 = vld [vmem:[%s5627_s11] sm:$0xc0] }
 0x21e   : > { %5147 = vmatpush1.bf16.msra.mxu0 %v5146_v19  ;;  %v5230_v19 = vpack.c.bf16 %v4050_v11, %v4046_v31  ;;  %v2493_v31 = vld [vmem:[%s5627_s11 + $0x10] sm:$0x3]  ;;  %v2500_v14 = vrot.slane %v2491_v9, 6  ;;  %s4099_s11 = sshll.u32 %s8954_s16, 4 }
 0x21f   : > { %5211 = vmatpush1.bf16.msra.mxu1 %v5210_v36  ;;  %5149 = vmatprep.subr.bf16.mxu0 %v5148_v17  ;;  %v5168_v36 = vpack.c.bf16 %v4057_v13, %v4053_v12  ;;  %v4052_v17 = vld [vmem:[%s8944_s1 + $0x22c0] sm:$0xff]  ;;  %v4086_v11 = vld [vmem:[%s8944_s1 + $0x23d0] sm:$0xff]  ;;  %v2501_v15 = vrot.slane %v2493_v31, 6  ;;  %s210_s18 = scalar_lea.vmem %s8945_s2, %s4099_s11 }
 0x220   : > { %5213 = vmatprep.subr.bf16.mxu1 %v5212_v21  ;;  %v4058_v21 = vld [vmem:[%s8944_s1 + $0x22f0] sm:$0xff]  ;;  %v5170_v25 = vpack.c.bf16 %v4056_v18, %v4052_v17 }
 0x221   : > { %v4090_v12 = vld [vmem:[%s8944_s1 + $0x23f0] sm:$0xff] }
 0x222   : > { %5151 = vmatpush1.bf16.msra.mxu0 %v5150_v26  ;;  %v5234_v26 = vpack.c.bf16 %v4058_v21, %v4054_v20  ;;  %v5301_v21 = vmov 1966171168  }
 0x223   : > { %5215 = vmatpush1.bf16.msra.mxu1 %v5214_v27  ;;  %5153 = vmatprep.subr.bf16.mxu0 %v5152_v28  ;;  %v5172_v27 = vpack.c.bf16 %v4065_v23, %v4061_v22  ;;  %v4060_v28 = vld [vmem:[%s8944_s1 + $0x2300] sm:$0xff]  ;;  %v2831_v22 = vunpack.c.l.s4 %v5301_v21 }
 0x224   : > { %5217 = vmatprep.subr.bf16.mxu1 %v5216_v33  ;;  %v4066_v33 = vld [vmem:[%s8944_s1 + $0x2330] sm:$0xff]  ;;  %v5174_v39 = vpack.c.bf16 %v4064_v29, %v4060_v28 }
 0x225   : > { %v2832_v9 = vunpack.c.0.s8 %v2831_v22 }
 0x226   : > { %5155 = vmatpush1.bf16.msra.mxu0 %v5154_v40  ;;  %v5238_v40 = vpack.c.bf16 %v4066_v33, %v4062_v30 }
 0x227   : > { %5219 = vmatpush1.bf16.msra.mxu1 %v5218_v41  ;;  %5157 = vmatprep.subr.bf16.mxu0 %v5156_v42  ;;  %v5176_v41 = vpack.c.bf16 %v4073_v35, %v4069_v34  ;;  %v4068_v42 = vld [vmem:[%s8944_s1 + $0x2340] sm:$0xff] }
 0x228   : > { %5221 = vmatprep.subr.bf16.mxu1 %v5220_v49  ;;  %v4074_v49 = vld [vmem:[%s8944_s1 + $0x2370] sm:$0xff]  ;;  %v5178_v54 = vpack.c.bf16 %v4072_v45, %v4068_v42 }
 0x22a   : > { %5159 = vmatpush1.bf16.msra.mxu0 %v5158_v55  ;;  %v5242_v55 = vpack.c.bf16 %v4074_v49, %v4070_v46 }
 0x22b   : > { %5223 = vmatpush1.bf16.msra.mxu1 %v5222_v57  ;;  %5161 = vmatprep.subr.bf16.mxu0 %v5160_v58  ;;  %v5180_v57 = vpack.c.bf16 %v4081_v5, %v4077_v51  ;;  %v4076_v58 = vld [vmem:[%s8944_s1 + $0x2380] sm:$0xff] }
 0x22c   : > { %5225 = vmatprep.subr.bf16.mxu1 %v5224_v62  ;;  %v4082_v62 = vld [vmem:[%s8944_s1 + $0x23b0] sm:$0xff]  ;;  %v5182_v3 = vpack.c.bf16 %v4080_v59, %v4076_v58 }
 0x22e   : > { %5163 = vmatpush1.bf16.msra.mxu0 %v5162_v4  ;;  %v4084_v4 = vld [vmem:[%s8944_s1 + $0x23c0] sm:$0xff] }
 0x22f   : > { %5227 = vmatpush1.bf16.msra.mxu1 %v5226_v6  ;;  %5165 = vmatprep.subr.bf16.mxu0 %v5164_v7  ;;  %v5246_v6 = vpack.c.bf16 %v4082_v62, %v4078_v60  ;;  %v5184_v7 = vpack.c.bf16 %v4089_v0, %v4085_v63  ;;  %v5186_v13 = vpack.c.bf16 %v4088_v8, %v4084_v4 }
 0x230   : > { %5229 = vmatprep.subr.bf16.mxu1 %v5228_v10  ;;  %v5248_v10 = vpack.c.bf16 %v4091_v2, %v4087_v1 }
 0x232   : > { %5167 = vmatpush1.bf16.msra.mxu0 %v5166_v16  ;;  %v5250_v16 = vpack.c.bf16 %v4090_v12, %v4086_v11 }
 0x233   : > { %5231 = vmatpush1.bf16.msra.mxu1 %v5230_v19  ;;  %5169 = vmatprep.subr.bf16.mxu0 %v5168_v36  ;;  %v2502_v19 = vsel %vm2499_vm3, %v2500_v14, %v2501_v15 }
 0x234   : > { %5233 = vmatprep.subr.bf16.mxu1 %v5232_v44 }
 0x236   : > { %5171 = vmatpush1.bf16.msra.mxu0 %v5170_v25 }
 0x237   : > { %5235 = vmatpush1.bf16.msra.mxu1 %v5234_v26  ;;  %5173 = vmatprep.subr.bf16.mxu0 %v5172_v27 }
 0x238   : > { %5237 = vmatprep.subr.bf16.mxu1 %v5236_v32 }
 0x23a   : > { %5175 = vmatpush1.bf16.msra.mxu0 %v5174_v39 }
 0x23b   : > { %5239 = vmatpush1.bf16.msra.mxu1 %v5238_v40  ;;  %5177 = vmatprep.subr.bf16.mxu0 %v5176_v41 }
 0x23c   : > { %5241 = vmatprep.subr.bf16.mxu1 %v5240_v48 }
 0x23e   : > { %5179 = vmatpush1.bf16.msra.mxu0 %v5178_v54 }
 0x23f   : > { %5243 = vmatpush1.bf16.msra.mxu1 %v5242_v55  ;;  %5181 = vmatprep.subr.bf16.mxu0 %v5180_v57 }
 0x240   : > { %5245 = vmatprep.subr.bf16.mxu1 %v5244_v61 }
 0x242   : > { %5183 = vmatpush1.bf16.msra.mxu0 %v5182_v3 }
 0x243   : > { %5247 = vmatpush1.bf16.msra.mxu1 %v5246_v6  ;;  %5185 = vmatprep.subr.bf16.mxu0 %v5184_v7 }
 0x244   : > { %5249 = vmatprep.subr.bf16.mxu1 %v5248_v10 }
 0x246   : > { %5187 = vmatpush1.bf16.msra.mxu0 %v5186_v13 }
 0x247   : > { %5251 = vmatpush1.bf16.msra.mxu1 %v5250_v16 }
 0x249   : > { %4093 = vmatmul.mubr.msk.f32.vlgmr.msra.gmra.mrb[0].mxu0 %vm6206_vm1, %v2502_v19 }
 0x24a   : > { %4095 = vmatmul.mubr.msk.f32.vlgmr.msra.gmra.mrb[0].mxu1 %vm6206_vm1, %v2502_v19 }
 0x31c   : > { %v2705_v36 = vpop.f32.mrb[0].mxu0 }
 0x31d   : > { %v2796_v17 = vsel %vm2795_vm4, %v2705_v36, 0.0  ;;  %v2858_v18 = vmul.f32 %v2705_v36, %v2705_v36  ;;  %v2776_v20 = vpop.f32.mrb[0].mxu1  ;;  %v2707_v44 = vpop.f32.mrb[1].mxu0 }
 0x31e   : > { %v2797_v23 = vrot.slane %v2796_v17, 4  ;;  %v2810_v24 = vsel %vm2795_vm4, %v2776_v20, 0.0  ;;  %v2860_v50 = vmul.f32 %v2776_v20, %v2776_v20  ;;  %v2789_v47 = vcombine.low %v2705_v36, %v2707_v44  ;;  %v2778_v25 = vpop.f32.mrb[1].mxu1 }
 0x31f   : > { %v2862_v26 = vsel %vm2795_vm4, %v2858_v18, 0.0  ;;  %v2811_v27 = vrot.slane %v2810_v24, 4  ;;  %v2803_v28 = vsel %vm2795_vm4, %v2707_v44, 0.0  ;;  %v2859_v29 = vmul.f32 %v2707_v44, %v2707_v44 }
 0x320   : > { %v2798_v30 = vadd.f32 %v2797_v23, %v2796_v17  ;;  %v2863_v32 = vrot.slane %v2862_v26, 4  ;;  %v2876_v33 = vsel %vm2795_vm4, %v2860_v50, 0.0  ;;  %2793 = vst [vmem:[%s210_s18] sm:$0xff] %v2789_v47  ;;  %v2804_v34 = vrot.slane %v2803_v28, 4 }
 0x321   : > { %v2812_v35 = vadd.f32 %v2811_v27, %v2810_v24  ;;  %v2877_v37 = vrot.slane %v2876_v33, 4  ;;  %v2869_v38 = vsel %vm2795_vm4, %v2859_v29, 0.0  ;;  %v2790_v39 = vcombine.low %v2776_v20, %v2778_v25 }
 0x322   : > { %v2799_v40 = vrot.slane %v2798_v30, 2  ;;  %v2864_v41 = vadd.f32 %v2863_v32, %v2862_v26  ;;  %v2805_v42 = vadd.f32 %v2804_v34, %v2803_v28  ;;  %v2870_v45 = vrot.slane %v2869_v38, 4 }
 0x323   : > { %v2813_v46 = vrot.slane %v2812_v35, 2  ;;  %v2878_v48 = vadd.f32 %v2877_v37, %v2876_v33  ;;  %2794 = vst [vmem:[%s210_s18 + $0x8] sm:$0xff] %v2790_v39  ;;  %v2817_v49 = vsel %vm2795_vm4, %v2778_v25, 0.0  ;;  %v2861_v51 = vmul.f32 %v2778_v25, %v2778_v25 }
 0x324   : > { %v2800_v5 = vadd.f32 %v2799_v40, %v2798_v30  ;;  %v2865_v52 = vrot.slane %v2864_v41, 2  ;;  %v2806_v53 = vrot.slane %v2805_v42, 2  ;;  %v2871_v54 = vadd.f32 %v2870_v45, %v2869_v38 }
 0x325   : > { %v2814_v55 = vadd.f32 %v2813_v46, %v2812_v35  ;;  %v2879_v57 = vrot.slane %v2878_v48, 2  ;;  %v2818_v58 = vrot.slane %v2817_v49, 4  ;;  %v2883_v59 = vsel %vm2795_vm4, %v2861_v51, 0.0 }
 0x326   : > { %v2801_v60 = vrot.slane %v2800_v5, 1  ;;  %v2866_v61 = vadd.f32 %v2865_v52, %v2864_v41  ;;  %v2807_v62 = vadd.f32 %v2806_v53, %v2805_v42  ;;  %v2872_v63 = vrot.slane %v2871_v54, 2 }
 0x327   : > { %v2880_v0 = vadd.f32 %v2879_v57, %v2878_v48  ;;  %v2819_v1 = vadd.f32 %v2818_v58, %v2817_v49  ;;  %v2884_v2 = vrot.slane %v2883_v59, 4  ;;  %v2815_v8 = vrot.slane %v2814_v55, 1 }
 0x328   : > { %v2802_v3 = vadd.f32 %v2801_v60, %v2800_v5  ;;  %v2867_v4 = vrot.slane %v2866_v61, 1  ;;  %v2808_v6 = vrot.slane %v2807_v62, 1  ;;  %v2873_v7 = vadd.f32 %v2872_v63, %v2871_v54 }
 0x329   : > { %v2820_v31 = vrot.slane %v2819_v1, 2  ;;  %v2885_v10 = vadd.f32 %v2884_v2, %v2883_v59  ;;  %v2881_v14 = vrot.slane %v2880_v0, 1  ;;  %v2816_v17 = vadd.f32 %v2815_v8, %v2814_v55 }
 0x32a   : > { %v2868_v11 = vadd.f32 %v2867_v4, %v2866_v61  ;;  %v2809_v12 = vadd.f32 %v2808_v6, %v2807_v62  ;;  %v2874_v13 = vrot.slane %v2873_v7, 1  ;;  %v2835_v18 = vsub.s32 %v2832_v9, %v5848_v56 }
 0x32b   : > { %v2821_v15 = vadd.f32 %v2820_v31, %v2819_v1  ;;  %v2886_v16 = vrot.slane %v2885_v10, 2  ;;  %v2882_v23 = vadd.f32 %v2881_v14, %v2880_v0 }
 0x32c   : > { %v2828_v19 = vcombine.low %v2802_v3, %v2809_v12  ;;  %v2875_v36 = vadd.f32 %v2874_v13, %v2873_v7 }
 0x32d   : > { %v2822_v20 = vrot.slane %v2821_v15, 1  ;;  %v2887_v44 = vadd.f32 %v2886_v16, %v2885_v10 }
 0x32e   : > { %v2894_v21 = vcombine.low %v2868_v11, %v2875_v36  ;;  %v2836_v50 = vrot.slane %v2828_v19, %v2835_v18 }
 0x32f   : > { %v2823_v24 = vadd.f32 %v2822_v20, %v2821_v15  ;;  %v2888_v22 = vrot.slane %v2887_v44, 1 }
 0x330   : > { %v2902_v26 = vrot.slane %v2894_v21, %v2835_v18 }
 0x331   : > { %v2829_v47 = vcombine.low %v2816_v17, %v2823_v24  ;;  %v2889_v25 = vadd.f32 %v2888_v22, %v2887_v44 }
 0x333   : > { %v2843_v27 = vrot.slane %v2829_v47, %v2835_v18  ;;  %v2895_v28 = vcombine.low %v2882_v23, %v2889_v25 }
 0x335   : > { %v2844_v29 = vcombine.low %v2836_v50, %v2843_v27  ;;  %v2909_v30 = vrot.slane %v2895_v28, %v2835_v18 }
 0x337   : > { %v2851_v56 = vrot.slane %v2844_v29, %v2835_v18  ;;  %v2910_v32 = vcombine.low %v2902_v26, %v2909_v30 }
 0x339   : > { %2857 = vst.msk [vmem:[%s214_s24] sm:$0xf] %vm2855_vm5, %v2851_v56  ;;  %v2917_v33 = vrot.slane %v2910_v32, %v2835_v18 }
 0x33b   : > { %2919 = vst.msk [vmem:[%s218_s27] sm:$0xf] %vm2855_vm5, %v2917_v33 }
 0x33c PF: > { %s15_s15 = sadd.s32 1, %s5299_s15  }
 0x33d   : > { %p12_p4 = scmp.ge.s32.totalorder %s15_s15, 4  }
 0x33f   :  { %14 = sbr.rel (!%p12_p4) target bundleno = 1 (0x1), region = 90 }

</bundles_post_ra>
